<compile_context>
chip_gen: v7x
topology: tpu7x:2x2x1
jax: 0.10.0
libtpu: 0.0.40
codegen_flags: <defaults>
</compile_context>

<pallas_src>
import functools

import jax
import jax.numpy as jnp
import numpy as np
from jax import lax
from jax.experimental import pallas as pl
from jax.experimental.pallas import tpu as pltpu

DILATION = 16
KSIZE = 3
PAD = 16
CIN = 2      # TCN input channels
CMID = 3     # TCN hidden channels
COUT = 2     # TCN output channels (== output_size forced by the skip add)
GROUP = 4    # h_t packed 4-at-a-time -> 4*H = 128 lanes per store at H=32


def _hardswish(x):
    # PyTorch nn.Hardswish: x * relu6(x + 3) / 6
    return x * jnp.clip(x + 3.0, 0.0, 6.0) * (1.0 / 6.0)


# ----------------------------- fused DeltaGRU kernel -----------------------------
def deltagru_kernel(x_ref, xpad_ref, w1_ref, w2_ref, w_ih_ref, w_hh_ref,
                    hpack_ref, skip_ref, *, th_x, th_h, group):
    # x_ref    : (T, B, 2)          raw input, time-major (feature construction)
    # xpad_ref : (CIN, B, T+2*PAD)  zero-padded input, channel-major, T on lanes (TCN)
    # w1_ref   : SMEM (CMID*CIN*KSIZE,)  dilated-conv taps, flattened row-major
    # w2_ref   : SMEM (COUT*CMID,)       1x1-conv weights,  flattened row-major
    # w_ih_ref : (6, 3H)            fused x2h weights, transposed (gates r|z|n cols)
    # w_hh_ref : (H, 3H)            fused h2h weights, transposed
    # hpack_ref: (ceil(T/G), B, G*H) hidden states, G steps packed on the lane axis
    # skip_ref : (COUT, B, T)       TCN skip branch, T on lanes
    T, B, _ = x_ref.shape
    H = w_hh_ref.shape[0]
    G = group

    # ---- TCN skip branch: dilated conv as KSIZE shifted VPU multiply-adds ----
    xcs = (xpad_ref[0], xpad_ref[1])                       # each (B, T+2*PAD)
    h1 = []
    for m in range(CMID):
        acc = jnp.zeros((B, T), jnp.float32)
        for c in range(CIN):
            xc = xcs[c]
            for k in range(KSIZE):
                w = w1_ref[(m * CIN + c) * KSIZE + k]      # SMEM scalar
                acc = acc + w * xc[:, k * DILATION:k * DILATION + T]
        h1.append(_hardswish(acc))
    for o in range(COUT):
        acc = (w2_ref[o * CMID + 0] * h1[0]
               + w2_ref[o * CMID + 1] * h1[1]
               + w2_ref[o * CMID + 2] * h1[2])
        skip_ref[o] = _hardswish(acc)

    # ---- features per column: (i, q, amp, amp^3, i_last, q_last) ----
    x_all = x_ref[...]                                     # (T, B, 2)
    x_nxt = jnp.concatenate([x_all[1:], x_all[0:1]], axis=0)  # circular roll -1 (wraps)
    i_all = x_all[:, :, 0:1]
    q_all = x_all[:, :, 1:2]
    amp = jnp.sqrt(i_all * i_all + q_all * q_all)
    amp3 = amp * amp * amp
    feat_cols = (i_all, q_all, amp, amp3, x_nxt[:, :, 0:1], x_nxt[:, :, 1:2])

    # ---- hoisted x-side delta scan + x2h contribution (off the serial chain) ----
    w_ih = w_ih_ref[...]                                   # (6, 3H)
    w_rows = [w_ih[f:f + 1, :] for f in range(6)]          # each (1, 3H), hoisted
    x_p = [jnp.zeros((B, 1), jnp.float32)] * 6             # per-feature hold state
    mac_x_all = []                                         # T x (B, 3H)
    for t in range(T):
        mxa = None
        for f in range(6):
            ft = feat_cols[f][t]                           # (B, 1)
            d = ft - x_p[f]
            keep = jnp.abs(d) >= th_x
            term = jnp.where(keep, d, 0.0) * w_rows[f]     # (B, 3H) broadcast-FMA
            mxa = term if mxa is None else mxa + term
            x_p[f] = jnp.where(keep, ft, x_p[f])
        mac_x_all.append(mxa)

    # ---- recurrence: only dh @ w_hh + gate math stay on the per-step chain ----
    w_hh = w_hh_ref[...]                                   # (H, 3H), hoisted
    # mask that zeroes the n-gate columns of mac_h when forming the carried dm
    rz_mask = (lax.broadcasted_iota(jnp.int32, (B, 3 * H), 1) < 2 * H
               ).astype(jnp.float32)

    h = jnp.zeros((B, H), jnp.float32)
    h_p = jnp.zeros((B, H), jnp.float32)
    dm = jnp.zeros((B, 3 * H), jnp.float32)
    dm_nh = jnp.zeros((B, H), jnp.float32)
    pack = []
    for t in range(T):                                     # full unroll (T small)
        # h-side deltas + threshold/hold
        dh = h - h_p
        adh = jnp.abs(dh)
        keep_h = adh >= th_h
        dh = jnp.where(keep_h, dh, 0.0)
        h_p = jnp.where(keep_h, h, h_p)

        # single per-step matmul (f32 operands, f32 accumulate)
        mac_h = jnp.dot(dh, w_hh, preferred_element_type=jnp.float32)   # (B, 3H)

        mac_x = mac_x_all[t] + dm
        dm = mac_x + mac_h * rz_mask         # cols [0:2H] = dm_r|dm_z, [2H:] = dm_n
        dm_nh = dm_nh + mac_h[:, 2 * H:]

        g = jax.nn.sigmoid(dm)               # one EUP slab; n-columns unused
        gate_r = g[:, 0:H]
        gate_z = g[:, H:2 * H]
        gate_n = jnp.tanh(dm[:, 2 * H:] + gate_r * dm_nh)
        h = gate_n + gate_z * (h - gate_n)   # == (1 - gz)*gn + gz*h

        pack.append(h)
        if len(pack) == G:                   # unmasked full-lane (B, G*H) store
            hpack_ref[t // G] = jnp.concatenate(pack, axis=-1)
            pack = []
    if pack:                                  # tail group when T % G != 0
        padz = [jnp.zeros((B, H), jnp.float32)] * (G - len(pack))
        hpack_ref[T // G] = jnp.concatenate(pack + padz, axis=-1)


# ----------------------------- wrapper -----------------------------
@functools.partial(jax.jit, static_argnames=("thx", "thh"))
def deltagru_forward(x, params, *, thx, thh):
    """x: (B, T, 2) float32.  Returns (B, T, 2) = fc_out(DeltaGRU(features)) + tcn_skip."""
    B, T, _ = x.shape
    H = params["h2h"].shape[1]
    G = GROUP
    n_grp = (T + G - 1) // G

    x = x.astype(jnp.float32)
    x_tm = jnp.transpose(x, (1, 0, 2))                           # (T, B, 2)
    xpad = jnp.pad(x, ((0, 0), (PAD, PAD), (0, 0)))              # (B, T+2*PAD, 2)
    xpad_cbt = jnp.transpose(xpad, (2, 0, 1))                    # (CIN, B, T+2*PAD)

    w1_flat = params["conv1"].reshape(-1).astype(jnp.float32)           # (CMID*CIN*KSIZE,)
    w2_flat = params["conv2"][:, :, 0].reshape(-1).astype(jnp.float32)  # (COUT*CMID,)
    w_ih = jnp.transpose(params["x2h"], (1, 0)).astype(jnp.float32)     # (6, 3H)
    w_hh = jnp.transpose(params["h2h"], (1, 0)).astype(jnp.float32)     # (H, 3H)

    # VMEM budget sanity (v7x has 64 MiB physical / 32 MiB scoped default).
    # Includes the spilled mac_x_all slab (~T*B*3H f32).  Tile over T if this trips.
    resident_bytes = 4 * (T * B * 2 + CIN * B * (T + 2 * PAD) + 6 * 3 * H
                          + H * 3 * H + n_grp * B * G * H + COUT * B * T
                          + T * B * 3 * H)
    assert resident_bytes < 24 * 1024 * 1024, "tile the time axis before scaling up"

    vmem = pltpu.MemorySpace.VMEM
    smem = pltpu.MemorySpace.SMEM
    h_pack, skip_cbt = pl.pallas_call(
        functools.partial(deltagru_kernel, th_x=float(thx), th_h=float(thh), group=G),
        out_shape=(jax.ShapeDtypeStruct((n_grp, B, G * H), jnp.float32),
                   jax.ShapeDtypeStruct((COUT, B, T), jnp.float32)),
        in_specs=[
            pl.BlockSpec(memory_space=vmem),    # x_tm
            pl.BlockSpec(memory_space=vmem),    # xpad_cbt
            pl.BlockSpec(memory_space=smem),    # conv1 taps (scalars)
            pl.BlockSpec(memory_space=smem),    # conv2 taps (scalars)
            pl.BlockSpec(memory_space=vmem),    # w_ih fused
            pl.BlockSpec(memory_space=vmem),    # w_hh fused
        ],
        out_specs=(pl.BlockSpec(memory_space=vmem),
                   pl.BlockSpec(memory_space=vmem)),
    )(x_tm, xpad_cbt, w1_flat, w2_flat, w_ih, w_hh)

    # unpack grouped hidden states; fc_out + skip add in XLA (trivial epilogue)
    h_all = h_pack.reshape(n_grp, B, G, H)
    h_all = jnp.transpose(h_all, (1, 0, 2, 3)).reshape(B, n_grp * G, H)[:, :T]
    out = jnp.einsum("bth,oh->bto", h_all, params["fc"])
    return out + jnp.transpose(skip_cbt, (1, 2, 0))              # (B, T, 2)


# ----------------------------- pure-JAX reference -----------------------------
def reference_forward(x, params, *, thx, thh):
    B, T, _ = x.shape
    H = params["h2h"].shape[1]

    # TCN skip via lax.conv (independent check of the in-kernel VPU conv)
    xt = jnp.transpose(x, (0, 2, 1))                       # (B, 2, T)
    h = lax.conv_general_dilated(xt, params["conv1"], window_strides=(1,),
                                 padding=[(PAD, PAD)], rhs_dilation=(DILATION,),
                                 dimension_numbers=("NCH", "OIH", "NCH"))
    h = _hardswish(h)
    h = lax.conv_general_dilated(h, params["conv2"], window_strides=(1,),
                                 padding=[(0, 0)],
                                 dimension_numbers=("NCH", "OIH", "NCH"))
    h = _hardswish(h)
    skip = jnp.transpose(h, (0, 2, 1))                     # (B, T, 2)

    last = jnp.roll(x, -1, axis=1)
    i_x = x[..., 0:1]
    q_x = x[..., 1:2]
    amp = jnp.sqrt(i_x * i_x + q_x * q_x)
    amp3 = amp * amp * amp
    feat = jnp.concatenate([i_x, q_x, amp, amp3, last[..., 0:1], last[..., 1:2]], axis=-1)

    W_ih = params["x2h"]     # (3H, 6)
    W_hh = params["h2h"]     # (3H, H)
    x_p = jnp.zeros((B, 6), jnp.float32)
    hs = jnp.zeros((B, H), jnp.float32)
    h_p = jnp.zeros((B, H), jnp.float32)
    dm_nh = jnp.zeros((B, H), jnp.float32)
    dm = jnp.zeros((B, 3 * H), jnp.float32)

    outs = []
    for t in range(T):
        xt_ = feat[:, t]
        dx = xt_ - x_p
        dh = hs - h_p
        adx = jnp.abs(dx)
        adh = jnp.abs(dh)
        dx = jnp.where(adx < thx, 0.0, dx)
        dh = jnp.where(adh < thh, 0.0, dh)
        x_p = jnp.where(adx >= thx, xt_, x_p)
        h_p = jnp.where(adh >= thh, hs, h_p)
        mac_x = dx @ W_ih.T + dm
        mac_h = dh @ W_hh.T
        dm_r = mac_x[:, :H] + mac_h[:, :H]
        dm_z = mac_x[:, H:2 * H] + mac_h[:, H:2 * H]
        dm_n = mac_x[:, 2 * H:]
        dm_nh = mac_h[:, 2 * H:] + dm_nh
        dm = jnp.concatenate([dm_r, dm_z, dm_n], axis=1)
        gr = jax.nn.sigmoid(dm_r)
        gz = jax.nn.sigmoid(dm_z)
        gn = jnp.tanh(dm_n + gr * dm_nh)
        hs = (1.0 - gz) * gn + gz * hs
        outs.append(hs)
    rnn_out = jnp.stack(outs, axis=1)                      # (B, T, H)
    return rnn_out @ params["fc"].T + skip


# ----------------------------- main -----------------------------
if __name__ == "__main__":
    B, T, H = 2, 24, 32          # batch, sequence length, hidden size
    OUT = 2                      # output_size forced to 2 by the skip connection
    thx, thh = 0.1, 0.05

    key = jax.random.PRNGKey(0)
    kx, k1, k2, k3, k4, k5 = jax.random.split(key, 6)
    x = jax.random.normal(kx, (B, T, 2), jnp.float32)
    params = {
        "conv1": 0.5 * jax.random.normal(k1, (CMID, CIN, KSIZE), jnp.float32),  # Conv1d(2->3, k=3)
        "conv2": 0.5 * jax.random.normal(k2, (COUT, CMID, 1), jnp.float32),     # Conv1d(3->2, k=1)
        "x2h": 0.3 * jax.random.normal(k3, (3 * H, 6), jnp.float32),            # Linear(6 -> 3H)
        "h2h": (1.0 / np.sqrt(H)) * jax.random.normal(k4, (3 * H, H), jnp.float32),  # Linear(H -> 3H)
        "fc": 0.3 * jax.random.normal(k5, (OUT, H), jnp.float32),               # Linear(H -> 2)
    }

    out = deltagru_forward(x, params, thx=thx, thh=thh)
    out = jax.block_until_ready(out)

    ref = reference_forward(x, params, thx=thx, thh=thh)
    np.testing.assert_allclose(np.asarray(out), np.asarray(ref), rtol=2e-3, atol=2e-3)

    print("KERNEL_OK")
</pallas_src>

<mosaic_0001>
module attributes {stable_mosaic.version = 11 : i64} {
  func.func @deltagru_kernel(%arg0: memref<24x2x2xf32, #tpu.memory_space<vmem>>, %arg1: memref<2x2x56xf32, #tpu.memory_space<vmem>>, %arg2: memref<18xf32, #tpu.memory_space<smem>>, %arg3: memref<6xf32, #tpu.memory_space<smem>>, %arg4: memref<6x96xf32, #tpu.memory_space<vmem>>, %arg5: memref<32x96xf32, #tpu.memory_space<vmem>>, %arg6: memref<6x2x128xf32, #tpu.memory_space<vmem>>, %arg7: memref<2x2x24xf32, #tpu.memory_space<vmem>>) attributes {dimension_semantics = [], scalar_prefetch = 0 : i64, scratch_operands = 0 : i64, tpu.core_type = #tpu.core_type<tc>} {
    %c0 = arith.constant 0 : index
    %c0_0 = arith.constant 0 : index
    %c0_1 = arith.constant 0 : index
    %0 = vector.load %arg1[%c0, %c0_0, %c0_1] : memref<2x2x56xf32, #tpu.memory_space<vmem>>, vector<1x2x56xf32>
    %1 = vector.shape_cast %0 : vector<1x2x56xf32> to vector<2x56xf32>
    %c1 = arith.constant 1 : index
    %c0_2 = arith.constant 0 : index
    %c0_3 = arith.constant 0 : index
    %2 = vector.load %arg1[%c1, %c0_2, %c0_3] : memref<2x2x56xf32, #tpu.memory_space<vmem>>, vector<1x2x56xf32>
    %3 = vector.shape_cast %2 : vector<1x2x56xf32> to vector<2x56xf32>
    %cst = arith.constant 0.000000e+00 : f32
    %4 = vector.broadcast %cst : f32 to vector<2x24xf32>
    %c0_4 = arith.constant 0 : index
    %5 = memref.load %arg2[%c0_4] : memref<18xf32, #tpu.memory_space<smem>>
    %6 = vector.extract_strided_slice %1 {offsets = [0, 0], sizes = [2, 24], strides = [1, 1]} : vector<2x56xf32> to vector<2x24xf32>
    %7 = vector.broadcast %5 : f32 to vector<2x24xf32>
    %8 = arith.mulf %7, %6 : vector<2x24xf32>
    %9 = arith.addf %4, %8 : vector<2x24xf32>
    %c1_5 = arith.constant 1 : index
    %10 = memref.load %arg2[%c1_5] : memref<18xf32, #tpu.memory_space<smem>>
    %11 = vector.extract_strided_slice %1 {offsets = [0, 16], sizes = [2, 24], strides = [1, 1]} : vector<2x56xf32> to vector<2x24xf32>
    %12 = vector.broadcast %10 : f32 to vector<2x24xf32>
    %13 = arith.mulf %12, %11 : vector<2x24xf32>
    %14 = arith.addf %9, %13 : vector<2x24xf32>
    %c2 = arith.constant 2 : index
    %15 = memref.load %arg2[%c2] : memref<18xf32, #tpu.memory_space<smem>>
    %16 = vector.extract_strided_slice %1 {offsets = [0, 32], sizes = [2, 24], strides = [1, 1]} : vector<2x56xf32> to vector<2x24xf32>
    %17 = vector.broadcast %15 : f32 to vector<2x24xf32>
    %18 = arith.mulf %17, %16 : vector<2x24xf32>
    %19 = arith.addf %14, %18 : vector<2x24xf32>
    %c3 = arith.constant 3 : index
    %20 = memref.load %arg2[%c3] : memref<18xf32, #tpu.memory_space<smem>>
    %21 = vector.extract_strided_slice %3 {offsets = [0, 0], sizes = [2, 24], strides = [1, 1]} : vector<2x56xf32> to vector<2x24xf32>
    %22 = vector.broadcast %20 : f32 to vector<2x24xf32>
    %23 = arith.mulf %22, %21 : vector<2x24xf32>
    %24 = arith.addf %19, %23 : vector<2x24xf32>
    %c4 = arith.constant 4 : index
    %25 = memref.load %arg2[%c4] : memref<18xf32, #tpu.memory_space<smem>>
    %26 = vector.extract_strided_slice %3 {offsets = [0, 16], sizes = [2, 24], strides = [1, 1]} : vector<2x56xf32> to vector<2x24xf32>
    %27 = vector.broadcast %25 : f32 to vector<2x24xf32>
    %28 = arith.mulf %27, %26 : vector<2x24xf32>
    %29 = arith.addf %24, %28 : vector<2x24xf32>
    %c5 = arith.constant 5 : index
    %30 = memref.load %arg2[%c5] : memref<18xf32, #tpu.memory_space<smem>>
    %31 = vector.extract_strided_slice %3 {offsets = [0, 32], sizes = [2, 24], strides = [1, 1]} : vector<2x56xf32> to vector<2x24xf32>
    %32 = vector.broadcast %30 : f32 to vector<2x24xf32>
    %33 = arith.mulf %32, %31 : vector<2x24xf32>
    %34 = arith.addf %29, %33 : vector<2x24xf32>
    %cst_6 = arith.constant 3.000000e+00 : f32
    %35 = vector.broadcast %cst_6 : f32 to vector<2x24xf32>
    %36 = arith.addf %34, %35 : vector<2x24xf32>
    %cst_7 = arith.constant 0.000000e+00 : f32
    %cst_8 = arith.constant 6.000000e+00 : f32
    %37 = vector.broadcast %cst_7 : f32 to vector<2x24xf32>
    %38 = arith.maximumf %37, %36 : vector<2x24xf32>
    %39 = vector.broadcast %cst_8 : f32 to vector<2x24xf32>
    %40 = arith.minimumf %39, %38 : vector<2x24xf32>
    %41 = arith.mulf %34, %40 : vector<2x24xf32>
    %cst_9 = arith.constant 0.166666672 : f32
    %42 = vector.broadcast %cst_9 : f32 to vector<2x24xf32>
    %43 = arith.mulf %41, %42 : vector<2x24xf32>
    %cst_10 = arith.constant 0.000000e+00 : f32
    %44 = vector.broadcast %cst_10 : f32 to vector<2x24xf32>
    %c6 = arith.constant 6 : index
    %45 = memref.load %arg2[%c6] : memref<18xf32, #tpu.memory_space<smem>>
    %46 = vector.extract_strided_slice %1 {offsets = [0, 0], sizes = [2, 24], strides = [1, 1]} : vector<2x56xf32> to vector<2x24xf32>
    %47 = vector.broadcast %45 : f32 to vector<2x24xf32>
    %48 = arith.mulf %47, %46 : vector<2x24xf32>
    %49 = arith.addf %44, %48 : vector<2x24xf32>
    %c7 = arith.constant 7 : index
    %50 = memref.load %arg2[%c7] : memref<18xf32, #tpu.memory_space<smem>>
    %51 = vector.extract_strided_slice %1 {offsets = [0, 16], sizes = [2, 24], strides = [1, 1]} : vector<2x56xf32> to vector<2x24xf32>
    %52 = vector.broadcast %50 : f32 to vector<2x24xf32>
    %53 = arith.mulf %52, %51 : vector<2x24xf32>
    %54 = arith.addf %49, %53 : vector<2x24xf32>
    %c8 = arith.constant 8 : index
    %55 = memref.load %arg2[%c8] : memref<18xf32, #tpu.memory_space<smem>>
    %56 = vector.extract_strided_slice %1 {offsets = [0, 32], sizes = [2, 24], strides = [1, 1]} : vector<2x56xf32> to vector<2x24xf32>
    %57 = vector.broadcast %55 : f32 to vector<2x24xf32>
    %58 = arith.mulf %57, %56 : vector<2x24xf32>
    %59 = arith.addf %54, %58 : vector<2x24xf32>
    %c9 = arith.constant 9 : index
    %60 = memref.load %arg2[%c9] : memref<18xf32, #tpu.memory_space<smem>>
    %61 = vector.extract_strided_slice %3 {offsets = [0, 0], sizes = [2, 24], strides = [1, 1]} : vector<2x56xf32> to vector<2x24xf32>
    %62 = vector.broadcast %60 : f32 to vector<2x24xf32>
    %63 = arith.mulf %62, %61 : vector<2x24xf32>
    %64 = arith.addf %59, %63 : vector<2x24xf32>
    %c10 = arith.constant 10 : index
    %65 = memref.load %arg2[%c10] : memref<18xf32, #tpu.memory_space<smem>>
    %66 = vector.extract_strided_slice %3 {offsets = [0, 16], sizes = [2, 24], strides = [1, 1]} : vector<2x56xf32> to vector<2x24xf32>
    %67 = vector.broadcast %65 : f32 to vector<2x24xf32>
    %68 = arith.mulf %67, %66 : vector<2x24xf32>
    %69 = arith.addf %64, %68 : vector<2x24xf32>
    %c11 = arith.constant 11 : index
    %70 = memref.load %arg2[%c11] : memref<18xf32, #tpu.memory_space<smem>>
    %71 = vector.extract_strided_slice %3 {offsets = [0, 32], sizes = [2, 24], strides = [1, 1]} : vector<2x56xf32> to vector<2x24xf32>
    %72 = vector.broadcast %70 : f32 to vector<2x24xf32>
    %73 = arith.mulf %72, %71 : vector<2x24xf32>
    %74 = arith.addf %69, %73 : vector<2x24xf32>
    %cst_11 = arith.constant 3.000000e+00 : f32
    %75 = vector.broadcast %cst_11 : f32 to vector<2x24xf32>
    %76 = arith.addf %74, %75 : vector<2x24xf32>
    %cst_12 = arith.constant 0.000000e+00 : f32
    %cst_13 = arith.constant 6.000000e+00 : f32
    %77 = vector.broadcast %cst_12 : f32 to vector<2x24xf32>
    %78 = arith.maximumf %77, %76 : vector<2x24xf32>
    %79 = vector.broadcast %cst_13 : f32 to vector<2x24xf32>
    %80 = arith.minimumf %79, %78 : vector<2x24xf32>
    %81 = arith.mulf %74, %80 : vector<2x24xf32>
    %cst_14 = arith.constant 0.166666672 : f32
    %82 = vector.broadcast %cst_14 : f32 to vector<2x24xf32>
    %83 = arith.mulf %81, %82 : vector<2x24xf32>
    %cst_15 = arith.constant 0.000000e+00 : f32
    %84 = vector.broadcast %cst_15 : f32 to vector<2x24xf32>
    %c12 = arith.constant 12 : index
    %85 = memref.load %arg2[%c12] : memref<18xf32, #tpu.memory_space<smem>>
    %86 = vector.extract_strided_slice %1 {offsets = [0, 0], sizes = [2, 24], strides = [1, 1]} : vector<2x56xf32> to vector<2x24xf32>
    %87 = vector.broadcast %85 : f32 to vector<2x24xf32>
    %88 = arith.mulf %87, %86 : vector<2x24xf32>
    %89 = arith.addf %84, %88 : vector<2x24xf32>
    %c13 = arith.constant 13 : index
    %90 = memref.load %arg2[%c13] : memref<18xf32, #tpu.memory_space<smem>>
    %91 = vector.extract_strided_slice %1 {offsets = [0, 16], sizes = [2, 24], strides = [1, 1]} : vector<2x56xf32> to vector<2x24xf32>
    %92 = vector.broadcast %90 : f32 to vector<2x24xf32>
    %93 = arith.mulf %92, %91 : vector<2x24xf32>
    %94 = arith.addf %89, %93 : vector<2x24xf32>
    %c14 = arith.constant 14 : index
    %95 = memref.load %arg2[%c14] : memref<18xf32, #tpu.memory_space<smem>>
    %96 = vector.extract_strided_slice %1 {offsets = [0, 32], sizes = [2, 24], strides = [1, 1]} : vector<2x56xf32> to vector<2x24xf32>
    %97 = vector.broadcast %95 : f32 to vector<2x24xf32>
    %98 = arith.mulf %97, %96 : vector<2x24xf32>
    %99 = arith.addf %94, %98 : vector<2x24xf32>
    %c15 = arith.constant 15 : index
    %100 = memref.load %arg2[%c15] : memref<18xf32, #tpu.memory_space<smem>>
    %101 = vector.extract_strided_slice %3 {offsets = [0, 0], sizes = [2, 24], strides = [1, 1]} : vector<2x56xf32> to vector<2x24xf32>
    %102 = vector.broadcast %100 : f32 to vector<2x24xf32>
    %103 = arith.mulf %102, %101 : vector<2x24xf32>
    %104 = arith.addf %99, %103 : vector<2x24xf32>
    %c16 = arith.constant 16 : index
    %105 = memref.load %arg2[%c16] : memref<18xf32, #tpu.memory_space<smem>>
    %106 = vector.extract_strided_slice %3 {offsets = [0, 16], sizes = [2, 24], strides = [1, 1]} : vector<2x56xf32> to vector<2x24xf32>
    %107 = vector.broadcast %105 : f32 to vector<2x24xf32>
    %108 = arith.mulf %107, %106 : vector<2x24xf32>
    %109 = arith.addf %104, %108 : vector<2x24xf32>
    %c17 = arith.constant 17 : index
    %110 = memref.load %arg2[%c17] : memref<18xf32, #tpu.memory_space<smem>>
    %111 = vector.extract_strided_slice %3 {offsets = [0, 32], sizes = [2, 24], strides = [1, 1]} : vector<2x56xf32> to vector<2x24xf32>
    %112 = vector.broadcast %110 : f32 to vector<2x24xf32>
    %113 = arith.mulf %112, %111 : vector<2x24xf32>
    %114 = arith.addf %109, %113 : vector<2x24xf32>
    %cst_16 = arith.constant 3.000000e+00 : f32
    %115 = vector.broadcast %cst_16 : f32 to vector<2x24xf32>
    %116 = arith.addf %114, %115 : vector<2x24xf32>
    %cst_17 = arith.constant 0.000000e+00 : f32
    %cst_18 = arith.constant 6.000000e+00 : f32
    %117 = vector.broadcast %cst_17 : f32 to vector<2x24xf32>
    %118 = arith.maximumf %117, %116 : vector<2x24xf32>
    %119 = vector.broadcast %cst_18 : f32 to vector<2x24xf32>
    %120 = arith.minimumf %119, %118 : vector<2x24xf32>
    %121 = arith.mulf %114, %120 : vector<2x24xf32>
    %cst_19 = arith.constant 0.166666672 : f32
    %122 = vector.broadcast %cst_19 : f32 to vector<2x24xf32>
    %123 = arith.mulf %121, %122 : vector<2x24xf32>
    %c0_20 = arith.constant 0 : index
    %124 = memref.load %arg3[%c0_20] : memref<6xf32, #tpu.memory_space<smem>>
    %125 = vector.broadcast %124 : f32 to vector<2x24xf32>
    %126 = arith.mulf %125, %43 : vector<2x24xf32>
    %c1_21 = arith.constant 1 : index
    %127 = memref.load %arg3[%c1_21] : memref<6xf32, #tpu.memory_space<smem>>
    %128 = vector.broadcast %127 : f32 to vector<2x24xf32>
    %129 = arith.mulf %128, %83 : vector<2x24xf32>
    %130 = arith.addf %126, %129 : vector<2x24xf32>
    %c2_22 = arith.constant 2 : index
    %131 = memref.load %arg3[%c2_22] : memref<6xf32, #tpu.memory_space<smem>>
    %132 = vector.broadcast %131 : f32 to vector<2x24xf32>
    %133 = arith.mulf %132, %123 : vector<2x24xf32>
    %134 = arith.addf %130, %133 : vector<2x24xf32>
    %cst_23 = arith.constant 3.000000e+00 : f32
    %135 = vector.broadcast %cst_23 : f32 to vector<2x24xf32>
    %136 = arith.addf %134, %135 : vector<2x24xf32>
    %cst_24 = arith.constant 0.000000e+00 : f32
    %cst_25 = arith.constant 6.000000e+00 : f32
    %137 = vector.broadcast %cst_24 : f32 to vector<2x24xf32>
    %138 = arith.maximumf %137, %136 : vector<2x24xf32>
    %139 = vector.broadcast %cst_25 : f32 to vector<2x24xf32>
    %140 = arith.minimumf %139, %138 : vector<2x24xf32>
    %141 = arith.mulf %134, %140 : vector<2x24xf32>
    %cst_26 = arith.constant 0.166666672 : f32
    %142 = vector.broadcast %cst_26 : f32 to vector<2x24xf32>
    %143 = arith.mulf %141, %142 : vector<2x24xf32>
    %c0_27 = arith.constant 0 : index
    %c0_28 = arith.constant 0 : index
    %c0_29 = arith.constant 0 : index
    %144 = vector.load %arg7[%c0_27, %c0_28, %c0_29] : memref<2x2x24xf32, #tpu.memory_space<vmem>>, vector<1x2x24xf32>
    %145 = vector.shape_cast %144 : vector<1x2x24xf32> to vector<2x24xf32>
    %146 = vector.shape_cast %143 : vector<2x24xf32> to vector<1x2x24xf32>
    tpu.vector_store %arg7[%c0_27, %c0_28, %c0_29], %146 {strides = array<i32>} : memref<2x2x24xf32, #tpu.memory_space<vmem>>, vector<1x2x24xf32>,
    %c3_30 = arith.constant 3 : index
    %147 = memref.load %arg3[%c3_30] : memref<6xf32, #tpu.memory_space<smem>>
    %148 = vector.broadcast %147 : f32 to vector<2x24xf32>
    %149 = arith.mulf %148, %43 : vector<2x24xf32>
    %c4_31 = arith.constant 4 : index
    %150 = memref.load %arg3[%c4_31] : memref<6xf32, #tpu.memory_space<smem>>
    %151 = vector.broadcast %150 : f32 to vector<2x24xf32>
    %152 = arith.mulf %151, %83 : vector<2x24xf32>
    %153 = arith.addf %149, %152 : vector<2x24xf32>
    %c5_32 = arith.constant 5 : index
    %154 = memref.load %arg3[%c5_32] : memref<6xf32, #tpu.memory_space<smem>>
    %155 = vector.broadcast %154 : f32 to vector<2x24xf32>
    %156 = arith.mulf %155, %123 : vector<2x24xf32>
    %157 = arith.addf %153, %156 : vector<2x24xf32>
    %cst_33 = arith.constant 3.000000e+00 : f32
    %158 = vector.broadcast %cst_33 : f32 to vector<2x24xf32>
    %159 = arith.addf %157, %158 : vector<2x24xf32>
    %cst_34 = arith.constant 0.000000e+00 : f32
    %cst_35 = arith.constant 6.000000e+00 : f32
    %160 = vector.broadcast %cst_34 : f32 to vector<2x24xf32>
    %161 = arith.maximumf %160, %159 : vector<2x24xf32>
    %162 = vector.broadcast %cst_35 : f32 to vector<2x24xf32>
    %163 = arith.minimumf %162, %161 : vector<2x24xf32>
    %164 = arith.mulf %157, %163 : vector<2x24xf32>
    %cst_36 = arith.constant 0.166666672 : f32
    %165 = vector.broadcast %cst_36 : f32 to vector<2x24xf32>
    %166 = arith.mulf %164, %165 : vector<2x24xf32>
    %c1_37 = arith.constant 1 : index
    %c0_38 = arith.constant 0 : index
    %c0_39 = arith.constant 0 : index
    %167 = vector.load %arg7[%c1_37, %c0_38, %c0_39] : memref<2x2x24xf32, #tpu.memory_space<vmem>>, vector<1x2x24xf32>
    %168 = vector.shape_cast %167 : vector<1x2x24xf32> to vector<2x24xf32>
    %169 = vector.shape_cast %166 : vector<2x24xf32> to vector<1x2x24xf32>
    tpu.vector_store %arg7[%c1_37, %c0_38, %c0_39], %169 {strides = array<i32>} : memref<2x2x24xf32, #tpu.memory_space<vmem>>, vector<1x2x24xf32>,
    %c0_40 = arith.constant 0 : index
    %c0_41 = arith.constant 0 : index
    %c0_42 = arith.constant 0 : index
    %170 = vector.load %arg0[%c0_40, %c0_41, %c0_42] : memref<24x2x2xf32, #tpu.memory_space<vmem>>, vector<24x2x2xf32>
    %171 = vector.extract_strided_slice %170 {offsets = [1, 0, 0], sizes = [23, 2, 2], strides = [1, 1, 1]} : vector<24x2x2xf32> to vector<23x2x2xf32>
    %172 = vector.extract_strided_slice %170 {offsets = [0, 0, 0], sizes = [1, 2, 2], strides = [1, 1, 1]} : vector<24x2x2xf32> to vector<1x2x2xf32>
    %173 = tpu.concatenate %171, %172 in 0 : vector<23x2x2xf32>, vector<1x2x2xf32> -> vector<24x2x2xf32>
    %174 = vector.extract_strided_slice %170 {offsets = [0, 0, 0], sizes = [24, 2, 1], strides = [1, 1, 1]} : vector<24x2x2xf32> to vector<24x2x1xf32>
    %175 = vector.extract_strided_slice %170 {offsets = [0, 0, 1], sizes = [24, 2, 1], strides = [1, 1, 1]} : vector<24x2x2xf32> to vector<24x2x1xf32>
    %176 = arith.mulf %174, %174 : vector<24x2x1xf32>
    %177 = arith.mulf %175, %175 : vector<24x2x1xf32>
    %178 = arith.addf %176, %177 : vector<24x2x1xf32>
    %179 = math.sqrt %178 : vector<24x2x1xf32>
    %180 = arith.mulf %179, %179 : vector<24x2x1xf32>
    %181 = arith.mulf %180, %179 : vector<24x2x1xf32>
    %182 = vector.extract_strided_slice %173 {offsets = [0, 0, 0], sizes = [24, 2, 1], strides = [1, 1, 1]} : vector<24x2x2xf32> to vector<24x2x1xf32>
    %183 = vector.extract_strided_slice %173 {offsets = [0, 0, 1], sizes = [24, 2, 1], strides = [1, 1, 1]} : vector<24x2x2xf32> to vector<24x2x1xf32>
    %c0_43 = arith.constant 0 : index
    %c0_44 = arith.constant 0 : index
    %184 = vector.load %arg4[%c0_43, %c0_44] : memref<6x96xf32, #tpu.memory_space<vmem>>, vector<6x96xf32>
    %185 = vector.extract_strided_slice %184 {offsets = [0, 0], sizes = [1, 96], strides = [1, 1]} : vector<6x96xf32> to vector<1x96xf32>
    %186 = vector.extract_strided_slice %184 {offsets = [1, 0], sizes = [1, 96], strides = [1, 1]} : vector<6x96xf32> to vector<1x96xf32>
    %187 = vector.extract_strided_slice %184 {offsets = [2, 0], sizes = [1, 96], strides = [1, 1]} : vector<6x96xf32> to vector<1x96xf32>
    %188 = vector.extract_strided_slice %184 {offsets = [3, 0], sizes = [1, 96], strides = [1, 1]} : vector<6x96xf32> to vector<1x96xf32>
    %189 = vector.extract_strided_slice %184 {offsets = [4, 0], sizes = [1, 96], strides = [1, 1]} : vector<6x96xf32> to vector<1x96xf32>
    %190 = vector.extract_strided_slice %184 {offsets = [5, 0], sizes = [1, 96], strides = [1, 1]} : vector<6x96xf32> to vector<1x96xf32>
    %cst_45 = arith.constant 0.000000e+00 : f32
    %191 = vector.broadcast %cst_45 : f32 to vector<2x1xf32>
    %192 = vector.extract_strided_slice %174 {offsets = [0, 0, 0], sizes = [1, 2, 1], strides = [1, 1, 1]} : vector<24x2x1xf32> to vector<1x2x1xf32>
    %193 = vector.shape_cast %192 : vector<1x2x1xf32> to vector<2x1xf32>
    %194 = arith.subf %193, %191 : vector<2x1xf32>
    %195 = math.absf %194 : vector<2x1xf32>
    %cst_46 = arith.constant 1.000000e-01 : f32
    %196 = vector.broadcast %cst_46 : f32 to vector<2x1xf32>
    %197 = arith.cmpf oge, %195, %196 : vector<2x1xf32>
    %cst_47 = arith.constant 0.000000e+00 : f32
    %198 = vector.broadcast %cst_47 : f32 to vector<2x1xf32>
    %199 = arith.select %197, %194, %198 : vector<2x1xi1>, vector<2x1xf32>
    %200 = vector.broadcast %199 : vector<2x1xf32> to vector<2x96xf32>
    %201 = vector.broadcast %185 : vector<1x96xf32> to vector<2x96xf32>
    %202 = arith.mulf %200, %201 : vector<2x96xf32>
    %203 = arith.select %197, %193, %191 : vector<2x1xi1>, vector<2x1xf32>
    %204 = vector.extract_strided_slice %175 {offsets = [0, 0, 0], sizes = [1, 2, 1], strides = [1, 1, 1]} : vector<24x2x1xf32> to vector<1x2x1xf32>
    %205 = vector.shape_cast %204 : vector<1x2x1xf32> to vector<2x1xf32>
    %206 = arith.subf %205, %191 : vector<2x1xf32>
    %207 = math.absf %206 : vector<2x1xf32>
    %cst_48 = arith.constant 1.000000e-01 : f32
    %208 = vector.broadcast %cst_48 : f32 to vector<2x1xf32>
    %209 = arith.cmpf oge, %207, %208 : vector<2x1xf32>
    %cst_49 = arith.constant 0.000000e+00 : f32
    %210 = vector.broadcast %cst_49 : f32 to vector<2x1xf32>
    %211 = arith.select %209, %206, %210 : vector<2x1xi1>, vector<2x1xf32>
    %212 = vector.broadcast %211 : vector<2x1xf32> to vector<2x96xf32>
    %213 = vector.broadcast %186 : vector<1x96xf32> to vector<2x96xf32>
    %214 = arith.mulf %212, %213 : vector<2x96xf32>
    %215 = arith.addf %202, %214 : vector<2x96xf32>
    %216 = arith.select %209, %205, %191 : vector<2x1xi1>, vector<2x1xf32>
    %217 = vector.extract_strided_slice %179 {offsets = [0, 0, 0], sizes = [1, 2, 1], strides = [1, 1, 1]} : vector<24x2x1xf32> to vector<1x2x1xf32>
    %218 = vector.shape_cast %217 : vector<1x2x1xf32> to vector<2x1xf32>
    %219 = arith.subf %218, %191 : vector<2x1xf32>
    %220 = math.absf %219 : vector<2x1xf32>
    %cst_50 = arith.constant 1.000000e-01 : f32
    %221 = vector.broadcast %cst_50 : f32 to vector<2x1xf32>
    %222 = arith.cmpf oge, %220, %221 : vector<2x1xf32>
    %cst_51 = arith.constant 0.000000e+00 : f32
    %223 = vector.broadcast %cst_51 : f32 to vector<2x1xf32>
    %224 = arith.select %222, %219, %223 : vector<2x1xi1>, vector<2x1xf32>
    %225 = vector.broadcast %224 : vector<2x1xf32> to vector<2x96xf32>
    %226 = vector.broadcast %187 : vector<1x96xf32> to vector<2x96xf32>
    %227 = arith.mulf %225, %226 : vector<2x96xf32>
    %228 = arith.addf %215, %227 : vector<2x96xf32>
    %229 = arith.select %222, %218, %191 : vector<2x1xi1>, vector<2x1xf32>
    %230 = vector.extract_strided_slice %181 {offsets = [0, 0, 0], sizes = [1, 2, 1], strides = [1, 1, 1]} : vector<24x2x1xf32> to vector<1x2x1xf32>
    %231 = vector.shape_cast %230 : vector<1x2x1xf32> to vector<2x1xf32>
    %232 = arith.subf %231, %191 : vector<2x1xf32>
    %233 = math.absf %232 : vector<2x1xf32>
    %cst_52 = arith.constant 1.000000e-01 : f32
    %234 = vector.broadcast %cst_52 : f32 to vector<2x1xf32>
    %235 = arith.cmpf oge, %233, %234 : vector<2x1xf32>
    %cst_53 = arith.constant 0.000000e+00 : f32
    %236 = vector.broadcast %cst_53 : f32 to vector<2x1xf32>
    %237 = arith.select %235, %232, %236 : vector<2x1xi1>, vector<2x1xf32>
    %238 = vector.broadcast %237 : vector<2x1xf32> to vector<2x96xf32>
    %239 = vector.broadcast %188 : vector<1x96xf32> to vector<2x96xf32>
    %240 = arith.mulf %238, %239 : vector<2x96xf32>
    %241 = arith.addf %228, %240 : vector<2x96xf32>
    %242 = arith.select %235, %231, %191 : vector<2x1xi1>, vector<2x1xf32>
    %243 = vector.extract_strided_slice %182 {offsets = [0, 0, 0], sizes = [1, 2, 1], strides = [1, 1, 1]} : vector<24x2x1xf32> to vector<1x2x1xf32>
    %244 = vector.shape_cast %243 : vector<1x2x1xf32> to vector<2x1xf32>
    %245 = arith.subf %244, %191 : vector<2x1xf32>
    %246 = math.absf %245 : vector<2x1xf32>
    %cst_54 = arith.constant 1.000000e-01 : f32
    %247 = vector.broadcast %cst_54 : f32 to vector<2x1xf32>
    %248 = arith.cmpf oge, %246, %247 : vector<2x1xf32>
    %cst_55 = arith.constant 0.000000e+00 : f32
    %249 = vector.broadcast %cst_55 : f32 to vector<2x1xf32>
    %250 = arith.select %248, %245, %249 : vector<2x1xi1>, vector<2x1xf32>
    %251 = vector.broadcast %250 : vector<2x1xf32> to vector<2x96xf32>
    %252 = vector.broadcast %189 : vector<1x96xf32> to vector<2x96xf32>
    %253 = arith.mulf %251, %252 : vector<2x96xf32>
    %254 = arith.addf %241, %253 : vector<2x96xf32>
    %255 = arith.select %248, %244, %191 : vector<2x1xi1>, vector<2x1xf32>
    %256 = vector.extract_strided_slice %183 {offsets = [0, 0, 0], sizes = [1, 2, 1], strides = [1, 1, 1]} : vector<24x2x1xf32> to vector<1x2x1xf32>
    %257 = vector.shape_cast %256 : vector<1x2x1xf32> to vector<2x1xf32>
    %258 = arith.subf %257, %191 : vector<2x1xf32>
    %259 = math.absf %258 : vector<2x1xf32>
    %cst_56 = arith.constant 1.000000e-01 : f32
    %260 = vector.broadcast %cst_56 : f32 to vector<2x1xf32>
    %261 = arith.cmpf oge, %259, %260 : vector<2x1xf32>
    %cst_57 = arith.constant 0.000000e+00 : f32
    %262 = vector.broadcast %cst_57 : f32 to vector<2x1xf32>
    %263 = arith.select %261, %258, %262 : vector<2x1xi1>, vector<2x1xf32>
    %264 = vector.broadcast %263 : vector<2x1xf32> to vector<2x96xf32>
    %265 = vector.broadcast %190 : vector<1x96xf32> to vector<2x96xf32>
    %266 = arith.mulf %264, %265 : vector<2x96xf32>
    %267 = arith.addf %254, %266 : vector<2x96xf32>
    %268 = arith.select %261, %257, %191 : vector<2x1xi1>, vector<2x1xf32>
    %269 = vector.extract_strided_slice %174 {offsets = [1, 0, 0], sizes = [1, 2, 1], strides = [1, 1, 1]} : vector<24x2x1xf32> to vector<1x2x1xf32>
    %270 = vector.shape_cast %269 : vector<1x2x1xf32> to vector<2x1xf32>
    %271 = arith.subf %270, %203 : vector<2x1xf32>
    %272 = math.absf %271 : vector<2x1xf32>
    %cst_58 = arith.constant 1.000000e-01 : f32
    %273 = vector.broadcast %cst_58 : f32 to vector<2x1xf32>
    %274 = arith.cmpf oge, %272, %273 : vector<2x1xf32>
    %cst_59 = arith.constant 0.000000e+00 : f32
    %275 = vector.broadcast %cst_59 : f32 to vector<2x1xf32>
    %276 = arith.select %274, %271, %275 : vector<2x1xi1>, vector<2x1xf32>
    %277 = vector.broadcast %276 : vector<2x1xf32> to vector<2x96xf32>
    %278 = vector.broadcast %185 : vector<1x96xf32> to vector<2x96xf32>
    %279 = arith.mulf %277, %278 : vector<2x96xf32>
    %280 = arith.select %274, %270, %203 : vector<2x1xi1>, vector<2x1xf32>
    %281 = vector.extract_strided_slice %175 {offsets = [1, 0, 0], sizes = [1, 2, 1], strides = [1, 1, 1]} : vector<24x2x1xf32> to vector<1x2x1xf32>
    %282 = vector.shape_cast %281 : vector<1x2x1xf32> to vector<2x1xf32>
    %283 = arith.subf %282, %216 : vector<2x1xf32>
    %284 = math.absf %283 : vector<2x1xf32>
    %cst_60 = arith.constant 1.000000e-01 : f32
    %285 = vector.broadcast %cst_60 : f32 to vector<2x1xf32>
    %286 = arith.cmpf oge, %284, %285 : vector<2x1xf32>
    %cst_61 = arith.constant 0.000000e+00 : f32
    %287 = vector.broadcast %cst_61 : f32 to vector<2x1xf32>
    %288 = arith.select %286, %283, %287 : vector<2x1xi1>, vector<2x1xf32>
    %289 = vector.broadcast %288 : vector<2x1xf32> to vector<2x96xf32>
    %290 = vector.broadcast %186 : vector<1x96xf32> to vector<2x96xf32>
    %291 = arith.mulf %289, %290 : vector<2x96xf32>
    %292 = arith.addf %279, %291 : vector<2x96xf32>
    %293 = arith.select %286, %282, %216 : vector<2x1xi1>, vector<2x1xf32>
    %294 = vector.extract_strided_slice %179 {offsets = [1, 0, 0], sizes = [1, 2, 1], strides = [1, 1, 1]} : vector<24x2x1xf32> to vector<1x2x1xf32>
    %295 = vector.shape_cast %294 : vector<1x2x1xf32> to vector<2x1xf32>
    %296 = arith.subf %295, %229 : vector<2x1xf32>
    %297 = math.absf %296 : vector<2x1xf32>
    %cst_62 = arith.constant 1.000000e-01 : f32
    %298 = vector.broadcast %cst_62 : f32 to vector<2x1xf32>
    %299 = arith.cmpf oge, %297, %298 : vector<2x1xf32>
    %cst_63 = arith.constant 0.000000e+00 : f32
    %300 = vector.broadcast %cst_63 : f32 to vector<2x1xf32>
    %301 = arith.select %299, %296, %300 : vector<2x1xi1>, vector<2x1xf32>
    %302 = vector.broadcast %301 : vector<2x1xf32> to vector<2x96xf32>
    %303 = vector.broadcast %187 : vector<1x96xf32> to vector<2x96xf32>
    %304 = arith.mulf %302, %303 : vector<2x96xf32>
    %305 = arith.addf %292, %304 : vector<2x96xf32>
    %306 = arith.select %299, %295, %229 : vector<2x1xi1>, vector<2x1xf32>
    %307 = vector.extract_strided_slice %181 {offsets = [1, 0, 0], sizes = [1, 2, 1], strides = [1, 1, 1]} : vector<24x2x1xf32> to vector<1x2x1xf32>
    %308 = vector.shape_cast %307 : vector<1x2x1xf32> to vector<2x1xf32>
    %309 = arith.subf %308, %242 : vector<2x1xf32>
    %310 = math.absf %309 : vector<2x1xf32>
    %cst_64 = arith.constant 1.000000e-01 : f32
    %311 = vector.broadcast %cst_64 : f32 to vector<2x1xf32>
    %312 = arith.cmpf oge, %310, %311 : vector<2x1xf32>
    %cst_65 = arith.constant 0.000000e+00 : f32
    %313 = vector.broadcast %cst_65 : f32 to vector<2x1xf32>
    %314 = arith.select %312, %309, %313 : vector<2x1xi1>, vector<2x1xf32>
    %315 = vector.broadcast %314 : vector<2x1xf32> to vector<2x96xf32>
    %316 = vector.broadcast %188 : vector<1x96xf32> to vector<2x96xf32>
    %317 = arith.mulf %315, %316 : vector<2x96xf32>
    %318 = arith.addf %305, %317 : vector<2x96xf32>
    %319 = arith.select %312, %308, %242 : vector<2x1xi1>, vector<2x1xf32>
    %320 = vector.extract_strided_slice %182 {offsets = [1, 0, 0], sizes = [1, 2, 1], strides = [1, 1, 1]} : vector<24x2x1xf32> to vector<1x2x1xf32>
    %321 = vector.shape_cast %320 : vector<1x2x1xf32> to vector<2x1xf32>
    %322 = arith.subf %321, %255 : vector<2x1xf32>
    %323 = math.absf %322 : vector<2x1xf32>
    %cst_66 = arith.constant 1.000000e-01 : f32
    %324 = vector.broadcast %cst_66 : f32 to vector<2x1xf32>
    %325 = arith.cmpf oge, %323, %324 : vector<2x1xf32>
    %cst_67 = arith.constant 0.000000e+00 : f32
    %326 = vector.broadcast %cst_67 : f32 to vector<2x1xf32>
    %327 = arith.select %325, %322, %326 : vector<2x1xi1>, vector<2x1xf32>
    %328 = vector.broadcast %327 : vector<2x1xf32> to vector<2x96xf32>
    %329 = vector.broadcast %189 : vector<1x96xf32> to vector<2x96xf32>
    %330 = arith.mulf %328, %329 : vector<2x96xf32>
    %331 = arith.addf %318, %330 : vector<2x96xf32>
    %332 = arith.select %325, %321, %255 : vector<2x1xi1>, vector<2x1xf32>
    %333 = vector.extract_strided_slice %183 {offsets = [1, 0, 0], sizes = [1, 2, 1], strides = [1, 1, 1]} : vector<24x2x1xf32> to vector<1x2x1xf32>
    %334 = vector.shape_cast %333 : vector<1x2x1xf32> to vector<2x1xf32>
    %335 = arith.subf %334, %268 : vector<2x1xf32>
    %336 = math.absf %335 : vector<2x1xf32>
    %cst_68 = arith.constant 1.000000e-01 : f32
    %337 = vector.broadcast %cst_68 : f32 to vector<2x1xf32>
    %338 = arith.cmpf oge, %336, %337 : vector<2x1xf32>
    %cst_69 = arith.constant 0.000000e+00 : f32
    %339 = vector.broadcast %cst_69 : f32 to vector<2x1xf32>
    %340 = arith.select %338, %335, %339 : vector<2x1xi1>, vector<2x1xf32>
    %341 = vector.broadcast %340 : vector<2x1xf32> to vector<2x96xf32>
    %342 = vector.broadcast %190 : vector<1x96xf32> to vector<2x96xf32>
    %343 = arith.mulf %341, %342 : vector<2x96xf32>
    %344 = arith.addf %331, %343 : vector<2x96xf32>
    %345 = arith.select %338, %334, %268 : vector<2x1xi1>, vector<2x1xf32>
    %346 = vector.extract_strided_slice %174 {offsets = [2, 0, 0], sizes = [1, 2, 1], strides = [1, 1, 1]} : vector<24x2x1xf32> to vector<1x2x1xf32>
    %347 = vector.shape_cast %346 : vector<1x2x1xf32> to vector<2x1xf32>
    %348 = arith.subf %347, %280 : vector<2x1xf32>
    %349 = math.absf %348 : vector<2x1xf32>
    %cst_70 = arith.constant 1.000000e-01 : f32
    %350 = vector.broadcast %cst_70 : f32 to vector<2x1xf32>
    %351 = arith.cmpf oge, %349, %350 : vector<2x1xf32>
    %cst_71 = arith.constant 0.000000e+00 : f32
    %352 = vector.broadcast %cst_71 : f32 to vector<2x1xf32>
    %353 = arith.select %351, %348, %352 : vector<2x1xi1>, vector<2x1xf32>
    %354 = vector.broadcast %353 : vector<2x1xf32> to vector<2x96xf32>
    %355 = vector.broadcast %185 : vector<1x96xf32> to vector<2x96xf32>
    %356 = arith.mulf %354, %355 : vector<2x96xf32>
    %357 = arith.select %351, %347, %280 : vector<2x1xi1>, vector<2x1xf32>
    %358 = vector.extract_strided_slice %175 {offsets = [2, 0, 0], sizes = [1, 2, 1], strides = [1, 1, 1]} : vector<24x2x1xf32> to vector<1x2x1xf32>
    %359 = vector.shape_cast %358 : vector<1x2x1xf32> to vector<2x1xf32>
    %360 = arith.subf %359, %293 : vector<2x1xf32>
    %361 = math.absf %360 : vector<2x1xf32>
    %cst_72 = arith.constant 1.000000e-01 : f32
    %362 = vector.broadcast %cst_72 : f32 to vector<2x1xf32>
    %363 = arith.cmpf oge, %361, %362 : vector<2x1xf32>
    %cst_73 = arith.constant 0.000000e+00 : f32
    %364 = vector.broadcast %cst_73 : f32 to vector<2x1xf32>
    %365 = arith.select %363, %360, %364 : vector<2x1xi1>, vector<2x1xf32>
    %366 = vector.broadcast %365 : vector<2x1xf32> to vector<2x96xf32>
    %367 = vector.broadcast %186 : vector<1x96xf32> to vector<2x96xf32>
    %368 = arith.mulf %366, %367 : vector<2x96xf32>
    %369 = arith.addf %356, %368 : vector<2x96xf32>
    %370 = arith.select %363, %359, %293 : vector<2x1xi1>, vector<2x1xf32>
    %371 = vector.extract_strided_slice %179 {offsets = [2, 0, 0], sizes = [1, 2, 1], strides = [1, 1, 1]} : vector<24x2x1xf32> to vector<1x2x1xf32>
    %372 = vector.shape_cast %371 : vector<1x2x1xf32> to vector<2x1xf32>
    %373 = arith.subf %372, %306 : vector<2x1xf32>
    %374 = math.absf %373 : vector<2x1xf32>
    %cst_74 = arith.constant 1.000000e-01 : f32
    %375 = vector.broadcast %cst_74 : f32 to vector<2x1xf32>
    %376 = arith.cmpf oge, %374, %375 : vector<2x1xf32>
    %cst_75 = arith.constant 0.000000e+00 : f32
    %377 = vector.broadcast %cst_75 : f32 to vector<2x1xf32>
    %378 = arith.select %376, %373, %377 : vector<2x1xi1>, vector<2x1xf32>
    %379 = vector.broadcast %378 : vector<2x1xf32> to vector<2x96xf32>
    %380 = vector.broadcast %187 : vector<1x96xf32> to vector<2x96xf32>
    %381 = arith.mulf %379, %380 : vector<2x96xf32>
    %382 = arith.addf %369, %381 : vector<2x96xf32>
    %383 = arith.select %376, %372, %306 : vector<2x1xi1>, vector<2x1xf32>
    %384 = vector.extract_strided_slice %181 {offsets = [2, 0, 0], sizes = [1, 2, 1], strides = [1, 1, 1]} : vector<24x2x1xf32> to vector<1x2x1xf32>
    %385 = vector.shape_cast %384 : vector<1x2x1xf32> to vector<2x1xf32>
    %386 = arith.subf %385, %319 : vector<2x1xf32>
    %387 = math.absf %386 : vector<2x1xf32>
    %cst_76 = arith.constant 1.000000e-01 : f32
    %388 = vector.broadcast %cst_76 : f32 to vector<2x1xf32>
    %389 = arith.cmpf oge, %387, %388 : vector<2x1xf32>
    %cst_77 = arith.constant 0.000000e+00 : f32
    %390 = vector.broadcast %cst_77 : f32 to vector<2x1xf32>
    %391 = arith.select %389, %386, %390 : vector<2x1xi1>, vector<2x1xf32>
    %392 = vector.broadcast %391 : vector<2x1xf32> to vector<2x96xf32>
    %393 = vector.broadcast %188 : vector<1x96xf32> to vector<2x96xf32>
    %394 = arith.mulf %392, %393 : vector<2x96xf32>
    %395 = arith.addf %382, %394 : vector<2x96xf32>
    %396 = arith.select %389, %385, %319 : vector<2x1xi1>, vector<2x1xf32>
    %397 = vector.extract_strided_slice %182 {offsets = [2, 0, 0], sizes = [1, 2, 1], strides = [1, 1, 1]} : vector<24x2x1xf32> to vector<1x2x1xf32>
    %398 = vector.shape_cast %397 : vector<1x2x1xf32> to vector<2x1xf32>
    %399 = arith.subf %398, %332 : vector<2x1xf32>
    %400 = math.absf %399 : vector<2x1xf32>
    %cst_78 = arith.constant 1.000000e-01 : f32
    %401 = vector.broadcast %cst_78 : f32 to vector<2x1xf32>
    %402 = arith.cmpf oge, %400, %401 : vector<2x1xf32>
    %cst_79 = arith.constant 0.000000e+00 : f32
    %403 = vector.broadcast %cst_79 : f32 to vector<2x1xf32>
    %404 = arith.select %402, %399, %403 : vector<2x1xi1>, vector<2x1xf32>
    %405 = vector.broadcast %404 : vector<2x1xf32> to vector<2x96xf32>
    %406 = vector.broadcast %189 : vector<1x96xf32> to vector<2x96xf32>
    %407 = arith.mulf %405, %406 : vector<2x96xf32>
    %408 = arith.addf %395, %407 : vector<2x96xf32>
    %409 = arith.select %402, %398, %332 : vector<2x1xi1>, vector<2x1xf32>
    %410 = vector.extract_strided_slice %183 {offsets = [2, 0, 0], sizes = [1, 2, 1], strides = [1, 1, 1]} : vector<24x2x1xf32> to vector<1x2x1xf32>
    %411 = vector.shape_cast %410 : vector<1x2x1xf32> to vector<2x1xf32>
    %412 = arith.subf %411, %345 : vector<2x1xf32>
    %413 = math.absf %412 : vector<2x1xf32>
    %cst_80 = arith.constant 1.000000e-01 : f32
    %414 = vector.broadcast %cst_80 : f32 to vector<2x1xf32>
    %415 = arith.cmpf oge, %413, %414 : vector<2x1xf32>
    %cst_81 = arith.constant 0.000000e+00 : f32
    %416 = vector.broadcast %cst_81 : f32 to vector<2x1xf32>
    %417 = arith.select %415, %412, %416 : vector<2x1xi1>, vector<2x1xf32>
    %418 = vector.broadcast %417 : vector<2x1xf32> to vector<2x96xf32>
    %419 = vector.broadcast %190 : vector<1x96xf32> to vector<2x96xf32>
    %420 = arith.mulf %418, %419 : vector<2x96xf32>
    %421 = arith.addf %408, %420 : vector<2x96xf32>
    %422 = arith.select %415, %411, %345 : vector<2x1xi1>, vector<2x1xf32>
    %423 = vector.extract_strided_slice %174 {offsets = [3, 0, 0], sizes = [1, 2, 1], strides = [1, 1, 1]} : vector<24x2x1xf32> to vector<1x2x1xf32>
    %424 = vector.shape_cast %423 : vector<1x2x1xf32> to vector<2x1xf32>
    %425 = arith.subf %424, %357 : vector<2x1xf32>
    %426 = math.absf %425 : vector<2x1xf32>
    %cst_82 = arith.constant 1.000000e-01 : f32
    %427 = vector.broadcast %cst_82 : f32 to vector<2x1xf32>
    %428 = arith.cmpf oge, %426, %427 : vector<2x1xf32>
    %cst_83 = arith.constant 0.000000e+00 : f32
    %429 = vector.broadcast %cst_83 : f32 to vector<2x1xf32>
    %430 = arith.select %428, %425, %429 : vector<2x1xi1>, vector<2x1xf32>
    %431 = vector.broadcast %430 : vector<2x1xf32> to vector<2x96xf32>
    %432 = vector.broadcast %185 : vector<1x96xf32> to vector<2x96xf32>
    %433 = arith.mulf %431, %432 : vector<2x96xf32>
    %434 = arith.select %428, %424, %357 : vector<2x1xi1>, vector<2x1xf32>
    %435 = vector.extract_strided_slice %175 {offsets = [3, 0, 0], sizes = [1, 2, 1], strides = [1, 1, 1]} : vector<24x2x1xf32> to vector<1x2x1xf32>
    %436 = vector.shape_cast %435 : vector<1x2x1xf32> to vector<2x1xf32>
    %437 = arith.subf %436, %370 : vector<2x1xf32>
    %438 = math.absf %437 : vector<2x1xf32>
    %cst_84 = arith.constant 1.000000e-01 : f32
    %439 = vector.broadcast %cst_84 : f32 to vector<2x1xf32>
    %440 = arith.cmpf oge, %438, %439 : vector<2x1xf32>
    %cst_85 = arith.constant 0.000000e+00 : f32
    %441 = vector.broadcast %cst_85 : f32 to vector<2x1xf32>
    %442 = arith.select %440, %437, %441 : vector<2x1xi1>, vector<2x1xf32>
    %443 = vector.broadcast %442 : vector<2x1xf32> to vector<2x96xf32>
    %444 = vector.broadcast %186 : vector<1x96xf32> to vector<2x96xf32>
    %445 = arith.mulf %443, %444 : vector<2x96xf32>
    %446 = arith.addf %433, %445 : vector<2x96xf32>
    %447 = arith.select %440, %436, %370 : vector<2x1xi1>, vector<2x1xf32>
    %448 = vector.extract_strided_slice %179 {offsets = [3, 0, 0], sizes = [1, 2, 1], strides = [1, 1, 1]} : vector<24x2x1xf32> to vector<1x2x1xf32>
    %449 = vector.shape_cast %448 : vector<1x2x1xf32> to vector<2x1xf32>
    %450 = arith.subf %449, %383 : vector<2x1xf32>
    %451 = math.absf %450 : vector<2x1xf32>
    %cst_86 = arith.constant 1.000000e-01 : f32
    %452 = vector.broadcast %cst_86 : f32 to vector<2x1xf32>
    %453 = arith.cmpf oge, %451, %452 : vector<2x1xf32>
    %cst_87 = arith.constant 0.000000e+00 : f32
    %454 = vector.broadcast %cst_87 : f32 to vector<2x1xf32>
    %455 = arith.select %453, %450, %454 : vector<2x1xi1>, vector<2x1xf32>
    %456 = vector.broadcast %455 : vector<2x1xf32> to vector<2x96xf32>
    %457 = vector.broadcast %187 : vector<1x96xf32> to vector<2x96xf32>
    %458 = arith.mulf %456, %457 : vector<2x96xf32>
    %459 = arith.addf %446, %458 : vector<2x96xf32>
    %460 = arith.select %453, %449, %383 : vector<2x1xi1>, vector<2x1xf32>
    %461 = vector.extract_strided_slice %181 {offsets = [3, 0, 0], sizes = [1, 2, 1], strides = [1, 1, 1]} : vector<24x2x1xf32> to vector<1x2x1xf32>
    %462 = vector.shape_cast %461 : vector<1x2x1xf32> to vector<2x1xf32>
    %463 = arith.subf %462, %396 : vector<2x1xf32>
    %464 = math.absf %463 : vector<2x1xf32>
    %cst_88 = arith.constant 1.000000e-01 : f32
    %465 = vector.broadcast %cst_88 : f32 to vector<2x1xf32>
    %466 = arith.cmpf oge, %464, %465 : vector<2x1xf32>
    %cst_89 = arith.constant 0.000000e+00 : f32
    %467 = vector.broadcast %cst_89 : f32 to vector<2x1xf32>
    %468 = arith.select %466, %463, %467 : vector<2x1xi1>, vector<2x1xf32>
    %469 = vector.broadcast %468 : vector<2x1xf32> to vector<2x96xf32>
    %470 = vector.broadcast %188 : vector<1x96xf32> to vector<2x96xf32>
    %471 = arith.mulf %469, %470 : vector<2x96xf32>
    %472 = arith.addf %459, %471 : vector<2x96xf32>
    %473 = arith.select %466, %462, %396 : vector<2x1xi1>, vector<2x1xf32>
    %474 = vector.extract_strided_slice %182 {offsets = [3, 0, 0], sizes = [1, 2, 1], strides = [1, 1, 1]} : vector<24x2x1xf32> to vector<1x2x1xf32>
    %475 = vector.shape_cast %474 : vector<1x2x1xf32> to vector<2x1xf32>
    %476 = arith.subf %475, %409 : vector<2x1xf32>
    %477 = math.absf %476 : vector<2x1xf32>
    %cst_90 = arith.constant 1.000000e-01 : f32
    %478 = vector.broadcast %cst_90 : f32 to vector<2x1xf32>
    %479 = arith.cmpf oge, %477, %478 : vector<2x1xf32>
    %cst_91 = arith.constant 0.000000e+00 : f32
    %480 = vector.broadcast %cst_91 : f32 to vector<2x1xf32>
    %481 = arith.select %479, %476, %480 : vector<2x1xi1>, vector<2x1xf32>
    %482 = vector.broadcast %481 : vector<2x1xf32> to vector<2x96xf32>
    %483 = vector.broadcast %189 : vector<1x96xf32> to vector<2x96xf32>
    %484 = arith.mulf %482, %483 : vector<2x96xf32>
    %485 = arith.addf %472, %484 : vector<2x96xf32>
    %486 = arith.select %479, %475, %409 : vector<2x1xi1>, vector<2x1xf32>
    %487 = vector.extract_strided_slice %183 {offsets = [3, 0, 0], sizes = [1, 2, 1], strides = [1, 1, 1]} : vector<24x2x1xf32> to vector<1x2x1xf32>
    %488 = vector.shape_cast %487 : vector<1x2x1xf32> to vector<2x1xf32>
    %489 = arith.subf %488, %422 : vector<2x1xf32>
    %490 = math.absf %489 : vector<2x1xf32>
    %cst_92 = arith.constant 1.000000e-01 : f32
    %491 = vector.broadcast %cst_92 : f32 to vector<2x1xf32>
    %492 = arith.cmpf oge, %490, %491 : vector<2x1xf32>
    %cst_93 = arith.constant 0.000000e+00 : f32
    %493 = vector.broadcast %cst_93 : f32 to vector<2x1xf32>
    %494 = arith.select %492, %489, %493 : vector<2x1xi1>, vector<2x1xf32>
    %495 = vector.broadcast %494 : vector<2x1xf32> to vector<2x96xf32>
    %496 = vector.broadcast %190 : vector<1x96xf32> to vector<2x96xf32>
    %497 = arith.mulf %495, %496 : vector<2x96xf32>
    %498 = arith.addf %485, %497 : vector<2x96xf32>
    %499 = arith.select %492, %488, %422 : vector<2x1xi1>, vector<2x1xf32>
    %500 = vector.extract_strided_slice %174 {offsets = [4, 0, 0], sizes = [1, 2, 1], strides = [1, 1, 1]} : vector<24x2x1xf32> to vector<1x2x1xf32>
    %501 = vector.shape_cast %500 : vector<1x2x1xf32> to vector<2x1xf32>
    %502 = arith.subf %501, %434 : vector<2x1xf32>
    %503 = math.absf %502 : vector<2x1xf32>
    %cst_94 = arith.constant 1.000000e-01 : f32
    %504 = vector.broadcast %cst_94 : f32 to vector<2x1xf32>
    %505 = arith.cmpf oge, %503, %504 : vector<2x1xf32>
    %cst_95 = arith.constant 0.000000e+00 : f32
    %506 = vector.broadcast %cst_95 : f32 to vector<2x1xf32>
    %507 = arith.select %505, %502, %506 : vector<2x1xi1>, vector<2x1xf32>
    %508 = vector.broadcast %507 : vector<2x1xf32> to vector<2x96xf32>
    %509 = vector.broadcast %185 : vector<1x96xf32> to vector<2x96xf32>
    %510 = arith.mulf %508, %509 : vector<2x96xf32>
    %511 = arith.select %505, %501, %434 : vector<2x1xi1>, vector<2x1xf32>
    %512 = vector.extract_strided_slice %175 {offsets = [4, 0, 0], sizes = [1, 2, 1], strides = [1, 1, 1]} : vector<24x2x1xf32> to vector<1x2x1xf32>
    %513 = vector.shape_cast %512 : vector<1x2x1xf32> to vector<2x1xf32>
    %514 = arith.subf %513, %447 : vector<2x1xf32>
    %515 = math.absf %514 : vector<2x1xf32>
    %cst_96 = arith.constant 1.000000e-01 : f32
    %516 = vector.broadcast %cst_96 : f32 to vector<2x1xf32>
    %517 = arith.cmpf oge, %515, %516 : vector<2x1xf32>
    %cst_97 = arith.constant 0.000000e+00 : f32
    %518 = vector.broadcast %cst_97 : f32 to vector<2x1xf32>
    %519 = arith.select %517, %514, %518 : vector<2x1xi1>, vector<2x1xf32>
    %520 = vector.broadcast %519 : vector<2x1xf32> to vector<2x96xf32>
    %521 = vector.broadcast %186 : vector<1x96xf32> to vector<2x96xf32>
    %522 = arith.mulf %520, %521 : vector<2x96xf32>
    %523 = arith.addf %510, %522 : vector<2x96xf32>
    %524 = arith.select %517, %513, %447 : vector<2x1xi1>, vector<2x1xf32>
    %525 = vector.extract_strided_slice %179 {offsets = [4, 0, 0], sizes = [1, 2, 1], strides = [1, 1, 1]} : vector<24x2x1xf32> to vector<1x2x1xf32>
    %526 = vector.shape_cast %525 : vector<1x2x1xf32> to vector<2x1xf32>
    %527 = arith.subf %526, %460 : vector<2x1xf32>
    %528 = math.absf %527 : vector<2x1xf32>
    %cst_98 = arith.constant 1.000000e-01 : f32
    %529 = vector.broadcast %cst_98 : f32 to vector<2x1xf32>
    %530 = arith.cmpf oge, %528, %529 : vector<2x1xf32>
    %cst_99 = arith.constant 0.000000e+00 : f32
    %531 = vector.broadcast %cst_99 : f32 to vector<2x1xf32>
    %532 = arith.select %530, %527, %531 : vector<2x1xi1>, vector<2x1xf32>
    %533 = vector.broadcast %532 : vector<2x1xf32> to vector<2x96xf32>
    %534 = vector.broadcast %187 : vector<1x96xf32> to vector<2x96xf32>
    %535 = arith.mulf %533, %534 : vector<2x96xf32>
    %536 = arith.addf %523, %535 : vector<2x96xf32>
    %537 = arith.select %530, %526, %460 : vector<2x1xi1>, vector<2x1xf32>
    %538 = vector.extract_strided_slice %181 {offsets = [4, 0, 0], sizes = [1, 2, 1], strides = [1, 1, 1]} : vector<24x2x1xf32> to vector<1x2x1xf32>
    %539 = vector.shape_cast %538 : vector<1x2x1xf32> to vector<2x1xf32>
    %540 = arith.subf %539, %473 : vector<2x1xf32>
    %541 = math.absf %540 : vector<2x1xf32>
    %cst_100 = arith.constant 1.000000e-01 : f32
    %542 = vector.broadcast %cst_100 : f32 to vector<2x1xf32>
    %543 = arith.cmpf oge, %541, %542 : vector<2x1xf32>
    %cst_101 = arith.constant 0.000000e+00 : f32
    %544 = vector.broadcast %cst_101 : f32 to vector<2x1xf32>
    %545 = arith.select %543, %540, %544 : vector<2x1xi1>, vector<2x1xf32>
    %546 = vector.broadcast %545 : vector<2x1xf32> to vector<2x96xf32>
    %547 = vector.broadcast %188 : vector<1x96xf32> to vector<2x96xf32>
    %548 = arith.mulf %546, %547 : vector<2x96xf32>
    %549 = arith.addf %536, %548 : vector<2x96xf32>
    %550 = arith.select %543, %539, %473 : vector<2x1xi1>, vector<2x1xf32>
    %551 = vector.extract_strided_slice %182 {offsets = [4, 0, 0], sizes = [1, 2, 1], strides = [1, 1, 1]} : vector<24x2x1xf32> to vector<1x2x1xf32>
    %552 = vector.shape_cast %551 : vector<1x2x1xf32> to vector<2x1xf32>
    %553 = arith.subf %552, %486 : vector<2x1xf32>
    %554 = math.absf %553 : vector<2x1xf32>
    %cst_102 = arith.constant 1.000000e-01 : f32
    %555 = vector.broadcast %cst_102 : f32 to vector<2x1xf32>
    %556 = arith.cmpf oge, %554, %555 : vector<2x1xf32>
    %cst_103 = arith.constant 0.000000e+00 : f32
    %557 = vector.broadcast %cst_103 : f32 to vector<2x1xf32>
    %558 = arith.select %556, %553, %557 : vector<2x1xi1>, vector<2x1xf32>
    %559 = vector.broadcast %558 : vector<2x1xf32> to vector<2x96xf32>
    %560 = vector.broadcast %189 : vector<1x96xf32> to vector<2x96xf32>
    %561 = arith.mulf %559, %560 : vector<2x96xf32>
    %562 = arith.addf %549, %561 : vector<2x96xf32>
    %563 = arith.select %556, %552, %486 : vector<2x1xi1>, vector<2x1xf32>
    %564 = vector.extract_strided_slice %183 {offsets = [4, 0, 0], sizes = [1, 2, 1], strides = [1, 1, 1]} : vector<24x2x1xf32> to vector<1x2x1xf32>
    %565 = vector.shape_cast %564 : vector<1x2x1xf32> to vector<2x1xf32>
    %566 = arith.subf %565, %499 : vector<2x1xf32>
    %567 = math.absf %566 : vector<2x1xf32>
    %cst_104 = arith.constant 1.000000e-01 : f32
    %568 = vector.broadcast %cst_104 : f32 to vector<2x1xf32>
    %569 = arith.cmpf oge, %567, %568 : vector<2x1xf32>
    %cst_105 = arith.constant 0.000000e+00 : f32
    %570 = vector.broadcast %cst_105 : f32 to vector<2x1xf32>
    %571 = arith.select %569, %566, %570 : vector<2x1xi1>, vector<2x1xf32>
    %572 = vector.broadcast %571 : vector<2x1xf32> to vector<2x96xf32>
    %573 = vector.broadcast %190 : vector<1x96xf32> to vector<2x96xf32>
    %574 = arith.mulf %572, %573 : vector<2x96xf32>
    %575 = arith.addf %562, %574 : vector<2x96xf32>
    %576 = arith.select %569, %565, %499 : vector<2x1xi1>, vector<2x1xf32>
    %577 = vector.extract_strided_slice %174 {offsets = [5, 0, 0], sizes = [1, 2, 1], strides = [1, 1, 1]} : vector<24x2x1xf32> to vector<1x2x1xf32>
    %578 = vector.shape_cast %577 : vector<1x2x1xf32> to vector<2x1xf32>
    %579 = arith.subf %578, %511 : vector<2x1xf32>
    %580 = math.absf %579 : vector<2x1xf32>
    %cst_106 = arith.constant 1.000000e-01 : f32
    %581 = vector.broadcast %cst_106 : f32 to vector<2x1xf32>
    %582 = arith.cmpf oge, %580, %581 : vector<2x1xf32>
    %cst_107 = arith.constant 0.000000e+00 : f32
    %583 = vector.broadcast %cst_107 : f32 to vector<2x1xf32>
    %584 = arith.select %582, %579, %583 : vector<2x1xi1>, vector<2x1xf32>
    %585 = vector.broadcast %584 : vector<2x1xf32> to vector<2x96xf32>
    %586 = vector.broadcast %185 : vector<1x96xf32> to vector<2x96xf32>
    %587 = arith.mulf %585, %586 : vector<2x96xf32>
    %588 = arith.select %582, %578, %511 : vector<2x1xi1>, vector<2x1xf32>
    %589 = vector.extract_strided_slice %175 {offsets = [5, 0, 0], sizes = [1, 2, 1], strides = [1, 1, 1]} : vector<24x2x1xf32> to vector<1x2x1xf32>
    %590 = vector.shape_cast %589 : vector<1x2x1xf32> to vector<2x1xf32>
    %591 = arith.subf %590, %524 : vector<2x1xf32>
    %592 = math.absf %591 : vector<2x1xf32>
    %cst_108 = arith.constant 1.000000e-01 : f32
    %593 = vector.broadcast %cst_108 : f32 to vector<2x1xf32>
    %594 = arith.cmpf oge, %592, %593 : vector<2x1xf32>
    %cst_109 = arith.constant 0.000000e+00 : f32
    %595 = vector.broadcast %cst_109 : f32 to vector<2x1xf32>
    %596 = arith.select %594, %591, %595 : vector<2x1xi1>, vector<2x1xf32>
    %597 = vector.broadcast %596 : vector<2x1xf32> to vector<2x96xf32>
    %598 = vector.broadcast %186 : vector<1x96xf32> to vector<2x96xf32>
    %599 = arith.mulf %597, %598 : vector<2x96xf32>
    %600 = arith.addf %587, %599 : vector<2x96xf32>
    %601 = arith.select %594, %590, %524 : vector<2x1xi1>, vector<2x1xf32>
    %602 = vector.extract_strided_slice %179 {offsets = [5, 0, 0], sizes = [1, 2, 1], strides = [1, 1, 1]} : vector<24x2x1xf32> to vector<1x2x1xf32>
    %603 = vector.shape_cast %602 : vector<1x2x1xf32> to vector<2x1xf32>
    %604 = arith.subf %603, %537 : vector<2x1xf32>
    %605 = math.absf %604 : vector<2x1xf32>
    %cst_110 = arith.constant 1.000000e-01 : f32
    %606 = vector.broadcast %cst_110 : f32 to vector<2x1xf32>
    %607 = arith.cmpf oge, %605, %606 : vector<2x1xf32>
    %cst_111 = arith.constant 0.000000e+00 : f32
    %608 = vector.broadcast %cst_111 : f32 to vector<2x1xf32>
    %609 = arith.select %607, %604, %608 : vector<2x1xi1>, vector<2x1xf32>
    %610 = vector.broadcast %609 : vector<2x1xf32> to vector<2x96xf32>
    %611 = vector.broadcast %187 : vector<1x96xf32> to vector<2x96xf32>
    %612 = arith.mulf %610, %611 : vector<2x96xf32>
    %613 = arith.addf %600, %612 : vector<2x96xf32>
    %614 = arith.select %607, %603, %537 : vector<2x1xi1>, vector<2x1xf32>
    %615 = vector.extract_strided_slice %181 {offsets = [5, 0, 0], sizes = [1, 2, 1], strides = [1, 1, 1]} : vector<24x2x1xf32> to vector<1x2x1xf32>
    %616 = vector.shape_cast %615 : vector<1x2x1xf32> to vector<2x1xf32>
    %617 = arith.subf %616, %550 : vector<2x1xf32>
    %618 = math.absf %617 : vector<2x1xf32>
    %cst_112 = arith.constant 1.000000e-01 : f32
    %619 = vector.broadcast %cst_112 : f32 to vector<2x1xf32>
    %620 = arith.cmpf oge, %618, %619 : vector<2x1xf32>
    %cst_113 = arith.constant 0.000000e+00 : f32
    %621 = vector.broadcast %cst_113 : f32 to vector<2x1xf32>
    %622 = arith.select %620, %617, %621 : vector<2x1xi1>, vector<2x1xf32>
    %623 = vector.broadcast %622 : vector<2x1xf32> to vector<2x96xf32>
    %624 = vector.broadcast %188 : vector<1x96xf32> to vector<2x96xf32>
    %625 = arith.mulf %623, %624 : vector<2x96xf32>
    %626 = arith.addf %613, %625 : vector<2x96xf32>
    %627 = arith.select %620, %616, %550 : vector<2x1xi1>, vector<2x1xf32>
    %628 = vector.extract_strided_slice %182 {offsets = [5, 0, 0], sizes = [1, 2, 1], strides = [1, 1, 1]} : vector<24x2x1xf32> to vector<1x2x1xf32>
    %629 = vector.shape_cast %628 : vector<1x2x1xf32> to vector<2x1xf32>
    %630 = arith.subf %629, %563 : vector<2x1xf32>
    %631 = math.absf %630 : vector<2x1xf32>
    %cst_114 = arith.constant 1.000000e-01 : f32
    %632 = vector.broadcast %cst_114 : f32 to vector<2x1xf32>
    %633 = arith.cmpf oge, %631, %632 : vector<2x1xf32>
    %cst_115 = arith.constant 0.000000e+00 : f32
    %634 = vector.broadcast %cst_115 : f32 to vector<2x1xf32>
    %635 = arith.select %633, %630, %634 : vector<2x1xi1>, vector<2x1xf32>
    %636 = vector.broadcast %635 : vector<2x1xf32> to vector<2x96xf32>
    %637 = vector.broadcast %189 : vector<1x96xf32> to vector<2x96xf32>
    %638 = arith.mulf %636, %637 : vector<2x96xf32>
    %639 = arith.addf %626, %638 : vector<2x96xf32>
    %640 = arith.select %633, %629, %563 : vector<2x1xi1>, vector<2x1xf32>
    %641 = vector.extract_strided_slice %183 {offsets = [5, 0, 0], sizes = [1, 2, 1], strides = [1, 1, 1]} : vector<24x2x1xf32> to vector<1x2x1xf32>
    %642 = vector.shape_cast %641 : vector<1x2x1xf32> to vector<2x1xf32>
    %643 = arith.subf %642, %576 : vector<2x1xf32>
    %644 = math.absf %643 : vector<2x1xf32>
    %cst_116 = arith.constant 1.000000e-01 : f32
    %645 = vector.broadcast %cst_116 : f32 to vector<2x1xf32>
    %646 = arith.cmpf oge, %644, %645 : vector<2x1xf32>
    %cst_117 = arith.constant 0.000000e+00 : f32
    %647 = vector.broadcast %cst_117 : f32 to vector<2x1xf32>
    %648 = arith.select %646, %643, %647 : vector<2x1xi1>, vector<2x1xf32>
    %649 = vector.broadcast %648 : vector<2x1xf32> to vector<2x96xf32>
    %650 = vector.broadcast %190 : vector<1x96xf32> to vector<2x96xf32>
    %651 = arith.mulf %649, %650 : vector<2x96xf32>
    %652 = arith.addf %639, %651 : vector<2x96xf32>
    %653 = arith.select %646, %642, %576 : vector<2x1xi1>, vector<2x1xf32>
    %654 = vector.extract_strided_slice %174 {offsets = [6, 0, 0], sizes = [1, 2, 1], strides = [1, 1, 1]} : vector<24x2x1xf32> to vector<1x2x1xf32>
    %655 = vector.shape_cast %654 : vector<1x2x1xf32> to vector<2x1xf32>
    %656 = arith.subf %655, %588 : vector<2x1xf32>
    %657 = math.absf %656 : vector<2x1xf32>
    %cst_118 = arith.constant 1.000000e-01 : f32
    %658 = vector.broadcast %cst_118 : f32 to vector<2x1xf32>
    %659 = arith.cmpf oge, %657, %658 : vector<2x1xf32>
    %cst_119 = arith.constant 0.000000e+00 : f32
    %660 = vector.broadcast %cst_119 : f32 to vector<2x1xf32>
    %661 = arith.select %659, %656, %660 : vector<2x1xi1>, vector<2x1xf32>
    %662 = vector.broadcast %661 : vector<2x1xf32> to vector<2x96xf32>
    %663 = vector.broadcast %185 : vector<1x96xf32> to vector<2x96xf32>
    %664 = arith.mulf %662, %663 : vector<2x96xf32>
    %665 = arith.select %659, %655, %588 : vector<2x1xi1>, vector<2x1xf32>
    %666 = vector.extract_strided_slice %175 {offsets = [6, 0, 0], sizes = [1, 2, 1], strides = [1, 1, 1]} : vector<24x2x1xf32> to vector<1x2x1xf32>
    %667 = vector.shape_cast %666 : vector<1x2x1xf32> to vector<2x1xf32>
    %668 = arith.subf %667, %601 : vector<2x1xf32>
    %669 = math.absf %668 : vector<2x1xf32>
    %cst_120 = arith.constant 1.000000e-01 : f32
    %670 = vector.broadcast %cst_120 : f32 to vector<2x1xf32>
    %671 = arith.cmpf oge, %669, %670 : vector<2x1xf32>
    %cst_121 = arith.constant 0.000000e+00 : f32
    %672 = vector.broadcast %cst_121 : f32 to vector<2x1xf32>
    %673 = arith.select %671, %668, %672 : vector<2x1xi1>, vector<2x1xf32>
    %674 = vector.broadcast %673 : vector<2x1xf32> to vector<2x96xf32>
    %675 = vector.broadcast %186 : vector<1x96xf32> to vector<2x96xf32>
    %676 = arith.mulf %674, %675 : vector<2x96xf32>
    %677 = arith.addf %664, %676 : vector<2x96xf32>
    %678 = arith.select %671, %667, %601 : vector<2x1xi1>, vector<2x1xf32>
    %679 = vector.extract_strided_slice %179 {offsets = [6, 0, 0], sizes = [1, 2, 1], strides = [1, 1, 1]} : vector<24x2x1xf32> to vector<1x2x1xf32>
    %680 = vector.shape_cast %679 : vector<1x2x1xf32> to vector<2x1xf32>
    %681 = arith.subf %680, %614 : vector<2x1xf32>
    %682 = math.absf %681 : vector<2x1xf32>
    %cst_122 = arith.constant 1.000000e-01 : f32
    %683 = vector.broadcast %cst_122 : f32 to vector<2x1xf32>
    %684 = arith.cmpf oge, %682, %683 : vector<2x1xf32>
    %cst_123 = arith.constant 0.000000e+00 : f32
    %685 = vector.broadcast %cst_123 : f32 to vector<2x1xf32>
    %686 = arith.select %684, %681, %685 : vector<2x1xi1>, vector<2x1xf32>
    %687 = vector.broadcast %686 : vector<2x1xf32> to vector<2x96xf32>
    %688 = vector.broadcast %187 : vector<1x96xf32> to vector<2x96xf32>
    %689 = arith.mulf %687, %688 : vector<2x96xf32>
    %690 = arith.addf %677, %689 : vector<2x96xf32>
    %691 = arith.select %684, %680, %614 : vector<2x1xi1>, vector<2x1xf32>
    %692 = vector.extract_strided_slice %181 {offsets = [6, 0, 0], sizes = [1, 2, 1], strides = [1, 1, 1]} : vector<24x2x1xf32> to vector<1x2x1xf32>
    %693 = vector.shape_cast %692 : vector<1x2x1xf32> to vector<2x1xf32>
    %694 = arith.subf %693, %627 : vector<2x1xf32>
    %695 = math.absf %694 : vector<2x1xf32>
    %cst_124 = arith.constant 1.000000e-01 : f32
    %696 = vector.broadcast %cst_124 : f32 to vector<2x1xf32>
    %697 = arith.cmpf oge, %695, %696 : vector<2x1xf32>
    %cst_125 = arith.constant 0.000000e+00 : f32
    %698 = vector.broadcast %cst_125 : f32 to vector<2x1xf32>
    %699 = arith.select %697, %694, %698 : vector<2x1xi1>, vector<2x1xf32>
    %700 = vector.broadcast %699 : vector<2x1xf32> to vector<2x96xf32>
    %701 = vector.broadcast %188 : vector<1x96xf32> to vector<2x96xf32>
    %702 = arith.mulf %700, %701 : vector<2x96xf32>
    %703 = arith.addf %690, %702 : vector<2x96xf32>
    %704 = arith.select %697, %693, %627 : vector<2x1xi1>, vector<2x1xf32>
    %705 = vector.extract_strided_slice %182 {offsets = [6, 0, 0], sizes = [1, 2, 1], strides = [1, 1, 1]} : vector<24x2x1xf32> to vector<1x2x1xf32>
    %706 = vector.shape_cast %705 : vector<1x2x1xf32> to vector<2x1xf32>
    %707 = arith.subf %706, %640 : vector<2x1xf32>
    %708 = math.absf %707 : vector<2x1xf32>
    %cst_126 = arith.constant 1.000000e-01 : f32
    %709 = vector.broadcast %cst_126 : f32 to vector<2x1xf32>
    %710 = arith.cmpf oge, %708, %709 : vector<2x1xf32>
    %cst_127 = arith.constant 0.000000e+00 : f32
    %711 = vector.broadcast %cst_127 : f32 to vector<2x1xf32>
    %712 = arith.select %710, %707, %711 : vector<2x1xi1>, vector<2x1xf32>
    %713 = vector.broadcast %712 : vector<2x1xf32> to vector<2x96xf32>
    %714 = vector.broadcast %189 : vector<1x96xf32> to vector<2x96xf32>
    %715 = arith.mulf %713, %714 : vector<2x96xf32>
    %716 = arith.addf %703, %715 : vector<2x96xf32>
    %717 = arith.select %710, %706, %640 : vector<2x1xi1>, vector<2x1xf32>
    %718 = vector.extract_strided_slice %183 {offsets = [6, 0, 0], sizes = [1, 2, 1], strides = [1, 1, 1]} : vector<24x2x1xf32> to vector<1x2x1xf32>
    %719 = vector.shape_cast %718 : vector<1x2x1xf32> to vector<2x1xf32>
    %720 = arith.subf %719, %653 : vector<2x1xf32>
    %721 = math.absf %720 : vector<2x1xf32>
    %cst_128 = arith.constant 1.000000e-01 : f32
    %722 = vector.broadcast %cst_128 : f32 to vector<2x1xf32>
    %723 = arith.cmpf oge, %721, %722 : vector<2x1xf32>
    %cst_129 = arith.constant 0.000000e+00 : f32
    %724 = vector.broadcast %cst_129 : f32 to vector<2x1xf32>
    %725 = arith.select %723, %720, %724 : vector<2x1xi1>, vector<2x1xf32>
    %726 = vector.broadcast %725 : vector<2x1xf32> to vector<2x96xf32>
    %727 = vector.broadcast %190 : vector<1x96xf32> to vector<2x96xf32>
    %728 = arith.mulf %726, %727 : vector<2x96xf32>
    %729 = arith.addf %716, %728 : vector<2x96xf32>
    %730 = arith.select %723, %719, %653 : vector<2x1xi1>, vector<2x1xf32>
    %731 = vector.extract_strided_slice %174 {offsets = [7, 0, 0], sizes = [1, 2, 1], strides = [1, 1, 1]} : vector<24x2x1xf32> to vector<1x2x1xf32>
    %732 = vector.shape_cast %731 : vector<1x2x1xf32> to vector<2x1xf32>
    %733 = arith.subf %732, %665 : vector<2x1xf32>
    %734 = math.absf %733 : vector<2x1xf32>
    %cst_130 = arith.constant 1.000000e-01 : f32
    %735 = vector.broadcast %cst_130 : f32 to vector<2x1xf32>
    %736 = arith.cmpf oge, %734, %735 : vector<2x1xf32>
    %cst_131 = arith.constant 0.000000e+00 : f32
    %737 = vector.broadcast %cst_131 : f32 to vector<2x1xf32>
    %738 = arith.select %736, %733, %737 : vector<2x1xi1>, vector<2x1xf32>
    %739 = vector.broadcast %738 : vector<2x1xf32> to vector<2x96xf32>
    %740 = vector.broadcast %185 : vector<1x96xf32> to vector<2x96xf32>
    %741 = arith.mulf %739, %740 : vector<2x96xf32>
    %742 = arith.select %736, %732, %665 : vector<2x1xi1>, vector<2x1xf32>
    %743 = vector.extract_strided_slice %175 {offsets = [7, 0, 0], sizes = [1, 2, 1], strides = [1, 1, 1]} : vector<24x2x1xf32> to vector<1x2x1xf32>
    %744 = vector.shape_cast %743 : vector<1x2x1xf32> to vector<2x1xf32>
    %745 = arith.subf %744, %678 : vector<2x1xf32>
    %746 = math.absf %745 : vector<2x1xf32>
    %cst_132 = arith.constant 1.000000e-01 : f32
    %747 = vector.broadcast %cst_132 : f32 to vector<2x1xf32>
    %748 = arith.cmpf oge, %746, %747 : vector<2x1xf32>
    %cst_133 = arith.constant 0.000000e+00 : f32
    %749 = vector.broadcast %cst_133 : f32 to vector<2x1xf32>
    %750 = arith.select %748, %745, %749 : vector<2x1xi1>, vector<2x1xf32>
    %751 = vector.broadcast %750 : vector<2x1xf32> to vector<2x96xf32>
    %752 = vector.broadcast %186 : vector<1x96xf32> to vector<2x96xf32>
    %753 = arith.mulf %751, %752 : vector<2x96xf32>
    %754 = arith.addf %741, %753 : vector<2x96xf32>
    %755 = arith.select %748, %744, %678 : vector<2x1xi1>, vector<2x1xf32>
    %756 = vector.extract_strided_slice %179 {offsets = [7, 0, 0], sizes = [1, 2, 1], strides = [1, 1, 1]} : vector<24x2x1xf32> to vector<1x2x1xf32>
    %757 = vector.shape_cast %756 : vector<1x2x1xf32> to vector<2x1xf32>
    %758 = arith.subf %757, %691 : vector<2x1xf32>
    %759 = math.absf %758 : vector<2x1xf32>
    %cst_134 = arith.constant 1.000000e-01 : f32
    %760 = vector.broadcast %cst_134 : f32 to vector<2x1xf32>
    %761 = arith.cmpf oge, %759, %760 : vector<2x1xf32>
    %cst_135 = arith.constant 0.000000e+00 : f32
    %762 = vector.broadcast %cst_135 : f32 to vector<2x1xf32>
    %763 = arith.select %761, %758, %762 : vector<2x1xi1>, vector<2x1xf32>
    %764 = vector.broadcast %763 : vector<2x1xf32> to vector<2x96xf32>
    %765 = vector.broadcast %187 : vector<1x96xf32> to vector<2x96xf32>
    %766 = arith.mulf %764, %765 : vector<2x96xf32>
    %767 = arith.addf %754, %766 : vector<2x96xf32>
    %768 = arith.select %761, %757, %691 : vector<2x1xi1>, vector<2x1xf32>
    %769 = vector.extract_strided_slice %181 {offsets = [7, 0, 0], sizes = [1, 2, 1], strides = [1, 1, 1]} : vector<24x2x1xf32> to vector<1x2x1xf32>
    %770 = vector.shape_cast %769 : vector<1x2x1xf32> to vector<2x1xf32>
    %771 = arith.subf %770, %704 : vector<2x1xf32>
    %772 = math.absf %771 : vector<2x1xf32>
    %cst_136 = arith.constant 1.000000e-01 : f32
    %773 = vector.broadcast %cst_136 : f32 to vector<2x1xf32>
    %774 = arith.cmpf oge, %772, %773 : vector<2x1xf32>
    %cst_137 = arith.constant 0.000000e+00 : f32
    %775 = vector.broadcast %cst_137 : f32 to vector<2x1xf32>
    %776 = arith.select %774, %771, %775 : vector<2x1xi1>, vector<2x1xf32>
    %777 = vector.broadcast %776 : vector<2x1xf32> to vector<2x96xf32>
    %778 = vector.broadcast %188 : vector<1x96xf32> to vector<2x96xf32>
    %779 = arith.mulf %777, %778 : vector<2x96xf32>
    %780 = arith.addf %767, %779 : vector<2x96xf32>
    %781 = arith.select %774, %770, %704 : vector<2x1xi1>, vector<2x1xf32>
    %782 = vector.extract_strided_slice %182 {offsets = [7, 0, 0], sizes = [1, 2, 1], strides = [1, 1, 1]} : vector<24x2x1xf32> to vector<1x2x1xf32>
    %783 = vector.shape_cast %782 : vector<1x2x1xf32> to vector<2x1xf32>
    %784 = arith.subf %783, %717 : vector<2x1xf32>
    %785 = math.absf %784 : vector<2x1xf32>
    %cst_138 = arith.constant 1.000000e-01 : f32
    %786 = vector.broadcast %cst_138 : f32 to vector<2x1xf32>
    %787 = arith.cmpf oge, %785, %786 : vector<2x1xf32>
    %cst_139 = arith.constant 0.000000e+00 : f32
    %788 = vector.broadcast %cst_139 : f32 to vector<2x1xf32>
    %789 = arith.select %787, %784, %788 : vector<2x1xi1>, vector<2x1xf32>
    %790 = vector.broadcast %789 : vector<2x1xf32> to vector<2x96xf32>
    %791 = vector.broadcast %189 : vector<1x96xf32> to vector<2x96xf32>
    %792 = arith.mulf %790, %791 : vector<2x96xf32>
    %793 = arith.addf %780, %792 : vector<2x96xf32>
    %794 = arith.select %787, %783, %717 : vector<2x1xi1>, vector<2x1xf32>
    %795 = vector.extract_strided_slice %183 {offsets = [7, 0, 0], sizes = [1, 2, 1], strides = [1, 1, 1]} : vector<24x2x1xf32> to vector<1x2x1xf32>
    %796 = vector.shape_cast %795 : vector<1x2x1xf32> to vector<2x1xf32>
    %797 = arith.subf %796, %730 : vector<2x1xf32>
    %798 = math.absf %797 : vector<2x1xf32>
    %cst_140 = arith.constant 1.000000e-01 : f32
    %799 = vector.broadcast %cst_140 : f32 to vector<2x1xf32>
    %800 = arith.cmpf oge, %798, %799 : vector<2x1xf32>
    %cst_141 = arith.constant 0.000000e+00 : f32
    %801 = vector.broadcast %cst_141 : f32 to vector<2x1xf32>
    %802 = arith.select %800, %797, %801 : vector<2x1xi1>, vector<2x1xf32>
    %803 = vector.broadcast %802 : vector<2x1xf32> to vector<2x96xf32>
    %804 = vector.broadcast %190 : vector<1x96xf32> to vector<2x96xf32>
    %805 = arith.mulf %803, %804 : vector<2x96xf32>
    %806 = arith.addf %793, %805 : vector<2x96xf32>
    %807 = arith.select %800, %796, %730 : vector<2x1xi1>, vector<2x1xf32>
    %808 = vector.extract_strided_slice %174 {offsets = [8, 0, 0], sizes = [1, 2, 1], strides = [1, 1, 1]} : vector<24x2x1xf32> to vector<1x2x1xf32>
    %809 = vector.shape_cast %808 : vector<1x2x1xf32> to vector<2x1xf32>
    %810 = arith.subf %809, %742 : vector<2x1xf32>
    %811 = math.absf %810 : vector<2x1xf32>
    %cst_142 = arith.constant 1.000000e-01 : f32
    %812 = vector.broadcast %cst_142 : f32 to vector<2x1xf32>
    %813 = arith.cmpf oge, %811, %812 : vector<2x1xf32>
    %cst_143 = arith.constant 0.000000e+00 : f32
    %814 = vector.broadcast %cst_143 : f32 to vector<2x1xf32>
    %815 = arith.select %813, %810, %814 : vector<2x1xi1>, vector<2x1xf32>
    %816 = vector.broadcast %815 : vector<2x1xf32> to vector<2x96xf32>
    %817 = vector.broadcast %185 : vector<1x96xf32> to vector<2x96xf32>
    %818 = arith.mulf %816, %817 : vector<2x96xf32>
    %819 = arith.select %813, %809, %742 : vector<2x1xi1>, vector<2x1xf32>
    %820 = vector.extract_strided_slice %175 {offsets = [8, 0, 0], sizes = [1, 2, 1], strides = [1, 1, 1]} : vector<24x2x1xf32> to vector<1x2x1xf32>
    %821 = vector.shape_cast %820 : vector<1x2x1xf32> to vector<2x1xf32>
    %822 = arith.subf %821, %755 : vector<2x1xf32>
    %823 = math.absf %822 : vector<2x1xf32>
    %cst_144 = arith.constant 1.000000e-01 : f32
    %824 = vector.broadcast %cst_144 : f32 to vector<2x1xf32>
    %825 = arith.cmpf oge, %823, %824 : vector<2x1xf32>
    %cst_145 = arith.constant 0.000000e+00 : f32
    %826 = vector.broadcast %cst_145 : f32 to vector<2x1xf32>
    %827 = arith.select %825, %822, %826 : vector<2x1xi1>, vector<2x1xf32>
    %828 = vector.broadcast %827 : vector<2x1xf32> to vector<2x96xf32>
    %829 = vector.broadcast %186 : vector<1x96xf32> to vector<2x96xf32>
    %830 = arith.mulf %828, %829 : vector<2x96xf32>
    %831 = arith.addf %818, %830 : vector<2x96xf32>
    %832 = arith.select %825, %821, %755 : vector<2x1xi1>, vector<2x1xf32>
    %833 = vector.extract_strided_slice %179 {offsets = [8, 0, 0], sizes = [1, 2, 1], strides = [1, 1, 1]} : vector<24x2x1xf32> to vector<1x2x1xf32>
    %834 = vector.shape_cast %833 : vector<1x2x1xf32> to vector<2x1xf32>
    %835 = arith.subf %834, %768 : vector<2x1xf32>
    %836 = math.absf %835 : vector<2x1xf32>
    %cst_146 = arith.constant 1.000000e-01 : f32
    %837 = vector.broadcast %cst_146 : f32 to vector<2x1xf32>
    %838 = arith.cmpf oge, %836, %837 : vector<2x1xf32>
    %cst_147 = arith.constant 0.000000e+00 : f32
    %839 = vector.broadcast %cst_147 : f32 to vector<2x1xf32>
    %840 = arith.select %838, %835, %839 : vector<2x1xi1>, vector<2x1xf32>
    %841 = vector.broadcast %840 : vector<2x1xf32> to vector<2x96xf32>
    %842 = vector.broadcast %187 : vector<1x96xf32> to vector<2x96xf32>
    %843 = arith.mulf %841, %842 : vector<2x96xf32>
    %844 = arith.addf %831, %843 : vector<2x96xf32>
    %845 = arith.select %838, %834, %768 : vector<2x1xi1>, vector<2x1xf32>
    %846 = vector.extract_strided_slice %181 {offsets = [8, 0, 0], sizes = [1, 2, 1], strides = [1, 1, 1]} : vector<24x2x1xf32> to vector<1x2x1xf32>
    %847 = vector.shape_cast %846 : vector<1x2x1xf32> to vector<2x1xf32>
    %848 = arith.subf %847, %781 : vector<2x1xf32>
    %849 = math.absf %848 : vector<2x1xf32>
    %cst_148 = arith.constant 1.000000e-01 : f32
    %850 = vector.broadcast %cst_148 : f32 to vector<2x1xf32>
    %851 = arith.cmpf oge, %849, %850 : vector<2x1xf32>
    %cst_149 = arith.constant 0.000000e+00 : f32
    %852 = vector.broadcast %cst_149 : f32 to vector<2x1xf32>
    %853 = arith.select %851, %848, %852 : vector<2x1xi1>, vector<2x1xf32>
    %854 = vector.broadcast %853 : vector<2x1xf32> to vector<2x96xf32>
    %855 = vector.broadcast %188 : vector<1x96xf32> to vector<2x96xf32>
    %856 = arith.mulf %854, %855 : vector<2x96xf32>
    %857 = arith.addf %844, %856 : vector<2x96xf32>
    %858 = arith.select %851, %847, %781 : vector<2x1xi1>, vector<2x1xf32>
    %859 = vector.extract_strided_slice %182 {offsets = [8, 0, 0], sizes = [1, 2, 1], strides = [1, 1, 1]} : vector<24x2x1xf32> to vector<1x2x1xf32>
    %860 = vector.shape_cast %859 : vector<1x2x1xf32> to vector<2x1xf32>
    %861 = arith.subf %860, %794 : vector<2x1xf32>
    %862 = math.absf %861 : vector<2x1xf32>
    %cst_150 = arith.constant 1.000000e-01 : f32
    %863 = vector.broadcast %cst_150 : f32 to vector<2x1xf32>
    %864 = arith.cmpf oge, %862, %863 : vector<2x1xf32>
    %cst_151 = arith.constant 0.000000e+00 : f32
    %865 = vector.broadcast %cst_151 : f32 to vector<2x1xf32>
    %866 = arith.select %864, %861, %865 : vector<2x1xi1>, vector<2x1xf32>
    %867 = vector.broadcast %866 : vector<2x1xf32> to vector<2x96xf32>
    %868 = vector.broadcast %189 : vector<1x96xf32> to vector<2x96xf32>
    %869 = arith.mulf %867, %868 : vector<2x96xf32>
    %870 = arith.addf %857, %869 : vector<2x96xf32>
    %871 = arith.select %864, %860, %794 : vector<2x1xi1>, vector<2x1xf32>
    %872 = vector.extract_strided_slice %183 {offsets = [8, 0, 0], sizes = [1, 2, 1], strides = [1, 1, 1]} : vector<24x2x1xf32> to vector<1x2x1xf32>
    %873 = vector.shape_cast %872 : vector<1x2x1xf32> to vector<2x1xf32>
    %874 = arith.subf %873, %807 : vector<2x1xf32>
    %875 = math.absf %874 : vector<2x1xf32>
    %cst_152 = arith.constant 1.000000e-01 : f32
    %876 = vector.broadcast %cst_152 : f32 to vector<2x1xf32>
    %877 = arith.cmpf oge, %875, %876 : vector<2x1xf32>
    %cst_153 = arith.constant 0.000000e+00 : f32
    %878 = vector.broadcast %cst_153 : f32 to vector<2x1xf32>
    %879 = arith.select %877, %874, %878 : vector<2x1xi1>, vector<2x1xf32>
    %880 = vector.broadcast %879 : vector<2x1xf32> to vector<2x96xf32>
    %881 = vector.broadcast %190 : vector<1x96xf32> to vector<2x96xf32>
    %882 = arith.mulf %880, %881 : vector<2x96xf32>
    %883 = arith.addf %870, %882 : vector<2x96xf32>
    %884 = arith.select %877, %873, %807 : vector<2x1xi1>, vector<2x1xf32>
    %885 = vector.extract_strided_slice %174 {offsets = [9, 0, 0], sizes = [1, 2, 1], strides = [1, 1, 1]} : vector<24x2x1xf32> to vector<1x2x1xf32>
    %886 = vector.shape_cast %885 : vector<1x2x1xf32> to vector<2x1xf32>
    %887 = arith.subf %886, %819 : vector<2x1xf32>
    %888 = math.absf %887 : vector<2x1xf32>
    %cst_154 = arith.constant 1.000000e-01 : f32
    %889 = vector.broadcast %cst_154 : f32 to vector<2x1xf32>
    %890 = arith.cmpf oge, %888, %889 : vector<2x1xf32>
    %cst_155 = arith.constant 0.000000e+00 : f32
    %891 = vector.broadcast %cst_155 : f32 to vector<2x1xf32>
    %892 = arith.select %890, %887, %891 : vector<2x1xi1>, vector<2x1xf32>
    %893 = vector.broadcast %892 : vector<2x1xf32> to vector<2x96xf32>
    %894 = vector.broadcast %185 : vector<1x96xf32> to vector<2x96xf32>
    %895 = arith.mulf %893, %894 : vector<2x96xf32>
    %896 = arith.select %890, %886, %819 : vector<2x1xi1>, vector<2x1xf32>
    %897 = vector.extract_strided_slice %175 {offsets = [9, 0, 0], sizes = [1, 2, 1], strides = [1, 1, 1]} : vector<24x2x1xf32> to vector<1x2x1xf32>
    %898 = vector.shape_cast %897 : vector<1x2x1xf32> to vector<2x1xf32>
    %899 = arith.subf %898, %832 : vector<2x1xf32>
    %900 = math.absf %899 : vector<2x1xf32>
    %cst_156 = arith.constant 1.000000e-01 : f32
    %901 = vector.broadcast %cst_156 : f32 to vector<2x1xf32>
    %902 = arith.cmpf oge, %900, %901 : vector<2x1xf32>
    %cst_157 = arith.constant 0.000000e+00 : f32
    %903 = vector.broadcast %cst_157 : f32 to vector<2x1xf32>
    %904 = arith.select %902, %899, %903 : vector<2x1xi1>, vector<2x1xf32>
    %905 = vector.broadcast %904 : vector<2x1xf32> to vector<2x96xf32>
    %906 = vector.broadcast %186 : vector<1x96xf32> to vector<2x96xf32>
    %907 = arith.mulf %905, %906 : vector<2x96xf32>
    %908 = arith.addf %895, %907 : vector<2x96xf32>
    %909 = arith.select %902, %898, %832 : vector<2x1xi1>, vector<2x1xf32>
    %910 = vector.extract_strided_slice %179 {offsets = [9, 0, 0], sizes = [1, 2, 1], strides = [1, 1, 1]} : vector<24x2x1xf32> to vector<1x2x1xf32>
    %911 = vector.shape_cast %910 : vector<1x2x1xf32> to vector<2x1xf32>
    %912 = arith.subf %911, %845 : vector<2x1xf32>
    %913 = math.absf %912 : vector<2x1xf32>
    %cst_158 = arith.constant 1.000000e-01 : f32
    %914 = vector.broadcast %cst_158 : f32 to vector<2x1xf32>
    %915 = arith.cmpf oge, %913, %914 : vector<2x1xf32>
    %cst_159 = arith.constant 0.000000e+00 : f32
    %916 = vector.broadcast %cst_159 : f32 to vector<2x1xf32>
    %917 = arith.select %915, %912, %916 : vector<2x1xi1>, vector<2x1xf32>
    %918 = vector.broadcast %917 : vector<2x1xf32> to vector<2x96xf32>
    %919 = vector.broadcast %187 : vector<1x96xf32> to vector<2x96xf32>
    %920 = arith.mulf %918, %919 : vector<2x96xf32>
    %921 = arith.addf %908, %920 : vector<2x96xf32>
    %922 = arith.select %915, %911, %845 : vector<2x1xi1>, vector<2x1xf32>
    %923 = vector.extract_strided_slice %181 {offsets = [9, 0, 0], sizes = [1, 2, 1], strides = [1, 1, 1]} : vector<24x2x1xf32> to vector<1x2x1xf32>
    %924 = vector.shape_cast %923 : vector<1x2x1xf32> to vector<2x1xf32>
    %925 = arith.subf %924, %858 : vector<2x1xf32>
    %926 = math.absf %925 : vector<2x1xf32>
    %cst_160 = arith.constant 1.000000e-01 : f32
    %927 = vector.broadcast %cst_160 : f32 to vector<2x1xf32>
    %928 = arith.cmpf oge, %926, %927 : vector<2x1xf32>
    %cst_161 = arith.constant 0.000000e+00 : f32
    %929 = vector.broadcast %cst_161 : f32 to vector<2x1xf32>
    %930 = arith.select %928, %925, %929 : vector<2x1xi1>, vector<2x1xf32>
    %931 = vector.broadcast %930 : vector<2x1xf32> to vector<2x96xf32>
    %932 = vector.broadcast %188 : vector<1x96xf32> to vector<2x96xf32>
    %933 = arith.mulf %931, %932 : vector<2x96xf32>
    %934 = arith.addf %921, %933 : vector<2x96xf32>
    %935 = arith.select %928, %924, %858 : vector<2x1xi1>, vector<2x1xf32>
    %936 = vector.extract_strided_slice %182 {offsets = [9, 0, 0], sizes = [1, 2, 1], strides = [1, 1, 1]} : vector<24x2x1xf32> to vector<1x2x1xf32>
    %937 = vector.shape_cast %936 : vector<1x2x1xf32> to vector<2x1xf32>
    %938 = arith.subf %937, %871 : vector<2x1xf32>
    %939 = math.absf %938 : vector<2x1xf32>
    %cst_162 = arith.constant 1.000000e-01 : f32
    %940 = vector.broadcast %cst_162 : f32 to vector<2x1xf32>
    %941 = arith.cmpf oge, %939, %940 : vector<2x1xf32>
    %cst_163 = arith.constant 0.000000e+00 : f32
    %942 = vector.broadcast %cst_163 : f32 to vector<2x1xf32>
    %943 = arith.select %941, %938, %942 : vector<2x1xi1>, vector<2x1xf32>
    %944 = vector.broadcast %943 : vector<2x1xf32> to vector<2x96xf32>
    %945 = vector.broadcast %189 : vector<1x96xf32> to vector<2x96xf32>
    %946 = arith.mulf %944, %945 : vector<2x96xf32>
    %947 = arith.addf %934, %946 : vector<2x96xf32>
    %948 = arith.select %941, %937, %871 : vector<2x1xi1>, vector<2x1xf32>
    %949 = vector.extract_strided_slice %183 {offsets = [9, 0, 0], sizes = [1, 2, 1], strides = [1, 1, 1]} : vector<24x2x1xf32> to vector<1x2x1xf32>
    %950 = vector.shape_cast %949 : vector<1x2x1xf32> to vector<2x1xf32>
    %951 = arith.subf %950, %884 : vector<2x1xf32>
    %952 = math.absf %951 : vector<2x1xf32>
    %cst_164 = arith.constant 1.000000e-01 : f32
    %953 = vector.broadcast %cst_164 : f32 to vector<2x1xf32>
    %954 = arith.cmpf oge, %952, %953 : vector<2x1xf32>
    %cst_165 = arith.constant 0.000000e+00 : f32
    %955 = vector.broadcast %cst_165 : f32 to vector<2x1xf32>
    %956 = arith.select %954, %951, %955 : vector<2x1xi1>, vector<2x1xf32>
    %957 = vector.broadcast %956 : vector<2x1xf32> to vector<2x96xf32>
    %958 = vector.broadcast %190 : vector<1x96xf32> to vector<2x96xf32>
    %959 = arith.mulf %957, %958 : vector<2x96xf32>
    %960 = arith.addf %947, %959 : vector<2x96xf32>
    %961 = arith.select %954, %950, %884 : vector<2x1xi1>, vector<2x1xf32>
    %962 = vector.extract_strided_slice %174 {offsets = [10, 0, 0], sizes = [1, 2, 1], strides = [1, 1, 1]} : vector<24x2x1xf32> to vector<1x2x1xf32>
    %963 = vector.shape_cast %962 : vector<1x2x1xf32> to vector<2x1xf32>
    %964 = arith.subf %963, %896 : vector<2x1xf32>
    %965 = math.absf %964 : vector<2x1xf32>
    %cst_166 = arith.constant 1.000000e-01 : f32
    %966 = vector.broadcast %cst_166 : f32 to vector<2x1xf32>
    %967 = arith.cmpf oge, %965, %966 : vector<2x1xf32>
    %cst_167 = arith.constant 0.000000e+00 : f32
    %968 = vector.broadcast %cst_167 : f32 to vector<2x1xf32>
    %969 = arith.select %967, %964, %968 : vector<2x1xi1>, vector<2x1xf32>
    %970 = vector.broadcast %969 : vector<2x1xf32> to vector<2x96xf32>
    %971 = vector.broadcast %185 : vector<1x96xf32> to vector<2x96xf32>
    %972 = arith.mulf %970, %971 : vector<2x96xf32>
    %973 = arith.select %967, %963, %896 : vector<2x1xi1>, vector<2x1xf32>
    %974 = vector.extract_strided_slice %175 {offsets = [10, 0, 0], sizes = [1, 2, 1], strides = [1, 1, 1]} : vector<24x2x1xf32> to vector<1x2x1xf32>
    %975 = vector.shape_cast %974 : vector<1x2x1xf32> to vector<2x1xf32>
    %976 = arith.subf %975, %909 : vector<2x1xf32>
    %977 = math.absf %976 : vector<2x1xf32>
    %cst_168 = arith.constant 1.000000e-01 : f32
    %978 = vector.broadcast %cst_168 : f32 to vector<2x1xf32>
    %979 = arith.cmpf oge, %977, %978 : vector<2x1xf32>
    %cst_169 = arith.constant 0.000000e+00 : f32
    %980 = vector.broadcast %cst_169 : f32 to vector<2x1xf32>
    %981 = arith.select %979, %976, %980 : vector<2x1xi1>, vector<2x1xf32>
    %982 = vector.broadcast %981 : vector<2x1xf32> to vector<2x96xf32>
    %983 = vector.broadcast %186 : vector<1x96xf32> to vector<2x96xf32>
    %984 = arith.mulf %982, %983 : vector<2x96xf32>
    %985 = arith.addf %972, %984 : vector<2x96xf32>
    %986 = arith.select %979, %975, %909 : vector<2x1xi1>, vector<2x1xf32>
    %987 = vector.extract_strided_slice %179 {offsets = [10, 0, 0], sizes = [1, 2, 1], strides = [1, 1, 1]} : vector<24x2x1xf32> to vector<1x2x1xf32>
    %988 = vector.shape_cast %987 : vector<1x2x1xf32> to vector<2x1xf32>
    %989 = arith.subf %988, %922 : vector<2x1xf32>
    %990 = math.absf %989 : vector<2x1xf32>
    %cst_170 = arith.constant 1.000000e-01 : f32
    %991 = vector.broadcast %cst_170 : f32 to vector<2x1xf32>
    %992 = arith.cmpf oge, %990, %991 : vector<2x1xf32>
    %cst_171 = arith.constant 0.000000e+00 : f32
    %993 = vector.broadcast %cst_171 : f32 to vector<2x1xf32>
    %994 = arith.select %992, %989, %993 : vector<2x1xi1>, vector<2x1xf32>
    %995 = vector.broadcast %994 : vector<2x1xf32> to vector<2x96xf32>
    %996 = vector.broadcast %187 : vector<1x96xf32> to vector<2x96xf32>
    %997 = arith.mulf %995, %996 : vector<2x96xf32>
    %998 = arith.addf %985, %997 : vector<2x96xf32>
    %999 = arith.select %992, %988, %922 : vector<2x1xi1>, vector<2x1xf32>
    %1000 = vector.extract_strided_slice %181 {offsets = [10, 0, 0], sizes = [1, 2, 1], strides = [1, 1, 1]} : vector<24x2x1xf32> to vector<1x2x1xf32>
    %1001 = vector.shape_cast %1000 : vector<1x2x1xf32> to vector<2x1xf32>
    %1002 = arith.subf %1001, %935 : vector<2x1xf32>
    %1003 = math.absf %1002 : vector<2x1xf32>
    %cst_172 = arith.constant 1.000000e-01 : f32
    %1004 = vector.broadcast %cst_172 : f32 to vector<2x1xf32>
    %1005 = arith.cmpf oge, %1003, %1004 : vector<2x1xf32>
    %cst_173 = arith.constant 0.000000e+00 : f32
    %1006 = vector.broadcast %cst_173 : f32 to vector<2x1xf32>
    %1007 = arith.select %1005, %1002, %1006 : vector<2x1xi1>, vector<2x1xf32>
    %1008 = vector.broadcast %1007 : vector<2x1xf32> to vector<2x96xf32>
    %1009 = vector.broadcast %188 : vector<1x96xf32> to vector<2x96xf32>
    %1010 = arith.mulf %1008, %1009 : vector<2x96xf32>
    %1011 = arith.addf %998, %1010 : vector<2x96xf32>
    %1012 = arith.select %1005, %1001, %935 : vector<2x1xi1>, vector<2x1xf32>
    %1013 = vector.extract_strided_slice %182 {offsets = [10, 0, 0], sizes = [1, 2, 1], strides = [1, 1, 1]} : vector<24x2x1xf32> to vector<1x2x1xf32>
    %1014 = vector.shape_cast %1013 : vector<1x2x1xf32> to vector<2x1xf32>
    %1015 = arith.subf %1014, %948 : vector<2x1xf32>
    %1016 = math.absf %1015 : vector<2x1xf32>
    %cst_174 = arith.constant 1.000000e-01 : f32
    %1017 = vector.broadcast %cst_174 : f32 to vector<2x1xf32>
    %1018 = arith.cmpf oge, %1016, %1017 : vector<2x1xf32>
    %cst_175 = arith.constant 0.000000e+00 : f32
    %1019 = vector.broadcast %cst_175 : f32 to vector<2x1xf32>
    %1020 = arith.select %1018, %1015, %1019 : vector<2x1xi1>, vector<2x1xf32>
    %1021 = vector.broadcast %1020 : vector<2x1xf32> to vector<2x96xf32>
    %1022 = vector.broadcast %189 : vector<1x96xf32> to vector<2x96xf32>
    %1023 = arith.mulf %1021, %1022 : vector<2x96xf32>
    %1024 = arith.addf %1011, %1023 : vector<2x96xf32>
    %1025 = arith.select %1018, %1014, %948 : vector<2x1xi1>, vector<2x1xf32>
    %1026 = vector.extract_strided_slice %183 {offsets = [10, 0, 0], sizes = [1, 2, 1], strides = [1, 1, 1]} : vector<24x2x1xf32> to vector<1x2x1xf32>
    %1027 = vector.shape_cast %1026 : vector<1x2x1xf32> to vector<2x1xf32>
    %1028 = arith.subf %1027, %961 : vector<2x1xf32>
    %1029 = math.absf %1028 : vector<2x1xf32>
    %cst_176 = arith.constant 1.000000e-01 : f32
    %1030 = vector.broadcast %cst_176 : f32 to vector<2x1xf32>
    %1031 = arith.cmpf oge, %1029, %1030 : vector<2x1xf32>
    %cst_177 = arith.constant 0.000000e+00 : f32
    %1032 = vector.broadcast %cst_177 : f32 to vector<2x1xf32>
    %1033 = arith.select %1031, %1028, %1032 : vector<2x1xi1>, vector<2x1xf32>
    %1034 = vector.broadcast %1033 : vector<2x1xf32> to vector<2x96xf32>
    %1035 = vector.broadcast %190 : vector<1x96xf32> to vector<2x96xf32>
    %1036 = arith.mulf %1034, %1035 : vector<2x96xf32>
    %1037 = arith.addf %1024, %1036 : vector<2x96xf32>
    %1038 = arith.select %1031, %1027, %961 : vector<2x1xi1>, vector<2x1xf32>
    %1039 = vector.extract_strided_slice %174 {offsets = [11, 0, 0], sizes = [1, 2, 1], strides = [1, 1, 1]} : vector<24x2x1xf32> to vector<1x2x1xf32>
    %1040 = vector.shape_cast %1039 : vector<1x2x1xf32> to vector<2x1xf32>
    %1041 = arith.subf %1040, %973 : vector<2x1xf32>
    %1042 = math.absf %1041 : vector<2x1xf32>
    %cst_178 = arith.constant 1.000000e-01 : f32
    %1043 = vector.broadcast %cst_178 : f32 to vector<2x1xf32>
    %1044 = arith.cmpf oge, %1042, %1043 : vector<2x1xf32>
    %cst_179 = arith.constant 0.000000e+00 : f32
    %1045 = vector.broadcast %cst_179 : f32 to vector<2x1xf32>
    %1046 = arith.select %1044, %1041, %1045 : vector<2x1xi1>, vector<2x1xf32>
    %1047 = vector.broadcast %1046 : vector<2x1xf32> to vector<2x96xf32>
    %1048 = vector.broadcast %185 : vector<1x96xf32> to vector<2x96xf32>
    %1049 = arith.mulf %1047, %1048 : vector<2x96xf32>
    %1050 = arith.select %1044, %1040, %973 : vector<2x1xi1>, vector<2x1xf32>
    %1051 = vector.extract_strided_slice %175 {offsets = [11, 0, 0], sizes = [1, 2, 1], strides = [1, 1, 1]} : vector<24x2x1xf32> to vector<1x2x1xf32>
    %1052 = vector.shape_cast %1051 : vector<1x2x1xf32> to vector<2x1xf32>
    %1053 = arith.subf %1052, %986 : vector<2x1xf32>
    %1054 = math.absf %1053 : vector<2x1xf32>
    %cst_180 = arith.constant 1.000000e-01 : f32
    %1055 = vector.broadcast %cst_180 : f32 to vector<2x1xf32>
    %1056 = arith.cmpf oge, %1054, %1055 : vector<2x1xf32>
    %cst_181 = arith.constant 0.000000e+00 : f32
    %1057 = vector.broadcast %cst_181 : f32 to vector<2x1xf32>
    %1058 = arith.select %1056, %1053, %1057 : vector<2x1xi1>, vector<2x1xf32>
    %1059 = vector.broadcast %1058 : vector<2x1xf32> to vector<2x96xf32>
    %1060 = vector.broadcast %186 : vector<1x96xf32> to vector<2x96xf32>
    %1061 = arith.mulf %1059, %1060 : vector<2x96xf32>
    %1062 = arith.addf %1049, %1061 : vector<2x96xf32>
    %1063 = arith.select %1056, %1052, %986 : vector<2x1xi1>, vector<2x1xf32>
    %1064 = vector.extract_strided_slice %179 {offsets = [11, 0, 0], sizes = [1, 2, 1], strides = [1, 1, 1]} : vector<24x2x1xf32> to vector<1x2x1xf32>
    %1065 = vector.shape_cast %1064 : vector<1x2x1xf32> to vector<2x1xf32>
    %1066 = arith.subf %1065, %999 : vector<2x1xf32>
    %1067 = math.absf %1066 : vector<2x1xf32>
    %cst_182 = arith.constant 1.000000e-01 : f32
    %1068 = vector.broadcast %cst_182 : f32 to vector<2x1xf32>
    %1069 = arith.cmpf oge, %1067, %1068 : vector<2x1xf32>
    %cst_183 = arith.constant 0.000000e+00 : f32
    %1070 = vector.broadcast %cst_183 : f32 to vector<2x1xf32>
    %1071 = arith.select %1069, %1066, %1070 : vector<2x1xi1>, vector<2x1xf32>
    %1072 = vector.broadcast %1071 : vector<2x1xf32> to vector<2x96xf32>
    %1073 = vector.broadcast %187 : vector<1x96xf32> to vector<2x96xf32>
    %1074 = arith.mulf %1072, %1073 : vector<2x96xf32>
    %1075 = arith.addf %1062, %1074 : vector<2x96xf32>
    %1076 = arith.select %1069, %1065, %999 : vector<2x1xi1>, vector<2x1xf32>
    %1077 = vector.extract_strided_slice %181 {offsets = [11, 0, 0], sizes = [1, 2, 1], strides = [1, 1, 1]} : vector<24x2x1xf32> to vector<1x2x1xf32>
    %1078 = vector.shape_cast %1077 : vector<1x2x1xf32> to vector<2x1xf32>
    %1079 = arith.subf %1078, %1012 : vector<2x1xf32>
    %1080 = math.absf %1079 : vector<2x1xf32>
    %cst_184 = arith.constant 1.000000e-01 : f32
    %1081 = vector.broadcast %cst_184 : f32 to vector<2x1xf32>
    %1082 = arith.cmpf oge, %1080, %1081 : vector<2x1xf32>
    %cst_185 = arith.constant 0.000000e+00 : f32
    %1083 = vector.broadcast %cst_185 : f32 to vector<2x1xf32>
    %1084 = arith.select %1082, %1079, %1083 : vector<2x1xi1>, vector<2x1xf32>
    %1085 = vector.broadcast %1084 : vector<2x1xf32> to vector<2x96xf32>
    %1086 = vector.broadcast %188 : vector<1x96xf32> to vector<2x96xf32>
    %1087 = arith.mulf %1085, %1086 : vector<2x96xf32>
    %1088 = arith.addf %1075, %1087 : vector<2x96xf32>
    %1089 = arith.select %1082, %1078, %1012 : vector<2x1xi1>, vector<2x1xf32>
    %1090 = vector.extract_strided_slice %182 {offsets = [11, 0, 0], sizes = [1, 2, 1], strides = [1, 1, 1]} : vector<24x2x1xf32> to vector<1x2x1xf32>
    %1091 = vector.shape_cast %1090 : vector<1x2x1xf32> to vector<2x1xf32>
    %1092 = arith.subf %1091, %1025 : vector<2x1xf32>
    %1093 = math.absf %1092 : vector<2x1xf32>
    %cst_186 = arith.constant 1.000000e-01 : f32
    %1094 = vector.broadcast %cst_186 : f32 to vector<2x1xf32>
    %1095 = arith.cmpf oge, %1093, %1094 : vector<2x1xf32>
    %cst_187 = arith.constant 0.000000e+00 : f32
    %1096 = vector.broadcast %cst_187 : f32 to vector<2x1xf32>
    %1097 = arith.select %1095, %1092, %1096 : vector<2x1xi1>, vector<2x1xf32>
    %1098 = vector.broadcast %1097 : vector<2x1xf32> to vector<2x96xf32>
    %1099 = vector.broadcast %189 : vector<1x96xf32> to vector<2x96xf32>
    %1100 = arith.mulf %1098, %1099 : vector<2x96xf32>
    %1101 = arith.addf %1088, %1100 : vector<2x96xf32>
    %1102 = arith.select %1095, %1091, %1025 : vector<2x1xi1>, vector<2x1xf32>
    %1103 = vector.extract_strided_slice %183 {offsets = [11, 0, 0], sizes = [1, 2, 1], strides = [1, 1, 1]} : vector<24x2x1xf32> to vector<1x2x1xf32>
    %1104 = vector.shape_cast %1103 : vector<1x2x1xf32> to vector<2x1xf32>
    %1105 = arith.subf %1104, %1038 : vector<2x1xf32>
    %1106 = math.absf %1105 : vector<2x1xf32>
    %cst_188 = arith.constant 1.000000e-01 : f32
    %1107 = vector.broadcast %cst_188 : f32 to vector<2x1xf32>
    %1108 = arith.cmpf oge, %1106, %1107 : vector<2x1xf32>
    %cst_189 = arith.constant 0.000000e+00 : f32
    %1109 = vector.broadcast %cst_189 : f32 to vector<2x1xf32>
    %1110 = arith.select %1108, %1105, %1109 : vector<2x1xi1>, vector<2x1xf32>
    %1111 = vector.broadcast %1110 : vector<2x1xf32> to vector<2x96xf32>
    %1112 = vector.broadcast %190 : vector<1x96xf32> to vector<2x96xf32>
    %1113 = arith.mulf %1111, %1112 : vector<2x96xf32>
    %1114 = arith.addf %1101, %1113 : vector<2x96xf32>
    %1115 = arith.select %1108, %1104, %1038 : vector<2x1xi1>, vector<2x1xf32>
    %1116 = vector.extract_strided_slice %174 {offsets = [12, 0, 0], sizes = [1, 2, 1], strides = [1, 1, 1]} : vector<24x2x1xf32> to vector<1x2x1xf32>
    %1117 = vector.shape_cast %1116 : vector<1x2x1xf32> to vector<2x1xf32>
    %1118 = arith.subf %1117, %1050 : vector<2x1xf32>
    %1119 = math.absf %1118 : vector<2x1xf32>
    %cst_190 = arith.constant 1.000000e-01 : f32
    %1120 = vector.broadcast %cst_190 : f32 to vector<2x1xf32>
    %1121 = arith.cmpf oge, %1119, %1120 : vector<2x1xf32>
    %cst_191 = arith.constant 0.000000e+00 : f32
    %1122 = vector.broadcast %cst_191 : f32 to vector<2x1xf32>
    %1123 = arith.select %1121, %1118, %1122 : vector<2x1xi1>, vector<2x1xf32>
    %1124 = vector.broadcast %1123 : vector<2x1xf32> to vector<2x96xf32>
    %1125 = vector.broadcast %185 : vector<1x96xf32> to vector<2x96xf32>
    %1126 = arith.mulf %1124, %1125 : vector<2x96xf32>
    %1127 = arith.select %1121, %1117, %1050 : vector<2x1xi1>, vector<2x1xf32>
    %1128 = vector.extract_strided_slice %175 {offsets = [12, 0, 0], sizes = [1, 2, 1], strides = [1, 1, 1]} : vector<24x2x1xf32> to vector<1x2x1xf32>
    %1129 = vector.shape_cast %1128 : vector<1x2x1xf32> to vector<2x1xf32>
    %1130 = arith.subf %1129, %1063 : vector<2x1xf32>
    %1131 = math.absf %1130 : vector<2x1xf32>
    %cst_192 = arith.constant 1.000000e-01 : f32
    %1132 = vector.broadcast %cst_192 : f32 to vector<2x1xf32>
    %1133 = arith.cmpf oge, %1131, %1132 : vector<2x1xf32>
    %cst_193 = arith.constant 0.000000e+00 : f32
    %1134 = vector.broadcast %cst_193 : f32 to vector<2x1xf32>
    %1135 = arith.select %1133, %1130, %1134 : vector<2x1xi1>, vector<2x1xf32>
    %1136 = vector.broadcast %1135 : vector<2x1xf32> to vector<2x96xf32>
    %1137 = vector.broadcast %186 : vector<1x96xf32> to vector<2x96xf32>
    %1138 = arith.mulf %1136, %1137 : vector<2x96xf32>
    %1139 = arith.addf %1126, %1138 : vector<2x96xf32>
    %1140 = arith.select %1133, %1129, %1063 : vector<2x1xi1>, vector<2x1xf32>
    %1141 = vector.extract_strided_slice %179 {offsets = [12, 0, 0], sizes = [1, 2, 1], strides = [1, 1, 1]} : vector<24x2x1xf32> to vector<1x2x1xf32>
    %1142 = vector.shape_cast %1141 : vector<1x2x1xf32> to vector<2x1xf32>
    %1143 = arith.subf %1142, %1076 : vector<2x1xf32>
    %1144 = math.absf %1143 : vector<2x1xf32>
    %cst_194 = arith.constant 1.000000e-01 : f32
    %1145 = vector.broadcast %cst_194 : f32 to vector<2x1xf32>
    %1146 = arith.cmpf oge, %1144, %1145 : vector<2x1xf32>
    %cst_195 = arith.constant 0.000000e+00 : f32
    %1147 = vector.broadcast %cst_195 : f32 to vector<2x1xf32>
    %1148 = arith.select %1146, %1143, %1147 : vector<2x1xi1>, vector<2x1xf32>
    %1149 = vector.broadcast %1148 : vector<2x1xf32> to vector<2x96xf32>
    %1150 = vector.broadcast %187 : vector<1x96xf32> to vector<2x96xf32>
    %1151 = arith.mulf %1149, %1150 : vector<2x96xf32>
    %1152 = arith.addf %1139, %1151 : vector<2x96xf32>
    %1153 = arith.select %1146, %1142, %1076 : vector<2x1xi1>, vector<2x1xf32>
    %1154 = vector.extract_strided_slice %181 {offsets = [12, 0, 0], sizes = [1, 2, 1], strides = [1, 1, 1]} : vector<24x2x1xf32> to vector<1x2x1xf32>
    %1155 = vector.shape_cast %1154 : vector<1x2x1xf32> to vector<2x1xf32>
    %1156 = arith.subf %1155, %1089 : vector<2x1xf32>
    %1157 = math.absf %1156 : vector<2x1xf32>
    %cst_196 = arith.constant 1.000000e-01 : f32
    %1158 = vector.broadcast %cst_196 : f32 to vector<2x1xf32>
    %1159 = arith.cmpf oge, %1157, %1158 : vector<2x1xf32>
    %cst_197 = arith.constant 0.000000e+00 : f32
    %1160 = vector.broadcast %cst_197 : f32 to vector<2x1xf32>
    %1161 = arith.select %1159, %1156, %1160 : vector<2x1xi1>, vector<2x1xf32>
    %1162 = vector.broadcast %1161 : vector<2x1xf32> to vector<2x96xf32>
    %1163 = vector.broadcast %188 : vector<1x96xf32> to vector<2x96xf32>
    %1164 = arith.mulf %1162, %1163 : vector<2x96xf32>
    %1165 = arith.addf %1152, %1164 : vector<2x96xf32>
    %1166 = arith.select %1159, %1155, %1089 : vector<2x1xi1>, vector<2x1xf32>
    %1167 = vector.extract_strided_slice %182 {offsets = [12, 0, 0], sizes = [1, 2, 1], strides = [1, 1, 1]} : vector<24x2x1xf32> to vector<1x2x1xf32>
    %1168 = vector.shape_cast %1167 : vector<1x2x1xf32> to vector<2x1xf32>
    %1169 = arith.subf %1168, %1102 : vector<2x1xf32>
    %1170 = math.absf %1169 : vector<2x1xf32>
    %cst_198 = arith.constant 1.000000e-01 : f32
    %1171 = vector.broadcast %cst_198 : f32 to vector<2x1xf32>
    %1172 = arith.cmpf oge, %1170, %1171 : vector<2x1xf32>
    %cst_199 = arith.constant 0.000000e+00 : f32
    %1173 = vector.broadcast %cst_199 : f32 to vector<2x1xf32>
    %1174 = arith.select %1172, %1169, %1173 : vector<2x1xi1>, vector<2x1xf32>
    %1175 = vector.broadcast %1174 : vector<2x1xf32> to vector<2x96xf32>
    %1176 = vector.broadcast %189 : vector<1x96xf32> to vector<2x96xf32>
    %1177 = arith.mulf %1175, %1176 : vector<2x96xf32>
    %1178 = arith.addf %1165, %1177 : vector<2x96xf32>
    %1179 = arith.select %1172, %1168, %1102 : vector<2x1xi1>, vector<2x1xf32>
    %1180 = vector.extract_strided_slice %183 {offsets = [12, 0, 0], sizes = [1, 2, 1], strides = [1, 1, 1]} : vector<24x2x1xf32> to vector<1x2x1xf32>
    %1181 = vector.shape_cast %1180 : vector<1x2x1xf32> to vector<2x1xf32>
    %1182 = arith.subf %1181, %1115 : vector<2x1xf32>
    %1183 = math.absf %1182 : vector<2x1xf32>
    %cst_200 = arith.constant 1.000000e-01 : f32
    %1184 = vector.broadcast %cst_200 : f32 to vector<2x1xf32>
    %1185 = arith.cmpf oge, %1183, %1184 : vector<2x1xf32>
    %cst_201 = arith.constant 0.000000e+00 : f32
    %1186 = vector.broadcast %cst_201 : f32 to vector<2x1xf32>
    %1187 = arith.select %1185, %1182, %1186 : vector<2x1xi1>, vector<2x1xf32>
    %1188 = vector.broadcast %1187 : vector<2x1xf32> to vector<2x96xf32>
    %1189 = vector.broadcast %190 : vector<1x96xf32> to vector<2x96xf32>
    %1190 = arith.mulf %1188, %1189 : vector<2x96xf32>
    %1191 = arith.addf %1178, %1190 : vector<2x96xf32>
    %1192 = arith.select %1185, %1181, %1115 : vector<2x1xi1>, vector<2x1xf32>
    %1193 = vector.extract_strided_slice %174 {offsets = [13, 0, 0], sizes = [1, 2, 1], strides = [1, 1, 1]} : vector<24x2x1xf32> to vector<1x2x1xf32>
    %1194 = vector.shape_cast %1193 : vector<1x2x1xf32> to vector<2x1xf32>
    %1195 = arith.subf %1194, %1127 : vector<2x1xf32>
    %1196 = math.absf %1195 : vector<2x1xf32>
    %cst_202 = arith.constant 1.000000e-01 : f32
    %1197 = vector.broadcast %cst_202 : f32 to vector<2x1xf32>
    %1198 = arith.cmpf oge, %1196, %1197 : vector<2x1xf32>
    %cst_203 = arith.constant 0.000000e+00 : f32
    %1199 = vector.broadcast %cst_203 : f32 to vector<2x1xf32>
    %1200 = arith.select %1198, %1195, %1199 : vector<2x1xi1>, vector<2x1xf32>
    %1201 = vector.broadcast %1200 : vector<2x1xf32> to vector<2x96xf32>
    %1202 = vector.broadcast %185 : vector<1x96xf32> to vector<2x96xf32>
    %1203 = arith.mulf %1201, %1202 : vector<2x96xf32>
    %1204 = arith.select %1198, %1194, %1127 : vector<2x1xi1>, vector<2x1xf32>
    %1205 = vector.extract_strided_slice %175 {offsets = [13, 0, 0], sizes = [1, 2, 1], strides = [1, 1, 1]} : vector<24x2x1xf32> to vector<1x2x1xf32>
    %1206 = vector.shape_cast %1205 : vector<1x2x1xf32> to vector<2x1xf32>
    %1207 = arith.subf %1206, %1140 : vector<2x1xf32>
    %1208 = math.absf %1207 : vector<2x1xf32>
    %cst_204 = arith.constant 1.000000e-01 : f32
    %1209 = vector.broadcast %cst_204 : f32 to vector<2x1xf32>
    %1210 = arith.cmpf oge, %1208, %1209 : vector<2x1xf32>
    %cst_205 = arith.constant 0.000000e+00 : f32
    %1211 = vector.broadcast %cst_205 : f32 to vector<2x1xf32>
    %1212 = arith.select %1210, %1207, %1211 : vector<2x1xi1>, vector<2x1xf32>
    %1213 = vector.broadcast %1212 : vector<2x1xf32> to vector<2x96xf32>
    %1214 = vector.broadcast %186 : vector<1x96xf32> to vector<2x96xf32>
    %1215 = arith.mulf %1213, %1214 : vector<2x96xf32>
    %1216 = arith.addf %1203, %1215 : vector<2x96xf32>
    %1217 = arith.select %1210, %1206, %1140 : vector<2x1xi1>, vector<2x1xf32>
    %1218 = vector.extract_strided_slice %179 {offsets = [13, 0, 0], sizes = [1, 2, 1], strides = [1, 1, 1]} : vector<24x2x1xf32> to vector<1x2x1xf32>
    %1219 = vector.shape_cast %1218 : vector<1x2x1xf32> to vector<2x1xf32>
    %1220 = arith.subf %1219, %1153 : vector<2x1xf32>
    %1221 = math.absf %1220 : vector<2x1xf32>
    %cst_206 = arith.constant 1.000000e-01 : f32
    %1222 = vector.broadcast %cst_206 : f32 to vector<2x1xf32>
    %1223 = arith.cmpf oge, %1221, %1222 : vector<2x1xf32>
    %cst_207 = arith.constant 0.000000e+00 : f32
    %1224 = vector.broadcast %cst_207 : f32 to vector<2x1xf32>
    %1225 = arith.select %1223, %1220, %1224 : vector<2x1xi1>, vector<2x1xf32>
    %1226 = vector.broadcast %1225 : vector<2x1xf32> to vector<2x96xf32>
    %1227 = vector.broadcast %187 : vector<1x96xf32> to vector<2x96xf32>
    %1228 = arith.mulf %1226, %1227 : vector<2x96xf32>
    %1229 = arith.addf %1216, %1228 : vector<2x96xf32>
    %1230 = arith.select %1223, %1219, %1153 : vector<2x1xi1>, vector<2x1xf32>
    %1231 = vector.extract_strided_slice %181 {offsets = [13, 0, 0], sizes = [1, 2, 1], strides = [1, 1, 1]} : vector<24x2x1xf32> to vector<1x2x1xf32>
    %1232 = vector.shape_cast %1231 : vector<1x2x1xf32> to vector<2x1xf32>
    %1233 = arith.subf %1232, %1166 : vector<2x1xf32>
    %1234 = math.absf %1233 : vector<2x1xf32>
    %cst_208 = arith.constant 1.000000e-01 : f32
    %1235 = vector.broadcast %cst_208 : f32 to vector<2x1xf32>
    %1236 = arith.cmpf oge, %1234, %1235 : vector<2x1xf32>
    %cst_209 = arith.constant 0.000000e+00 : f32
    %1237 = vector.broadcast %cst_209 : f32 to vector<2x1xf32>
    %1238 = arith.select %1236, %1233, %1237 : vector<2x1xi1>, vector<2x1xf32>
    %1239 = vector.broadcast %1238 : vector<2x1xf32> to vector<2x96xf32>
    %1240 = vector.broadcast %188 : vector<1x96xf32> to vector<2x96xf32>
    %1241 = arith.mulf %1239, %1240 : vector<2x96xf32>
    %1242 = arith.addf %1229, %1241 : vector<2x96xf32>
    %1243 = arith.select %1236, %1232, %1166 : vector<2x1xi1>, vector<2x1xf32>
    %1244 = vector.extract_strided_slice %182 {offsets = [13, 0, 0], sizes = [1, 2, 1], strides = [1, 1, 1]} : vector<24x2x1xf32> to vector<1x2x1xf32>
    %1245 = vector.shape_cast %1244 : vector<1x2x1xf32> to vector<2x1xf32>
    %1246 = arith.subf %1245, %1179 : vector<2x1xf32>
    %1247 = math.absf %1246 : vector<2x1xf32>
    %cst_210 = arith.constant 1.000000e-01 : f32
    %1248 = vector.broadcast %cst_210 : f32 to vector<2x1xf32>
    %1249 = arith.cmpf oge, %1247, %1248 : vector<2x1xf32>
    %cst_211 = arith.constant 0.000000e+00 : f32
    %1250 = vector.broadcast %cst_211 : f32 to vector<2x1xf32>
    %1251 = arith.select %1249, %1246, %1250 : vector<2x1xi1>, vector<2x1xf32>
    %1252 = vector.broadcast %1251 : vector<2x1xf32> to vector<2x96xf32>
    %1253 = vector.broadcast %189 : vector<1x96xf32> to vector<2x96xf32>
    %1254 = arith.mulf %1252, %1253 : vector<2x96xf32>
    %1255 = arith.addf %1242, %1254 : vector<2x96xf32>
    %1256 = arith.select %1249, %1245, %1179 : vector<2x1xi1>, vector<2x1xf32>
    %1257 = vector.extract_strided_slice %183 {offsets = [13, 0, 0], sizes = [1, 2, 1], strides = [1, 1, 1]} : vector<24x2x1xf32> to vector<1x2x1xf32>
    %1258 = vector.shape_cast %1257 : vector<1x2x1xf32> to vector<2x1xf32>
    %1259 = arith.subf %1258, %1192 : vector<2x1xf32>
    %1260 = math.absf %1259 : vector<2x1xf32>
    %cst_212 = arith.constant 1.000000e-01 : f32
    %1261 = vector.broadcast %cst_212 : f32 to vector<2x1xf32>
    %1262 = arith.cmpf oge, %1260, %1261 : vector<2x1xf32>
    %cst_213 = arith.constant 0.000000e+00 : f32
    %1263 = vector.broadcast %cst_213 : f32 to vector<2x1xf32>
    %1264 = arith.select %1262, %1259, %1263 : vector<2x1xi1>, vector<2x1xf32>
    %1265 = vector.broadcast %1264 : vector<2x1xf32> to vector<2x96xf32>
    %1266 = vector.broadcast %190 : vector<1x96xf32> to vector<2x96xf32>
    %1267 = arith.mulf %1265, %1266 : vector<2x96xf32>
    %1268 = arith.addf %1255, %1267 : vector<2x96xf32>
    %1269 = arith.select %1262, %1258, %1192 : vector<2x1xi1>, vector<2x1xf32>
    %1270 = vector.extract_strided_slice %174 {offsets = [14, 0, 0], sizes = [1, 2, 1], strides = [1, 1, 1]} : vector<24x2x1xf32> to vector<1x2x1xf32>
    %1271 = vector.shape_cast %1270 : vector<1x2x1xf32> to vector<2x1xf32>
    %1272 = arith.subf %1271, %1204 : vector<2x1xf32>
    %1273 = math.absf %1272 : vector<2x1xf32>
    %cst_214 = arith.constant 1.000000e-01 : f32
    %1274 = vector.broadcast %cst_214 : f32 to vector<2x1xf32>
    %1275 = arith.cmpf oge, %1273, %1274 : vector<2x1xf32>
    %cst_215 = arith.constant 0.000000e+00 : f32
    %1276 = vector.broadcast %cst_215 : f32 to vector<2x1xf32>
    %1277 = arith.select %1275, %1272, %1276 : vector<2x1xi1>, vector<2x1xf32>
    %1278 = vector.broadcast %1277 : vector<2x1xf32> to vector<2x96xf32>
    %1279 = vector.broadcast %185 : vector<1x96xf32> to vector<2x96xf32>
    %1280 = arith.mulf %1278, %1279 : vector<2x96xf32>
    %1281 = arith.select %1275, %1271, %1204 : vector<2x1xi1>, vector<2x1xf32>
    %1282 = vector.extract_strided_slice %175 {offsets = [14, 0, 0], sizes = [1, 2, 1], strides = [1, 1, 1]} : vector<24x2x1xf32> to vector<1x2x1xf32>
    %1283 = vector.shape_cast %1282 : vector<1x2x1xf32> to vector<2x1xf32>
    %1284 = arith.subf %1283, %1217 : vector<2x1xf32>
    %1285 = math.absf %1284 : vector<2x1xf32>
    %cst_216 = arith.constant 1.000000e-01 : f32
    %1286 = vector.broadcast %cst_216 : f32 to vector<2x1xf32>
    %1287 = arith.cmpf oge, %1285, %1286 : vector<2x1xf32>
    %cst_217 = arith.constant 0.000000e+00 : f32
    %1288 = vector.broadcast %cst_217 : f32 to vector<2x1xf32>
    %1289 = arith.select %1287, %1284, %1288 : vector<2x1xi1>, vector<2x1xf32>
    %1290 = vector.broadcast %1289 : vector<2x1xf32> to vector<2x96xf32>
    %1291 = vector.broadcast %186 : vector<1x96xf32> to vector<2x96xf32>
    %1292 = arith.mulf %1290, %1291 : vector<2x96xf32>
    %1293 = arith.addf %1280, %1292 : vector<2x96xf32>
    %1294 = arith.select %1287, %1283, %1217 : vector<2x1xi1>, vector<2x1xf32>
    %1295 = vector.extract_strided_slice %179 {offsets = [14, 0, 0], sizes = [1, 2, 1], strides = [1, 1, 1]} : vector<24x2x1xf32> to vector<1x2x1xf32>
    %1296 = vector.shape_cast %1295 : vector<1x2x1xf32> to vector<2x1xf32>
    %1297 = arith.subf %1296, %1230 : vector<2x1xf32>
    %1298 = math.absf %1297 : vector<2x1xf32>
    %cst_218 = arith.constant 1.000000e-01 : f32
    %1299 = vector.broadcast %cst_218 : f32 to vector<2x1xf32>
    %1300 = arith.cmpf oge, %1298, %1299 : vector<2x1xf32>
    %cst_219 = arith.constant 0.000000e+00 : f32
    %1301 = vector.broadcast %cst_219 : f32 to vector<2x1xf32>
    %1302 = arith.select %1300, %1297, %1301 : vector<2x1xi1>, vector<2x1xf32>
    %1303 = vector.broadcast %1302 : vector<2x1xf32> to vector<2x96xf32>
    %1304 = vector.broadcast %187 : vector<1x96xf32> to vector<2x96xf32>
    %1305 = arith.mulf %1303, %1304 : vector<2x96xf32>
    %1306 = arith.addf %1293, %1305 : vector<2x96xf32>
    %1307 = arith.select %1300, %1296, %1230 : vector<2x1xi1>, vector<2x1xf32>
    %1308 = vector.extract_strided_slice %181 {offsets = [14, 0, 0], sizes = [1, 2, 1], strides = [1, 1, 1]} : vector<24x2x1xf32> to vector<1x2x1xf32>
    %1309 = vector.shape_cast %1308 : vector<1x2x1xf32> to vector<2x1xf32>
    %1310 = arith.subf %1309, %1243 : vector<2x1xf32>
    %1311 = math.absf %1310 : vector<2x1xf32>
    %cst_220 = arith.constant 1.000000e-01 : f32
    %1312 = vector.broadcast %cst_220 : f32 to vector<2x1xf32>
    %1313 = arith.cmpf oge, %1311, %1312 : vector<2x1xf32>
    %cst_221 = arith.constant 0.000000e+00 : f32
    %1314 = vector.broadcast %cst_221 : f32 to vector<2x1xf32>
    %1315 = arith.select %1313, %1310, %1314 : vector<2x1xi1>, vector<2x1xf32>
    %1316 = vector.broadcast %1315 : vector<2x1xf32> to vector<2x96xf32>
    %1317 = vector.broadcast %188 : vector<1x96xf32> to vector<2x96xf32>
    %1318 = arith.mulf %1316, %1317 : vector<2x96xf32>
    %1319 = arith.addf %1306, %1318 : vector<2x96xf32>
    %1320 = arith.select %1313, %1309, %1243 : vector<2x1xi1>, vector<2x1xf32>
    %1321 = vector.extract_strided_slice %182 {offsets = [14, 0, 0], sizes = [1, 2, 1], strides = [1, 1, 1]} : vector<24x2x1xf32> to vector<1x2x1xf32>
    %1322 = vector.shape_cast %1321 : vector<1x2x1xf32> to vector<2x1xf32>
    %1323 = arith.subf %1322, %1256 : vector<2x1xf32>
    %1324 = math.absf %1323 : vector<2x1xf32>
    %cst_222 = arith.constant 1.000000e-01 : f32
    %1325 = vector.broadcast %cst_222 : f32 to vector<2x1xf32>
    %1326 = arith.cmpf oge, %1324, %1325 : vector<2x1xf32>
    %cst_223 = arith.constant 0.000000e+00 : f32
    %1327 = vector.broadcast %cst_223 : f32 to vector<2x1xf32>
    %1328 = arith.select %1326, %1323, %1327 : vector<2x1xi1>, vector<2x1xf32>
    %1329 = vector.broadcast %1328 : vector<2x1xf32> to vector<2x96xf32>
    %1330 = vector.broadcast %189 : vector<1x96xf32> to vector<2x96xf32>
    %1331 = arith.mulf %1329, %1330 : vector<2x96xf32>
    %1332 = arith.addf %1319, %1331 : vector<2x96xf32>
    %1333 = arith.select %1326, %1322, %1256 : vector<2x1xi1>, vector<2x1xf32>
    %1334 = vector.extract_strided_slice %183 {offsets = [14, 0, 0], sizes = [1, 2, 1], strides = [1, 1, 1]} : vector<24x2x1xf32> to vector<1x2x1xf32>
    %1335 = vector.shape_cast %1334 : vector<1x2x1xf32> to vector<2x1xf32>
    %1336 = arith.subf %1335, %1269 : vector<2x1xf32>
    %1337 = math.absf %1336 : vector<2x1xf32>
    %cst_224 = arith.constant 1.000000e-01 : f32
    %1338 = vector.broadcast %cst_224 : f32 to vector<2x1xf32>
    %1339 = arith.cmpf oge, %1337, %1338 : vector<2x1xf32>
    %cst_225 = arith.constant 0.000000e+00 : f32
    %1340 = vector.broadcast %cst_225 : f32 to vector<2x1xf32>
    %1341 = arith.select %1339, %1336, %1340 : vector<2x1xi1>, vector<2x1xf32>
    %1342 = vector.broadcast %1341 : vector<2x1xf32> to vector<2x96xf32>
    %1343 = vector.broadcast %190 : vector<1x96xf32> to vector<2x96xf32>
    %1344 = arith.mulf %1342, %1343 : vector<2x96xf32>
    %1345 = arith.addf %1332, %1344 : vector<2x96xf32>
    %1346 = arith.select %1339, %1335, %1269 : vector<2x1xi1>, vector<2x1xf32>
    %1347 = vector.extract_strided_slice %174 {offsets = [15, 0, 0], sizes = [1, 2, 1], strides = [1, 1, 1]} : vector<24x2x1xf32> to vector<1x2x1xf32>
    %1348 = vector.shape_cast %1347 : vector<1x2x1xf32> to vector<2x1xf32>
    %1349 = arith.subf %1348, %1281 : vector<2x1xf32>
    %1350 = math.absf %1349 : vector<2x1xf32>
    %cst_226 = arith.constant 1.000000e-01 : f32
    %1351 = vector.broadcast %cst_226 : f32 to vector<2x1xf32>
    %1352 = arith.cmpf oge, %1350, %1351 : vector<2x1xf32>
    %cst_227 = arith.constant 0.000000e+00 : f32
    %1353 = vector.broadcast %cst_227 : f32 to vector<2x1xf32>
    %1354 = arith.select %1352, %1349, %1353 : vector<2x1xi1>, vector<2x1xf32>
    %1355 = vector.broadcast %1354 : vector<2x1xf32> to vector<2x96xf32>
    %1356 = vector.broadcast %185 : vector<1x96xf32> to vector<2x96xf32>
    %1357 = arith.mulf %1355, %1356 : vector<2x96xf32>
    %1358 = arith.select %1352, %1348, %1281 : vector<2x1xi1>, vector<2x1xf32>
    %1359 = vector.extract_strided_slice %175 {offsets = [15, 0, 0], sizes = [1, 2, 1], strides = [1, 1, 1]} : vector<24x2x1xf32> to vector<1x2x1xf32>
    %1360 = vector.shape_cast %1359 : vector<1x2x1xf32> to vector<2x1xf32>
    %1361 = arith.subf %1360, %1294 : vector<2x1xf32>
    %1362 = math.absf %1361 : vector<2x1xf32>
    %cst_228 = arith.constant 1.000000e-01 : f32
    %1363 = vector.broadcast %cst_228 : f32 to vector<2x1xf32>
    %1364 = arith.cmpf oge, %1362, %1363 : vector<2x1xf32>
    %cst_229 = arith.constant 0.000000e+00 : f32
    %1365 = vector.broadcast %cst_229 : f32 to vector<2x1xf32>
    %1366 = arith.select %1364, %1361, %1365 : vector<2x1xi1>, vector<2x1xf32>
    %1367 = vector.broadcast %1366 : vector<2x1xf32> to vector<2x96xf32>
    %1368 = vector.broadcast %186 : vector<1x96xf32> to vector<2x96xf32>
    %1369 = arith.mulf %1367, %1368 : vector<2x96xf32>
    %1370 = arith.addf %1357, %1369 : vector<2x96xf32>
    %1371 = arith.select %1364, %1360, %1294 : vector<2x1xi1>, vector<2x1xf32>
    %1372 = vector.extract_strided_slice %179 {offsets = [15, 0, 0], sizes = [1, 2, 1], strides = [1, 1, 1]} : vector<24x2x1xf32> to vector<1x2x1xf32>
    %1373 = vector.shape_cast %1372 : vector<1x2x1xf32> to vector<2x1xf32>
    %1374 = arith.subf %1373, %1307 : vector<2x1xf32>
    %1375 = math.absf %1374 : vector<2x1xf32>
    %cst_230 = arith.constant 1.000000e-01 : f32
    %1376 = vector.broadcast %cst_230 : f32 to vector<2x1xf32>
    %1377 = arith.cmpf oge, %1375, %1376 : vector<2x1xf32>
    %cst_231 = arith.constant 0.000000e+00 : f32
    %1378 = vector.broadcast %cst_231 : f32 to vector<2x1xf32>
    %1379 = arith.select %1377, %1374, %1378 : vector<2x1xi1>, vector<2x1xf32>
    %1380 = vector.broadcast %1379 : vector<2x1xf32> to vector<2x96xf32>
    %1381 = vector.broadcast %187 : vector<1x96xf32> to vector<2x96xf32>
    %1382 = arith.mulf %1380, %1381 : vector<2x96xf32>
    %1383 = arith.addf %1370, %1382 : vector<2x96xf32>
    %1384 = arith.select %1377, %1373, %1307 : vector<2x1xi1>, vector<2x1xf32>
    %1385 = vector.extract_strided_slice %181 {offsets = [15, 0, 0], sizes = [1, 2, 1], strides = [1, 1, 1]} : vector<24x2x1xf32> to vector<1x2x1xf32>
    %1386 = vector.shape_cast %1385 : vector<1x2x1xf32> to vector<2x1xf32>
    %1387 = arith.subf %1386, %1320 : vector<2x1xf32>
    %1388 = math.absf %1387 : vector<2x1xf32>
    %cst_232 = arith.constant 1.000000e-01 : f32
    %1389 = vector.broadcast %cst_232 : f32 to vector<2x1xf32>
    %1390 = arith.cmpf oge, %1388, %1389 : vector<2x1xf32>
    %cst_233 = arith.constant 0.000000e+00 : f32
    %1391 = vector.broadcast %cst_233 : f32 to vector<2x1xf32>
    %1392 = arith.select %1390, %1387, %1391 : vector<2x1xi1>, vector<2x1xf32>
    %1393 = vector.broadcast %1392 : vector<2x1xf32> to vector<2x96xf32>
    %1394 = vector.broadcast %188 : vector<1x96xf32> to vector<2x96xf32>
    %1395 = arith.mulf %1393, %1394 : vector<2x96xf32>
    %1396 = arith.addf %1383, %1395 : vector<2x96xf32>
    %1397 = arith.select %1390, %1386, %1320 : vector<2x1xi1>, vector<2x1xf32>
    %1398 = vector.extract_strided_slice %182 {offsets = [15, 0, 0], sizes = [1, 2, 1], strides = [1, 1, 1]} : vector<24x2x1xf32> to vector<1x2x1xf32>
    %1399 = vector.shape_cast %1398 : vector<1x2x1xf32> to vector<2x1xf32>
    %1400 = arith.subf %1399, %1333 : vector<2x1xf32>
    %1401 = math.absf %1400 : vector<2x1xf32>
    %cst_234 = arith.constant 1.000000e-01 : f32
    %1402 = vector.broadcast %cst_234 : f32 to vector<2x1xf32>
    %1403 = arith.cmpf oge, %1401, %1402 : vector<2x1xf32>
    %cst_235 = arith.constant 0.000000e+00 : f32
    %1404 = vector.broadcast %cst_235 : f32 to vector<2x1xf32>
    %1405 = arith.select %1403, %1400, %1404 : vector<2x1xi1>, vector<2x1xf32>
    %1406 = vector.broadcast %1405 : vector<2x1xf32> to vector<2x96xf32>
    %1407 = vector.broadcast %189 : vector<1x96xf32> to vector<2x96xf32>
    %1408 = arith.mulf %1406, %1407 : vector<2x96xf32>
    %1409 = arith.addf %1396, %1408 : vector<2x96xf32>
    %1410 = arith.select %1403, %1399, %1333 : vector<2x1xi1>, vector<2x1xf32>
    %1411 = vector.extract_strided_slice %183 {offsets = [15, 0, 0], sizes = [1, 2, 1], strides = [1, 1, 1]} : vector<24x2x1xf32> to vector<1x2x1xf32>
    %1412 = vector.shape_cast %1411 : vector<1x2x1xf32> to vector<2x1xf32>
    %1413 = arith.subf %1412, %1346 : vector<2x1xf32>
    %1414 = math.absf %1413 : vector<2x1xf32>
    %cst_236 = arith.constant 1.000000e-01 : f32
    %1415 = vector.broadcast %cst_236 : f32 to vector<2x1xf32>
    %1416 = arith.cmpf oge, %1414, %1415 : vector<2x1xf32>
    %cst_237 = arith.constant 0.000000e+00 : f32
    %1417 = vector.broadcast %cst_237 : f32 to vector<2x1xf32>
    %1418 = arith.select %1416, %1413, %1417 : vector<2x1xi1>, vector<2x1xf32>
    %1419 = vector.broadcast %1418 : vector<2x1xf32> to vector<2x96xf32>
    %1420 = vector.broadcast %190 : vector<1x96xf32> to vector<2x96xf32>
    %1421 = arith.mulf %1419, %1420 : vector<2x96xf32>
    %1422 = arith.addf %1409, %1421 : vector<2x96xf32>
    %1423 = arith.select %1416, %1412, %1346 : vector<2x1xi1>, vector<2x1xf32>
    %1424 = vector.extract_strided_slice %174 {offsets = [16, 0, 0], sizes = [1, 2, 1], strides = [1, 1, 1]} : vector<24x2x1xf32> to vector<1x2x1xf32>
    %1425 = vector.shape_cast %1424 : vector<1x2x1xf32> to vector<2x1xf32>
    %1426 = arith.subf %1425, %1358 : vector<2x1xf32>
    %1427 = math.absf %1426 : vector<2x1xf32>
    %cst_238 = arith.constant 1.000000e-01 : f32
    %1428 = vector.broadcast %cst_238 : f32 to vector<2x1xf32>
    %1429 = arith.cmpf oge, %1427, %1428 : vector<2x1xf32>
    %cst_239 = arith.constant 0.000000e+00 : f32
    %1430 = vector.broadcast %cst_239 : f32 to vector<2x1xf32>
    %1431 = arith.select %1429, %1426, %1430 : vector<2x1xi1>, vector<2x1xf32>
    %1432 = vector.broadcast %1431 : vector<2x1xf32> to vector<2x96xf32>
    %1433 = vector.broadcast %185 : vector<1x96xf32> to vector<2x96xf32>
    %1434 = arith.mulf %1432, %1433 : vector<2x96xf32>
    %1435 = arith.select %1429, %1425, %1358 : vector<2x1xi1>, vector<2x1xf32>
    %1436 = vector.extract_strided_slice %175 {offsets = [16, 0, 0], sizes = [1, 2, 1], strides = [1, 1, 1]} : vector<24x2x1xf32> to vector<1x2x1xf32>
    %1437 = vector.shape_cast %1436 : vector<1x2x1xf32> to vector<2x1xf32>
    %1438 = arith.subf %1437, %1371 : vector<2x1xf32>
    %1439 = math.absf %1438 : vector<2x1xf32>
    %cst_240 = arith.constant 1.000000e-01 : f32
    %1440 = vector.broadcast %cst_240 : f32 to vector<2x1xf32>
    %1441 = arith.cmpf oge, %1439, %1440 : vector<2x1xf32>
    %cst_241 = arith.constant 0.000000e+00 : f32
    %1442 = vector.broadcast %cst_241 : f32 to vector<2x1xf32>
    %1443 = arith.select %1441, %1438, %1442 : vector<2x1xi1>, vector<2x1xf32>
    %1444 = vector.broadcast %1443 : vector<2x1xf32> to vector<2x96xf32>
    %1445 = vector.broadcast %186 : vector<1x96xf32> to vector<2x96xf32>
    %1446 = arith.mulf %1444, %1445 : vector<2x96xf32>
    %1447 = arith.addf %1434, %1446 : vector<2x96xf32>
    %1448 = arith.select %1441, %1437, %1371 : vector<2x1xi1>, vector<2x1xf32>
    %1449 = vector.extract_strided_slice %179 {offsets = [16, 0, 0], sizes = [1, 2, 1], strides = [1, 1, 1]} : vector<24x2x1xf32> to vector<1x2x1xf32>
    %1450 = vector.shape_cast %1449 : vector<1x2x1xf32> to vector<2x1xf32>
    %1451 = arith.subf %1450, %1384 : vector<2x1xf32>
    %1452 = math.absf %1451 : vector<2x1xf32>
    %cst_242 = arith.constant 1.000000e-01 : f32
    %1453 = vector.broadcast %cst_242 : f32 to vector<2x1xf32>
    %1454 = arith.cmpf oge, %1452, %1453 : vector<2x1xf32>
    %cst_243 = arith.constant 0.000000e+00 : f32
    %1455 = vector.broadcast %cst_243 : f32 to vector<2x1xf32>
    %1456 = arith.select %1454, %1451, %1455 : vector<2x1xi1>, vector<2x1xf32>
    %1457 = vector.broadcast %1456 : vector<2x1xf32> to vector<2x96xf32>
    %1458 = vector.broadcast %187 : vector<1x96xf32> to vector<2x96xf32>
    %1459 = arith.mulf %1457, %1458 : vector<2x96xf32>
    %1460 = arith.addf %1447, %1459 : vector<2x96xf32>
    %1461 = arith.select %1454, %1450, %1384 : vector<2x1xi1>, vector<2x1xf32>
    %1462 = vector.extract_strided_slice %181 {offsets = [16, 0, 0], sizes = [1, 2, 1], strides = [1, 1, 1]} : vector<24x2x1xf32> to vector<1x2x1xf32>
    %1463 = vector.shape_cast %1462 : vector<1x2x1xf32> to vector<2x1xf32>
    %1464 = arith.subf %1463, %1397 : vector<2x1xf32>
    %1465 = math.absf %1464 : vector<2x1xf32>
    %cst_244 = arith.constant 1.000000e-01 : f32
    %1466 = vector.broadcast %cst_244 : f32 to vector<2x1xf32>
    %1467 = arith.cmpf oge, %1465, %1466 : vector<2x1xf32>
    %cst_245 = arith.constant 0.000000e+00 : f32
    %1468 = vector.broadcast %cst_245 : f32 to vector<2x1xf32>
    %1469 = arith.select %1467, %1464, %1468 : vector<2x1xi1>, vector<2x1xf32>
    %1470 = vector.broadcast %1469 : vector<2x1xf32> to vector<2x96xf32>
    %1471 = vector.broadcast %188 : vector<1x96xf32> to vector<2x96xf32>
    %1472 = arith.mulf %1470, %1471 : vector<2x96xf32>
    %1473 = arith.addf %1460, %1472 : vector<2x96xf32>
    %1474 = arith.select %1467, %1463, %1397 : vector<2x1xi1>, vector<2x1xf32>
    %1475 = vector.extract_strided_slice %182 {offsets = [16, 0, 0], sizes = [1, 2, 1], strides = [1, 1, 1]} : vector<24x2x1xf32> to vector<1x2x1xf32>
    %1476 = vector.shape_cast %1475 : vector<1x2x1xf32> to vector<2x1xf32>
    %1477 = arith.subf %1476, %1410 : vector<2x1xf32>
    %1478 = math.absf %1477 : vector<2x1xf32>
    %cst_246 = arith.constant 1.000000e-01 : f32
    %1479 = vector.broadcast %cst_246 : f32 to vector<2x1xf32>
    %1480 = arith.cmpf oge, %1478, %1479 : vector<2x1xf32>
    %cst_247 = arith.constant 0.000000e+00 : f32
    %1481 = vector.broadcast %cst_247 : f32 to vector<2x1xf32>
    %1482 = arith.select %1480, %1477, %1481 : vector<2x1xi1>, vector<2x1xf32>
    %1483 = vector.broadcast %1482 : vector<2x1xf32> to vector<2x96xf32>
    %1484 = vector.broadcast %189 : vector<1x96xf32> to vector<2x96xf32>
    %1485 = arith.mulf %1483, %1484 : vector<2x96xf32>
    %1486 = arith.addf %1473, %1485 : vector<2x96xf32>
    %1487 = arith.select %1480, %1476, %1410 : vector<2x1xi1>, vector<2x1xf32>
    %1488 = vector.extract_strided_slice %183 {offsets = [16, 0, 0], sizes = [1, 2, 1], strides = [1, 1, 1]} : vector<24x2x1xf32> to vector<1x2x1xf32>
    %1489 = vector.shape_cast %1488 : vector<1x2x1xf32> to vector<2x1xf32>
    %1490 = arith.subf %1489, %1423 : vector<2x1xf32>
    %1491 = math.absf %1490 : vector<2x1xf32>
    %cst_248 = arith.constant 1.000000e-01 : f32
    %1492 = vector.broadcast %cst_248 : f32 to vector<2x1xf32>
    %1493 = arith.cmpf oge, %1491, %1492 : vector<2x1xf32>
    %cst_249 = arith.constant 0.000000e+00 : f32
    %1494 = vector.broadcast %cst_249 : f32 to vector<2x1xf32>
    %1495 = arith.select %1493, %1490, %1494 : vector<2x1xi1>, vector<2x1xf32>
    %1496 = vector.broadcast %1495 : vector<2x1xf32> to vector<2x96xf32>
    %1497 = vector.broadcast %190 : vector<1x96xf32> to vector<2x96xf32>
    %1498 = arith.mulf %1496, %1497 : vector<2x96xf32>
    %1499 = arith.addf %1486, %1498 : vector<2x96xf32>
    %1500 = arith.select %1493, %1489, %1423 : vector<2x1xi1>, vector<2x1xf32>
    %1501 = vector.extract_strided_slice %174 {offsets = [17, 0, 0], sizes = [1, 2, 1], strides = [1, 1, 1]} : vector<24x2x1xf32> to vector<1x2x1xf32>
    %1502 = vector.shape_cast %1501 : vector<1x2x1xf32> to vector<2x1xf32>
    %1503 = arith.subf %1502, %1435 : vector<2x1xf32>
    %1504 = math.absf %1503 : vector<2x1xf32>
    %cst_250 = arith.constant 1.000000e-01 : f32
    %1505 = vector.broadcast %cst_250 : f32 to vector<2x1xf32>
    %1506 = arith.cmpf oge, %1504, %1505 : vector<2x1xf32>
    %cst_251 = arith.constant 0.000000e+00 : f32
    %1507 = vector.broadcast %cst_251 : f32 to vector<2x1xf32>
    %1508 = arith.select %1506, %1503, %1507 : vector<2x1xi1>, vector<2x1xf32>
    %1509 = vector.broadcast %1508 : vector<2x1xf32> to vector<2x96xf32>
    %1510 = vector.broadcast %185 : vector<1x96xf32> to vector<2x96xf32>
    %1511 = arith.mulf %1509, %1510 : vector<2x96xf32>
    %1512 = arith.select %1506, %1502, %1435 : vector<2x1xi1>, vector<2x1xf32>
    %1513 = vector.extract_strided_slice %175 {offsets = [17, 0, 0], sizes = [1, 2, 1], strides = [1, 1, 1]} : vector<24x2x1xf32> to vector<1x2x1xf32>
    %1514 = vector.shape_cast %1513 : vector<1x2x1xf32> to vector<2x1xf32>
    %1515 = arith.subf %1514, %1448 : vector<2x1xf32>
    %1516 = math.absf %1515 : vector<2x1xf32>
    %cst_252 = arith.constant 1.000000e-01 : f32
    %1517 = vector.broadcast %cst_252 : f32 to vector<2x1xf32>
    %1518 = arith.cmpf oge, %1516, %1517 : vector<2x1xf32>
    %cst_253 = arith.constant 0.000000e+00 : f32
    %1519 = vector.broadcast %cst_253 : f32 to vector<2x1xf32>
    %1520 = arith.select %1518, %1515, %1519 : vector<2x1xi1>, vector<2x1xf32>
    %1521 = vector.broadcast %1520 : vector<2x1xf32> to vector<2x96xf32>
    %1522 = vector.broadcast %186 : vector<1x96xf32> to vector<2x96xf32>
    %1523 = arith.mulf %1521, %1522 : vector<2x96xf32>
    %1524 = arith.addf %1511, %1523 : vector<2x96xf32>
    %1525 = arith.select %1518, %1514, %1448 : vector<2x1xi1>, vector<2x1xf32>
    %1526 = vector.extract_strided_slice %179 {offsets = [17, 0, 0], sizes = [1, 2, 1], strides = [1, 1, 1]} : vector<24x2x1xf32> to vector<1x2x1xf32>
    %1527 = vector.shape_cast %1526 : vector<1x2x1xf32> to vector<2x1xf32>
    %1528 = arith.subf %1527, %1461 : vector<2x1xf32>
    %1529 = math.absf %1528 : vector<2x1xf32>
    %cst_254 = arith.constant 1.000000e-01 : f32
    %1530 = vector.broadcast %cst_254 : f32 to vector<2x1xf32>
    %1531 = arith.cmpf oge, %1529, %1530 : vector<2x1xf32>
    %cst_255 = arith.constant 0.000000e+00 : f32
    %1532 = vector.broadcast %cst_255 : f32 to vector<2x1xf32>
    %1533 = arith.select %1531, %1528, %1532 : vector<2x1xi1>, vector<2x1xf32>
    %1534 = vector.broadcast %1533 : vector<2x1xf32> to vector<2x96xf32>
    %1535 = vector.broadcast %187 : vector<1x96xf32> to vector<2x96xf32>
    %1536 = arith.mulf %1534, %1535 : vector<2x96xf32>
    %1537 = arith.addf %1524, %1536 : vector<2x96xf32>
    %1538 = arith.select %1531, %1527, %1461 : vector<2x1xi1>, vector<2x1xf32>
    %1539 = vector.extract_strided_slice %181 {offsets = [17, 0, 0], sizes = [1, 2, 1], strides = [1, 1, 1]} : vector<24x2x1xf32> to vector<1x2x1xf32>
    %1540 = vector.shape_cast %1539 : vector<1x2x1xf32> to vector<2x1xf32>
    %1541 = arith.subf %1540, %1474 : vector<2x1xf32>
    %1542 = math.absf %1541 : vector<2x1xf32>
    %cst_256 = arith.constant 1.000000e-01 : f32
    %1543 = vector.broadcast %cst_256 : f32 to vector<2x1xf32>
    %1544 = arith.cmpf oge, %1542, %1543 : vector<2x1xf32>
    %cst_257 = arith.constant 0.000000e+00 : f32
    %1545 = vector.broadcast %cst_257 : f32 to vector<2x1xf32>
    %1546 = arith.select %1544, %1541, %1545 : vector<2x1xi1>, vector<2x1xf32>
    %1547 = vector.broadcast %1546 : vector<2x1xf32> to vector<2x96xf32>
    %1548 = vector.broadcast %188 : vector<1x96xf32> to vector<2x96xf32>
    %1549 = arith.mulf %1547, %1548 : vector<2x96xf32>
    %1550 = arith.addf %1537, %1549 : vector<2x96xf32>
    %1551 = arith.select %1544, %1540, %1474 : vector<2x1xi1>, vector<2x1xf32>
    %1552 = vector.extract_strided_slice %182 {offsets = [17, 0, 0], sizes = [1, 2, 1], strides = [1, 1, 1]} : vector<24x2x1xf32> to vector<1x2x1xf32>
    %1553 = vector.shape_cast %1552 : vector<1x2x1xf32> to vector<2x1xf32>
    %1554 = arith.subf %1553, %1487 : vector<2x1xf32>
    %1555 = math.absf %1554 : vector<2x1xf32>
    %cst_258 = arith.constant 1.000000e-01 : f32
    %1556 = vector.broadcast %cst_258 : f32 to vector<2x1xf32>
    %1557 = arith.cmpf oge, %1555, %1556 : vector<2x1xf32>
    %cst_259 = arith.constant 0.000000e+00 : f32
    %1558 = vector.broadcast %cst_259 : f32 to vector<2x1xf32>
    %1559 = arith.select %1557, %1554, %1558 : vector<2x1xi1>, vector<2x1xf32>
    %1560 = vector.broadcast %1559 : vector<2x1xf32> to vector<2x96xf32>
    %1561 = vector.broadcast %189 : vector<1x96xf32> to vector<2x96xf32>
    %1562 = arith.mulf %1560, %1561 : vector<2x96xf32>
    %1563 = arith.addf %1550, %1562 : vector<2x96xf32>
    %1564 = arith.select %1557, %1553, %1487 : vector<2x1xi1>, vector<2x1xf32>
    %1565 = vector.extract_strided_slice %183 {offsets = [17, 0, 0], sizes = [1, 2, 1], strides = [1, 1, 1]} : vector<24x2x1xf32> to vector<1x2x1xf32>
    %1566 = vector.shape_cast %1565 : vector<1x2x1xf32> to vector<2x1xf32>
    %1567 = arith.subf %1566, %1500 : vector<2x1xf32>
    %1568 = math.absf %1567 : vector<2x1xf32>
    %cst_260 = arith.constant 1.000000e-01 : f32
    %1569 = vector.broadcast %cst_260 : f32 to vector<2x1xf32>
    %1570 = arith.cmpf oge, %1568, %1569 : vector<2x1xf32>
    %cst_261 = arith.constant 0.000000e+00 : f32
    %1571 = vector.broadcast %cst_261 : f32 to vector<2x1xf32>
    %1572 = arith.select %1570, %1567, %1571 : vector<2x1xi1>, vector<2x1xf32>
    %1573 = vector.broadcast %1572 : vector<2x1xf32> to vector<2x96xf32>
    %1574 = vector.broadcast %190 : vector<1x96xf32> to vector<2x96xf32>
    %1575 = arith.mulf %1573, %1574 : vector<2x96xf32>
    %1576 = arith.addf %1563, %1575 : vector<2x96xf32>
    %1577 = arith.select %1570, %1566, %1500 : vector<2x1xi1>, vector<2x1xf32>
    %1578 = vector.extract_strided_slice %174 {offsets = [18, 0, 0], sizes = [1, 2, 1], strides = [1, 1, 1]} : vector<24x2x1xf32> to vector<1x2x1xf32>
    %1579 = vector.shape_cast %1578 : vector<1x2x1xf32> to vector<2x1xf32>
    %1580 = arith.subf %1579, %1512 : vector<2x1xf32>
    %1581 = math.absf %1580 : vector<2x1xf32>
    %cst_262 = arith.constant 1.000000e-01 : f32
    %1582 = vector.broadcast %cst_262 : f32 to vector<2x1xf32>
    %1583 = arith.cmpf oge, %1581, %1582 : vector<2x1xf32>
    %cst_263 = arith.constant 0.000000e+00 : f32
    %1584 = vector.broadcast %cst_263 : f32 to vector<2x1xf32>
    %1585 = arith.select %1583, %1580, %1584 : vector<2x1xi1>, vector<2x1xf32>
    %1586 = vector.broadcast %1585 : vector<2x1xf32> to vector<2x96xf32>
    %1587 = vector.broadcast %185 : vector<1x96xf32> to vector<2x96xf32>
    %1588 = arith.mulf %1586, %1587 : vector<2x96xf32>
    %1589 = arith.select %1583, %1579, %1512 : vector<2x1xi1>, vector<2x1xf32>
    %1590 = vector.extract_strided_slice %175 {offsets = [18, 0, 0], sizes = [1, 2, 1], strides = [1, 1, 1]} : vector<24x2x1xf32> to vector<1x2x1xf32>
    %1591 = vector.shape_cast %1590 : vector<1x2x1xf32> to vector<2x1xf32>
    %1592 = arith.subf %1591, %1525 : vector<2x1xf32>
    %1593 = math.absf %1592 : vector<2x1xf32>
    %cst_264 = arith.constant 1.000000e-01 : f32
    %1594 = vector.broadcast %cst_264 : f32 to vector<2x1xf32>
    %1595 = arith.cmpf oge, %1593, %1594 : vector<2x1xf32>
    %cst_265 = arith.constant 0.000000e+00 : f32
    %1596 = vector.broadcast %cst_265 : f32 to vector<2x1xf32>
    %1597 = arith.select %1595, %1592, %1596 : vector<2x1xi1>, vector<2x1xf32>
    %1598 = vector.broadcast %1597 : vector<2x1xf32> to vector<2x96xf32>
    %1599 = vector.broadcast %186 : vector<1x96xf32> to vector<2x96xf32>
    %1600 = arith.mulf %1598, %1599 : vector<2x96xf32>
    %1601 = arith.addf %1588, %1600 : vector<2x96xf32>
    %1602 = arith.select %1595, %1591, %1525 : vector<2x1xi1>, vector<2x1xf32>
    %1603 = vector.extract_strided_slice %179 {offsets = [18, 0, 0], sizes = [1, 2, 1], strides = [1, 1, 1]} : vector<24x2x1xf32> to vector<1x2x1xf32>
    %1604 = vector.shape_cast %1603 : vector<1x2x1xf32> to vector<2x1xf32>
    %1605 = arith.subf %1604, %1538 : vector<2x1xf32>
    %1606 = math.absf %1605 : vector<2x1xf32>
    %cst_266 = arith.constant 1.000000e-01 : f32
    %1607 = vector.broadcast %cst_266 : f32 to vector<2x1xf32>
    %1608 = arith.cmpf oge, %1606, %1607 : vector<2x1xf32>
    %cst_267 = arith.constant 0.000000e+00 : f32
    %1609 = vector.broadcast %cst_267 : f32 to vector<2x1xf32>
    %1610 = arith.select %1608, %1605, %1609 : vector<2x1xi1>, vector<2x1xf32>
    %1611 = vector.broadcast %1610 : vector<2x1xf32> to vector<2x96xf32>
    %1612 = vector.broadcast %187 : vector<1x96xf32> to vector<2x96xf32>
    %1613 = arith.mulf %1611, %1612 : vector<2x96xf32>
    %1614 = arith.addf %1601, %1613 : vector<2x96xf32>
    %1615 = arith.select %1608, %1604, %1538 : vector<2x1xi1>, vector<2x1xf32>
    %1616 = vector.extract_strided_slice %181 {offsets = [18, 0, 0], sizes = [1, 2, 1], strides = [1, 1, 1]} : vector<24x2x1xf32> to vector<1x2x1xf32>
    %1617 = vector.shape_cast %1616 : vector<1x2x1xf32> to vector<2x1xf32>
    %1618 = arith.subf %1617, %1551 : vector<2x1xf32>
    %1619 = math.absf %1618 : vector<2x1xf32>
    %cst_268 = arith.constant 1.000000e-01 : f32
    %1620 = vector.broadcast %cst_268 : f32 to vector<2x1xf32>
    %1621 = arith.cmpf oge, %1619, %1620 : vector<2x1xf32>
    %cst_269 = arith.constant 0.000000e+00 : f32
    %1622 = vector.broadcast %cst_269 : f32 to vector<2x1xf32>
    %1623 = arith.select %1621, %1618, %1622 : vector<2x1xi1>, vector<2x1xf32>
    %1624 = vector.broadcast %1623 : vector<2x1xf32> to vector<2x96xf32>
    %1625 = vector.broadcast %188 : vector<1x96xf32> to vector<2x96xf32>
    %1626 = arith.mulf %1624, %1625 : vector<2x96xf32>
    %1627 = arith.addf %1614, %1626 : vector<2x96xf32>
    %1628 = arith.select %1621, %1617, %1551 : vector<2x1xi1>, vector<2x1xf32>
    %1629 = vector.extract_strided_slice %182 {offsets = [18, 0, 0], sizes = [1, 2, 1], strides = [1, 1, 1]} : vector<24x2x1xf32> to vector<1x2x1xf32>
    %1630 = vector.shape_cast %1629 : vector<1x2x1xf32> to vector<2x1xf32>
    %1631 = arith.subf %1630, %1564 : vector<2x1xf32>
    %1632 = math.absf %1631 : vector<2x1xf32>
    %cst_270 = arith.constant 1.000000e-01 : f32
    %1633 = vector.broadcast %cst_270 : f32 to vector<2x1xf32>
    %1634 = arith.cmpf oge, %1632, %1633 : vector<2x1xf32>
    %cst_271 = arith.constant 0.000000e+00 : f32
    %1635 = vector.broadcast %cst_271 : f32 to vector<2x1xf32>
    %1636 = arith.select %1634, %1631, %1635 : vector<2x1xi1>, vector<2x1xf32>
    %1637 = vector.broadcast %1636 : vector<2x1xf32> to vector<2x96xf32>
    %1638 = vector.broadcast %189 : vector<1x96xf32> to vector<2x96xf32>
    %1639 = arith.mulf %1637, %1638 : vector<2x96xf32>
    %1640 = arith.addf %1627, %1639 : vector<2x96xf32>
    %1641 = arith.select %1634, %1630, %1564 : vector<2x1xi1>, vector<2x1xf32>
    %1642 = vector.extract_strided_slice %183 {offsets = [18, 0, 0], sizes = [1, 2, 1], strides = [1, 1, 1]} : vector<24x2x1xf32> to vector<1x2x1xf32>
    %1643 = vector.shape_cast %1642 : vector<1x2x1xf32> to vector<2x1xf32>
    %1644 = arith.subf %1643, %1577 : vector<2x1xf32>
    %1645 = math.absf %1644 : vector<2x1xf32>
    %cst_272 = arith.constant 1.000000e-01 : f32
    %1646 = vector.broadcast %cst_272 : f32 to vector<2x1xf32>
    %1647 = arith.cmpf oge, %1645, %1646 : vector<2x1xf32>
    %cst_273 = arith.constant 0.000000e+00 : f32
    %1648 = vector.broadcast %cst_273 : f32 to vector<2x1xf32>
    %1649 = arith.select %1647, %1644, %1648 : vector<2x1xi1>, vector<2x1xf32>
    %1650 = vector.broadcast %1649 : vector<2x1xf32> to vector<2x96xf32>
    %1651 = vector.broadcast %190 : vector<1x96xf32> to vector<2x96xf32>
    %1652 = arith.mulf %1650, %1651 : vector<2x96xf32>
    %1653 = arith.addf %1640, %1652 : vector<2x96xf32>
    %1654 = arith.select %1647, %1643, %1577 : vector<2x1xi1>, vector<2x1xf32>
    %1655 = vector.extract_strided_slice %174 {offsets = [19, 0, 0], sizes = [1, 2, 1], strides = [1, 1, 1]} : vector<24x2x1xf32> to vector<1x2x1xf32>
    %1656 = vector.shape_cast %1655 : vector<1x2x1xf32> to vector<2x1xf32>
    %1657 = arith.subf %1656, %1589 : vector<2x1xf32>
    %1658 = math.absf %1657 : vector<2x1xf32>
    %cst_274 = arith.constant 1.000000e-01 : f32
    %1659 = vector.broadcast %cst_274 : f32 to vector<2x1xf32>
    %1660 = arith.cmpf oge, %1658, %1659 : vector<2x1xf32>
    %cst_275 = arith.constant 0.000000e+00 : f32
    %1661 = vector.broadcast %cst_275 : f32 to vector<2x1xf32>
    %1662 = arith.select %1660, %1657, %1661 : vector<2x1xi1>, vector<2x1xf32>
    %1663 = vector.broadcast %1662 : vector<2x1xf32> to vector<2x96xf32>
    %1664 = vector.broadcast %185 : vector<1x96xf32> to vector<2x96xf32>
    %1665 = arith.mulf %1663, %1664 : vector<2x96xf32>
    %1666 = arith.select %1660, %1656, %1589 : vector<2x1xi1>, vector<2x1xf32>
    %1667 = vector.extract_strided_slice %175 {offsets = [19, 0, 0], sizes = [1, 2, 1], strides = [1, 1, 1]} : vector<24x2x1xf32> to vector<1x2x1xf32>
    %1668 = vector.shape_cast %1667 : vector<1x2x1xf32> to vector<2x1xf32>
    %1669 = arith.subf %1668, %1602 : vector<2x1xf32>
    %1670 = math.absf %1669 : vector<2x1xf32>
    %cst_276 = arith.constant 1.000000e-01 : f32
    %1671 = vector.broadcast %cst_276 : f32 to vector<2x1xf32>
    %1672 = arith.cmpf oge, %1670, %1671 : vector<2x1xf32>
    %cst_277 = arith.constant 0.000000e+00 : f32
    %1673 = vector.broadcast %cst_277 : f32 to vector<2x1xf32>
    %1674 = arith.select %1672, %1669, %1673 : vector<2x1xi1>, vector<2x1xf32>
    %1675 = vector.broadcast %1674 : vector<2x1xf32> to vector<2x96xf32>
    %1676 = vector.broadcast %186 : vector<1x96xf32> to vector<2x96xf32>
    %1677 = arith.mulf %1675, %1676 : vector<2x96xf32>
    %1678 = arith.addf %1665, %1677 : vector<2x96xf32>
    %1679 = arith.select %1672, %1668, %1602 : vector<2x1xi1>, vector<2x1xf32>
    %1680 = vector.extract_strided_slice %179 {offsets = [19, 0, 0], sizes = [1, 2, 1], strides = [1, 1, 1]} : vector<24x2x1xf32> to vector<1x2x1xf32>
    %1681 = vector.shape_cast %1680 : vector<1x2x1xf32> to vector<2x1xf32>
    %1682 = arith.subf %1681, %1615 : vector<2x1xf32>
    %1683 = math.absf %1682 : vector<2x1xf32>
    %cst_278 = arith.constant 1.000000e-01 : f32
    %1684 = vector.broadcast %cst_278 : f32 to vector<2x1xf32>
    %1685 = arith.cmpf oge, %1683, %1684 : vector<2x1xf32>
    %cst_279 = arith.constant 0.000000e+00 : f32
    %1686 = vector.broadcast %cst_279 : f32 to vector<2x1xf32>
    %1687 = arith.select %1685, %1682, %1686 : vector<2x1xi1>, vector<2x1xf32>
    %1688 = vector.broadcast %1687 : vector<2x1xf32> to vector<2x96xf32>
    %1689 = vector.broadcast %187 : vector<1x96xf32> to vector<2x96xf32>
    %1690 = arith.mulf %1688, %1689 : vector<2x96xf32>
    %1691 = arith.addf %1678, %1690 : vector<2x96xf32>
    %1692 = arith.select %1685, %1681, %1615 : vector<2x1xi1>, vector<2x1xf32>
    %1693 = vector.extract_strided_slice %181 {offsets = [19, 0, 0], sizes = [1, 2, 1], strides = [1, 1, 1]} : vector<24x2x1xf32> to vector<1x2x1xf32>
    %1694 = vector.shape_cast %1693 : vector<1x2x1xf32> to vector<2x1xf32>
    %1695 = arith.subf %1694, %1628 : vector<2x1xf32>
    %1696 = math.absf %1695 : vector<2x1xf32>
    %cst_280 = arith.constant 1.000000e-01 : f32
    %1697 = vector.broadcast %cst_280 : f32 to vector<2x1xf32>
    %1698 = arith.cmpf oge, %1696, %1697 : vector<2x1xf32>
    %cst_281 = arith.constant 0.000000e+00 : f32
    %1699 = vector.broadcast %cst_281 : f32 to vector<2x1xf32>
    %1700 = arith.select %1698, %1695, %1699 : vector<2x1xi1>, vector<2x1xf32>
    %1701 = vector.broadcast %1700 : vector<2x1xf32> to vector<2x96xf32>
    %1702 = vector.broadcast %188 : vector<1x96xf32> to vector<2x96xf32>
    %1703 = arith.mulf %1701, %1702 : vector<2x96xf32>
    %1704 = arith.addf %1691, %1703 : vector<2x96xf32>
    %1705 = arith.select %1698, %1694, %1628 : vector<2x1xi1>, vector<2x1xf32>
    %1706 = vector.extract_strided_slice %182 {offsets = [19, 0, 0], sizes = [1, 2, 1], strides = [1, 1, 1]} : vector<24x2x1xf32> to vector<1x2x1xf32>
    %1707 = vector.shape_cast %1706 : vector<1x2x1xf32> to vector<2x1xf32>
    %1708 = arith.subf %1707, %1641 : vector<2x1xf32>
    %1709 = math.absf %1708 : vector<2x1xf32>
    %cst_282 = arith.constant 1.000000e-01 : f32
    %1710 = vector.broadcast %cst_282 : f32 to vector<2x1xf32>
    %1711 = arith.cmpf oge, %1709, %1710 : vector<2x1xf32>
    %cst_283 = arith.constant 0.000000e+00 : f32
    %1712 = vector.broadcast %cst_283 : f32 to vector<2x1xf32>
    %1713 = arith.select %1711, %1708, %1712 : vector<2x1xi1>, vector<2x1xf32>
    %1714 = vector.broadcast %1713 : vector<2x1xf32> to vector<2x96xf32>
    %1715 = vector.broadcast %189 : vector<1x96xf32> to vector<2x96xf32>
    %1716 = arith.mulf %1714, %1715 : vector<2x96xf32>
    %1717 = arith.addf %1704, %1716 : vector<2x96xf32>
    %1718 = arith.select %1711, %1707, %1641 : vector<2x1xi1>, vector<2x1xf32>
    %1719 = vector.extract_strided_slice %183 {offsets = [19, 0, 0], sizes = [1, 2, 1], strides = [1, 1, 1]} : vector<24x2x1xf32> to vector<1x2x1xf32>
    %1720 = vector.shape_cast %1719 : vector<1x2x1xf32> to vector<2x1xf32>
    %1721 = arith.subf %1720, %1654 : vector<2x1xf32>
    %1722 = math.absf %1721 : vector<2x1xf32>
    %cst_284 = arith.constant 1.000000e-01 : f32
    %1723 = vector.broadcast %cst_284 : f32 to vector<2x1xf32>
    %1724 = arith.cmpf oge, %1722, %1723 : vector<2x1xf32>
    %cst_285 = arith.constant 0.000000e+00 : f32
    %1725 = vector.broadcast %cst_285 : f32 to vector<2x1xf32>
    %1726 = arith.select %1724, %1721, %1725 : vector<2x1xi1>, vector<2x1xf32>
    %1727 = vector.broadcast %1726 : vector<2x1xf32> to vector<2x96xf32>
    %1728 = vector.broadcast %190 : vector<1x96xf32> to vector<2x96xf32>
    %1729 = arith.mulf %1727, %1728 : vector<2x96xf32>
    %1730 = arith.addf %1717, %1729 : vector<2x96xf32>
    %1731 = arith.select %1724, %1720, %1654 : vector<2x1xi1>, vector<2x1xf32>
    %1732 = vector.extract_strided_slice %174 {offsets = [20, 0, 0], sizes = [1, 2, 1], strides = [1, 1, 1]} : vector<24x2x1xf32> to vector<1x2x1xf32>
    %1733 = vector.shape_cast %1732 : vector<1x2x1xf32> to vector<2x1xf32>
    %1734 = arith.subf %1733, %1666 : vector<2x1xf32>
    %1735 = math.absf %1734 : vector<2x1xf32>
    %cst_286 = arith.constant 1.000000e-01 : f32
    %1736 = vector.broadcast %cst_286 : f32 to vector<2x1xf32>
    %1737 = arith.cmpf oge, %1735, %1736 : vector<2x1xf32>
    %cst_287 = arith.constant 0.000000e+00 : f32
    %1738 = vector.broadcast %cst_287 : f32 to vector<2x1xf32>
    %1739 = arith.select %1737, %1734, %1738 : vector<2x1xi1>, vector<2x1xf32>
    %1740 = vector.broadcast %1739 : vector<2x1xf32> to vector<2x96xf32>
    %1741 = vector.broadcast %185 : vector<1x96xf32> to vector<2x96xf32>
    %1742 = arith.mulf %1740, %1741 : vector<2x96xf32>
    %1743 = arith.select %1737, %1733, %1666 : vector<2x1xi1>, vector<2x1xf32>
    %1744 = vector.extract_strided_slice %175 {offsets = [20, 0, 0], sizes = [1, 2, 1], strides = [1, 1, 1]} : vector<24x2x1xf32> to vector<1x2x1xf32>
    %1745 = vector.shape_cast %1744 : vector<1x2x1xf32> to vector<2x1xf32>
    %1746 = arith.subf %1745, %1679 : vector<2x1xf32>
    %1747 = math.absf %1746 : vector<2x1xf32>
    %cst_288 = arith.constant 1.000000e-01 : f32
    %1748 = vector.broadcast %cst_288 : f32 to vector<2x1xf32>
    %1749 = arith.cmpf oge, %1747, %1748 : vector<2x1xf32>
    %cst_289 = arith.constant 0.000000e+00 : f32
    %1750 = vector.broadcast %cst_289 : f32 to vector<2x1xf32>
    %1751 = arith.select %1749, %1746, %1750 : vector<2x1xi1>, vector<2x1xf32>
    %1752 = vector.broadcast %1751 : vector<2x1xf32> to vector<2x96xf32>
    %1753 = vector.broadcast %186 : vector<1x96xf32> to vector<2x96xf32>
    %1754 = arith.mulf %1752, %1753 : vector<2x96xf32>
    %1755 = arith.addf %1742, %1754 : vector<2x96xf32>
    %1756 = arith.select %1749, %1745, %1679 : vector<2x1xi1>, vector<2x1xf32>
    %1757 = vector.extract_strided_slice %179 {offsets = [20, 0, 0], sizes = [1, 2, 1], strides = [1, 1, 1]} : vector<24x2x1xf32> to vector<1x2x1xf32>
    %1758 = vector.shape_cast %1757 : vector<1x2x1xf32> to vector<2x1xf32>
    %1759 = arith.subf %1758, %1692 : vector<2x1xf32>
    %1760 = math.absf %1759 : vector<2x1xf32>
    %cst_290 = arith.constant 1.000000e-01 : f32
    %1761 = vector.broadcast %cst_290 : f32 to vector<2x1xf32>
    %1762 = arith.cmpf oge, %1760, %1761 : vector<2x1xf32>
    %cst_291 = arith.constant 0.000000e+00 : f32
    %1763 = vector.broadcast %cst_291 : f32 to vector<2x1xf32>
    %1764 = arith.select %1762, %1759, %1763 : vector<2x1xi1>, vector<2x1xf32>
    %1765 = vector.broadcast %1764 : vector<2x1xf32> to vector<2x96xf32>
    %1766 = vector.broadcast %187 : vector<1x96xf32> to vector<2x96xf32>
    %1767 = arith.mulf %1765, %1766 : vector<2x96xf32>
    %1768 = arith.addf %1755, %1767 : vector<2x96xf32>
    %1769 = arith.select %1762, %1758, %1692 : vector<2x1xi1>, vector<2x1xf32>
    %1770 = vector.extract_strided_slice %181 {offsets = [20, 0, 0], sizes = [1, 2, 1], strides = [1, 1, 1]} : vector<24x2x1xf32> to vector<1x2x1xf32>
    %1771 = vector.shape_cast %1770 : vector<1x2x1xf32> to vector<2x1xf32>
    %1772 = arith.subf %1771, %1705 : vector<2x1xf32>
    %1773 = math.absf %1772 : vector<2x1xf32>
    %cst_292 = arith.constant 1.000000e-01 : f32
    %1774 = vector.broadcast %cst_292 : f32 to vector<2x1xf32>
    %1775 = arith.cmpf oge, %1773, %1774 : vector<2x1xf32>
    %cst_293 = arith.constant 0.000000e+00 : f32
    %1776 = vector.broadcast %cst_293 : f32 to vector<2x1xf32>
    %1777 = arith.select %1775, %1772, %1776 : vector<2x1xi1>, vector<2x1xf32>
    %1778 = vector.broadcast %1777 : vector<2x1xf32> to vector<2x96xf32>
    %1779 = vector.broadcast %188 : vector<1x96xf32> to vector<2x96xf32>
    %1780 = arith.mulf %1778, %1779 : vector<2x96xf32>
    %1781 = arith.addf %1768, %1780 : vector<2x96xf32>
    %1782 = arith.select %1775, %1771, %1705 : vector<2x1xi1>, vector<2x1xf32>
    %1783 = vector.extract_strided_slice %182 {offsets = [20, 0, 0], sizes = [1, 2, 1], strides = [1, 1, 1]} : vector<24x2x1xf32> to vector<1x2x1xf32>
    %1784 = vector.shape_cast %1783 : vector<1x2x1xf32> to vector<2x1xf32>
    %1785 = arith.subf %1784, %1718 : vector<2x1xf32>
    %1786 = math.absf %1785 : vector<2x1xf32>
    %cst_294 = arith.constant 1.000000e-01 : f32
    %1787 = vector.broadcast %cst_294 : f32 to vector<2x1xf32>
    %1788 = arith.cmpf oge, %1786, %1787 : vector<2x1xf32>
    %cst_295 = arith.constant 0.000000e+00 : f32
    %1789 = vector.broadcast %cst_295 : f32 to vector<2x1xf32>
    %1790 = arith.select %1788, %1785, %1789 : vector<2x1xi1>, vector<2x1xf32>
    %1791 = vector.broadcast %1790 : vector<2x1xf32> to vector<2x96xf32>
    %1792 = vector.broadcast %189 : vector<1x96xf32> to vector<2x96xf32>
    %1793 = arith.mulf %1791, %1792 : vector<2x96xf32>
    %1794 = arith.addf %1781, %1793 : vector<2x96xf32>
    %1795 = arith.select %1788, %1784, %1718 : vector<2x1xi1>, vector<2x1xf32>
    %1796 = vector.extract_strided_slice %183 {offsets = [20, 0, 0], sizes = [1, 2, 1], strides = [1, 1, 1]} : vector<24x2x1xf32> to vector<1x2x1xf32>
    %1797 = vector.shape_cast %1796 : vector<1x2x1xf32> to vector<2x1xf32>
    %1798 = arith.subf %1797, %1731 : vector<2x1xf32>
    %1799 = math.absf %1798 : vector<2x1xf32>
    %cst_296 = arith.constant 1.000000e-01 : f32
    %1800 = vector.broadcast %cst_296 : f32 to vector<2x1xf32>
    %1801 = arith.cmpf oge, %1799, %1800 : vector<2x1xf32>
    %cst_297 = arith.constant 0.000000e+00 : f32
    %1802 = vector.broadcast %cst_297 : f32 to vector<2x1xf32>
    %1803 = arith.select %1801, %1798, %1802 : vector<2x1xi1>, vector<2x1xf32>
    %1804 = vector.broadcast %1803 : vector<2x1xf32> to vector<2x96xf32>
    %1805 = vector.broadcast %190 : vector<1x96xf32> to vector<2x96xf32>
    %1806 = arith.mulf %1804, %1805 : vector<2x96xf32>
    %1807 = arith.addf %1794, %1806 : vector<2x96xf32>
    %1808 = arith.select %1801, %1797, %1731 : vector<2x1xi1>, vector<2x1xf32>
    %1809 = vector.extract_strided_slice %174 {offsets = [21, 0, 0], sizes = [1, 2, 1], strides = [1, 1, 1]} : vector<24x2x1xf32> to vector<1x2x1xf32>
    %1810 = vector.shape_cast %1809 : vector<1x2x1xf32> to vector<2x1xf32>
    %1811 = arith.subf %1810, %1743 : vector<2x1xf32>
    %1812 = math.absf %1811 : vector<2x1xf32>
    %cst_298 = arith.constant 1.000000e-01 : f32
    %1813 = vector.broadcast %cst_298 : f32 to vector<2x1xf32>
    %1814 = arith.cmpf oge, %1812, %1813 : vector<2x1xf32>
    %cst_299 = arith.constant 0.000000e+00 : f32
    %1815 = vector.broadcast %cst_299 : f32 to vector<2x1xf32>
    %1816 = arith.select %1814, %1811, %1815 : vector<2x1xi1>, vector<2x1xf32>
    %1817 = vector.broadcast %1816 : vector<2x1xf32> to vector<2x96xf32>
    %1818 = vector.broadcast %185 : vector<1x96xf32> to vector<2x96xf32>
    %1819 = arith.mulf %1817, %1818 : vector<2x96xf32>
    %1820 = arith.select %1814, %1810, %1743 : vector<2x1xi1>, vector<2x1xf32>
    %1821 = vector.extract_strided_slice %175 {offsets = [21, 0, 0], sizes = [1, 2, 1], strides = [1, 1, 1]} : vector<24x2x1xf32> to vector<1x2x1xf32>
    %1822 = vector.shape_cast %1821 : vector<1x2x1xf32> to vector<2x1xf32>
    %1823 = arith.subf %1822, %1756 : vector<2x1xf32>
    %1824 = math.absf %1823 : vector<2x1xf32>
    %cst_300 = arith.constant 1.000000e-01 : f32
    %1825 = vector.broadcast %cst_300 : f32 to vector<2x1xf32>
    %1826 = arith.cmpf oge, %1824, %1825 : vector<2x1xf32>
    %cst_301 = arith.constant 0.000000e+00 : f32
    %1827 = vector.broadcast %cst_301 : f32 to vector<2x1xf32>
    %1828 = arith.select %1826, %1823, %1827 : vector<2x1xi1>, vector<2x1xf32>
    %1829 = vector.broadcast %1828 : vector<2x1xf32> to vector<2x96xf32>
    %1830 = vector.broadcast %186 : vector<1x96xf32> to vector<2x96xf32>
    %1831 = arith.mulf %1829, %1830 : vector<2x96xf32>
    %1832 = arith.addf %1819, %1831 : vector<2x96xf32>
    %1833 = arith.select %1826, %1822, %1756 : vector<2x1xi1>, vector<2x1xf32>
    %1834 = vector.extract_strided_slice %179 {offsets = [21, 0, 0], sizes = [1, 2, 1], strides = [1, 1, 1]} : vector<24x2x1xf32> to vector<1x2x1xf32>
    %1835 = vector.shape_cast %1834 : vector<1x2x1xf32> to vector<2x1xf32>
    %1836 = arith.subf %1835, %1769 : vector<2x1xf32>
    %1837 = math.absf %1836 : vector<2x1xf32>
    %cst_302 = arith.constant 1.000000e-01 : f32
    %1838 = vector.broadcast %cst_302 : f32 to vector<2x1xf32>
    %1839 = arith.cmpf oge, %1837, %1838 : vector<2x1xf32>
    %cst_303 = arith.constant 0.000000e+00 : f32
    %1840 = vector.broadcast %cst_303 : f32 to vector<2x1xf32>
    %1841 = arith.select %1839, %1836, %1840 : vector<2x1xi1>, vector<2x1xf32>
    %1842 = vector.broadcast %1841 : vector<2x1xf32> to vector<2x96xf32>
    %1843 = vector.broadcast %187 : vector<1x96xf32> to vector<2x96xf32>
    %1844 = arith.mulf %1842, %1843 : vector<2x96xf32>
    %1845 = arith.addf %1832, %1844 : vector<2x96xf32>
    %1846 = arith.select %1839, %1835, %1769 : vector<2x1xi1>, vector<2x1xf32>
    %1847 = vector.extract_strided_slice %181 {offsets = [21, 0, 0], sizes = [1, 2, 1], strides = [1, 1, 1]} : vector<24x2x1xf32> to vector<1x2x1xf32>
    %1848 = vector.shape_cast %1847 : vector<1x2x1xf32> to vector<2x1xf32>
    %1849 = arith.subf %1848, %1782 : vector<2x1xf32>
    %1850 = math.absf %1849 : vector<2x1xf32>
    %cst_304 = arith.constant 1.000000e-01 : f32
    %1851 = vector.broadcast %cst_304 : f32 to vector<2x1xf32>
    %1852 = arith.cmpf oge, %1850, %1851 : vector<2x1xf32>
    %cst_305 = arith.constant 0.000000e+00 : f32
    %1853 = vector.broadcast %cst_305 : f32 to vector<2x1xf32>
    %1854 = arith.select %1852, %1849, %1853 : vector<2x1xi1>, vector<2x1xf32>
    %1855 = vector.broadcast %1854 : vector<2x1xf32> to vector<2x96xf32>
    %1856 = vector.broadcast %188 : vector<1x96xf32> to vector<2x96xf32>
    %1857 = arith.mulf %1855, %1856 : vector<2x96xf32>
    %1858 = arith.addf %1845, %1857 : vector<2x96xf32>
    %1859 = arith.select %1852, %1848, %1782 : vector<2x1xi1>, vector<2x1xf32>
    %1860 = vector.extract_strided_slice %182 {offsets = [21, 0, 0], sizes = [1, 2, 1], strides = [1, 1, 1]} : vector<24x2x1xf32> to vector<1x2x1xf32>
    %1861 = vector.shape_cast %1860 : vector<1x2x1xf32> to vector<2x1xf32>
    %1862 = arith.subf %1861, %1795 : vector<2x1xf32>
    %1863 = math.absf %1862 : vector<2x1xf32>
    %cst_306 = arith.constant 1.000000e-01 : f32
    %1864 = vector.broadcast %cst_306 : f32 to vector<2x1xf32>
    %1865 = arith.cmpf oge, %1863, %1864 : vector<2x1xf32>
    %cst_307 = arith.constant 0.000000e+00 : f32
    %1866 = vector.broadcast %cst_307 : f32 to vector<2x1xf32>
    %1867 = arith.select %1865, %1862, %1866 : vector<2x1xi1>, vector<2x1xf32>
    %1868 = vector.broadcast %1867 : vector<2x1xf32> to vector<2x96xf32>
    %1869 = vector.broadcast %189 : vector<1x96xf32> to vector<2x96xf32>
    %1870 = arith.mulf %1868, %1869 : vector<2x96xf32>
    %1871 = arith.addf %1858, %1870 : vector<2x96xf32>
    %1872 = arith.select %1865, %1861, %1795 : vector<2x1xi1>, vector<2x1xf32>
    %1873 = vector.extract_strided_slice %183 {offsets = [21, 0, 0], sizes = [1, 2, 1], strides = [1, 1, 1]} : vector<24x2x1xf32> to vector<1x2x1xf32>
    %1874 = vector.shape_cast %1873 : vector<1x2x1xf32> to vector<2x1xf32>
    %1875 = arith.subf %1874, %1808 : vector<2x1xf32>
    %1876 = math.absf %1875 : vector<2x1xf32>
    %cst_308 = arith.constant 1.000000e-01 : f32
    %1877 = vector.broadcast %cst_308 : f32 to vector<2x1xf32>
    %1878 = arith.cmpf oge, %1876, %1877 : vector<2x1xf32>
    %cst_309 = arith.constant 0.000000e+00 : f32
    %1879 = vector.broadcast %cst_309 : f32 to vector<2x1xf32>
    %1880 = arith.select %1878, %1875, %1879 : vector<2x1xi1>, vector<2x1xf32>
    %1881 = vector.broadcast %1880 : vector<2x1xf32> to vector<2x96xf32>
    %1882 = vector.broadcast %190 : vector<1x96xf32> to vector<2x96xf32>
    %1883 = arith.mulf %1881, %1882 : vector<2x96xf32>
    %1884 = arith.addf %1871, %1883 : vector<2x96xf32>
    %1885 = arith.select %1878, %1874, %1808 : vector<2x1xi1>, vector<2x1xf32>
    %1886 = vector.extract_strided_slice %174 {offsets = [22, 0, 0], sizes = [1, 2, 1], strides = [1, 1, 1]} : vector<24x2x1xf32> to vector<1x2x1xf32>
    %1887 = vector.shape_cast %1886 : vector<1x2x1xf32> to vector<2x1xf32>
    %1888 = arith.subf %1887, %1820 : vector<2x1xf32>
    %1889 = math.absf %1888 : vector<2x1xf32>
    %cst_310 = arith.constant 1.000000e-01 : f32
    %1890 = vector.broadcast %cst_310 : f32 to vector<2x1xf32>
    %1891 = arith.cmpf oge, %1889, %1890 : vector<2x1xf32>
    %cst_311 = arith.constant 0.000000e+00 : f32
    %1892 = vector.broadcast %cst_311 : f32 to vector<2x1xf32>
    %1893 = arith.select %1891, %1888, %1892 : vector<2x1xi1>, vector<2x1xf32>
    %1894 = vector.broadcast %1893 : vector<2x1xf32> to vector<2x96xf32>
    %1895 = vector.broadcast %185 : vector<1x96xf32> to vector<2x96xf32>
    %1896 = arith.mulf %1894, %1895 : vector<2x96xf32>
    %1897 = arith.select %1891, %1887, %1820 : vector<2x1xi1>, vector<2x1xf32>
    %1898 = vector.extract_strided_slice %175 {offsets = [22, 0, 0], sizes = [1, 2, 1], strides = [1, 1, 1]} : vector<24x2x1xf32> to vector<1x2x1xf32>
    %1899 = vector.shape_cast %1898 : vector<1x2x1xf32> to vector<2x1xf32>
    %1900 = arith.subf %1899, %1833 : vector<2x1xf32>
    %1901 = math.absf %1900 : vector<2x1xf32>
    %cst_312 = arith.constant 1.000000e-01 : f32
    %1902 = vector.broadcast %cst_312 : f32 to vector<2x1xf32>
    %1903 = arith.cmpf oge, %1901, %1902 : vector<2x1xf32>
    %cst_313 = arith.constant 0.000000e+00 : f32
    %1904 = vector.broadcast %cst_313 : f32 to vector<2x1xf32>
    %1905 = arith.select %1903, %1900, %1904 : vector<2x1xi1>, vector<2x1xf32>
    %1906 = vector.broadcast %1905 : vector<2x1xf32> to vector<2x96xf32>
    %1907 = vector.broadcast %186 : vector<1x96xf32> to vector<2x96xf32>
    %1908 = arith.mulf %1906, %1907 : vector<2x96xf32>
    %1909 = arith.addf %1896, %1908 : vector<2x96xf32>
    %1910 = arith.select %1903, %1899, %1833 : vector<2x1xi1>, vector<2x1xf32>
    %1911 = vector.extract_strided_slice %179 {offsets = [22, 0, 0], sizes = [1, 2, 1], strides = [1, 1, 1]} : vector<24x2x1xf32> to vector<1x2x1xf32>
    %1912 = vector.shape_cast %1911 : vector<1x2x1xf32> to vector<2x1xf32>
    %1913 = arith.subf %1912, %1846 : vector<2x1xf32>
    %1914 = math.absf %1913 : vector<2x1xf32>
    %cst_314 = arith.constant 1.000000e-01 : f32
    %1915 = vector.broadcast %cst_314 : f32 to vector<2x1xf32>
    %1916 = arith.cmpf oge, %1914, %1915 : vector<2x1xf32>
    %cst_315 = arith.constant 0.000000e+00 : f32
    %1917 = vector.broadcast %cst_315 : f32 to vector<2x1xf32>
    %1918 = arith.select %1916, %1913, %1917 : vector<2x1xi1>, vector<2x1xf32>
    %1919 = vector.broadcast %1918 : vector<2x1xf32> to vector<2x96xf32>
    %1920 = vector.broadcast %187 : vector<1x96xf32> to vector<2x96xf32>
    %1921 = arith.mulf %1919, %1920 : vector<2x96xf32>
    %1922 = arith.addf %1909, %1921 : vector<2x96xf32>
    %1923 = arith.select %1916, %1912, %1846 : vector<2x1xi1>, vector<2x1xf32>
    %1924 = vector.extract_strided_slice %181 {offsets = [22, 0, 0], sizes = [1, 2, 1], strides = [1, 1, 1]} : vector<24x2x1xf32> to vector<1x2x1xf32>
    %1925 = vector.shape_cast %1924 : vector<1x2x1xf32> to vector<2x1xf32>
    %1926 = arith.subf %1925, %1859 : vector<2x1xf32>
    %1927 = math.absf %1926 : vector<2x1xf32>
    %cst_316 = arith.constant 1.000000e-01 : f32
    %1928 = vector.broadcast %cst_316 : f32 to vector<2x1xf32>
    %1929 = arith.cmpf oge, %1927, %1928 : vector<2x1xf32>
    %cst_317 = arith.constant 0.000000e+00 : f32
    %1930 = vector.broadcast %cst_317 : f32 to vector<2x1xf32>
    %1931 = arith.select %1929, %1926, %1930 : vector<2x1xi1>, vector<2x1xf32>
    %1932 = vector.broadcast %1931 : vector<2x1xf32> to vector<2x96xf32>
    %1933 = vector.broadcast %188 : vector<1x96xf32> to vector<2x96xf32>
    %1934 = arith.mulf %1932, %1933 : vector<2x96xf32>
    %1935 = arith.addf %1922, %1934 : vector<2x96xf32>
    %1936 = arith.select %1929, %1925, %1859 : vector<2x1xi1>, vector<2x1xf32>
    %1937 = vector.extract_strided_slice %182 {offsets = [22, 0, 0], sizes = [1, 2, 1], strides = [1, 1, 1]} : vector<24x2x1xf32> to vector<1x2x1xf32>
    %1938 = vector.shape_cast %1937 : vector<1x2x1xf32> to vector<2x1xf32>
    %1939 = arith.subf %1938, %1872 : vector<2x1xf32>
    %1940 = math.absf %1939 : vector<2x1xf32>
    %cst_318 = arith.constant 1.000000e-01 : f32
    %1941 = vector.broadcast %cst_318 : f32 to vector<2x1xf32>
    %1942 = arith.cmpf oge, %1940, %1941 : vector<2x1xf32>
    %cst_319 = arith.constant 0.000000e+00 : f32
    %1943 = vector.broadcast %cst_319 : f32 to vector<2x1xf32>
    %1944 = arith.select %1942, %1939, %1943 : vector<2x1xi1>, vector<2x1xf32>
    %1945 = vector.broadcast %1944 : vector<2x1xf32> to vector<2x96xf32>
    %1946 = vector.broadcast %189 : vector<1x96xf32> to vector<2x96xf32>
    %1947 = arith.mulf %1945, %1946 : vector<2x96xf32>
    %1948 = arith.addf %1935, %1947 : vector<2x96xf32>
    %1949 = arith.select %1942, %1938, %1872 : vector<2x1xi1>, vector<2x1xf32>
    %1950 = vector.extract_strided_slice %183 {offsets = [22, 0, 0], sizes = [1, 2, 1], strides = [1, 1, 1]} : vector<24x2x1xf32> to vector<1x2x1xf32>
    %1951 = vector.shape_cast %1950 : vector<1x2x1xf32> to vector<2x1xf32>
    %1952 = arith.subf %1951, %1885 : vector<2x1xf32>
    %1953 = math.absf %1952 : vector<2x1xf32>
    %cst_320 = arith.constant 1.000000e-01 : f32
    %1954 = vector.broadcast %cst_320 : f32 to vector<2x1xf32>
    %1955 = arith.cmpf oge, %1953, %1954 : vector<2x1xf32>
    %cst_321 = arith.constant 0.000000e+00 : f32
    %1956 = vector.broadcast %cst_321 : f32 to vector<2x1xf32>
    %1957 = arith.select %1955, %1952, %1956 : vector<2x1xi1>, vector<2x1xf32>
    %1958 = vector.broadcast %1957 : vector<2x1xf32> to vector<2x96xf32>
    %1959 = vector.broadcast %190 : vector<1x96xf32> to vector<2x96xf32>
    %1960 = arith.mulf %1958, %1959 : vector<2x96xf32>
    %1961 = arith.addf %1948, %1960 : vector<2x96xf32>
    %1962 = arith.select %1955, %1951, %1885 : vector<2x1xi1>, vector<2x1xf32>
    %1963 = vector.extract_strided_slice %174 {offsets = [23, 0, 0], sizes = [1, 2, 1], strides = [1, 1, 1]} : vector<24x2x1xf32> to vector<1x2x1xf32>
    %1964 = vector.shape_cast %1963 : vector<1x2x1xf32> to vector<2x1xf32>
    %1965 = arith.subf %1964, %1897 : vector<2x1xf32>
    %1966 = math.absf %1965 : vector<2x1xf32>
    %cst_322 = arith.constant 1.000000e-01 : f32
    %1967 = vector.broadcast %cst_322 : f32 to vector<2x1xf32>
    %1968 = arith.cmpf oge, %1966, %1967 : vector<2x1xf32>
    %cst_323 = arith.constant 0.000000e+00 : f32
    %1969 = vector.broadcast %cst_323 : f32 to vector<2x1xf32>
    %1970 = arith.select %1968, %1965, %1969 : vector<2x1xi1>, vector<2x1xf32>
    %1971 = vector.broadcast %1970 : vector<2x1xf32> to vector<2x96xf32>
    %1972 = vector.broadcast %185 : vector<1x96xf32> to vector<2x96xf32>
    %1973 = arith.mulf %1971, %1972 : vector<2x96xf32>
    %1974 = vector.extract_strided_slice %175 {offsets = [23, 0, 0], sizes = [1, 2, 1], strides = [1, 1, 1]} : vector<24x2x1xf32> to vector<1x2x1xf32>
    %1975 = vector.shape_cast %1974 : vector<1x2x1xf32> to vector<2x1xf32>
    %1976 = arith.subf %1975, %1910 : vector<2x1xf32>
    %1977 = math.absf %1976 : vector<2x1xf32>
    %cst_324 = arith.constant 1.000000e-01 : f32
    %1978 = vector.broadcast %cst_324 : f32 to vector<2x1xf32>
    %1979 = arith.cmpf oge, %1977, %1978 : vector<2x1xf32>
    %cst_325 = arith.constant 0.000000e+00 : f32
    %1980 = vector.broadcast %cst_325 : f32 to vector<2x1xf32>
    %1981 = arith.select %1979, %1976, %1980 : vector<2x1xi1>, vector<2x1xf32>
    %1982 = vector.broadcast %1981 : vector<2x1xf32> to vector<2x96xf32>
    %1983 = vector.broadcast %186 : vector<1x96xf32> to vector<2x96xf32>
    %1984 = arith.mulf %1982, %1983 : vector<2x96xf32>
    %1985 = arith.addf %1973, %1984 : vector<2x96xf32>
    %1986 = vector.extract_strided_slice %179 {offsets = [23, 0, 0], sizes = [1, 2, 1], strides = [1, 1, 1]} : vector<24x2x1xf32> to vector<1x2x1xf32>
    %1987 = vector.shape_cast %1986 : vector<1x2x1xf32> to vector<2x1xf32>
    %1988 = arith.subf %1987, %1923 : vector<2x1xf32>
    %1989 = math.absf %1988 : vector<2x1xf32>
    %cst_326 = arith.constant 1.000000e-01 : f32
    %1990 = vector.broadcast %cst_326 : f32 to vector<2x1xf32>
    %1991 = arith.cmpf oge, %1989, %1990 : vector<2x1xf32>
    %cst_327 = arith.constant 0.000000e+00 : f32
    %1992 = vector.broadcast %cst_327 : f32 to vector<2x1xf32>
    %1993 = arith.select %1991, %1988, %1992 : vector<2x1xi1>, vector<2x1xf32>
    %1994 = vector.broadcast %1993 : vector<2x1xf32> to vector<2x96xf32>
    %1995 = vector.broadcast %187 : vector<1x96xf32> to vector<2x96xf32>
    %1996 = arith.mulf %1994, %1995 : vector<2x96xf32>
    %1997 = arith.addf %1985, %1996 : vector<2x96xf32>
    %1998 = vector.extract_strided_slice %181 {offsets = [23, 0, 0], sizes = [1, 2, 1], strides = [1, 1, 1]} : vector<24x2x1xf32> to vector<1x2x1xf32>
    %1999 = vector.shape_cast %1998 : vector<1x2x1xf32> to vector<2x1xf32>
    %2000 = arith.subf %1999, %1936 : vector<2x1xf32>
    %2001 = math.absf %2000 : vector<2x1xf32>
    %cst_328 = arith.constant 1.000000e-01 : f32
    %2002 = vector.broadcast %cst_328 : f32 to vector<2x1xf32>
    %2003 = arith.cmpf oge, %2001, %2002 : vector<2x1xf32>
    %cst_329 = arith.constant 0.000000e+00 : f32
    %2004 = vector.broadcast %cst_329 : f32 to vector<2x1xf32>
    %2005 = arith.select %2003, %2000, %2004 : vector<2x1xi1>, vector<2x1xf32>
    %2006 = vector.broadcast %2005 : vector<2x1xf32> to vector<2x96xf32>
    %2007 = vector.broadcast %188 : vector<1x96xf32> to vector<2x96xf32>
    %2008 = arith.mulf %2006, %2007 : vector<2x96xf32>
    %2009 = arith.addf %1997, %2008 : vector<2x96xf32>
    %2010 = vector.extract_strided_slice %182 {offsets = [23, 0, 0], sizes = [1, 2, 1], strides = [1, 1, 1]} : vector<24x2x1xf32> to vector<1x2x1xf32>
    %2011 = vector.shape_cast %2010 : vector<1x2x1xf32> to vector<2x1xf32>
    %2012 = arith.subf %2011, %1949 : vector<2x1xf32>
    %2013 = math.absf %2012 : vector<2x1xf32>
    %cst_330 = arith.constant 1.000000e-01 : f32
    %2014 = vector.broadcast %cst_330 : f32 to vector<2x1xf32>
    %2015 = arith.cmpf oge, %2013, %2014 : vector<2x1xf32>
    %cst_331 = arith.constant 0.000000e+00 : f32
    %2016 = vector.broadcast %cst_331 : f32 to vector<2x1xf32>
    %2017 = arith.select %2015, %2012, %2016 : vector<2x1xi1>, vector<2x1xf32>
    %2018 = vector.broadcast %2017 : vector<2x1xf32> to vector<2x96xf32>
    %2019 = vector.broadcast %189 : vector<1x96xf32> to vector<2x96xf32>
    %2020 = arith.mulf %2018, %2019 : vector<2x96xf32>
    %2021 = arith.addf %2009, %2020 : vector<2x96xf32>
    %2022 = vector.extract_strided_slice %183 {offsets = [23, 0, 0], sizes = [1, 2, 1], strides = [1, 1, 1]} : vector<24x2x1xf32> to vector<1x2x1xf32>
    %2023 = vector.shape_cast %2022 : vector<1x2x1xf32> to vector<2x1xf32>
    %2024 = arith.subf %2023, %1962 : vector<2x1xf32>
    %2025 = math.absf %2024 : vector<2x1xf32>
    %cst_332 = arith.constant 1.000000e-01 : f32
    %2026 = vector.broadcast %cst_332 : f32 to vector<2x1xf32>
    %2027 = arith.cmpf oge, %2025, %2026 : vector<2x1xf32>
    %cst_333 = arith.constant 0.000000e+00 : f32
    %2028 = vector.broadcast %cst_333 : f32 to vector<2x1xf32>
    %2029 = arith.select %2027, %2024, %2028 : vector<2x1xi1>, vector<2x1xf32>
    %2030 = vector.broadcast %2029 : vector<2x1xf32> to vector<2x96xf32>
    %2031 = vector.broadcast %190 : vector<1x96xf32> to vector<2x96xf32>
    %2032 = arith.mulf %2030, %2031 : vector<2x96xf32>
    %2033 = arith.addf %2021, %2032 : vector<2x96xf32>
    %c0_334 = arith.constant 0 : index
    %c0_335 = arith.constant 0 : index
    %2034 = vector.load %arg5[%c0_334, %c0_335] : memref<32x96xf32, #tpu.memory_space<vmem>>, vector<32x96xf32>
    %2035 = tpu.iota {dimensions = array<i32: 1>} : vector<2x96xi32>
    %c64_i32 = arith.constant 64 : i32
    %2036 = vector.broadcast %c64_i32 : i32 to vector<2x96xi32>
    %2037 = arith.cmpi slt, %2035, %2036 : vector<2x96xi32>
    %2038 = arith.extui %2037 : vector<2x96xi1> to vector<2x96xi32>
    %2039 = arith.sitofp %2038 : vector<2x96xi32> to vector<2x96xf32>
    %cst_336 = arith.constant 0.000000e+00 : f32
    %2040 = vector.broadcast %cst_336 : f32 to vector<2x32xf32>
    %cst_337 = arith.constant 0.000000e+00 : f32
    %2041 = vector.broadcast %cst_337 : f32 to vector<2x32xf32>
    %cst_338 = arith.constant 0.000000e+00 : f32
    %2042 = vector.broadcast %cst_338 : f32 to vector<2x96xf32>
    %cst_339 = arith.constant 0.000000e+00 : f32
    %2043 = vector.broadcast %cst_339 : f32 to vector<2x32xf32>
    %2044 = arith.subf %2040, %2041 : vector<2x32xf32>
    %2045 = math.absf %2044 : vector<2x32xf32>
    %cst_340 = arith.constant 5.000000e-02 : f32
    %2046 = vector.broadcast %cst_340 : f32 to vector<2x32xf32>
    %2047 = arith.cmpf oge, %2045, %2046 : vector<2x32xf32>
    %cst_341 = arith.constant 0.000000e+00 : f32
    %2048 = vector.broadcast %cst_341 : f32 to vector<2x32xf32>
    %2049 = arith.select %2047, %2044, %2048 : vector<2x32xi1>, vector<2x32xf32>
    %2050 = arith.select %2047, %2040, %2041 : vector<2x32xi1>, vector<2x32xf32>
    %cst_342 = arith.constant dense<0.000000e+00> : vector<2x96xf32>
    %2051 = tpu.matmul %2049, %2034, %cst_342 {dimension_numbers = #tpu.dot_dimension_numbers<[1], [0], [0], [1], [0, 0, 1, 1], [], []>} : vector<2x32xf32>, vector<32x96xf32>, vector<2x96xf32> -> vector<2x96xf32>
    %2052 = arith.addf %267, %2042 : vector<2x96xf32>
    %2053 = arith.mulf %2051, %2039 : vector<2x96xf32>
    %2054 = arith.addf %2052, %2053 : vector<2x96xf32>
    %2055 = vector.extract_strided_slice %2051 {offsets = [0, 64], sizes = [2, 32], strides = [1, 1]} : vector<2x96xf32> to vector<2x32xf32>
    %2056 = arith.addf %2043, %2055 : vector<2x32xf32>
    %2057 = arith.negf %2054 : vector<2x96xf32>
    %2058 = math.exp %2057 : vector<2x96xf32>
    %cst_343 = arith.constant 1.000000e+00 : f32
    %2059 = vector.broadcast %cst_343 : f32 to vector<2x96xf32>
    %2060 = arith.addf %2059, %2058 : vector<2x96xf32>
    %2061 = arith.divf %2059, %2060 : vector<2x96xf32>
    %2062 = vector.extract_strided_slice %2061 {offsets = [0, 0], sizes = [2, 32], strides = [1, 1]} : vector<2x96xf32> to vector<2x32xf32>
    %2063 = vector.extract_strided_slice %2061 {offsets = [0, 32], sizes = [2, 32], strides = [1, 1]} : vector<2x96xf32> to vector<2x32xf32>
    %2064 = vector.extract_strided_slice %2054 {offsets = [0, 64], sizes = [2, 32], strides = [1, 1]} : vector<2x96xf32> to vector<2x32xf32>
    %2065 = arith.mulf %2062, %2056 : vector<2x32xf32>
    %2066 = arith.addf %2064, %2065 : vector<2x32xf32>
    %2067 = math.tanh %2066 : vector<2x32xf32>
    %2068 = arith.subf %2040, %2067 : vector<2x32xf32>
    %2069 = arith.mulf %2063, %2068 : vector<2x32xf32>
    %2070 = arith.addf %2067, %2069 : vector<2x32xf32>
    %2071 = arith.subf %2070, %2050 : vector<2x32xf32>
    %2072 = math.absf %2071 : vector<2x32xf32>
    %cst_344 = arith.constant 5.000000e-02 : f32
    %2073 = vector.broadcast %cst_344 : f32 to vector<2x32xf32>
    %2074 = arith.cmpf oge, %2072, %2073 : vector<2x32xf32>
    %cst_345 = arith.constant 0.000000e+00 : f32
    %2075 = vector.broadcast %cst_345 : f32 to vector<2x32xf32>
    %2076 = arith.select %2074, %2071, %2075 : vector<2x32xi1>, vector<2x32xf32>
    %2077 = arith.select %2074, %2070, %2050 : vector<2x32xi1>, vector<2x32xf32>
    %cst_346 = arith.constant dense<0.000000e+00> : vector<2x96xf32>
    %2078 = tpu.matmul %2076, %2034, %cst_346 {dimension_numbers = #tpu.dot_dimension_numbers<[1], [0], [0], [1], [0, 0, 1, 1], [], []>} : vector<2x32xf32>, vector<32x96xf32>, vector<2x96xf32> -> vector<2x96xf32>
    %2079 = arith.addf %344, %2054 : vector<2x96xf32>
    %2080 = arith.mulf %2078, %2039 : vector<2x96xf32>
    %2081 = arith.addf %2079, %2080 : vector<2x96xf32>
    %2082 = vector.extract_strided_slice %2078 {offsets = [0, 64], sizes = [2, 32], strides = [1, 1]} : vector<2x96xf32> to vector<2x32xf32>
    %2083 = arith.addf %2056, %2082 : vector<2x32xf32>
    %2084 = arith.negf %2081 : vector<2x96xf32>
    %2085 = math.exp %2084 : vector<2x96xf32>
    %cst_347 = arith.constant 1.000000e+00 : f32
    %2086 = vector.broadcast %cst_347 : f32 to vector<2x96xf32>
    %2087 = arith.addf %2086, %2085 : vector<2x96xf32>
    %2088 = arith.divf %2086, %2087 : vector<2x96xf32>
    %2089 = vector.extract_strided_slice %2088 {offsets = [0, 0], sizes = [2, 32], strides = [1, 1]} : vector<2x96xf32> to vector<2x32xf32>
    %2090 = vector.extract_strided_slice %2088 {offsets = [0, 32], sizes = [2, 32], strides = [1, 1]} : vector<2x96xf32> to vector<2x32xf32>
    %2091 = vector.extract_strided_slice %2081 {offsets = [0, 64], sizes = [2, 32], strides = [1, 1]} : vector<2x96xf32> to vector<2x32xf32>
    %2092 = arith.mulf %2089, %2083 : vector<2x32xf32>
    %2093 = arith.addf %2091, %2092 : vector<2x32xf32>
    %2094 = math.tanh %2093 : vector<2x32xf32>
    %2095 = arith.subf %2070, %2094 : vector<2x32xf32>
    %2096 = arith.mulf %2090, %2095 : vector<2x32xf32>
    %2097 = arith.addf %2094, %2096 : vector<2x32xf32>
    %2098 = arith.subf %2097, %2077 : vector<2x32xf32>
    %2099 = math.absf %2098 : vector<2x32xf32>
    %cst_348 = arith.constant 5.000000e-02 : f32
    %2100 = vector.broadcast %cst_348 : f32 to vector<2x32xf32>
    %2101 = arith.cmpf oge, %2099, %2100 : vector<2x32xf32>
    %cst_349 = arith.constant 0.000000e+00 : f32
    %2102 = vector.broadcast %cst_349 : f32 to vector<2x32xf32>
    %2103 = arith.select %2101, %2098, %2102 : vector<2x32xi1>, vector<2x32xf32>
    %2104 = arith.select %2101, %2097, %2077 : vector<2x32xi1>, vector<2x32xf32>
    %cst_350 = arith.constant dense<0.000000e+00> : vector<2x96xf32>
    %2105 = tpu.matmul %2103, %2034, %cst_350 {dimension_numbers = #tpu.dot_dimension_numbers<[1], [0], [0], [1], [0, 0, 1, 1], [], []>} : vector<2x32xf32>, vector<32x96xf32>, vector<2x96xf32> -> vector<2x96xf32>
    %2106 = arith.addf %421, %2081 : vector<2x96xf32>
    %2107 = arith.mulf %2105, %2039 : vector<2x96xf32>
    %2108 = arith.addf %2106, %2107 : vector<2x96xf32>
    %2109 = vector.extract_strided_slice %2105 {offsets = [0, 64], sizes = [2, 32], strides = [1, 1]} : vector<2x96xf32> to vector<2x32xf32>
    %2110 = arith.addf %2083, %2109 : vector<2x32xf32>
    %2111 = arith.negf %2108 : vector<2x96xf32>
    %2112 = math.exp %2111 : vector<2x96xf32>
    %cst_351 = arith.constant 1.000000e+00 : f32
    %2113 = vector.broadcast %cst_351 : f32 to vector<2x96xf32>
    %2114 = arith.addf %2113, %2112 : vector<2x96xf32>
    %2115 = arith.divf %2113, %2114 : vector<2x96xf32>
    %2116 = vector.extract_strided_slice %2115 {offsets = [0, 0], sizes = [2, 32], strides = [1, 1]} : vector<2x96xf32> to vector<2x32xf32>
    %2117 = vector.extract_strided_slice %2115 {offsets = [0, 32], sizes = [2, 32], strides = [1, 1]} : vector<2x96xf32> to vector<2x32xf32>
    %2118 = vector.extract_strided_slice %2108 {offsets = [0, 64], sizes = [2, 32], strides = [1, 1]} : vector<2x96xf32> to vector<2x32xf32>
    %2119 = arith.mulf %2116, %2110 : vector<2x32xf32>
    %2120 = arith.addf %2118, %2119 : vector<2x32xf32>
    %2121 = math.tanh %2120 : vector<2x32xf32>
    %2122 = arith.subf %2097, %2121 : vector<2x32xf32>
    %2123 = arith.mulf %2117, %2122 : vector<2x32xf32>
    %2124 = arith.addf %2121, %2123 : vector<2x32xf32>
    %2125 = arith.subf %2124, %2104 : vector<2x32xf32>
    %2126 = math.absf %2125 : vector<2x32xf32>
    %cst_352 = arith.constant 5.000000e-02 : f32
    %2127 = vector.broadcast %cst_352 : f32 to vector<2x32xf32>
    %2128 = arith.cmpf oge, %2126, %2127 : vector<2x32xf32>
    %cst_353 = arith.constant 0.000000e+00 : f32
    %2129 = vector.broadcast %cst_353 : f32 to vector<2x32xf32>
    %2130 = arith.select %2128, %2125, %2129 : vector<2x32xi1>, vector<2x32xf32>
    %2131 = arith.select %2128, %2124, %2104 : vector<2x32xi1>, vector<2x32xf32>
    %cst_354 = arith.constant dense<0.000000e+00> : vector<2x96xf32>
    %2132 = tpu.matmul %2130, %2034, %cst_354 {dimension_numbers = #tpu.dot_dimension_numbers<[1], [0], [0], [1], [0, 0, 1, 1], [], []>} : vector<2x32xf32>, vector<32x96xf32>, vector<2x96xf32> -> vector<2x96xf32>
    %2133 = arith.addf %498, %2108 : vector<2x96xf32>
    %2134 = arith.mulf %2132, %2039 : vector<2x96xf32>
    %2135 = arith.addf %2133, %2134 : vector<2x96xf32>
    %2136 = vector.extract_strided_slice %2132 {offsets = [0, 64], sizes = [2, 32], strides = [1, 1]} : vector<2x96xf32> to vector<2x32xf32>
    %2137 = arith.addf %2110, %2136 : vector<2x32xf32>
    %2138 = arith.negf %2135 : vector<2x96xf32>
    %2139 = math.exp %2138 : vector<2x96xf32>
    %cst_355 = arith.constant 1.000000e+00 : f32
    %2140 = vector.broadcast %cst_355 : f32 to vector<2x96xf32>
    %2141 = arith.addf %2140, %2139 : vector<2x96xf32>
    %2142 = arith.divf %2140, %2141 : vector<2x96xf32>
    %2143 = vector.extract_strided_slice %2142 {offsets = [0, 0], sizes = [2, 32], strides = [1, 1]} : vector<2x96xf32> to vector<2x32xf32>
    %2144 = vector.extract_strided_slice %2142 {offsets = [0, 32], sizes = [2, 32], strides = [1, 1]} : vector<2x96xf32> to vector<2x32xf32>
    %2145 = vector.extract_strided_slice %2135 {offsets = [0, 64], sizes = [2, 32], strides = [1, 1]} : vector<2x96xf32> to vector<2x32xf32>
    %2146 = arith.mulf %2143, %2137 : vector<2x32xf32>
    %2147 = arith.addf %2145, %2146 : vector<2x32xf32>
    %2148 = math.tanh %2147 : vector<2x32xf32>
    %2149 = arith.subf %2124, %2148 : vector<2x32xf32>
    %2150 = arith.mulf %2144, %2149 : vector<2x32xf32>
    %2151 = arith.addf %2148, %2150 : vector<2x32xf32>
    %2152 = tpu.concatenate %2070, %2097, %2124, %2151 in 1 : vector<2x32xf32>, vector<2x32xf32>, vector<2x32xf32>, vector<2x32xf32> -> vector<2x128xf32>
    %c0_356 = arith.constant 0 : index
    %c0_357 = arith.constant 0 : index
    %c0_358 = arith.constant 0 : index
    %2153 = vector.load %arg6[%c0_356, %c0_357, %c0_358] : memref<6x2x128xf32, #tpu.memory_space<vmem>>, vector<1x2x128xf32>
    %2154 = vector.shape_cast %2153 : vector<1x2x128xf32> to vector<2x128xf32>
    %2155 = vector.shape_cast %2152 : vector<2x128xf32> to vector<1x2x128xf32>
    tpu.vector_store %arg6[%c0_356, %c0_357, %c0_358], %2155 {strides = array<i32>} : memref<6x2x128xf32, #tpu.memory_space<vmem>>, vector<1x2x128xf32>,
    %2156 = arith.subf %2151, %2131 : vector<2x32xf32>
    %2157 = math.absf %2156 : vector<2x32xf32>
    %cst_359 = arith.constant 5.000000e-02 : f32
    %2158 = vector.broadcast %cst_359 : f32 to vector<2x32xf32>
    %2159 = arith.cmpf oge, %2157, %2158 : vector<2x32xf32>
    %cst_360 = arith.constant 0.000000e+00 : f32
    %2160 = vector.broadcast %cst_360 : f32 to vector<2x32xf32>
    %2161 = arith.select %2159, %2156, %2160 : vector<2x32xi1>, vector<2x32xf32>
    %2162 = arith.select %2159, %2151, %2131 : vector<2x32xi1>, vector<2x32xf32>
    %cst_361 = arith.constant dense<0.000000e+00> : vector<2x96xf32>
    %2163 = tpu.matmul %2161, %2034, %cst_361 {dimension_numbers = #tpu.dot_dimension_numbers<[1], [0], [0], [1], [0, 0, 1, 1], [], []>} : vector<2x32xf32>, vector<32x96xf32>, vector<2x96xf32> -> vector<2x96xf32>
    %2164 = arith.addf %575, %2135 : vector<2x96xf32>
    %2165 = arith.mulf %2163, %2039 : vector<2x96xf32>
    %2166 = arith.addf %2164, %2165 : vector<2x96xf32>
    %2167 = vector.extract_strided_slice %2163 {offsets = [0, 64], sizes = [2, 32], strides = [1, 1]} : vector<2x96xf32> to vector<2x32xf32>
    %2168 = arith.addf %2137, %2167 : vector<2x32xf32>
    %2169 = arith.negf %2166 : vector<2x96xf32>
    %2170 = math.exp %2169 : vector<2x96xf32>
    %cst_362 = arith.constant 1.000000e+00 : f32
    %2171 = vector.broadcast %cst_362 : f32 to vector<2x96xf32>
    %2172 = arith.addf %2171, %2170 : vector<2x96xf32>
    %2173 = arith.divf %2171, %2172 : vector<2x96xf32>
    %2174 = vector.extract_strided_slice %2173 {offsets = [0, 0], sizes = [2, 32], strides = [1, 1]} : vector<2x96xf32> to vector<2x32xf32>
    %2175 = vector.extract_strided_slice %2173 {offsets = [0, 32], sizes = [2, 32], strides = [1, 1]} : vector<2x96xf32> to vector<2x32xf32>
    %2176 = vector.extract_strided_slice %2166 {offsets = [0, 64], sizes = [2, 32], strides = [1, 1]} : vector<2x96xf32> to vector<2x32xf32>
    %2177 = arith.mulf %2174, %2168 : vector<2x32xf32>
    %2178 = arith.addf %2176, %2177 : vector<2x32xf32>
    %2179 = math.tanh %2178 : vector<2x32xf32>
    %2180 = arith.subf %2151, %2179 : vector<2x32xf32>
    %2181 = arith.mulf %2175, %2180 : vector<2x32xf32>
    %2182 = arith.addf %2179, %2181 : vector<2x32xf32>
    %2183 = arith.subf %2182, %2162 : vector<2x32xf32>
    %2184 = math.absf %2183 : vector<2x32xf32>
    %cst_363 = arith.constant 5.000000e-02 : f32
    %2185 = vector.broadcast %cst_363 : f32 to vector<2x32xf32>
    %2186 = arith.cmpf oge, %2184, %2185 : vector<2x32xf32>
    %cst_364 = arith.constant 0.000000e+00 : f32
    %2187 = vector.broadcast %cst_364 : f32 to vector<2x32xf32>
    %2188 = arith.select %2186, %2183, %2187 : vector<2x32xi1>, vector<2x32xf32>
    %2189 = arith.select %2186, %2182, %2162 : vector<2x32xi1>, vector<2x32xf32>
    %cst_365 = arith.constant dense<0.000000e+00> : vector<2x96xf32>
    %2190 = tpu.matmul %2188, %2034, %cst_365 {dimension_numbers = #tpu.dot_dimension_numbers<[1], [0], [0], [1], [0, 0, 1, 1], [], []>} : vector<2x32xf32>, vector<32x96xf32>, vector<2x96xf32> -> vector<2x96xf32>
    %2191 = arith.addf %652, %2166 : vector<2x96xf32>
    %2192 = arith.mulf %2190, %2039 : vector<2x96xf32>
    %2193 = arith.addf %2191, %2192 : vector<2x96xf32>
    %2194 = vector.extract_strided_slice %2190 {offsets = [0, 64], sizes = [2, 32], strides = [1, 1]} : vector<2x96xf32> to vector<2x32xf32>
    %2195 = arith.addf %2168, %2194 : vector<2x32xf32>
    %2196 = arith.negf %2193 : vector<2x96xf32>
    %2197 = math.exp %2196 : vector<2x96xf32>
    %cst_366 = arith.constant 1.000000e+00 : f32
    %2198 = vector.broadcast %cst_366 : f32 to vector<2x96xf32>
    %2199 = arith.addf %2198, %2197 : vector<2x96xf32>
    %2200 = arith.divf %2198, %2199 : vector<2x96xf32>
    %2201 = vector.extract_strided_slice %2200 {offsets = [0, 0], sizes = [2, 32], strides = [1, 1]} : vector<2x96xf32> to vector<2x32xf32>
    %2202 = vector.extract_strided_slice %2200 {offsets = [0, 32], sizes = [2, 32], strides = [1, 1]} : vector<2x96xf32> to vector<2x32xf32>
    %2203 = vector.extract_strided_slice %2193 {offsets = [0, 64], sizes = [2, 32], strides = [1, 1]} : vector<2x96xf32> to vector<2x32xf32>
    %2204 = arith.mulf %2201, %2195 : vector<2x32xf32>
    %2205 = arith.addf %2203, %2204 : vector<2x32xf32>
    %2206 = math.tanh %2205 : vector<2x32xf32>
    %2207 = arith.subf %2182, %2206 : vector<2x32xf32>
    %2208 = arith.mulf %2202, %2207 : vector<2x32xf32>
    %2209 = arith.addf %2206, %2208 : vector<2x32xf32>
    %2210 = arith.subf %2209, %2189 : vector<2x32xf32>
    %2211 = math.absf %2210 : vector<2x32xf32>
    %cst_367 = arith.constant 5.000000e-02 : f32
    %2212 = vector.broadcast %cst_367 : f32 to vector<2x32xf32>
    %2213 = arith.cmpf oge, %2211, %2212 : vector<2x32xf32>
    %cst_368 = arith.constant 0.000000e+00 : f32
    %2214 = vector.broadcast %cst_368 : f32 to vector<2x32xf32>
    %2215 = arith.select %2213, %2210, %2214 : vector<2x32xi1>, vector<2x32xf32>
    %2216 = arith.select %2213, %2209, %2189 : vector<2x32xi1>, vector<2x32xf32>
    %cst_369 = arith.constant dense<0.000000e+00> : vector<2x96xf32>
    %2217 = tpu.matmul %2215, %2034, %cst_369 {dimension_numbers = #tpu.dot_dimension_numbers<[1], [0], [0], [1], [0, 0, 1, 1], [], []>} : vector<2x32xf32>, vector<32x96xf32>, vector<2x96xf32> -> vector<2x96xf32>
    %2218 = arith.addf %729, %2193 : vector<2x96xf32>
    %2219 = arith.mulf %2217, %2039 : vector<2x96xf32>
    %2220 = arith.addf %2218, %2219 : vector<2x96xf32>
    %2221 = vector.extract_strided_slice %2217 {offsets = [0, 64], sizes = [2, 32], strides = [1, 1]} : vector<2x96xf32> to vector<2x32xf32>
    %2222 = arith.addf %2195, %2221 : vector<2x32xf32>
    %2223 = arith.negf %2220 : vector<2x96xf32>
    %2224 = math.exp %2223 : vector<2x96xf32>
    %cst_370 = arith.constant 1.000000e+00 : f32
    %2225 = vector.broadcast %cst_370 : f32 to vector<2x96xf32>
    %2226 = arith.addf %2225, %2224 : vector<2x96xf32>
    %2227 = arith.divf %2225, %2226 : vector<2x96xf32>
    %2228 = vector.extract_strided_slice %2227 {offsets = [0, 0], sizes = [2, 32], strides = [1, 1]} : vector<2x96xf32> to vector<2x32xf32>
    %2229 = vector.extract_strided_slice %2227 {offsets = [0, 32], sizes = [2, 32], strides = [1, 1]} : vector<2x96xf32> to vector<2x32xf32>
    %2230 = vector.extract_strided_slice %2220 {offsets = [0, 64], sizes = [2, 32], strides = [1, 1]} : vector<2x96xf32> to vector<2x32xf32>
    %2231 = arith.mulf %2228, %2222 : vector<2x32xf32>
    %2232 = arith.addf %2230, %2231 : vector<2x32xf32>
    %2233 = math.tanh %2232 : vector<2x32xf32>
    %2234 = arith.subf %2209, %2233 : vector<2x32xf32>
    %2235 = arith.mulf %2229, %2234 : vector<2x32xf32>
    %2236 = arith.addf %2233, %2235 : vector<2x32xf32>
    %2237 = arith.subf %2236, %2216 : vector<2x32xf32>
    %2238 = math.absf %2237 : vector<2x32xf32>
    %cst_371 = arith.constant 5.000000e-02 : f32
    %2239 = vector.broadcast %cst_371 : f32 to vector<2x32xf32>
    %2240 = arith.cmpf oge, %2238, %2239 : vector<2x32xf32>
    %cst_372 = arith.constant 0.000000e+00 : f32
    %2241 = vector.broadcast %cst_372 : f32 to vector<2x32xf32>
    %2242 = arith.select %2240, %2237, %2241 : vector<2x32xi1>, vector<2x32xf32>
    %2243 = arith.select %2240, %2236, %2216 : vector<2x32xi1>, vector<2x32xf32>
    %cst_373 = arith.constant dense<0.000000e+00> : vector<2x96xf32>
    %2244 = tpu.matmul %2242, %2034, %cst_373 {dimension_numbers = #tpu.dot_dimension_numbers<[1], [0], [0], [1], [0, 0, 1, 1], [], []>} : vector<2x32xf32>, vector<32x96xf32>, vector<2x96xf32> -> vector<2x96xf32>
    %2245 = arith.addf %806, %2220 : vector<2x96xf32>
    %2246 = arith.mulf %2244, %2039 : vector<2x96xf32>
    %2247 = arith.addf %2245, %2246 : vector<2x96xf32>
    %2248 = vector.extract_strided_slice %2244 {offsets = [0, 64], sizes = [2, 32], strides = [1, 1]} : vector<2x96xf32> to vector<2x32xf32>
    %2249 = arith.addf %2222, %2248 : vector<2x32xf32>
    %2250 = arith.negf %2247 : vector<2x96xf32>
    %2251 = math.exp %2250 : vector<2x96xf32>
    %cst_374 = arith.constant 1.000000e+00 : f32
    %2252 = vector.broadcast %cst_374 : f32 to vector<2x96xf32>
    %2253 = arith.addf %2252, %2251 : vector<2x96xf32>
    %2254 = arith.divf %2252, %2253 : vector<2x96xf32>
    %2255 = vector.extract_strided_slice %2254 {offsets = [0, 0], sizes = [2, 32], strides = [1, 1]} : vector<2x96xf32> to vector<2x32xf32>
    %2256 = vector.extract_strided_slice %2254 {offsets = [0, 32], sizes = [2, 32], strides = [1, 1]} : vector<2x96xf32> to vector<2x32xf32>
    %2257 = vector.extract_strided_slice %2247 {offsets = [0, 64], sizes = [2, 32], strides = [1, 1]} : vector<2x96xf32> to vector<2x32xf32>
    %2258 = arith.mulf %2255, %2249 : vector<2x32xf32>
    %2259 = arith.addf %2257, %2258 : vector<2x32xf32>
    %2260 = math.tanh %2259 : vector<2x32xf32>
    %2261 = arith.subf %2236, %2260 : vector<2x32xf32>
    %2262 = arith.mulf %2256, %2261 : vector<2x32xf32>
    %2263 = arith.addf %2260, %2262 : vector<2x32xf32>
    %2264 = tpu.concatenate %2182, %2209, %2236, %2263 in 1 : vector<2x32xf32>, vector<2x32xf32>, vector<2x32xf32>, vector<2x32xf32> -> vector<2x128xf32>
    %c1_375 = arith.constant 1 : index
    %c0_376 = arith.constant 0 : index
    %c0_377 = arith.constant 0 : index
    %2265 = vector.load %arg6[%c1_375, %c0_376, %c0_377] : memref<6x2x128xf32, #tpu.memory_space<vmem>>, vector<1x2x128xf32>
    %2266 = vector.shape_cast %2265 : vector<1x2x128xf32> to vector<2x128xf32>
    %2267 = vector.shape_cast %2264 : vector<2x128xf32> to vector<1x2x128xf32>
    tpu.vector_store %arg6[%c1_375, %c0_376, %c0_377], %2267 {strides = array<i32>} : memref<6x2x128xf32, #tpu.memory_space<vmem>>, vector<1x2x128xf32>,
    %2268 = arith.subf %2263, %2243 : vector<2x32xf32>
    %2269 = math.absf %2268 : vector<2x32xf32>
    %cst_378 = arith.constant 5.000000e-02 : f32
    %2270 = vector.broadcast %cst_378 : f32 to vector<2x32xf32>
    %2271 = arith.cmpf oge, %2269, %2270 : vector<2x32xf32>
    %cst_379 = arith.constant 0.000000e+00 : f32
    %2272 = vector.broadcast %cst_379 : f32 to vector<2x32xf32>
    %2273 = arith.select %2271, %2268, %2272 : vector<2x32xi1>, vector<2x32xf32>
    %2274 = arith.select %2271, %2263, %2243 : vector<2x32xi1>, vector<2x32xf32>
    %cst_380 = arith.constant dense<0.000000e+00> : vector<2x96xf32>
    %2275 = tpu.matmul %2273, %2034, %cst_380 {dimension_numbers = #tpu.dot_dimension_numbers<[1], [0], [0], [1], [0, 0, 1, 1], [], []>} : vector<2x32xf32>, vector<32x96xf32>, vector<2x96xf32> -> vector<2x96xf32>
    %2276 = arith.addf %883, %2247 : vector<2x96xf32>
    %2277 = arith.mulf %2275, %2039 : vector<2x96xf32>
    %2278 = arith.addf %2276, %2277 : vector<2x96xf32>
    %2279 = vector.extract_strided_slice %2275 {offsets = [0, 64], sizes = [2, 32], strides = [1, 1]} : vector<2x96xf32> to vector<2x32xf32>
    %2280 = arith.addf %2249, %2279 : vector<2x32xf32>
    %2281 = arith.negf %2278 : vector<2x96xf32>
    %2282 = math.exp %2281 : vector<2x96xf32>
    %cst_381 = arith.constant 1.000000e+00 : f32
    %2283 = vector.broadcast %cst_381 : f32 to vector<2x96xf32>
    %2284 = arith.addf %2283, %2282 : vector<2x96xf32>
    %2285 = arith.divf %2283, %2284 : vector<2x96xf32>
    %2286 = vector.extract_strided_slice %2285 {offsets = [0, 0], sizes = [2, 32], strides = [1, 1]} : vector<2x96xf32> to vector<2x32xf32>
    %2287 = vector.extract_strided_slice %2285 {offsets = [0, 32], sizes = [2, 32], strides = [1, 1]} : vector<2x96xf32> to vector<2x32xf32>
    %2288 = vector.extract_strided_slice %2278 {offsets = [0, 64], sizes = [2, 32], strides = [1, 1]} : vector<2x96xf32> to vector<2x32xf32>
    %2289 = arith.mulf %2286, %2280 : vector<2x32xf32>
    %2290 = arith.addf %2288, %2289 : vector<2x32xf32>
    %2291 = math.tanh %2290 : vector<2x32xf32>
    %2292 = arith.subf %2263, %2291 : vector<2x32xf32>
    %2293 = arith.mulf %2287, %2292 : vector<2x32xf32>
    %2294 = arith.addf %2291, %2293 : vector<2x32xf32>
    %2295 = arith.subf %2294, %2274 : vector<2x32xf32>
    %2296 = math.absf %2295 : vector<2x32xf32>
    %cst_382 = arith.constant 5.000000e-02 : f32
    %2297 = vector.broadcast %cst_382 : f32 to vector<2x32xf32>
    %2298 = arith.cmpf oge, %2296, %2297 : vector<2x32xf32>
    %cst_383 = arith.constant 0.000000e+00 : f32
    %2299 = vector.broadcast %cst_383 : f32 to vector<2x32xf32>
    %2300 = arith.select %2298, %2295, %2299 : vector<2x32xi1>, vector<2x32xf32>
    %2301 = arith.select %2298, %2294, %2274 : vector<2x32xi1>, vector<2x32xf32>
    %cst_384 = arith.constant dense<0.000000e+00> : vector<2x96xf32>
    %2302 = tpu.matmul %2300, %2034, %cst_384 {dimension_numbers = #tpu.dot_dimension_numbers<[1], [0], [0], [1], [0, 0, 1, 1], [], []>} : vector<2x32xf32>, vector<32x96xf32>, vector<2x96xf32> -> vector<2x96xf32>
    %2303 = arith.addf %960, %2278 : vector<2x96xf32>
    %2304 = arith.mulf %2302, %2039 : vector<2x96xf32>
    %2305 = arith.addf %2303, %2304 : vector<2x96xf32>
    %2306 = vector.extract_strided_slice %2302 {offsets = [0, 64], sizes = [2, 32], strides = [1, 1]} : vector<2x96xf32> to vector<2x32xf32>
    %2307 = arith.addf %2280, %2306 : vector<2x32xf32>
    %2308 = arith.negf %2305 : vector<2x96xf32>
    %2309 = math.exp %2308 : vector<2x96xf32>
    %cst_385 = arith.constant 1.000000e+00 : f32
    %2310 = vector.broadcast %cst_385 : f32 to vector<2x96xf32>
    %2311 = arith.addf %2310, %2309 : vector<2x96xf32>
    %2312 = arith.divf %2310, %2311 : vector<2x96xf32>
    %2313 = vector.extract_strided_slice %2312 {offsets = [0, 0], sizes = [2, 32], strides = [1, 1]} : vector<2x96xf32> to vector<2x32xf32>
    %2314 = vector.extract_strided_slice %2312 {offsets = [0, 32], sizes = [2, 32], strides = [1, 1]} : vector<2x96xf32> to vector<2x32xf32>
    %2315 = vector.extract_strided_slice %2305 {offsets = [0, 64], sizes = [2, 32], strides = [1, 1]} : vector<2x96xf32> to vector<2x32xf32>
    %2316 = arith.mulf %2313, %2307 : vector<2x32xf32>
    %2317 = arith.addf %2315, %2316 : vector<2x32xf32>
    %2318 = math.tanh %2317 : vector<2x32xf32>
    %2319 = arith.subf %2294, %2318 : vector<2x32xf32>
    %2320 = arith.mulf %2314, %2319 : vector<2x32xf32>
    %2321 = arith.addf %2318, %2320 : vector<2x32xf32>
    %2322 = arith.subf %2321, %2301 : vector<2x32xf32>
    %2323 = math.absf %2322 : vector<2x32xf32>
    %cst_386 = arith.constant 5.000000e-02 : f32
    %2324 = vector.broadcast %cst_386 : f32 to vector<2x32xf32>
    %2325 = arith.cmpf oge, %2323, %2324 : vector<2x32xf32>
    %cst_387 = arith.constant 0.000000e+00 : f32
    %2326 = vector.broadcast %cst_387 : f32 to vector<2x32xf32>
    %2327 = arith.select %2325, %2322, %2326 : vector<2x32xi1>, vector<2x32xf32>
    %2328 = arith.select %2325, %2321, %2301 : vector<2x32xi1>, vector<2x32xf32>
    %cst_388 = arith.constant dense<0.000000e+00> : vector<2x96xf32>
    %2329 = tpu.matmul %2327, %2034, %cst_388 {dimension_numbers = #tpu.dot_dimension_numbers<[1], [0], [0], [1], [0, 0, 1, 1], [], []>} : vector<2x32xf32>, vector<32x96xf32>, vector<2x96xf32> -> vector<2x96xf32>
    %2330 = arith.addf %1037, %2305 : vector<2x96xf32>
    %2331 = arith.mulf %2329, %2039 : vector<2x96xf32>
    %2332 = arith.addf %2330, %2331 : vector<2x96xf32>
    %2333 = vector.extract_strided_slice %2329 {offsets = [0, 64], sizes = [2, 32], strides = [1, 1]} : vector<2x96xf32> to vector<2x32xf32>
    %2334 = arith.addf %2307, %2333 : vector<2x32xf32>
    %2335 = arith.negf %2332 : vector<2x96xf32>
    %2336 = math.exp %2335 : vector<2x96xf32>
    %cst_389 = arith.constant 1.000000e+00 : f32
    %2337 = vector.broadcast %cst_389 : f32 to vector<2x96xf32>
    %2338 = arith.addf %2337, %2336 : vector<2x96xf32>
    %2339 = arith.divf %2337, %2338 : vector<2x96xf32>
    %2340 = vector.extract_strided_slice %2339 {offsets = [0, 0], sizes = [2, 32], strides = [1, 1]} : vector<2x96xf32> to vector<2x32xf32>
    %2341 = vector.extract_strided_slice %2339 {offsets = [0, 32], sizes = [2, 32], strides = [1, 1]} : vector<2x96xf32> to vector<2x32xf32>
    %2342 = vector.extract_strided_slice %2332 {offsets = [0, 64], sizes = [2, 32], strides = [1, 1]} : vector<2x96xf32> to vector<2x32xf32>
    %2343 = arith.mulf %2340, %2334 : vector<2x32xf32>
    %2344 = arith.addf %2342, %2343 : vector<2x32xf32>
    %2345 = math.tanh %2344 : vector<2x32xf32>
    %2346 = arith.subf %2321, %2345 : vector<2x32xf32>
    %2347 = arith.mulf %2341, %2346 : vector<2x32xf32>
    %2348 = arith.addf %2345, %2347 : vector<2x32xf32>
    %2349 = arith.subf %2348, %2328 : vector<2x32xf32>
    %2350 = math.absf %2349 : vector<2x32xf32>
    %cst_390 = arith.constant 5.000000e-02 : f32
    %2351 = vector.broadcast %cst_390 : f32 to vector<2x32xf32>
    %2352 = arith.cmpf oge, %2350, %2351 : vector<2x32xf32>
    %cst_391 = arith.constant 0.000000e+00 : f32
    %2353 = vector.broadcast %cst_391 : f32 to vector<2x32xf32>
    %2354 = arith.select %2352, %2349, %2353 : vector<2x32xi1>, vector<2x32xf32>
    %2355 = arith.select %2352, %2348, %2328 : vector<2x32xi1>, vector<2x32xf32>
    %cst_392 = arith.constant dense<0.000000e+00> : vector<2x96xf32>
    %2356 = tpu.matmul %2354, %2034, %cst_392 {dimension_numbers = #tpu.dot_dimension_numbers<[1], [0], [0], [1], [0, 0, 1, 1], [], []>} : vector<2x32xf32>, vector<32x96xf32>, vector<2x96xf32> -> vector<2x96xf32>
    %2357 = arith.addf %1114, %2332 : vector<2x96xf32>
    %2358 = arith.mulf %2356, %2039 : vector<2x96xf32>
    %2359 = arith.addf %2357, %2358 : vector<2x96xf32>
    %2360 = vector.extract_strided_slice %2356 {offsets = [0, 64], sizes = [2, 32], strides = [1, 1]} : vector<2x96xf32> to vector<2x32xf32>
    %2361 = arith.addf %2334, %2360 : vector<2x32xf32>
    %2362 = arith.negf %2359 : vector<2x96xf32>
    %2363 = math.exp %2362 : vector<2x96xf32>
    %cst_393 = arith.constant 1.000000e+00 : f32
    %2364 = vector.broadcast %cst_393 : f32 to vector<2x96xf32>
    %2365 = arith.addf %2364, %2363 : vector<2x96xf32>
    %2366 = arith.divf %2364, %2365 : vector<2x96xf32>
    %2367 = vector.extract_strided_slice %2366 {offsets = [0, 0], sizes = [2, 32], strides = [1, 1]} : vector<2x96xf32> to vector<2x32xf32>
    %2368 = vector.extract_strided_slice %2366 {offsets = [0, 32], sizes = [2, 32], strides = [1, 1]} : vector<2x96xf32> to vector<2x32xf32>
    %2369 = vector.extract_strided_slice %2359 {offsets = [0, 64], sizes = [2, 32], strides = [1, 1]} : vector<2x96xf32> to vector<2x32xf32>
    %2370 = arith.mulf %2367, %2361 : vector<2x32xf32>
    %2371 = arith.addf %2369, %2370 : vector<2x32xf32>
    %2372 = math.tanh %2371 : vector<2x32xf32>
    %2373 = arith.subf %2348, %2372 : vector<2x32xf32>
    %2374 = arith.mulf %2368, %2373 : vector<2x32xf32>
    %2375 = arith.addf %2372, %2374 : vector<2x32xf32>
    %2376 = tpu.concatenate %2294, %2321, %2348, %2375 in 1 : vector<2x32xf32>, vector<2x32xf32>, vector<2x32xf32>, vector<2x32xf32> -> vector<2x128xf32>
    %c2_394 = arith.constant 2 : index
    %c0_395 = arith.constant 0 : index
    %c0_396 = arith.constant 0 : index
    %2377 = vector.load %arg6[%c2_394, %c0_395, %c0_396] : memref<6x2x128xf32, #tpu.memory_space<vmem>>, vector<1x2x128xf32>
    %2378 = vector.shape_cast %2377 : vector<1x2x128xf32> to vector<2x128xf32>
    %2379 = vector.shape_cast %2376 : vector<2x128xf32> to vector<1x2x128xf32>
    tpu.vector_store %arg6[%c2_394, %c0_395, %c0_396], %2379 {strides = array<i32>} : memref<6x2x128xf32, #tpu.memory_space<vmem>>, vector<1x2x128xf32>,
    %2380 = arith.subf %2375, %2355 : vector<2x32xf32>
    %2381 = math.absf %2380 : vector<2x32xf32>
    %cst_397 = arith.constant 5.000000e-02 : f32
    %2382 = vector.broadcast %cst_397 : f32 to vector<2x32xf32>
    %2383 = arith.cmpf oge, %2381, %2382 : vector<2x32xf32>
    %cst_398 = arith.constant 0.000000e+00 : f32
    %2384 = vector.broadcast %cst_398 : f32 to vector<2x32xf32>
    %2385 = arith.select %2383, %2380, %2384 : vector<2x32xi1>, vector<2x32xf32>
    %2386 = arith.select %2383, %2375, %2355 : vector<2x32xi1>, vector<2x32xf32>
    %cst_399 = arith.constant dense<0.000000e+00> : vector<2x96xf32>
    %2387 = tpu.matmul %2385, %2034, %cst_399 {dimension_numbers = #tpu.dot_dimension_numbers<[1], [0], [0], [1], [0, 0, 1, 1], [], []>} : vector<2x32xf32>, vector<32x96xf32>, vector<2x96xf32> -> vector<2x96xf32>
    %2388 = arith.addf %1191, %2359 : vector<2x96xf32>
    %2389 = arith.mulf %2387, %2039 : vector<2x96xf32>
    %2390 = arith.addf %2388, %2389 : vector<2x96xf32>
    %2391 = vector.extract_strided_slice %2387 {offsets = [0, 64], sizes = [2, 32], strides = [1, 1]} : vector<2x96xf32> to vector<2x32xf32>
    %2392 = arith.addf %2361, %2391 : vector<2x32xf32>
    %2393 = arith.negf %2390 : vector<2x96xf32>
    %2394 = math.exp %2393 : vector<2x96xf32>
    %cst_400 = arith.constant 1.000000e+00 : f32
    %2395 = vector.broadcast %cst_400 : f32 to vector<2x96xf32>
    %2396 = arith.addf %2395, %2394 : vector<2x96xf32>
    %2397 = arith.divf %2395, %2396 : vector<2x96xf32>
    %2398 = vector.extract_strided_slice %2397 {offsets = [0, 0], sizes = [2, 32], strides = [1, 1]} : vector<2x96xf32> to vector<2x32xf32>
    %2399 = vector.extract_strided_slice %2397 {offsets = [0, 32], sizes = [2, 32], strides = [1, 1]} : vector<2x96xf32> to vector<2x32xf32>
    %2400 = vector.extract_strided_slice %2390 {offsets = [0, 64], sizes = [2, 32], strides = [1, 1]} : vector<2x96xf32> to vector<2x32xf32>
    %2401 = arith.mulf %2398, %2392 : vector<2x32xf32>
    %2402 = arith.addf %2400, %2401 : vector<2x32xf32>
    %2403 = math.tanh %2402 : vector<2x32xf32>
    %2404 = arith.subf %2375, %2403 : vector<2x32xf32>
    %2405 = arith.mulf %2399, %2404 : vector<2x32xf32>
    %2406 = arith.addf %2403, %2405 : vector<2x32xf32>
    %2407 = arith.subf %2406, %2386 : vector<2x32xf32>
    %2408 = math.absf %2407 : vector<2x32xf32>
    %cst_401 = arith.constant 5.000000e-02 : f32
    %2409 = vector.broadcast %cst_401 : f32 to vector<2x32xf32>
    %2410 = arith.cmpf oge, %2408, %2409 : vector<2x32xf32>
    %cst_402 = arith.constant 0.000000e+00 : f32
    %2411 = vector.broadcast %cst_402 : f32 to vector<2x32xf32>
    %2412 = arith.select %2410, %2407, %2411 : vector<2x32xi1>, vector<2x32xf32>
    %2413 = arith.select %2410, %2406, %2386 : vector<2x32xi1>, vector<2x32xf32>
    %cst_403 = arith.constant dense<0.000000e+00> : vector<2x96xf32>
    %2414 = tpu.matmul %2412, %2034, %cst_403 {dimension_numbers = #tpu.dot_dimension_numbers<[1], [0], [0], [1], [0, 0, 1, 1], [], []>} : vector<2x32xf32>, vector<32x96xf32>, vector<2x96xf32> -> vector<2x96xf32>
    %2415 = arith.addf %1268, %2390 : vector<2x96xf32>
    %2416 = arith.mulf %2414, %2039 : vector<2x96xf32>
    %2417 = arith.addf %2415, %2416 : vector<2x96xf32>
    %2418 = vector.extract_strided_slice %2414 {offsets = [0, 64], sizes = [2, 32], strides = [1, 1]} : vector<2x96xf32> to vector<2x32xf32>
    %2419 = arith.addf %2392, %2418 : vector<2x32xf32>
    %2420 = arith.negf %2417 : vector<2x96xf32>
    %2421 = math.exp %2420 : vector<2x96xf32>
    %cst_404 = arith.constant 1.000000e+00 : f32
    %2422 = vector.broadcast %cst_404 : f32 to vector<2x96xf32>
    %2423 = arith.addf %2422, %2421 : vector<2x96xf32>
    %2424 = arith.divf %2422, %2423 : vector<2x96xf32>
    %2425 = vector.extract_strided_slice %2424 {offsets = [0, 0], sizes = [2, 32], strides = [1, 1]} : vector<2x96xf32> to vector<2x32xf32>
    %2426 = vector.extract_strided_slice %2424 {offsets = [0, 32], sizes = [2, 32], strides = [1, 1]} : vector<2x96xf32> to vector<2x32xf32>
    %2427 = vector.extract_strided_slice %2417 {offsets = [0, 64], sizes = [2, 32], strides = [1, 1]} : vector<2x96xf32> to vector<2x32xf32>
    %2428 = arith.mulf %2425, %2419 : vector<2x32xf32>
    %2429 = arith.addf %2427, %2428 : vector<2x32xf32>
    %2430 = math.tanh %2429 : vector<2x32xf32>
    %2431 = arith.subf %2406, %2430 : vector<2x32xf32>
    %2432 = arith.mulf %2426, %2431 : vector<2x32xf32>
    %2433 = arith.addf %2430, %2432 : vector<2x32xf32>
    %2434 = arith.subf %2433, %2413 : vector<2x32xf32>
    %2435 = math.absf %2434 : vector<2x32xf32>
    %cst_405 = arith.constant 5.000000e-02 : f32
    %2436 = vector.broadcast %cst_405 : f32 to vector<2x32xf32>
    %2437 = arith.cmpf oge, %2435, %2436 : vector<2x32xf32>
    %cst_406 = arith.constant 0.000000e+00 : f32
    %2438 = vector.broadcast %cst_406 : f32 to vector<2x32xf32>
    %2439 = arith.select %2437, %2434, %2438 : vector<2x32xi1>, vector<2x32xf32>
    %2440 = arith.select %2437, %2433, %2413 : vector<2x32xi1>, vector<2x32xf32>
    %cst_407 = arith.constant dense<0.000000e+00> : vector<2x96xf32>
    %2441 = tpu.matmul %2439, %2034, %cst_407 {dimension_numbers = #tpu.dot_dimension_numbers<[1], [0], [0], [1], [0, 0, 1, 1], [], []>} : vector<2x32xf32>, vector<32x96xf32>, vector<2x96xf32> -> vector<2x96xf32>
    %2442 = arith.addf %1345, %2417 : vector<2x96xf32>
    %2443 = arith.mulf %2441, %2039 : vector<2x96xf32>
    %2444 = arith.addf %2442, %2443 : vector<2x96xf32>
    %2445 = vector.extract_strided_slice %2441 {offsets = [0, 64], sizes = [2, 32], strides = [1, 1]} : vector<2x96xf32> to vector<2x32xf32>
    %2446 = arith.addf %2419, %2445 : vector<2x32xf32>
    %2447 = arith.negf %2444 : vector<2x96xf32>
    %2448 = math.exp %2447 : vector<2x96xf32>
    %cst_408 = arith.constant 1.000000e+00 : f32
    %2449 = vector.broadcast %cst_408 : f32 to vector<2x96xf32>
    %2450 = arith.addf %2449, %2448 : vector<2x96xf32>
    %2451 = arith.divf %2449, %2450 : vector<2x96xf32>
    %2452 = vector.extract_strided_slice %2451 {offsets = [0, 0], sizes = [2, 32], strides = [1, 1]} : vector<2x96xf32> to vector<2x32xf32>
    %2453 = vector.extract_strided_slice %2451 {offsets = [0, 32], sizes = [2, 32], strides = [1, 1]} : vector<2x96xf32> to vector<2x32xf32>
    %2454 = vector.extract_strided_slice %2444 {offsets = [0, 64], sizes = [2, 32], strides = [1, 1]} : vector<2x96xf32> to vector<2x32xf32>
    %2455 = arith.mulf %2452, %2446 : vector<2x32xf32>
    %2456 = arith.addf %2454, %2455 : vector<2x32xf32>
    %2457 = math.tanh %2456 : vector<2x32xf32>
    %2458 = arith.subf %2433, %2457 : vector<2x32xf32>
    %2459 = arith.mulf %2453, %2458 : vector<2x32xf32>
    %2460 = arith.addf %2457, %2459 : vector<2x32xf32>
    %2461 = arith.subf %2460, %2440 : vector<2x32xf32>
    %2462 = math.absf %2461 : vector<2x32xf32>
    %cst_409 = arith.constant 5.000000e-02 : f32
    %2463 = vector.broadcast %cst_409 : f32 to vector<2x32xf32>
    %2464 = arith.cmpf oge, %2462, %2463 : vector<2x32xf32>
    %cst_410 = arith.constant 0.000000e+00 : f32
    %2465 = vector.broadcast %cst_410 : f32 to vector<2x32xf32>
    %2466 = arith.select %2464, %2461, %2465 : vector<2x32xi1>, vector<2x32xf32>
    %2467 = arith.select %2464, %2460, %2440 : vector<2x32xi1>, vector<2x32xf32>
    %cst_411 = arith.constant dense<0.000000e+00> : vector<2x96xf32>
    %2468 = tpu.matmul %2466, %2034, %cst_411 {dimension_numbers = #tpu.dot_dimension_numbers<[1], [0], [0], [1], [0, 0, 1, 1], [], []>} : vector<2x32xf32>, vector<32x96xf32>, vector<2x96xf32> -> vector<2x96xf32>
    %2469 = arith.addf %1422, %2444 : vector<2x96xf32>
    %2470 = arith.mulf %2468, %2039 : vector<2x96xf32>
    %2471 = arith.addf %2469, %2470 : vector<2x96xf32>
    %2472 = vector.extract_strided_slice %2468 {offsets = [0, 64], sizes = [2, 32], strides = [1, 1]} : vector<2x96xf32> to vector<2x32xf32>
    %2473 = arith.addf %2446, %2472 : vector<2x32xf32>
    %2474 = arith.negf %2471 : vector<2x96xf32>
    %2475 = math.exp %2474 : vector<2x96xf32>
    %cst_412 = arith.constant 1.000000e+00 : f32
    %2476 = vector.broadcast %cst_412 : f32 to vector<2x96xf32>
    %2477 = arith.addf %2476, %2475 : vector<2x96xf32>
    %2478 = arith.divf %2476, %2477 : vector<2x96xf32>
    %2479 = vector.extract_strided_slice %2478 {offsets = [0, 0], sizes = [2, 32], strides = [1, 1]} : vector<2x96xf32> to vector<2x32xf32>
    %2480 = vector.extract_strided_slice %2478 {offsets = [0, 32], sizes = [2, 32], strides = [1, 1]} : vector<2x96xf32> to vector<2x32xf32>
    %2481 = vector.extract_strided_slice %2471 {offsets = [0, 64], sizes = [2, 32], strides = [1, 1]} : vector<2x96xf32> to vector<2x32xf32>
    %2482 = arith.mulf %2479, %2473 : vector<2x32xf32>
    %2483 = arith.addf %2481, %2482 : vector<2x32xf32>
    %2484 = math.tanh %2483 : vector<2x32xf32>
    %2485 = arith.subf %2460, %2484 : vector<2x32xf32>
    %2486 = arith.mulf %2480, %2485 : vector<2x32xf32>
    %2487 = arith.addf %2484, %2486 : vector<2x32xf32>
    %2488 = tpu.concatenate %2406, %2433, %2460, %2487 in 1 : vector<2x32xf32>, vector<2x32xf32>, vector<2x32xf32>, vector<2x32xf32> -> vector<2x128xf32>
    %c3_413 = arith.constant 3 : index
    %c0_414 = arith.constant 0 : index
    %c0_415 = arith.constant 0 : index
    %2489 = vector.load %arg6[%c3_413, %c0_414, %c0_415] : memref<6x2x128xf32, #tpu.memory_space<vmem>>, vector<1x2x128xf32>
    %2490 = vector.shape_cast %2489 : vector<1x2x128xf32> to vector<2x128xf32>
    %2491 = vector.shape_cast %2488 : vector<2x128xf32> to vector<1x2x128xf32>
    tpu.vector_store %arg6[%c3_413, %c0_414, %c0_415], %2491 {strides = array<i32>} : memref<6x2x128xf32, #tpu.memory_space<vmem>>, vector<1x2x128xf32>,
    %2492 = arith.subf %2487, %2467 : vector<2x32xf32>
    %2493 = math.absf %2492 : vector<2x32xf32>
    %cst_416 = arith.constant 5.000000e-02 : f32
    %2494 = vector.broadcast %cst_416 : f32 to vector<2x32xf32>
    %2495 = arith.cmpf oge, %2493, %2494 : vector<2x32xf32>
    %cst_417 = arith.constant 0.000000e+00 : f32
    %2496 = vector.broadcast %cst_417 : f32 to vector<2x32xf32>
    %2497 = arith.select %2495, %2492, %2496 : vector<2x32xi1>, vector<2x32xf32>
    %2498 = arith.select %2495, %2487, %2467 : vector<2x32xi1>, vector<2x32xf32>
    %cst_418 = arith.constant dense<0.000000e+00> : vector<2x96xf32>
    %2499 = tpu.matmul %2497, %2034, %cst_418 {dimension_numbers = #tpu.dot_dimension_numbers<[1], [0], [0], [1], [0, 0, 1, 1], [], []>} : vector<2x32xf32>, vector<32x96xf32>, vector<2x96xf32> -> vector<2x96xf32>
    %2500 = arith.addf %1499, %2471 : vector<2x96xf32>
    %2501 = arith.mulf %2499, %2039 : vector<2x96xf32>
    %2502 = arith.addf %2500, %2501 : vector<2x96xf32>
    %2503 = vector.extract_strided_slice %2499 {offsets = [0, 64], sizes = [2, 32], strides = [1, 1]} : vector<2x96xf32> to vector<2x32xf32>
    %2504 = arith.addf %2473, %2503 : vector<2x32xf32>
    %2505 = arith.negf %2502 : vector<2x96xf32>
    %2506 = math.exp %2505 : vector<2x96xf32>
    %cst_419 = arith.constant 1.000000e+00 : f32
    %2507 = vector.broadcast %cst_419 : f32 to vector<2x96xf32>
    %2508 = arith.addf %2507, %2506 : vector<2x96xf32>
    %2509 = arith.divf %2507, %2508 : vector<2x96xf32>
    %2510 = vector.extract_strided_slice %2509 {offsets = [0, 0], sizes = [2, 32], strides = [1, 1]} : vector<2x96xf32> to vector<2x32xf32>
    %2511 = vector.extract_strided_slice %2509 {offsets = [0, 32], sizes = [2, 32], strides = [1, 1]} : vector<2x96xf32> to vector<2x32xf32>
    %2512 = vector.extract_strided_slice %2502 {offsets = [0, 64], sizes = [2, 32], strides = [1, 1]} : vector<2x96xf32> to vector<2x32xf32>
    %2513 = arith.mulf %2510, %2504 : vector<2x32xf32>
    %2514 = arith.addf %2512, %2513 : vector<2x32xf32>
    %2515 = math.tanh %2514 : vector<2x32xf32>
    %2516 = arith.subf %2487, %2515 : vector<2x32xf32>
    %2517 = arith.mulf %2511, %2516 : vector<2x32xf32>
    %2518 = arith.addf %2515, %2517 : vector<2x32xf32>
    %2519 = arith.subf %2518, %2498 : vector<2x32xf32>
    %2520 = math.absf %2519 : vector<2x32xf32>
    %cst_420 = arith.constant 5.000000e-02 : f32
    %2521 = vector.broadcast %cst_420 : f32 to vector<2x32xf32>
    %2522 = arith.cmpf oge, %2520, %2521 : vector<2x32xf32>
    %cst_421 = arith.constant 0.000000e+00 : f32
    %2523 = vector.broadcast %cst_421 : f32 to vector<2x32xf32>
    %2524 = arith.select %2522, %2519, %2523 : vector<2x32xi1>, vector<2x32xf32>
    %2525 = arith.select %2522, %2518, %2498 : vector<2x32xi1>, vector<2x32xf32>
    %cst_422 = arith.constant dense<0.000000e+00> : vector<2x96xf32>
    %2526 = tpu.matmul %2524, %2034, %cst_422 {dimension_numbers = #tpu.dot_dimension_numbers<[1], [0], [0], [1], [0, 0, 1, 1], [], []>} : vector<2x32xf32>, vector<32x96xf32>, vector<2x96xf32> -> vector<2x96xf32>
    %2527 = arith.addf %1576, %2502 : vector<2x96xf32>
    %2528 = arith.mulf %2526, %2039 : vector<2x96xf32>
    %2529 = arith.addf %2527, %2528 : vector<2x96xf32>
    %2530 = vector.extract_strided_slice %2526 {offsets = [0, 64], sizes = [2, 32], strides = [1, 1]} : vector<2x96xf32> to vector<2x32xf32>
    %2531 = arith.addf %2504, %2530 : vector<2x32xf32>
    %2532 = arith.negf %2529 : vector<2x96xf32>
    %2533 = math.exp %2532 : vector<2x96xf32>
    %cst_423 = arith.constant 1.000000e+00 : f32
    %2534 = vector.broadcast %cst_423 : f32 to vector<2x96xf32>
    %2535 = arith.addf %2534, %2533 : vector<2x96xf32>
    %2536 = arith.divf %2534, %2535 : vector<2x96xf32>
    %2537 = vector.extract_strided_slice %2536 {offsets = [0, 0], sizes = [2, 32], strides = [1, 1]} : vector<2x96xf32> to vector<2x32xf32>
    %2538 = vector.extract_strided_slice %2536 {offsets = [0, 32], sizes = [2, 32], strides = [1, 1]} : vector<2x96xf32> to vector<2x32xf32>
    %2539 = vector.extract_strided_slice %2529 {offsets = [0, 64], sizes = [2, 32], strides = [1, 1]} : vector<2x96xf32> to vector<2x32xf32>
    %2540 = arith.mulf %2537, %2531 : vector<2x32xf32>
    %2541 = arith.addf %2539, %2540 : vector<2x32xf32>
    %2542 = math.tanh %2541 : vector<2x32xf32>
    %2543 = arith.subf %2518, %2542 : vector<2x32xf32>
    %2544 = arith.mulf %2538, %2543 : vector<2x32xf32>
    %2545 = arith.addf %2542, %2544 : vector<2x32xf32>
    %2546 = arith.subf %2545, %2525 : vector<2x32xf32>
    %2547 = math.absf %2546 : vector<2x32xf32>
    %cst_424 = arith.constant 5.000000e-02 : f32
    %2548 = vector.broadcast %cst_424 : f32 to vector<2x32xf32>
    %2549 = arith.cmpf oge, %2547, %2548 : vector<2x32xf32>
    %cst_425 = arith.constant 0.000000e+00 : f32
    %2550 = vector.broadcast %cst_425 : f32 to vector<2x32xf32>
    %2551 = arith.select %2549, %2546, %2550 : vector<2x32xi1>, vector<2x32xf32>
    %2552 = arith.select %2549, %2545, %2525 : vector<2x32xi1>, vector<2x32xf32>
    %cst_426 = arith.constant dense<0.000000e+00> : vector<2x96xf32>
    %2553 = tpu.matmul %2551, %2034, %cst_426 {dimension_numbers = #tpu.dot_dimension_numbers<[1], [0], [0], [1], [0, 0, 1, 1], [], []>} : vector<2x32xf32>, vector<32x96xf32>, vector<2x96xf32> -> vector<2x96xf32>
    %2554 = arith.addf %1653, %2529 : vector<2x96xf32>
    %2555 = arith.mulf %2553, %2039 : vector<2x96xf32>
    %2556 = arith.addf %2554, %2555 : vector<2x96xf32>
    %2557 = vector.extract_strided_slice %2553 {offsets = [0, 64], sizes = [2, 32], strides = [1, 1]} : vector<2x96xf32> to vector<2x32xf32>
    %2558 = arith.addf %2531, %2557 : vector<2x32xf32>
    %2559 = arith.negf %2556 : vector<2x96xf32>
    %2560 = math.exp %2559 : vector<2x96xf32>
    %cst_427 = arith.constant 1.000000e+00 : f32
    %2561 = vector.broadcast %cst_427 : f32 to vector<2x96xf32>
    %2562 = arith.addf %2561, %2560 : vector<2x96xf32>
    %2563 = arith.divf %2561, %2562 : vector<2x96xf32>
    %2564 = vector.extract_strided_slice %2563 {offsets = [0, 0], sizes = [2, 32], strides = [1, 1]} : vector<2x96xf32> to vector<2x32xf32>
    %2565 = vector.extract_strided_slice %2563 {offsets = [0, 32], sizes = [2, 32], strides = [1, 1]} : vector<2x96xf32> to vector<2x32xf32>
    %2566 = vector.extract_strided_slice %2556 {offsets = [0, 64], sizes = [2, 32], strides = [1, 1]} : vector<2x96xf32> to vector<2x32xf32>
    %2567 = arith.mulf %2564, %2558 : vector<2x32xf32>
    %2568 = arith.addf %2566, %2567 : vector<2x32xf32>
    %2569 = math.tanh %2568 : vector<2x32xf32>
    %2570 = arith.subf %2545, %2569 : vector<2x32xf32>
    %2571 = arith.mulf %2565, %2570 : vector<2x32xf32>
    %2572 = arith.addf %2569, %2571 : vector<2x32xf32>
    %2573 = arith.subf %2572, %2552 : vector<2x32xf32>
    %2574 = math.absf %2573 : vector<2x32xf32>
    %cst_428 = arith.constant 5.000000e-02 : f32
    %2575 = vector.broadcast %cst_428 : f32 to vector<2x32xf32>
    %2576 = arith.cmpf oge, %2574, %2575 : vector<2x32xf32>
    %cst_429 = arith.constant 0.000000e+00 : f32
    %2577 = vector.broadcast %cst_429 : f32 to vector<2x32xf32>
    %2578 = arith.select %2576, %2573, %2577 : vector<2x32xi1>, vector<2x32xf32>
    %2579 = arith.select %2576, %2572, %2552 : vector<2x32xi1>, vector<2x32xf32>
    %cst_430 = arith.constant dense<0.000000e+00> : vector<2x96xf32>
    %2580 = tpu.matmul %2578, %2034, %cst_430 {dimension_numbers = #tpu.dot_dimension_numbers<[1], [0], [0], [1], [0, 0, 1, 1], [], []>} : vector<2x32xf32>, vector<32x96xf32>, vector<2x96xf32> -> vector<2x96xf32>
    %2581 = arith.addf %1730, %2556 : vector<2x96xf32>
    %2582 = arith.mulf %2580, %2039 : vector<2x96xf32>
    %2583 = arith.addf %2581, %2582 : vector<2x96xf32>
    %2584 = vector.extract_strided_slice %2580 {offsets = [0, 64], sizes = [2, 32], strides = [1, 1]} : vector<2x96xf32> to vector<2x32xf32>
    %2585 = arith.addf %2558, %2584 : vector<2x32xf32>
    %2586 = arith.negf %2583 : vector<2x96xf32>
    %2587 = math.exp %2586 : vector<2x96xf32>
    %cst_431 = arith.constant 1.000000e+00 : f32
    %2588 = vector.broadcast %cst_431 : f32 to vector<2x96xf32>
    %2589 = arith.addf %2588, %2587 : vector<2x96xf32>
    %2590 = arith.divf %2588, %2589 : vector<2x96xf32>
    %2591 = vector.extract_strided_slice %2590 {offsets = [0, 0], sizes = [2, 32], strides = [1, 1]} : vector<2x96xf32> to vector<2x32xf32>
    %2592 = vector.extract_strided_slice %2590 {offsets = [0, 32], sizes = [2, 32], strides = [1, 1]} : vector<2x96xf32> to vector<2x32xf32>
    %2593 = vector.extract_strided_slice %2583 {offsets = [0, 64], sizes = [2, 32], strides = [1, 1]} : vector<2x96xf32> to vector<2x32xf32>
    %2594 = arith.mulf %2591, %2585 : vector<2x32xf32>
    %2595 = arith.addf %2593, %2594 : vector<2x32xf32>
    %2596 = math.tanh %2595 : vector<2x32xf32>
    %2597 = arith.subf %2572, %2596 : vector<2x32xf32>
    %2598 = arith.mulf %2592, %2597 : vector<2x32xf32>
    %2599 = arith.addf %2596, %2598 : vector<2x32xf32>
    %2600 = tpu.concatenate %2518, %2545, %2572, %2599 in 1 : vector<2x32xf32>, vector<2x32xf32>, vector<2x32xf32>, vector<2x32xf32> -> vector<2x128xf32>
    %c4_432 = arith.constant 4 : index
    %c0_433 = arith.constant 0 : index
    %c0_434 = arith.constant 0 : index
    %2601 = vector.load %arg6[%c4_432, %c0_433, %c0_434] : memref<6x2x128xf32, #tpu.memory_space<vmem>>, vector<1x2x128xf32>
    %2602 = vector.shape_cast %2601 : vector<1x2x128xf32> to vector<2x128xf32>
    %2603 = vector.shape_cast %2600 : vector<2x128xf32> to vector<1x2x128xf32>
    tpu.vector_store %arg6[%c4_432, %c0_433, %c0_434], %2603 {strides = array<i32>} : memref<6x2x128xf32, #tpu.memory_space<vmem>>, vector<1x2x128xf32>,
    %2604 = arith.subf %2599, %2579 : vector<2x32xf32>
    %2605 = math.absf %2604 : vector<2x32xf32>
    %cst_435 = arith.constant 5.000000e-02 : f32
    %2606 = vector.broadcast %cst_435 : f32 to vector<2x32xf32>
    %2607 = arith.cmpf oge, %2605, %2606 : vector<2x32xf32>
    %cst_436 = arith.constant 0.000000e+00 : f32
    %2608 = vector.broadcast %cst_436 : f32 to vector<2x32xf32>
    %2609 = arith.select %2607, %2604, %2608 : vector<2x32xi1>, vector<2x32xf32>
    %2610 = arith.select %2607, %2599, %2579 : vector<2x32xi1>, vector<2x32xf32>
    %cst_437 = arith.constant dense<0.000000e+00> : vector<2x96xf32>
    %2611 = tpu.matmul %2609, %2034, %cst_437 {dimension_numbers = #tpu.dot_dimension_numbers<[1], [0], [0], [1], [0, 0, 1, 1], [], []>} : vector<2x32xf32>, vector<32x96xf32>, vector<2x96xf32> -> vector<2x96xf32>
    %2612 = arith.addf %1807, %2583 : vector<2x96xf32>
    %2613 = arith.mulf %2611, %2039 : vector<2x96xf32>
    %2614 = arith.addf %2612, %2613 : vector<2x96xf32>
    %2615 = vector.extract_strided_slice %2611 {offsets = [0, 64], sizes = [2, 32], strides = [1, 1]} : vector<2x96xf32> to vector<2x32xf32>
    %2616 = arith.addf %2585, %2615 : vector<2x32xf32>
    %2617 = arith.negf %2614 : vector<2x96xf32>
    %2618 = math.exp %2617 : vector<2x96xf32>
    %cst_438 = arith.constant 1.000000e+00 : f32
    %2619 = vector.broadcast %cst_438 : f32 to vector<2x96xf32>
    %2620 = arith.addf %2619, %2618 : vector<2x96xf32>
    %2621 = arith.divf %2619, %2620 : vector<2x96xf32>
    %2622 = vector.extract_strided_slice %2621 {offsets = [0, 0], sizes = [2, 32], strides = [1, 1]} : vector<2x96xf32> to vector<2x32xf32>
    %2623 = vector.extract_strided_slice %2621 {offsets = [0, 32], sizes = [2, 32], strides = [1, 1]} : vector<2x96xf32> to vector<2x32xf32>
    %2624 = vector.extract_strided_slice %2614 {offsets = [0, 64], sizes = [2, 32], strides = [1, 1]} : vector<2x96xf32> to vector<2x32xf32>
    %2625 = arith.mulf %2622, %2616 : vector<2x32xf32>
    %2626 = arith.addf %2624, %2625 : vector<2x32xf32>
    %2627 = math.tanh %2626 : vector<2x32xf32>
    %2628 = arith.subf %2599, %2627 : vector<2x32xf32>
    %2629 = arith.mulf %2623, %2628 : vector<2x32xf32>
    %2630 = arith.addf %2627, %2629 : vector<2x32xf32>
    %2631 = arith.subf %2630, %2610 : vector<2x32xf32>
    %2632 = math.absf %2631 : vector<2x32xf32>
    %cst_439 = arith.constant 5.000000e-02 : f32
    %2633 = vector.broadcast %cst_439 : f32 to vector<2x32xf32>
    %2634 = arith.cmpf oge, %2632, %2633 : vector<2x32xf32>
    %cst_440 = arith.constant 0.000000e+00 : f32
    %2635 = vector.broadcast %cst_440 : f32 to vector<2x32xf32>
    %2636 = arith.select %2634, %2631, %2635 : vector<2x32xi1>, vector<2x32xf32>
    %2637 = arith.select %2634, %2630, %2610 : vector<2x32xi1>, vector<2x32xf32>
    %cst_441 = arith.constant dense<0.000000e+00> : vector<2x96xf32>
    %2638 = tpu.matmul %2636, %2034, %cst_441 {dimension_numbers = #tpu.dot_dimension_numbers<[1], [0], [0], [1], [0, 0, 1, 1], [], []>} : vector<2x32xf32>, vector<32x96xf32>, vector<2x96xf32> -> vector<2x96xf32>
    %2639 = arith.addf %1884, %2614 : vector<2x96xf32>
    %2640 = arith.mulf %2638, %2039 : vector<2x96xf32>
    %2641 = arith.addf %2639, %2640 : vector<2x96xf32>
    %2642 = vector.extract_strided_slice %2638 {offsets = [0, 64], sizes = [2, 32], strides = [1, 1]} : vector<2x96xf32> to vector<2x32xf32>
    %2643 = arith.addf %2616, %2642 : vector<2x32xf32>
    %2644 = arith.negf %2641 : vector<2x96xf32>
    %2645 = math.exp %2644 : vector<2x96xf32>
    %cst_442 = arith.constant 1.000000e+00 : f32
    %2646 = vector.broadcast %cst_442 : f32 to vector<2x96xf32>
    %2647 = arith.addf %2646, %2645 : vector<2x96xf32>
    %2648 = arith.divf %2646, %2647 : vector<2x96xf32>
    %2649 = vector.extract_strided_slice %2648 {offsets = [0, 0], sizes = [2, 32], strides = [1, 1]} : vector<2x96xf32> to vector<2x32xf32>
    %2650 = vector.extract_strided_slice %2648 {offsets = [0, 32], sizes = [2, 32], strides = [1, 1]} : vector<2x96xf32> to vector<2x32xf32>
    %2651 = vector.extract_strided_slice %2641 {offsets = [0, 64], sizes = [2, 32], strides = [1, 1]} : vector<2x96xf32> to vector<2x32xf32>
    %2652 = arith.mulf %2649, %2643 : vector<2x32xf32>
    %2653 = arith.addf %2651, %2652 : vector<2x32xf32>
    %2654 = math.tanh %2653 : vector<2x32xf32>
    %2655 = arith.subf %2630, %2654 : vector<2x32xf32>
    %2656 = arith.mulf %2650, %2655 : vector<2x32xf32>
    %2657 = arith.addf %2654, %2656 : vector<2x32xf32>
    %2658 = arith.subf %2657, %2637 : vector<2x32xf32>
    %2659 = math.absf %2658 : vector<2x32xf32>
    %cst_443 = arith.constant 5.000000e-02 : f32
    %2660 = vector.broadcast %cst_443 : f32 to vector<2x32xf32>
    %2661 = arith.cmpf oge, %2659, %2660 : vector<2x32xf32>
    %cst_444 = arith.constant 0.000000e+00 : f32
    %2662 = vector.broadcast %cst_444 : f32 to vector<2x32xf32>
    %2663 = arith.select %2661, %2658, %2662 : vector<2x32xi1>, vector<2x32xf32>
    %2664 = arith.select %2661, %2657, %2637 : vector<2x32xi1>, vector<2x32xf32>
    %cst_445 = arith.constant dense<0.000000e+00> : vector<2x96xf32>
    %2665 = tpu.matmul %2663, %2034, %cst_445 {dimension_numbers = #tpu.dot_dimension_numbers<[1], [0], [0], [1], [0, 0, 1, 1], [], []>} : vector<2x32xf32>, vector<32x96xf32>, vector<2x96xf32> -> vector<2x96xf32>
    %2666 = arith.addf %1961, %2641 : vector<2x96xf32>
    %2667 = arith.mulf %2665, %2039 : vector<2x96xf32>
    %2668 = arith.addf %2666, %2667 : vector<2x96xf32>
    %2669 = vector.extract_strided_slice %2665 {offsets = [0, 64], sizes = [2, 32], strides = [1, 1]} : vector<2x96xf32> to vector<2x32xf32>
    %2670 = arith.addf %2643, %2669 : vector<2x32xf32>
    %2671 = arith.negf %2668 : vector<2x96xf32>
    %2672 = math.exp %2671 : vector<2x96xf32>
    %cst_446 = arith.constant 1.000000e+00 : f32
    %2673 = vector.broadcast %cst_446 : f32 to vector<2x96xf32>
    %2674 = arith.addf %2673, %2672 : vector<2x96xf32>
    %2675 = arith.divf %2673, %2674 : vector<2x96xf32>
    %2676 = vector.extract_strided_slice %2675 {offsets = [0, 0], sizes = [2, 32], strides = [1, 1]} : vector<2x96xf32> to vector<2x32xf32>
    %2677 = vector.extract_strided_slice %2675 {offsets = [0, 32], sizes = [2, 32], strides = [1, 1]} : vector<2x96xf32> to vector<2x32xf32>
    %2678 = vector.extract_strided_slice %2668 {offsets = [0, 64], sizes = [2, 32], strides = [1, 1]} : vector<2x96xf32> to vector<2x32xf32>
    %2679 = arith.mulf %2676, %2670 : vector<2x32xf32>
    %2680 = arith.addf %2678, %2679 : vector<2x32xf32>
    %2681 = math.tanh %2680 : vector<2x32xf32>
    %2682 = arith.subf %2657, %2681 : vector<2x32xf32>
    %2683 = arith.mulf %2677, %2682 : vector<2x32xf32>
    %2684 = arith.addf %2681, %2683 : vector<2x32xf32>
    %2685 = arith.subf %2684, %2664 : vector<2x32xf32>
    %2686 = math.absf %2685 : vector<2x32xf32>
    %cst_447 = arith.constant 5.000000e-02 : f32
    %2687 = vector.broadcast %cst_447 : f32 to vector<2x32xf32>
    %2688 = arith.cmpf oge, %2686, %2687 : vector<2x32xf32>
    %cst_448 = arith.constant 0.000000e+00 : f32
    %2689 = vector.broadcast %cst_448 : f32 to vector<2x32xf32>
    %2690 = arith.select %2688, %2685, %2689 : vector<2x32xi1>, vector<2x32xf32>
    %cst_449 = arith.constant dense<0.000000e+00> : vector<2x96xf32>
    %2691 = tpu.matmul %2690, %2034, %cst_449 {dimension_numbers = #tpu.dot_dimension_numbers<[1], [0], [0], [1], [0, 0, 1, 1], [], []>} : vector<2x32xf32>, vector<32x96xf32>, vector<2x96xf32> -> vector<2x96xf32>
    %2692 = arith.addf %2033, %2668 : vector<2x96xf32>
    %2693 = arith.mulf %2691, %2039 : vector<2x96xf32>
    %2694 = arith.addf %2692, %2693 : vector<2x96xf32>
    %2695 = vector.extract_strided_slice %2691 {offsets = [0, 64], sizes = [2, 32], strides = [1, 1]} : vector<2x96xf32> to vector<2x32xf32>
    %2696 = arith.addf %2670, %2695 : vector<2x32xf32>
    %2697 = arith.negf %2694 : vector<2x96xf32>
    %2698 = math.exp %2697 : vector<2x96xf32>
    %cst_450 = arith.constant 1.000000e+00 : f32
    %2699 = vector.broadcast %cst_450 : f32 to vector<2x96xf32>
    %2700 = arith.addf %2699, %2698 : vector<2x96xf32>
    %2701 = arith.divf %2699, %2700 : vector<2x96xf32>
    %2702 = vector.extract_strided_slice %2701 {offsets = [0, 0], sizes = [2, 32], strides = [1, 1]} : vector<2x96xf32> to vector<2x32xf32>
    %2703 = vector.extract_strided_slice %2701 {offsets = [0, 32], sizes = [2, 32], strides = [1, 1]} : vector<2x96xf32> to vector<2x32xf32>
    %2704 = vector.extract_strided_slice %2694 {offsets = [0, 64], sizes = [2, 32], strides = [1, 1]} : vector<2x96xf32> to vector<2x32xf32>
    %2705 = arith.mulf %2702, %2696 : vector<2x32xf32>
    %2706 = arith.addf %2704, %2705 : vector<2x32xf32>
    %2707 = math.tanh %2706 : vector<2x32xf32>
    %2708 = arith.subf %2684, %2707 : vector<2x32xf32>
    %2709 = arith.mulf %2703, %2708 : vector<2x32xf32>
    %2710 = arith.addf %2707, %2709 : vector<2x32xf32>
    %2711 = tpu.concatenate %2630, %2657, %2684, %2710 in 1 : vector<2x32xf32>, vector<2x32xf32>, vector<2x32xf32>, vector<2x32xf32> -> vector<2x128xf32>
    %c5_451 = arith.constant 5 : index
    %c0_452 = arith.constant 0 : index
    %c0_453 = arith.constant 0 : index
    %2712 = vector.load %arg6[%c5_451, %c0_452, %c0_453] : memref<6x2x128xf32, #tpu.memory_space<vmem>>, vector<1x2x128xf32>
    %2713 = vector.shape_cast %2712 : vector<1x2x128xf32> to vector<2x128xf32>
    %2714 = vector.shape_cast %2711 : vector<2x128xf32> to vector<1x2x128xf32>
    tpu.vector_store %arg6[%c5_451, %c0_452, %c0_453], %2714 {strides = array<i32>} : memref<6x2x128xf32, #tpu.memory_space<vmem>>, vector<1x2x128xf32>,
    return
  }
}

</mosaic_0001>

<bundles_post_ra>
// kernel: squeeze.1
= control target key start
LH: loop header
LB: loop body
LE: loop exit
PB: predicated region body
PF: predicated region fallthrough
CT: control target
= control target key end

     0   :  { %vm7_vm0 = vcmask 23552   ;;  %vm13_vm1 = vcmask 48152   ;;  %s39_s0 = inlined_call_operand.vmem [shape: f32[2,3], index: 0, kind: input, shape index: {}]   ;;  %s40_s1 = inlined_call_operand.vmem [shape: f32[6], index: 1, kind: output, shape index: {}]  }
   0x1   :  { %v4_v0 = vld [vmem:[%s39_s0] sm:$0x3]  ;;  %s22_s0 = smov 3  }
   0x2   :  { %5 = vst [vmem:[#allocation1] sm:$0x3] %v4_v0 }
   0x9   :  { %v10_v1 = vld [vmem:[#allocation1 + $0x1] sm:$0x1]   ;;  %v6_v2 = vld [vmem:[#allocation1] sm:$0x1]  }
   0xa   :  { %11 = vrot.lane.b32.xlu0 %v10_v1, %s22_s0  ;;  %8 = vst.msk [vmem:[#allocation0] sm:$0x1] %vm7_vm0, %v6_v2  }
  0x7c   :  { %v12_v3 = vpop.permute.xlu0 %11  }
  0x7d   :  { %14 = vst.msk [vmem:[#allocation0] sm:$0x1] %vm13_vm1, %v12_v3  }
  0x84   :  { %v18_v4 = vld [vmem:[#allocation0] sm:$0x1] }
  0x85   :  { %20 = vst [vmem:[%s40_s1] sm:$0x1] %v18_v4 }

// kernel: deltagru_forward.1
= control target key start
LH: loop header
LB: loop body
LE: loop exit
PB: predicated region body
PF: predicated region fallthrough
CT: control target
= control target key end

     0   :  { %13 = vsyncpa [#allocation3], 0  ;;  %s7916_s0 = inlined_call_operand.vmem [shape: f32[24,2,2], index: 0, kind: input, shape index: {}]   ;;  %s7917_s1 = inlined_call_operand.vmem [shape: f32[2,2,56], index: 1, kind: input, shape index: {}]   ;;  %s7918_s2 = inlined_call_operand.vmem [shape: f32[18], index: 2, kind: input, shape index: {}]   ;;  %s7919_s3 = inlined_call_operand.vmem [shape: f32[6], index: 3, kind: input, shape index: {}]   ;;  %s7920_s4 = inlined_call_operand.vmem [shape: f32[6,96], index: 4, kind: input, shape index: {}]   ;;  %s7921_s5 = inlined_call_operand.vmem [shape: f32[32,96], index: 5, kind: input, shape index: {}]   ;;  %s7922_s6 = inlined_call_operand.vmem [shape: f32[6,2,128], index: 6, kind: output, shape index: {0}]   ;;  %s7923_s7 = inlined_call_operand.vmem [shape: f32[2,2,24], index: 7, kind: output, shape index: {1}]  }
   0x1   :  { %s25_s26 = sshll.u32 %s7918_s2, 4  ;;  %s26_s26 = int_to_ptr.vmem [resolvable:$true] %s25_s26 }
   0x2   :  { %14 = vsyncpa [#allocation5], 0  ;;  %s35_s29 = sshll.u32 %s7919_s3, 4  ;;  %s5699_s30 = scalar_lea.vmem %s26_s26, 16  ;;  %s36_s29 = int_to_ptr.vmem [resolvable:$true] %s35_s29 }
   0x3   :  { %p5700_p0 = scmp.ne.s32.totalorder %s26_s26, %s5699_s30  ;;  %p5704_p1 = scmp.lt.s32.totalorder %s26_s26, %s26_s26 }
   0x4   :  { %p5705_p2 = scmp.lt.s32.totalorder %s5699_s30, %s5699_s30 }
   0x6   :  { %p5706_p3 = por %p5705_p2, %p5704_p1 }
   0x8   :  { %p5707_p4 = pnand %p5706_p3, %p5700_p0 }
   0xa   :  { %5710 = shalt.err (!%p5707_p4)
}
   0xb   :  { %s5727_s8 = smov [#allocation2]   ;;  %s5711_s9 = scalar_lea.vmem %s36_s29, 16 }
   0xc   :  { %28 = dma.vmem_to_smem %s26_s26, 16, %s5727_s8, [#allocation3]  }
   0xd   :  { %p5712_p5 = scmp.ne.s32.totalorder %s36_s29, %s5711_s9  ;;  %p5716_p6 = scmp.lt.s32.totalorder %s36_s29, %s36_s29 }
   0xe   :  { %p5717_p7 = scmp.lt.s32.totalorder %s5711_s9, %s5711_s9 }
  0x10   :  { %p5718_p8 = por %p5717_p7, %p5716_p6 }
  0x12   :  { %p5719_p9 = pnand %p5718_p8, %p5712_p5 }
  0x14   :  { %5722 = shalt.err (!%p5719_p9)
}
  0x15   :  { %s5728_s2 = smov [#allocation4]  }
  0x16   :  { %38 = dma.vmem_to_smem %s36_s29, 16, %s5728_s2, [#allocation5]  }
  0x17   :  { %5723 = dma.done.wait [#allocation3], 16  }
  0x18   :  { %5724 = vsyncadd [#allocation3], 4294967280 }
  0x19   :  { %5725 = dma.done.wait [#allocation5], 16  }
  0x1a   :  { %5726 = vsyncadd [#allocation5], 4294967280 }
  0x1b   :  { %49 = sfence }
  0x1c   :  { %v2037_v0 = vld [vmem:[%s7921_s5] sm:$0xff]  ;;  %v2038_v1 = vld [vmem:[%s7921_s5 + $0x8] sm:$0xff]  ;;  %v5729_v3 = vmov 0.0|0.0   ;;  %v2039_v6 = vld [vmem:[%s7921_s5 + $0x10] sm:$0xff]  ;;  %vm5730_vm0 = vmmov 0   ;;  %v5731_v8 = vmov 0.0   ;;  %v617_v32 = vlaneseq }
  0x1d   :  { %v224_v2 = vld [vmem:[%s7916_s0] sm:$0x3]  ;;  %5299 = vmatprep.subr.bf16.mxu0 %v5729_v3  ;;  %v5795_v4 = vpack.c.bf16 %v2038_v1, %v2037_v0  ;;  %v2040_v7 = vld [vmem:[%s7921_s5 + $0x18] sm:$0xff]  ;;  %5305 = vmatprep.subr.bf16.mxu1 %v5729_v3  ;;  %s5732_s19 = smov 127   ;;  %v7924_v11 = vmov 1   ;;  %v7926_v13 = vmov 0  }
  0x1e   :  { %v248_v5 = vmul.f32 %v224_v2, %v224_v2  ;;  %5043 = vmatprep.mubr.msk.f32.mxu0 %vm5730_vm0, %v5731_v8  ;;  %v609_v9 = vand.u32 2147483647, %v224_v2  ;;  %5054 = vmatprep.mubr.msk.f32.mxu1 %vm5730_vm0, %v5731_v8  ;;  %v5810_v10 = vpack.c.bf16 %v2040_v7, %v2039_v6  ;;  %v5834_v14 = vld [vmem:[%s7916_s0 + $0x2] sm:$0x3]  ;;  %s5735_s21 = smov 64   ;;  %v618_v33 = vshrl.u32 %v617_v32, 7 }
  0x1f   :  { %5301 = vmatpush3.bf16.msra.mxu0 %v5795_v4  ;;  %5456 = vset.pattern.permute.xlu1 %v7924_v11  ;;  %v660_v15 = vand.u32 2147483647, %v5834_v14  ;;  %v608_v36 = vld [vmem:[%s7920_s4] sm:$0x3f]  ;;  %v2042_v57 = vand.u32 127, %v617_v32  ;;  %s5736_s4 = smov 96  }
  0x20   :  { %296 = vrot.lane.b32.xlu0 %v248_v5, %s5732_s19  ;;  %5302 = vmatprep.subr.bf16.mxu0 %v5729_v3  ;;  %vm610_vm1 = vcmp.ge.f32.partialorder %v609_v9, 0.1  ;;  %v628_v34 = vsub.s32 1, %v618_v33  ;;  %v619_v35 = vsub.s32 0, %v618_v33  ;;  %v642_v39 = vsub.s32 2, %v618_v33  ;;  %s5737_s24 = smov 32  }
  0x21   :  { %v5814_v12 = vsel %vm610_vm1, %v224_v2, 0.0  ;;  %5455 = vset.pattern.permute.xlu0 %v7926_v13  ;;  %5307 = vmatpush3.bf16.msra.mxu1 %v5795_v4  ;;  %vm661_vm2 = vcmp.ge.f32.partialorder %v660_v15, 0.1  ;;  %v656_v46 = vsub.s32 3, %v618_v33  ;;  %v670_v50 = vsub.s32 4, %v618_v33  ;;  %s4840_s23 = sld [smem:[#allocation2 + $0x2]] }
  0x22   :  { %623 = vperm.xlu1 %5456, %v5814_v12   ;;  %5308 = vmatprep.subr.bf16.mxu1 %v5729_v3  ;;  %v5840_v16 = vsel %vm661_vm2, %v5834_v14, 0.0  ;;  %v5858_v38 = vrot.slane %v608_v36, %v628_v34  ;;  %v5860_v40 = vrot.slane %v608_v36, %v619_v35  ;;  %v5863_v44 = vrot.slane %v608_v36, %v642_v39  ;;  %s4851_s27 = sld [smem:[#allocation2 + $0xd]]  ;;  %s4842_s28 = sld [smem:[#allocation2 + $0x4]] }
  0x23   :  { %5304 = vmatpush3.bf16.msra.mxu0 %v5810_v10  ;;  %v5867_v49 = vrot.slane %v608_v36, %v656_v46  ;;  %v5870_v54 = vrot.slane %v608_v36, %v670_v50  ;;  %v680_v55 = vsub.s32 5, %v618_v33  ;;  %vm2043_vm7 = vcmp.lt.s32.totalorder %v2042_v57, 64  ;;  %s5738_s29 = smov 112   ;;  %s4843_s30 = sld [smem:[#allocation2 + $0x5]] }
  0x24   :  { %614 = vperm.xlu0 %5455, %v5814_v12   ;;  %5311 = vmatprep.subr.bf16.mxu0 %v5729_v3  ;;  %v5877_v0 = vsel %vm2043_vm7, 1.0, %v5731_v8  ;;  %vm2046_vm15 = vcmask 261120   ;;  %s4854_s2 = sld [smem:[#allocation2 + $0x10]]  ;;  %s4852_s10 = sld [smem:[#allocation2 + $0xe]] }
  0x25   :  { %5310 = vmatpush3.bf16.msra.mxu1 %v5810_v10  ;;  %v5873_v60 = vrot.slane %v608_v36, %v680_v55  ;;  %s4846_s3 = sld [smem:[#allocation2 + $0x8]]  ;;  %s4849_s11 = sld [smem:[#allocation2 + $0xb]] }
  0x26   :  { %5044 = vmatmul.mubr.f32.vlgmr.msra.gmra.mrb[0].mxu0 %v5731_v8  ;;  %5457 = vset.pattern.permute.xlu1 %v7926_v13  ;;  %s4855_s12 = sld [smem:[#allocation2 + $0x11]]  ;;  %s53_s13 = sld [smem:[#allocation2]] }
  0x27   :  { %5313 = vmatpush3.bf16.msra.mxu0 %v5795_v4  ;;  %5065 = vmatprep.mubr.msk.f32.mxu0 %vm5730_vm0, %v5731_v8  ;;  %s4841_s14 = sld [smem:[#allocation2 + $0x3]]  ;;  %s4844_s15 = sld [smem:[#allocation2 + $0x6]] }
  0x28   :  { %5314 = vmatprep.subr.bf16.mxu0 %v5729_v3  ;;  %5317 = vmatprep.subr.bf16.mxu1 %v5729_v3  ;;  %s4847_s16 = sld [smem:[#allocation2 + $0x9]]  ;;  %s4853_s17 = sld [smem:[#allocation2 + $0xf]] }
  0x29   :  { %665 = vperm.xlu0 %5455, %v5840_v16   ;;  %s4858_s18 = sld [smem:[#allocation4 + $0x3]]  ;;  %s7849_s5 = sld [smem:[#allocation4 + $0x1]] }
  0x2a   :  { %s7851_s20 = sld [smem:[#allocation4 + $0x4]]  ;;  %s7857_s22 = sld [smem:[#allocation4 + $0x5]] }
  0x2b   :  { %5316 = vmatpush3.bf16.msra.mxu0 %v5810_v10 }
  0x2c   :  { %5323 = vmatprep.subr.bf16.mxu0 %v5729_v3 }
  0x92   :  { %v297_v17 = vpop.permute.xlu0 %296 }
  0x93   :  { %v368_v18 = vadd.f32 %v297_v17, %v248_v5 }
  0x95   :  { %5506 = vrsqrt.f32 %v368_v18  ;;  %vm394_vm3 = vcmp.eq.f32.partialorder %v368_v18, inf  ;;  %v397_v20 = vand.u32 2147483648, %v368_v18  ;;  %vm396_vm4 = vcmp.eq.f32.partialorder %v368_v18, 0.0 }
  0x9f   :  { %v5507_v19 = vpop.eup %5506 }
  0xa0   :  { %v393_v21 = vmul.f32 %v5507_v19, %v368_v18 }
  0xa1   :  { %v624_v37 = vpop.permute.xlu1 %623 }
  0xa2   :  { %v395_v22 = vsel %vm394_vm3, %v368_v18, %v393_v21  ;;  %v630_v43 = vmul.f32 %v5858_v38, %v624_v37 }
  0xa3   :  { %v398_v23 = vsel %vm396_vm4, %v397_v20, %v395_v22  ;;  %v615_v41 = vpop.permute.xlu0 %614 }
  0xa4   :  { %v632_v24 = vand.u32 2147483647, %v398_v23  ;;  %v560_v25 = vmul.f32 %v398_v23, %v398_v23  ;;  %v621_v45 = vmul.f32 %v5860_v40, %v615_v41  ;;  %v5911_v41 = vld [vmem:[%s7916_s0 + $0x4] sm:$0x3] }
  0xa5   :  { %v725_v46 = vsub.f32 %v5911_v41, %v5840_v16 }
  0xa6   :  { %vm633_vm5 = vcmp.ge.f32.partialorder %v632_v24, 0.1  ;;  %v584_v26 = vmul.f32 %v560_v25, %v398_v23  ;;  %v631_v48 = vadd.f32 %v630_v43, %v621_v45 }
  0xa7   :  { %v5843_v27 = vsel %vm633_vm5, %v398_v23, 0.0  ;;  %v684_v23 = vsub.f32 %v5834_v14, %v5814_v12 }
  0xa8   :  { %637 = vperm.xlu1 %5457, %v5843_v27   ;;  %v646_v28 = vand.u32 2147483647, %v584_v26  ;;  %v666_v56 = vpop.permute.xlu0 %665 }
  0xa9   :  { %v672_v59 = vmul.f32 %v5870_v54, %v666_v56 }
  0xaa   :  { %vm647_vm6 = vcmp.ge.f32.partialorder %v646_v28, 0.1  ;;  %v249_v28 = vmul.f32 %v5834_v14, %v5834_v14 }
  0xab   :  { %v5846_v29 = vsel %vm647_vm6, %v584_v26, 0.0  ;;  %v685_v26 = vand.u32 2147483647, %v684_v23 }
  0xac   :  { %651 = vperm.xlu1 %5457, %v5846_v29  }
  0xad   :  { %vm5892_vm8 = vcmp.ge.f32.partialorder %v685_v26, 0.1 }
  0xae   :  { %v687_v32 = vsel %vm5892_vm8, %v684_v23, 0.0 }
  0xb0   :  { %5458 = vset.pattern.permute.xlu1 %v7924_v11 }
  0xb1   :  { %675 = vperm.xlu1 %5458, %v5840_v16  }
  0xf9   :  { %v5851_v30 = vpop.f32.mrb[0].mxu0 }
  0xfa   :  { %v5045_v31 = vpop.f32.mrb[1].mxu0  ;;  %2131 = vrot.lane.b32.xlu0 %v5851_v30, %s5735_s21  ;;  %v2121_v2 = vmul.f32 %v5877_v0, %v5851_v30 }
 0x127   :  { %v638_v42 = vpop.permute.xlu1 %637 }
 0x128   :  { %v644_v47 = vmul.f32 %v5863_v44, %v638_v42 }
 0x12a   :  { %v645_v52 = vadd.f32 %v644_v47, %v631_v48 }
 0x12b   :  { %v652_v51 = vpop.permute.xlu1 %651 }
 0x12c   :  { %v658_v53 = vmul.f32 %v5867_v49, %v652_v51  ;;  %v726_v51 = vand.u32 2147483647, %v725_v46 }
 0x12e   :  { %v659_v58 = vadd.f32 %v658_v53, %v645_v52  ;;  %vm5916_vm13 = vcmp.ge.f32.partialorder %v726_v51, 0.1 }
 0x130   :  { %v676_v61 = vpop.permute.xlu1 %675  ;;  %v673_v62 = vadd.f32 %v672_v59, %v659_v58 }
 0x131   :  { %v682_v63 = vmul.f32 %v5873_v60, %v676_v61 }
 0x133   :  { %v683_v1 = vadd.f32 %v682_v63, %v673_v62  ;;  %v728_v62 = vsel %vm5916_vm13, %v725_v46, 0.0 }
 0x135   :  { %v5881_v5 = vadd.f32 %v2121_v2, %v683_v1 }
 0x137   :  { %v4863_v6 = vmul.f32 -1.442695, %v5881_v5 }
 0x139   :  { %5508 = vpow2.f32 %v4863_v6 }
 0x143   :  { %v5509_v7 = vpop.eup %5508 }
 0x144   :  { %v2127_v9 = vadd.f32 1.0, %v5509_v7 }
 0x146   :  { %5510 = vrcp.f32 %v2127_v9 }
 0x150   :  { %v5511_v15 = vpop.eup %5510 }
 0x16c   :  { %v2132_v17 = vpop.permute.xlu0 %2131 }
 0x16d   :  { %v2134_v18 = vmul.f32 %v5511_v15, %v2132_v17 }
 0x16f   :  { %2136 = vrot.lane.b32.xlu1 %v2134_v18, %s5735_s21 }
 0x1e1   :  { %v2137_v19 = vpop.permute.xlu1 %2136 }
 0x1e2   :  { %v2139_v20 = vadd.f32 %v2137_v19, %v5881_v5 }
 0x1e4   :  { %5512 = vtanh.f32 %v2139_v20 }
 0x1ee   :  { %v5513_v21 = vpop.eup %5512 }
 0x1ef   :  { %v2141_v22 = vsub.f32 0.0, %v5513_v21 }
 0x1f1   :  { %2143 = vrot.lane.b32.xlu0 %v2141_v22, %s5736_s4 }
 0x263   :  { %v2144_v24 = vpop.permute.xlu0 %2143 }
 0x264   :  { %v2146_v25 = vmul.f32 %v5511_v15, %v2144_v24 }
 0x266   :  { %2148 = vrot.lane.b32.xlu1 %v2146_v25, %s5737_s24 }
 0x26a   :  { %298 = vrot.lane.b32.xlu1 %v249_v28, %s5732_s19 }
 0x26e   :  { %696 = vperm.xlu1 %5458, %v687_v32  }
 0x272   :  { %5459 = vset.pattern.permute.xlu1 %v7926_v13 }
 0x2d8   :  { %v2149_v33 = vpop.permute.xlu1 %2148 }
 0x2d9   :  { %v5900_v34 = vadd.f32 %v5513_v21, %v2149_v33 }
 0x2db   :  { %v2152_v35 = vand.u32 2147483647, %v5900_v34 }
 0x2dc   :  { %v299_v36 = vpop.permute.xlu1 %298 }
 0x2dd   :  { %v369_v37 = vadd.f32 %v299_v36, %v249_v28  ;;  %vm2153_vm9 = vcmp.ge.f32.partialorder %v2152_v35, 0.05 }
 0x2de   :  { %v5904_v39 = vsel %vm2153_vm9, %v5900_v34, 0.0 }
 0x2df   :  { %5514 = vrsqrt.f32 %v369_v37  ;;  %2156 = vrot.lane.b32.xlu0 %v5904_v39, %s5735_s21  ;;  %vm401_vm10 = vcmp.eq.f32.partialorder %v369_v37, inf  ;;  %v404_v43 = vand.u32 2147483648, %v369_v37  ;;  %vm403_vm11 = vcmp.eq.f32.partialorder %v369_v37, 0.0 }
 0x2e3   :  { %690 = vperm.xlu0 %5455, %v687_v32  }
 0x2e9   :  { %v5515_v42 = vpop.eup %5514 }
 0x2ea   :  { %v400_v45 = vmul.f32 %v5515_v42, %v369_v37 }
 0x2ec   :  { %v402_v47 = vsel %vm401_vm10, %v369_v37, %v400_v45 }
 0x2ed   :  { %v405_v48 = vsel %vm403_vm11, %v404_v43, %v402_v47  ;;  %v697_v9 = vpop.permute.xlu1 %696 }
 0x2ee   :  { %v701_v50 = vsub.f32 %v405_v48, %v5843_v27  ;;  %v561_v52 = vmul.f32 %v405_v48, %v405_v48  ;;  %v699_v19 = vmul.f32 %v697_v9, %v5858_v38 }
 0x2f0   :  { %v702_v53 = vand.u32 2147483647, %v701_v50  ;;  %v585_v55 = vmul.f32 %v561_v52, %v405_v48 }
 0x2f2   :  { %vm703_vm12 = vcmp.ge.f32.partialorder %v702_v53, 0.1  ;;  %v713_v57 = vsub.f32 %v585_v55, %v5846_v29  ;;  %v5961_v53 = vsel %vm5892_vm8, %v5834_v14, %v5814_v12 }
 0x2f3   :  { %v704_v58 = vsel %vm703_vm12, %v701_v50, 0.0  ;;  %v5922_v59 = vsel %vm703_vm12, %v405_v48, %v5843_v27 }
 0x2f4   :  { %707 = vperm.xlu0 %5455, %v704_v58   ;;  %v714_v61 = vand.u32 2147483647, %v713_v57 }
 0x2f6   :  { %vm715_vm14 = vcmp.ge.f32.partialorder %v714_v61, 0.1 }
 0x2f7   :  { %v716_v63 = vsel %vm715_vm14, %v713_v57, 0.0  ;;  %v5927_v1 = vsel %vm715_vm14, %v585_v55, %v5846_v29  ;;  %v743_v55 = vsub.f32 %v5911_v41, %v5961_v53 }
 0x2f8   :  { %731 = vperm.xlu0 %5455, %v728_v62   ;;  %719 = vperm.xlu1 %5459, %v716_v63  }
 0x2f9   :  { %v744_v61 = vand.u32 2147483647, %v743_v55 }
 0x2fb   :  { %vm5968_vm1 = vcmp.ge.f32.partialorder %v744_v61, 0.1 }
 0x2fc   :  { %5460 = vset.pattern.permute.xlu1 %v7924_v11  ;;  %v746_v12 = vsel %vm5968_vm1, %v743_v55, 0.0 }
 0x2fd   :  { %738 = vperm.xlu1 %5460, %v728_v62   ;;  %v250_v62 = vmul.f32 %v5911_v41, %v5911_v41 }
 0x351   :  { %v2157_v2 = vpop.permute.xlu0 %2156 }
 0x352   :  { %5055 = vmatmul.mubr.msk.f32.vlgmr.msra.gmra.mrb[0].mxu1 %vm2046_vm15, %v2157_v2 }
 0x353   :  { %5319 = vmatpush3.bf16.msra.mxu1 %v5795_v4  ;;  %5076 = vmatprep.mubr.msk.f32.mxu1 %vm5730_vm0, %v5731_v8 }
 0x354   :  { %5320 = vmatprep.subr.bf16.mxu1 %v5729_v3 }
 0x357   :  { %5322 = vmatpush3.bf16.msra.mxu1 %v5810_v10 }
 0x358   :  { %5329 = vmatprep.subr.bf16.mxu1 %v5729_v3 }
 0x362   :  { %v691_v7 = vpop.permute.xlu0 %690 }
 0x363   :  { %v693_v17 = vmul.f32 %v691_v7, %v5860_v40 }
 0x365   :  { %v700_v21 = vadd.f32 %v699_v19, %v693_v17  ;;  %v5990_v17 = vld [vmem:[%s7916_s0 + $0x6] sm:$0x3] }
 0x373   :  { %v708_v15 = vpop.permute.xlu0 %707 }
 0x374   :  { %v710_v20 = vmul.f32 %v708_v15, %v5863_v44 }
 0x376   :  { %v711_v23 = vadd.f32 %v710_v20, %v700_v21 }
 0x377   :  { %v720_v18 = vpop.permute.xlu1 %719 }
 0x378   :  { %v722_v22 = vmul.f32 %v720_v18, %v5867_v49  ;;  %v5996_v18 = vsel %vm5916_vm13, %v5911_v41, %v5840_v16 }
 0x37a   :  { %v723_v24 = vadd.f32 %v722_v22, %v711_v23  ;;  %v784_v22 = vsub.f32 %v5990_v17, %v5996_v18 }
 0x37c   :  { %v739_v25 = vpop.permute.xlu1 %738 }
 0x37d   :  { %v741_v32 = vmul.f32 %v739_v25, %v5873_v60  ;;  %v785_v25 = vand.u32 2147483647, %v784_v22 }
 0x37f   :  { %vm6001_vm6 = vcmp.ge.f32.partialorder %v785_v25, 0.1 }
 0x425   :  { %v2226_v27 = vpop.f32.mrb[0].mxu1 }
 0x426   :  { %v5938_v29 = vadd.f32 %v2226_v27, %v5851_v30  ;;  %v5056_v6 = vpop.f32.mrb[1].mxu1  ;;  %v732_v30 = vpop.permute.xlu0 %731  ;;  %v2231_v35 = vmul.f32 %v5877_v0, %v2226_v27 }
 0x427   :  { %v734_v26 = vmul.f32 %v732_v30, %v5870_v54 }
 0x428   :  { %2241 = vrot.lane.b32.xlu0 %v5938_v29, %s5735_s21 }
 0x429   :  { %v735_v28 = vadd.f32 %v734_v26, %v723_v24 }
 0x42b   :  { %v742_v33 = vadd.f32 %v741_v32, %v735_v28 }
 0x42d   :  { %v2230_v36 = vadd.f32 %v5881_v5, %v742_v33 }
 0x42f   :  { %v5950_v37 = vadd.f32 %v2231_v35, %v2230_v36 }
 0x431   :  { %v4865_v42 = vmul.f32 -1.442695, %v5950_v37 }
 0x433   :  { %5516 = vpow2.f32 %v4865_v42  ;;  %v787_v42 = vsel %vm6001_vm6, %v784_v22, 0.0 }
 0x43d   :  { %v5517_v43 = vpop.eup %5516 }
 0x43e   :  { %v2237_v45 = vadd.f32 1.0, %v5517_v43 }
 0x440   :  { %5518 = vrcp.f32 %v2237_v45 }
 0x44a   :  { %v5519_v46 = vpop.eup %5518 }
 0x49a   :  { %v2242_v47 = vpop.permute.xlu0 %2241 }
 0x49b   :  { %v2244_v48 = vmul.f32 %v5519_v46, %v2242_v47 }
 0x49d   :  { %2246 = vrot.lane.b32.xlu1 %v2244_v48, %s5735_s21 }
 0x50f   :  { %v2247_v50 = vpop.permute.xlu1 %2246 }
 0x510   :  { %v2249_v51 = vadd.f32 %v2247_v50, %v5950_v37 }
 0x512   :  { %5520 = vtanh.f32 %v2249_v51 }
 0x51c   :  { %v5521_v52 = vpop.eup %5520 }
 0x51d   :  { %v2251_v5 = vsub.f32 %v5900_v34, %v5521_v52 }
 0x51f   :  { %2253 = vrot.lane.b32.xlu0 %v2251_v5, %s5736_s4 }
 0x591   :  { %v2254_v57 = vpop.permute.xlu0 %2253 }
 0x592   :  { %v2256_v58 = vmul.f32 %v5519_v46, %v2254_v57 }
 0x594   :  { %2258 = vrot.lane.b32.xlu1 %v2256_v58, %s5737_s24 }
 0x598   :  { %300 = vrot.lane.b32.xlu1 %v250_v62, %s5732_s19 }
 0x59c   :  { %755 = vperm.xlu1 %5460, %v746_v12  }
 0x5a0   :  { %5461 = vset.pattern.permute.xlu1 %v7926_v13 }
 0x606   :  { %v2259_v14 = vpop.permute.xlu1 %2258 }
 0x607   :  { %v5976_v31 = vadd.f32 %v5521_v52, %v2259_v14 }
 0x609   :  { %v2262_v2 = vsub.f32 %v5976_v31, %v5904_v39 }
 0x60a   :  { %v301_v27 = vpop.permute.xlu1 %300 }
 0x60b   :  { %v370_v6 = vadd.f32 %v301_v27, %v250_v62  ;;  %v2263_v7 = vand.u32 2147483647, %v2262_v2 }
 0x60d   :  { %5522 = vrsqrt.f32 %v370_v6  ;;  %vm5980_vm2 = vcmp.ge.f32.partialorder %v2263_v7, 0.05  ;;  %vm408_vm3 = vcmp.eq.f32.partialorder %v370_v6, inf  ;;  %v411_v20 = vand.u32 2147483648, %v370_v6 }
 0x60e   :  { %v2265_v15 = vsel %vm5980_vm2, %v2262_v2, 0.0  ;;  %vm410_vm4 = vcmp.eq.f32.partialorder %v370_v6, 0.0 }
 0x60f   :  { %2268 = vrot.lane.b32.xlu0 %v2265_v15, %s5735_s21 }
 0x613   :  { %749 = vperm.xlu0 %5455, %v746_v12  }
 0x617   :  { %v5523_v19 = vpop.eup %5522 }
 0x618   :  { %v407_v21 = vmul.f32 %v5523_v19, %v370_v6 }
 0x61a   :  { %v409_v23 = vsel %vm408_vm3, %v370_v6, %v407_v21 }
 0x61b   :  { %v412_v30 = vsel %vm410_vm4, %v411_v20, %v409_v23  ;;  %v756_v50 = vpop.permute.xlu1 %755 }
 0x61c   :  { %v760_v24 = vsub.f32 %v412_v30, %v5922_v59  ;;  %v562_v26 = vmul.f32 %v412_v30, %v412_v30  ;;  %v758_v55 = vmul.f32 %v756_v50, %v5858_v38 }
 0x61e   :  { %v761_v28 = vand.u32 2147483647, %v760_v24  ;;  %v586_v32 = vmul.f32 %v562_v26, %v412_v30 }
 0x620   :  { %vm762_vm5 = vcmp.ge.f32.partialorder %v761_v28, 0.1  ;;  %v772_v56 = vsub.f32 %v586_v32, %v5927_v1 }
 0x621   :  { %v763_v33 = vsel %vm762_vm5, %v760_v24, 0.0  ;;  %v6007_v35 = vsel %vm762_vm5, %v412_v30, %v5922_v59 }
 0x622   :  { %766 = vperm.xlu0 %5455, %v763_v33   ;;  %v773_v36 = vand.u32 2147483647, %v772_v56 }
 0x624   :  { %vm774_vm7 = vcmp.ge.f32.partialorder %v773_v36, 0.1 }
 0x625   :  { %v775_v43 = vsel %vm774_vm7, %v772_v56, 0.0  ;;  %v6012_v45 = vsel %vm774_vm7, %v586_v32, %v5927_v1  ;;  %v6046_v56 = vsel %vm5968_vm1, %v5911_v41, %v5961_v53 }
 0x626   :  { %790 = vperm.xlu0 %5455, %v787_v42   ;;  %778 = vperm.xlu1 %5461, %v775_v43   ;;  %v802_v33 = vsub.f32 %v5990_v17, %v6046_v56 }
 0x628   :  { %v803_v43 = vand.u32 2147483647, %v802_v33 }
 0x62a   :  { %5462 = vset.pattern.permute.xlu1 %v7924_v11  ;;  %vm6053_vm8 = vcmp.ge.f32.partialorder %v803_v43, 0.1 }
 0x62b   :  { %797 = vperm.xlu1 %5462, %v787_v42   ;;  %v805_v41 = vsel %vm6053_vm8, %v802_v33, 0.0 }
 0x681   :  { %v2269_v46 = vpop.permute.xlu0 %2268 }
 0x682   :  { %5066 = vmatmul.mubr.msk.f32.vlgmr.msra.gmra.mrb[2].mxu0 %vm2046_vm15, %v2269_v46  ;;  %v251_v46 = vmul.f32 %v5990_v17, %v5990_v17 }
 0x683   :  { %5325 = vmatpush3.bf16.msra.mxu0 %v5795_v4  ;;  %5087 = vmatprep.mubr.msk.f32.mxu0 %vm5730_vm0, %v5731_v8 }
 0x684   :  { %5326 = vmatprep.subr.bf16.mxu0 %v5729_v3 }
 0x687   :  { %5328 = vmatpush3.bf16.msra.mxu0 %v5810_v10 }
 0x688   :  { %5335 = vmatprep.subr.bf16.mxu0 %v5729_v3 }
 0x692   :  { %v750_v48 = vpop.permute.xlu0 %749 }
 0x693   :  { %v752_v52 = vmul.f32 %v750_v48, %v5860_v40 }
 0x695   :  { %v759_v58 = vadd.f32 %v758_v55, %v752_v52 }
 0x6a1   :  { %v767_v51 = vpop.permute.xlu0 %766 }
 0x6a2   :  { %v769_v57 = vmul.f32 %v767_v51, %v5863_v44 }
 0x6a4   :  { %v770_v62 = vadd.f32 %v769_v57, %v759_v58  ;;  %v6075_v57 = vld [vmem:[%s7916_s0 + $0x8] sm:$0x3] }
 0x6a5   :  { %v779_v5 = vpop.permute.xlu1 %778 }
 0x6a6   :  { %v781_v61 = vmul.f32 %v779_v5, %v5867_v49 }
 0x6a8   :  { %v782_v12 = vadd.f32 %v781_v61, %v770_v62 }
 0x6aa   :  { %v798_v14 = vpop.permute.xlu1 %797 }
 0x6ab   :  { %v800_v6 = vmul.f32 %v798_v14, %v5873_v60 }
 0x755   :  { %v2338_v59 = vpop.f32.mrb[2].mxu0 }
 0x756   :  { %v6023_v1 = vadd.f32 %v2338_v59, %v5938_v29  ;;  %v5067_v47 = vpop.f32.mrb[3].mxu0  ;;  %v791_v29 = vpop.permute.xlu0 %790  ;;  %v2343_v15 = vmul.f32 %v5877_v0, %v2338_v59 }
 0x757   :  { %v793_v2 = vmul.f32 %v791_v29, %v5870_v54  ;;  %v2266_v47 = vsel %vm5980_vm2, %v5976_v31, %v5904_v39  ;;  %v6081_v39 = vsel %vm6001_vm6, %v5990_v17, %v5996_v18 }
 0x758   :  { %2353 = vrot.lane.b32.xlu0 %v6023_v1, %s5735_s21  ;;  %v843_v62 = vsub.f32 %v6075_v57, %v6081_v39 }
 0x759   :  { %v794_v27 = vadd.f32 %v793_v2, %v782_v12 }
 0x75a   :  { %v844_v2 = vand.u32 2147483647, %v843_v62 }
 0x75b   :  { %v801_v7 = vadd.f32 %v800_v6, %v794_v27 }
 0x75c   :  { %vm6086_vm13 = vcmp.ge.f32.partialorder %v844_v2, 0.1 }
 0x75d   :  { %v2342_v19 = vadd.f32 %v5950_v37, %v801_v7 }
 0x75f   :  { %v6035_v20 = vadd.f32 %v2343_v15, %v2342_v19 }
 0x761   :  { %v4867_v21 = vmul.f32 -1.442695, %v6035_v20 }
 0x763   :  { %5524 = vpow2.f32 %v4867_v21 }
 0x76d   :  { %v5525_v22 = vpop.eup %5524 }
 0x76e   :  { %v2349_v23 = vadd.f32 1.0, %v5525_v22  ;;  %v846_v22 = vsel %vm6086_vm13, %v843_v62, 0.0 }
 0x770   :  { %5526 = vrcp.f32 %v2349_v23 }
 0x77a   :  { %v5527_v30 = vpop.eup %5526 }
 0x7ca   :  { %v2354_v24 = vpop.permute.xlu0 %2353 }
 0x7cb   :  { %v2356_v25 = vmul.f32 %v5527_v30, %v2354_v24 }
 0x7cd   :  { %2358 = vrot.lane.b32.xlu1 %v2356_v25, %s5735_s21 }
 0x83f   :  { %v2359_v26 = vpop.permute.xlu1 %2358 }
 0x840   :  { %v2361_v28 = vadd.f32 %v2359_v26, %v6035_v20 }
 0x842   :  { %5528 = vtanh.f32 %v2361_v28 }
 0x84c   :  { %v5529_v32 = vpop.eup %5528 }
 0x84d   :  { %v2363_v37 = vsub.f32 %v5976_v31, %v5529_v32 }
 0x84f   :  { %2365 = vrot.lane.b32.xlu0 %v2363_v37, %s5736_s4 }
 0x8c1   :  { %v2366_v36 = vpop.permute.xlu0 %2365 }
 0x8c2   :  { %v2368_v42 = vmul.f32 %v5527_v30, %v2366_v36 }
 0x8c4   :  { %2370 = vrot.lane.b32.xlu1 %v2368_v42, %s5737_s24 }
 0x8c8   :  { %302 = vrot.lane.b32.xlu1 %v251_v46, %s5732_s19 }
 0x8cc   :  { %814 = vperm.xlu1 %5462, %v805_v41  }
 0x8d0   :  { %5463 = vset.pattern.permute.xlu1 %v7926_v13 }
 0x936   :  { %v2371_v53 = vpop.permute.xlu1 %2370 }
 0x937   :  { %v6061_v63 = vadd.f32 %v5529_v32, %v2371_v53 }
 0x939   :  { %v2374_v48 = vsub.f32 %v6061_v63, %v2266_v47 }
 0x93a   :  { %v303_v50 = vpop.permute.xlu1 %302 }
 0x93b   :  { %v371_v51 = vadd.f32 %v303_v50, %v251_v46  ;;  %v2375_v52 = vand.u32 2147483647, %v2374_v48 }
 0x93d   :  { %5530 = vrsqrt.f32 %v371_v51  ;;  %vm2376_vm9 = vcmp.ge.f32.partialorder %v2375_v52, 0.05  ;;  %vm415_vm10 = vcmp.eq.f32.partialorder %v371_v51, inf  ;;  %v418_v58 = vand.u32 2147483648, %v371_v51 }
 0x93e   :  { %v2377_v5 = vsel %vm2376_vm9, %v2374_v48, 0.0  ;;  %v6069_v55 = vsel %vm2376_vm9, %v6061_v63, %v2266_v47  ;;  %vm417_vm11 = vcmp.eq.f32.partialorder %v371_v51, 0.0 }
 0x93f   :  { %2380 = vrot.lane.b32.xlu0 %v2377_v5, %s5735_s21 }
 0x943   :  { %808 = vperm.xlu0 %5455, %v805_v41  }
 0x947   :  { %v5531_v9 = vpop.eup %5530 }
 0x948   :  { %v414_v61 = vmul.f32 %v5531_v9, %v371_v51 }
 0x94a   :  { %v416_v29 = vsel %vm415_vm10, %v371_v51, %v414_v61 }
 0x94b   :  { %v419_v12 = vsel %vm417_vm11, %v418_v58, %v416_v29  ;;  %v815_v28 = vpop.permute.xlu1 %814 }
 0x94c   :  { %v819_v14 = vsub.f32 %v419_v12, %v6007_v35  ;;  %v563_v27 = vmul.f32 %v419_v12, %v419_v12  ;;  %v817_v36 = vmul.f32 %v815_v28, %v5858_v38 }
 0x94e   :  { %v820_v6 = vand.u32 2147483647, %v819_v14  ;;  %v587_v7 = vmul.f32 %v563_v27, %v419_v12 }
 0x950   :  { %vm821_vm12 = vcmp.ge.f32.partialorder %v820_v6, 0.1  ;;  %v831_v16 = vsub.f32 %v587_v7, %v6012_v45 }
 0x951   :  { %v822_v15 = vsel %vm821_vm12, %v819_v14, 0.0  ;;  %v6092_v19 = vsel %vm821_vm12, %v419_v12, %v6007_v35 }
 0x952   :  { %825 = vperm.xlu0 %5455, %v822_v15   ;;  %v832_v21 = vand.u32 2147483647, %v831_v16 }
 0x954   :  { %vm833_vm14 = vcmp.ge.f32.partialorder %v832_v21, 0.1 }
 0x955   :  { %v834_v23 = vsel %vm833_vm14, %v831_v16, 0.0  ;;  %v6097_v30 = vsel %vm833_vm14, %v587_v7, %v6012_v45  ;;  %v6131_v16 = vsel %vm6053_vm8, %v5990_v17, %v6046_v56 }
 0x956   :  { %849 = vperm.xlu0 %5455, %v846_v22   ;;  %837 = vperm.xlu1 %5463, %v834_v23   ;;  %v861_v15 = vsub.f32 %v6075_v57, %v6131_v16 }
 0x958   :  { %v862_v23 = vand.u32 2147483647, %v861_v15 }
 0x95a   :  { %5464 = vset.pattern.permute.xlu1 %v7924_v11  ;;  %vm6138_vm1 = vcmp.ge.f32.partialorder %v862_v23, 0.1 }
 0x95b   :  { %856 = vperm.xlu1 %5464, %v846_v22   ;;  %v864_v17 = vsel %vm6138_vm1, %v861_v15, 0.0 }
 0x9b1   :  { %v2381_v24 = vpop.permute.xlu0 %2380 }
 0x9b2   :  { %5077 = vmatmul.mubr.msk.f32.vlgmr.msra.gmra.mrb[2].mxu1 %vm2046_vm15, %v2381_v24  ;;  %v252_v24 = vmul.f32 %v6075_v57, %v6075_v57 }
 0x9b3   :  { %5331 = vmatpush3.bf16.msra.mxu1 %v5795_v4  ;;  %5098 = vmatprep.mubr.msk.f32.mxu1 %vm5730_vm0, %v5731_v8 }
 0x9b4   :  { %5332 = vmatprep.subr.bf16.mxu1 %v5729_v3 }
 0x9b7   :  { %5334 = vmatpush3.bf16.msra.mxu1 %v5810_v10 }
 0x9b8   :  { %5341 = vmatprep.subr.bf16.mxu1 %v5729_v3 }
 0x9c2   :  { %v809_v26 = vpop.permute.xlu0 %808 }
 0x9c3   :  { %v811_v37 = vmul.f32 %v809_v26, %v5860_v40 }
 0x9c5   :  { %v818_v43 = vadd.f32 %v817_v36, %v811_v37  ;;  %v6158_v36 = vld [vmem:[%s7916_s0 + $0xa] sm:$0x3] }
 0x9d1   :  { %v826_v32 = vpop.permute.xlu0 %825 }
 0x9d2   :  { %v828_v42 = vmul.f32 %v826_v32, %v5863_v44 }
 0x9d4   :  { %v829_v41 = vadd.f32 %v828_v42, %v818_v43  ;;  %v6164_v42 = vsel %vm6086_vm13, %v6075_v57, %v6081_v39 }
 0x9d5   :  { %v838_v33 = vpop.permute.xlu1 %837 }
 0x9d6   :  { %v840_v46 = vmul.f32 %v838_v33, %v5867_v49 }
 0x9d8   :  { %v841_v53 = vadd.f32 %v840_v46, %v829_v41 }
 0x9da   :  { %v857_v47 = vpop.permute.xlu1 %856 }
 0x9db   :  { %v859_v51 = vmul.f32 %v857_v47, %v5873_v60 }
 0xa85   :  { %v2450_v35 = vpop.f32.mrb[2].mxu1 }
 0xa86   :  { %v6108_v45 = vadd.f32 %v2450_v35, %v6023_v1  ;;  %v5078_v25 = vpop.f32.mrb[3].mxu1  ;;  %v850_v1 = vpop.permute.xlu0 %849  ;;  %v2455_v5 = vmul.f32 %v5877_v0, %v2450_v35 }
 0xa87   :  { %v852_v48 = vmul.f32 %v850_v1, %v5870_v54 }
 0xa88   :  { %2465 = vrot.lane.b32.xlu0 %v6108_v45, %s5735_s21 }
 0xa89   :  { %v853_v50 = vadd.f32 %v852_v48, %v841_v53 }
 0xa8b   :  { %v860_v52 = vadd.f32 %v859_v51, %v853_v50 }
 0xa8d   :  { %v2454_v9 = vadd.f32 %v6035_v20, %v860_v52 }
 0xa8f   :  { %v6120_v58 = vadd.f32 %v2455_v5, %v2454_v9 }
 0xa91   :  { %v4869_v61 = vmul.f32 -1.442695, %v6120_v58 }
 0xa93   :  { %5532 = vpow2.f32 %v4869_v61 }
 0xa9d   :  { %v5533_v62 = vpop.eup %5532 }
 0xa9e   :  { %v2461_v29 = vadd.f32 1.0, %v5533_v62 }
 0xaa0   :  { %5534 = vrcp.f32 %v2461_v29 }
 0xaaa   :  { %v5535_v12 = vpop.eup %5534 }
 0xafa   :  { %v2466_v14 = vpop.permute.xlu0 %2465 }
 0xafb   :  { %v2468_v2 = vmul.f32 %v5535_v12, %v2466_v14 }
 0xafd   :  { %2470 = vrot.lane.b32.xlu1 %v2468_v2, %s5735_s21 }
 0xb6f   :  { %v2471_v27 = vpop.permute.xlu1 %2470 }
 0xb70   :  { %v2473_v6 = vadd.f32 %v2471_v27, %v6120_v58 }
 0xb72   :  { %5536 = vtanh.f32 %v2473_v6 }
 0xb7c   :  { %v5537_v7 = vpop.eup %5536 }
 0xb7d   :  { %v2475_v20 = vsub.f32 %v6061_v63, %v5537_v7 }
 0xb7f   :  { %2477 = vrot.lane.b32.xlu0 %v2475_v20, %s5736_s4 }
 0xbf1   :  { %v2478_v21 = vpop.permute.xlu0 %2477 }
 0xbf2   :  { %v2480_v22 = vmul.f32 %v5535_v12, %v2478_v21 }
 0xbf4   :  { %2482 = vrot.lane.b32.xlu1 %v2480_v22, %s5737_s24 }
 0xbf8   :  { %304 = vrot.lane.b32.xlu1 %v252_v24, %s5732_s19 }
 0xbfc   :  { %873 = vperm.xlu1 %5464, %v864_v17  }
 0xc00   :  { %5465 = vset.pattern.permute.xlu1 %v7926_v13 }
 0xc66   :  { %v2483_v56 = vpop.permute.xlu1 %2482 }
 0xc67   :  { %v6146_v59 = vadd.f32 %v5537_v7, %v2483_v56 }
 0xc69   :  { %v2504_v25 = vsub.f32 %v6146_v59, %v6069_v55 }
 0xc6a   :  { %v305_v26 = vpop.permute.xlu1 %304 }
 0xc6b   :  { %v372_v28 = vadd.f32 %v305_v26, %v252_v24  ;;  %v2505_v32 = vand.u32 2147483647, %v2504_v25 }
 0xc6d   :  { %5538 = vrsqrt.f32 %v372_v28  ;;  %vm2506_vm2 = vcmp.ge.f32.partialorder %v2505_v32, 0.05  ;;  %vm422_vm3 = vcmp.eq.f32.partialorder %v372_v28, inf  ;;  %v425_v46 = vand.u32 2147483648, %v372_v28 }
 0xc6e   :  { %v2507_v37 = vsel %vm2506_vm2, %v2504_v25, 0.0  ;;  %v6152_v33 = vsel %vm2506_vm2, %v6146_v59, %v6069_v55  ;;  %vm424_vm4 = vcmp.eq.f32.partialorder %v372_v28, 0.0  ;;  %v902_v55 = vsub.f32 %v6158_v36, %v6164_v42 }
 0xc6f   :  { %2510 = vrot.lane.b32.xlu0 %v2507_v37, %s5735_s21 }
 0xc70   :  { %v903_v48 = vand.u32 2147483647, %v902_v55 }
 0xc72   :  { %vm6169_vm6 = vcmp.ge.f32.partialorder %v903_v48, 0.1 }
 0xc73   :  { %867 = vperm.xlu0 %5455, %v864_v17   ;;  %v905_v62 = vsel %vm6169_vm6, %v902_v55, 0.0 }
 0xc77   :  { %v5539_v43 = vpop.eup %5538 }
 0xc78   :  { %v421_v41 = vmul.f32 %v5539_v43, %v372_v28 }
 0xc7a   :  { %v423_v1 = vsel %vm422_vm3, %v372_v28, %v421_v41 }
 0xc7b   :  { %v426_v53 = vsel %vm424_vm4, %v425_v46, %v423_v1  ;;  %v874_v6 = vpop.permute.xlu1 %873 }
 0xc7c   :  { %v878_v47 = vsub.f32 %v426_v53, %v6092_v19  ;;  %v564_v50 = vmul.f32 %v426_v53, %v426_v53  ;;  %v876_v21 = vmul.f32 %v874_v6, %v5858_v38 }
 0xc7e   :  { %v879_v51 = vand.u32 2147483647, %v878_v47  ;;  %v588_v52 = vmul.f32 %v564_v50, %v426_v53 }
 0xc80   :  { %vm880_vm5 = vcmp.ge.f32.partialorder %v879_v51, 0.1  ;;  %v890_v18 = vsub.f32 %v588_v52, %v6097_v30 }
 0xc81   :  { %v881_v5 = vsel %vm880_vm5, %v878_v47, 0.0  ;;  %v6175_v9 = vsel %vm880_vm5, %v426_v53, %v6092_v19 }
 0xc82   :  { %884 = vperm.xlu0 %5455, %v881_v5   ;;  %v891_v61 = vand.u32 2147483647, %v890_v18  ;;  %v6214_v5 = vsel %vm6138_vm1, %v6075_v57, %v6131_v16 }
 0xc84   :  { %vm892_vm7 = vcmp.ge.f32.partialorder %v891_v61, 0.1  ;;  %v920_v61 = vsub.f32 %v6158_v36, %v6214_v5 }
 0xc85   :  { %v893_v29 = vsel %vm892_vm7, %v890_v18, 0.0  ;;  %v6180_v12 = vsel %vm892_vm7, %v588_v52, %v6097_v30 }
 0xc86   :  { %908 = vperm.xlu0 %5455, %v905_v62   ;;  %896 = vperm.xlu1 %5465, %v893_v29  }
 0xc8a   :  { %5466 = vset.pattern.permute.xlu1 %v7924_v11 }
 0xc8b   :  { %915 = vperm.xlu1 %5466, %v905_v62  }
 0xce1   :  { %v2511_v14 = vpop.permute.xlu0 %2510 }
 0xce2   :  { %5088 = vmatmul.mubr.msk.f32.vlgmr.msra.gmra.mrb[4].mxu0 %vm2046_vm15, %v2511_v14  ;;  %v921_v14 = vand.u32 2147483647, %v920_v61 }
 0xce3   :  { %5337 = vmatpush3.bf16.msra.mxu0 %v5795_v4  ;;  %5109 = vmatprep.mubr.msk.f32.mxu0 %vm5730_vm0, %v5731_v8 }
 0xce4   :  { %5338 = vmatprep.subr.bf16.mxu0 %v5729_v3  ;;  %vm6221_vm8 = vcmp.ge.f32.partialorder %v921_v14, 0.1 }
 0xce5   :  { %v923_v57 = vsel %vm6221_vm8, %v920_v61, 0.0 }
 0xce7   :  { %5340 = vmatpush3.bf16.msra.mxu0 %v5810_v10 }
 0xce8   :  { %5347 = vmatprep.subr.bf16.mxu0 %v5729_v3 }
 0xcf2   :  { %v868_v27 = vpop.permute.xlu0 %867 }
 0xcf3   :  { %v870_v20 = vmul.f32 %v868_v27, %v5860_v40 }
 0xcf5   :  { %v877_v23 = vadd.f32 %v876_v21, %v870_v20 }
 0xd01   :  { %v885_v7 = vpop.permute.xlu0 %884 }
 0xd02   :  { %v887_v22 = vmul.f32 %v885_v7, %v5863_v44 }
 0xd04   :  { %v888_v17 = vadd.f32 %v887_v22, %v877_v23  ;;  %v6241_v22 = vld [vmem:[%s7916_s0 + $0xc] sm:$0x3]  ;;  %v6247_v23 = vsel %vm6169_vm6, %v6158_v36, %v6164_v42 }
 0xd05   :  { %v897_v15 = vpop.permute.xlu1 %896 }
 0xd06   :  { %v899_v24 = vmul.f32 %v897_v15, %v5867_v49 }
 0xd08   :  { %v900_v56 = vadd.f32 %v899_v24, %v888_v17 }
 0xd0a   :  { %v916_v25 = vpop.permute.xlu1 %915 }
 0xd0b   :  { %v918_v32 = vmul.f32 %v916_v25, %v5873_v60 }
 0xdb5   :  { %v2580_v19 = vpop.f32.mrb[4].mxu0 }
 0xdb6   :  { %v6191_v30 = vadd.f32 %v2580_v19, %v6108_v45  ;;  %v5089_v2 = vpop.f32.mrb[5].mxu0  ;;  %v909_v45 = vpop.permute.xlu0 %908  ;;  %v2585_v43 = vmul.f32 %v5877_v0, %v2580_v19  ;;  %v253_v19 = vmul.f32 %v6158_v36, %v6158_v36 }
 0xdb7   :  { %v911_v26 = vmul.f32 %v909_v45, %v5870_v54 }
 0xdb8   :  { %2595 = vrot.lane.b32.xlu0 %v6191_v30, %s5735_s21 }
 0xdb9   :  { %v912_v28 = vadd.f32 %v911_v26, %v900_v56 }
 0xdbb   :  { %v919_v37 = vadd.f32 %v918_v32, %v912_v28 }
 0xdbd   :  { %v2584_v46 = vadd.f32 %v6120_v58, %v919_v37 }
 0xdbf   :  { %v6203_v41 = vadd.f32 %v2585_v43, %v2584_v46 }
 0xdc1   :  { %v4871_v55 = vmul.f32 -1.442695, %v6203_v41 }
 0xdc3   :  { %5540 = vpow2.f32 %v4871_v55 }
 0xdcd   :  { %v5541_v1 = vpop.eup %5540 }
 0xdce   :  { %v2591_v53 = vadd.f32 1.0, %v5541_v1 }
 0xdd0   :  { %5542 = vrcp.f32 %v2591_v53 }
 0xdda   :  { %v5543_v47 = vpop.eup %5542 }
 0xe2a   :  { %v2596_v48 = vpop.permute.xlu0 %2595 }
 0xe2b   :  { %v2598_v50 = vmul.f32 %v5543_v47, %v2596_v48 }
 0xe2d   :  { %2600 = vrot.lane.b32.xlu1 %v2598_v50, %s5735_s21 }
 0xe9f   :  { %v2601_v51 = vpop.permute.xlu1 %2600 }
 0xea0   :  { %v2603_v52 = vadd.f32 %v2601_v51, %v6203_v41 }
 0xea2   :  { %5544 = vtanh.f32 %v2603_v52 }
 0xeac   :  { %v5545_v18 = vpop.eup %5544 }
 0xead   :  { %v2605_v58 = vsub.f32 %v6146_v59, %v5545_v18 }
 0xeaf   :  { %2607 = vrot.lane.b32.xlu0 %v2605_v58, %s5736_s4 }
 0xf21   :  { %v2608_v62 = vpop.permute.xlu0 %2607 }
 0xf22   :  { %v2610_v29 = vmul.f32 %v5543_v47, %v2608_v62 }
 0xf24   :  { %2612 = vrot.lane.b32.xlu1 %v2610_v29, %s5737_s24 }
 0xf28   :  { %306 = vrot.lane.b32.xlu1 %v253_v19, %s5732_s19 }
 0xf2c   :  { %932 = vperm.xlu1 %5466, %v923_v57  }
 0xf30   :  { %5467 = vset.pattern.permute.xlu1 %v7926_v13 }
 0xf96   :  { %v2613_v16 = vpop.permute.xlu1 %2612 }
 0xf97   :  { %v6229_v35 = vadd.f32 %v5545_v18, %v2613_v16 }
 0xf99   :  { %v2616_v27 = vsub.f32 %v6229_v35, %v6152_v33 }
 0xf9a   :  { %v307_v6 = vpop.permute.xlu1 %306 }
 0xf9b   :  { %v373_v7 = vadd.f32 %v307_v6, %v253_v19  ;;  %v2617_v20 = vand.u32 2147483647, %v2616_v27 }
 0xf9d   :  { %5546 = vrsqrt.f32 %v373_v7  ;;  %vm2618_vm9 = vcmp.ge.f32.partialorder %v2617_v20, 0.05  ;;  %vm429_vm10 = vcmp.eq.f32.partialorder %v373_v7, inf  ;;  %v432_v17 = vand.u32 2147483648, %v373_v7 }
 0xf9e   :  { %v2619_v15 = vsel %vm2618_vm9, %v2616_v27, 0.0  ;;  %v6235_v21 = vsel %vm2618_vm9, %v6229_v35, %v6152_v33  ;;  %vm431_vm11 = vcmp.eq.f32.partialorder %v373_v7, 0.0  ;;  %v961_v33 = vsub.f32 %v6241_v22, %v6247_v23 }
 0xf9f   :  { %2622 = vrot.lane.b32.xlu0 %v2619_v15, %s5735_s21 }
 0xfa0   :  { %v962_v28 = vand.u32 2147483647, %v961_v33 }
 0xfa2   :  { %vm6252_vm13 = vcmp.ge.f32.partialorder %v962_v28, 0.1 }
 0xfa3   :  { %926 = vperm.xlu0 %5455, %v923_v57   ;;  %v964_v53 = vsel %vm6252_vm13, %v961_v33, 0.0 }
 0xfa7   :  { %v5547_v24 = vpop.eup %5546 }
 0xfa8   :  { %v428_v45 = vmul.f32 %v5547_v24, %v373_v7 }
 0xfaa   :  { %v430_v56 = vsel %vm429_vm10, %v373_v7, %v428_v45 }
 0xfab   :  { %v433_v25 = vsel %vm431_vm11, %v432_v17, %v430_v56  ;;  %v933_v18 = vpop.permute.xlu1 %932 }
 0xfac   :  { %v937_v26 = vsub.f32 %v433_v25, %v6175_v9  ;;  %v565_v32 = vmul.f32 %v433_v25, %v433_v25  ;;  %v935_v29 = vmul.f32 %v933_v18, %v5858_v38 }
 0xfae   :  { %v938_v37 = vand.u32 2147483647, %v937_v26  ;;  %v589_v43 = vmul.f32 %v565_v32, %v433_v25 }
 0xfb0   :  { %vm939_vm12 = vcmp.ge.f32.partialorder %v938_v37, 0.1  ;;  %v949_v39 = vsub.f32 %v589_v43, %v6180_v12 }
 0xfb1   :  { %v940_v46 = vsel %vm939_vm12, %v937_v26, 0.0  ;;  %v6258_v55 = vsel %vm939_vm12, %v433_v25, %v6175_v9 }
 0xfb2   :  { %943 = vperm.xlu0 %5455, %v940_v46   ;;  %v950_v1 = vand.u32 2147483647, %v949_v39 }
 0xfb4   :  { %vm951_vm14 = vcmp.ge.f32.partialorder %v950_v1, 0.1  ;;  %v6297_v1 = vsel %vm6221_vm8, %v6158_v36, %v6214_v5 }
 0xfb5   :  { %v952_v47 = vsel %vm951_vm14, %v949_v39, 0.0  ;;  %v6263_v48 = vsel %vm951_vm14, %v589_v43, %v6180_v12 }
 0xfb6   :  { %967 = vperm.xlu0 %5455, %v964_v53   ;;  %955 = vperm.xlu1 %5467, %v952_v47  }
 0xfba   :  { %5468 = vset.pattern.permute.xlu1 %v7924_v11 }
 0xfbb   :  { %974 = vperm.xlu1 %5468, %v964_v53   ;;  %v979_v53 = vsub.f32 %v6241_v22, %v6297_v1 }
0x1011   :  { %v2623_v50 = vpop.permute.xlu0 %2622 }
0x1012   :  { %5099 = vmatmul.mubr.msk.f32.vlgmr.msra.gmra.mrb[4].mxu1 %vm2046_vm15, %v2623_v50 }
0x1013   :  { %5343 = vmatpush3.bf16.msra.mxu1 %v5795_v4  ;;  %5120 = vmatprep.mubr.msk.f32.mxu1 %vm5730_vm0, %v5731_v8 }
0x1014   :  { %5344 = vmatprep.subr.bf16.mxu1 %v5729_v3 }
0x1017   :  { %5346 = vmatpush3.bf16.msra.mxu1 %v5810_v10 }
0x1018   :  { %5353 = vmatprep.subr.bf16.mxu1 %v5729_v3 }
0x1022   :  { %v927_v52 = vpop.permute.xlu0 %926 }
0x1023   :  { %v929_v61 = vmul.f32 %v927_v52, %v5860_v40 }
0x1025   :  { %v936_v19 = vadd.f32 %v935_v29, %v929_v61 }
0x1031   :  { %v944_v58 = vpop.permute.xlu0 %943 }
0x1032   :  { %v946_v14 = vmul.f32 %v944_v58, %v5863_v44 }
0x1034   :  { %v947_v16 = vadd.f32 %v946_v14, %v936_v19  ;;  %v6324_v19 = vld [vmem:[%s7916_s0 + $0xe] sm:$0x3] }
0x1035   :  { %v956_v62 = vpop.permute.xlu1 %955  ;;  %v255_v52 = vmul.f32 %v6324_v19, %v6324_v19 }
0x1036   :  { %v958_v57 = vmul.f32 %v956_v62, %v5867_v49 }
0x1038   :  { %v959_v27 = vadd.f32 %v958_v57, %v947_v16  ;;  %v6330_v57 = vsel %vm6252_vm13, %v6241_v22, %v6247_v23 }
0x103a   :  { %v975_v6 = vpop.permute.xlu1 %974 }
0x103b   :  { %v977_v15 = vmul.f32 %v975_v6, %v5873_v60 }
0x10e5   :  { %v2692_v9 = vpop.f32.mrb[4].mxu1 }
0x10e6   :  { %v6274_v12 = vadd.f32 %v2692_v9, %v6191_v30  ;;  %v5100_v51 = vpop.f32.mrb[5].mxu1  ;;  %v968_v30 = vpop.permute.xlu0 %967  ;;  %v2697_v17 = vmul.f32 %v5877_v0, %v2692_v9  ;;  %v980_v9 = vand.u32 2147483647, %v979_v53 }
0x10e7   :  { %v970_v7 = vmul.f32 %v968_v30, %v5870_v54  ;;  %v254_v51 = vmul.f32 %v6241_v22, %v6241_v22 }
0x10e8   :  { %2707 = vrot.lane.b32.xlu0 %v6274_v12, %s5735_s21  ;;  %vm6304_vm1 = vcmp.ge.f32.partialorder %v980_v9, 0.1 }
0x10e9   :  { %v971_v20 = vadd.f32 %v970_v7, %v959_v27  ;;  %v982_v36 = vsel %vm6304_vm1, %v979_v53, 0.0 }
0x10eb   :  { %v978_v24 = vadd.f32 %v977_v15, %v971_v20 }
0x10ed   :  { %v2696_v45 = vadd.f32 %v6203_v41, %v978_v24 }
0x10ef   :  { %v6286_v33 = vadd.f32 %v2697_v17, %v2696_v45 }
0x10f1   :  { %v4873_v56 = vmul.f32 -1.442695, %v6286_v33 }
0x10f3   :  { %5548 = vpow2.f32 %v4873_v56 }
0x10fd   :  { %v5549_v25 = vpop.eup %5548 }
0x10fe   :  { %v2703_v26 = vadd.f32 1.0, %v5549_v25 }
0x1100   :  { %5550 = vrcp.f32 %v2703_v26 }
0x110a   :  { %v5551_v28 = vpop.eup %5550 }
0x115a   :  { %v2708_v32 = vpop.permute.xlu0 %2707 }
0x115b   :  { %v2710_v37 = vmul.f32 %v5551_v28, %v2708_v32 }
0x115d   :  { %2712 = vrot.lane.b32.xlu1 %v2710_v37, %s5735_s21 }
0x11cf   :  { %v2713_v43 = vpop.permute.xlu1 %2712 }
0x11d0   :  { %v2715_v39 = vadd.f32 %v2713_v43, %v6286_v33 }
0x11d2   :  { %5552 = vtanh.f32 %v2715_v39 }
0x11dc   :  { %v5553_v46 = vpop.eup %5552 }
0x11dd   :  { %v2717_v41 = vsub.f32 %v6229_v35, %v5553_v46 }
0x11df   :  { %2719 = vrot.lane.b32.xlu0 %v2717_v41, %s5736_s4 }
0x1251   :  { %v2720_v47 = vpop.permute.xlu0 %2719 }
0x1252   :  { %v2722_v50 = vmul.f32 %v5551_v28, %v2720_v47 }
0x1254   :  { %2724 = vrot.lane.b32.xlu1 %v2722_v50, %s5737_s24 }
0x1258   :  { %308 = vrot.lane.b32.xlu1 %v254_v51, %s5732_s19 }
0x125c   :  { %991 = vperm.xlu1 %5468, %v982_v36  }
0x1260   :  { %5469 = vset.pattern.permute.xlu1 %v7926_v13 }
0x12c6   :  { %v2725_v5 = vpop.permute.xlu1 %2724 }
0x12c7   :  { %v6312_v2 = vadd.f32 %v5553_v46, %v2725_v5 }
0x12c9   :  { %v2728_v18 = vsub.f32 %v6312_v2, %v6235_v21 }
0x12ca   :  { %v309_v58 = vpop.permute.xlu1 %308 }
0x12cb   :  { %v374_v61 = vadd.f32 %v309_v58, %v254_v51  ;;  %v2729_v62 = vand.u32 2147483647, %v2728_v18 }
0x12cd   :  { %5554 = vrsqrt.f32 %v374_v61  ;;  %vm2730_vm2 = vcmp.ge.f32.partialorder %v2729_v62, 0.05  ;;  %vm436_vm3 = vcmp.eq.f32.partialorder %v374_v61, inf  ;;  %v439_v30 = vand.u32 2147483648, %v374_v61 }
0x12ce   :  { %v2731_v29 = vsel %vm2730_vm2, %v2728_v18, 0.0  ;;  %v6318_v14 = vsel %vm2730_vm2, %v6312_v2, %v6235_v21  ;;  %vm438_vm4 = vcmp.eq.f32.partialorder %v374_v61, 0.0  ;;  %v1020_v21 = vsub.f32 %v6324_v19, %v6330_v57 }
0x12cf   :  { %2734 = vrot.lane.b32.xlu0 %v2731_v29, %s5735_s21 }
0x12d0   :  { %v1021_v15 = vand.u32 2147483647, %v1020_v21 }
0x12d2   :  { %vm6335_vm6 = vcmp.ge.f32.partialorder %v1021_v15, 0.1 }
0x12d3   :  { %985 = vperm.xlu0 %5455, %v982_v36   ;;  %v1023_v28 = vsel %vm6335_vm6, %v1020_v21, 0.0 }
0x12d7   :  { %v5555_v16 = vpop.eup %5554 }
0x12d8   :  { %v435_v27 = vmul.f32 %v5555_v16, %v374_v61 }
0x12da   :  { %v437_v6 = vsel %vm436_vm3, %v374_v61, %v435_v27 }
0x12db   :  { %v440_v7 = vsel %vm438_vm4, %v439_v30, %v437_v6  ;;  %v992_v41 = vpop.permute.xlu1 %991 }
0x12dc   :  { %v996_v20 = vsub.f32 %v440_v7, %v6258_v55  ;;  %v566_v24 = vmul.f32 %v440_v7, %v440_v7  ;;  %v994_v9 = vmul.f32 %v992_v41, %v5858_v38  ;;  %v1031_v41 = vsel %vm6335_vm6, %v6324_v19, %v6330_v57 }
0x12de   :  { %v997_v17 = vand.u32 2147483647, %v996_v20  ;;  %v590_v45 = vmul.f32 %v566_v24, %v440_v7 }
0x12e0   :  { %vm998_vm5 = vcmp.ge.f32.partialorder %v997_v17, 0.1  ;;  %v1008_v42 = vsub.f32 %v590_v45, %v6263_v48 }
0x12e1   :  { %v999_v56 = vsel %vm998_vm5, %v996_v20, 0.0  ;;  %v6341_v25 = vsel %vm998_vm5, %v440_v7, %v6258_v55 }
0x12e2   :  { %1002 = vperm.xlu0 %5455, %v999_v56   ;;  %v1009_v26 = vand.u32 2147483647, %v1008_v42 }
0x12e4   :  { %vm1010_vm7 = vcmp.ge.f32.partialorder %v1009_v26, 0.1 }
0x12e5   :  { %v1011_v32 = vsel %vm1010_vm7, %v1008_v42, 0.0  ;;  %v6346_v37 = vsel %vm1010_vm7, %v590_v45, %v6263_v48 }
0x12e6   :  { %1026 = vperm.xlu0 %5455, %v1023_v28   ;;  %1014 = vperm.xlu1 %5469, %v1011_v32  }
0x12ea   :  { %5470 = vset.pattern.permute.xlu1 %v7924_v11 }
0x12eb   :  { %1033 = vperm.xlu1 %5470, %v1023_v28  }
0x1341   :  { %v2735_v43 = vpop.permute.xlu0 %2734 }
0x1342   :  { %5110 = vmatmul.mubr.msk.f32.vlgmr.msra.gmra.mrb[6].mxu0 %vm2046_vm15, %v2735_v43 }
0x1343   :  { %5349 = vmatpush3.bf16.msra.mxu0 %v5795_v4  ;;  %5131 = vmatprep.mubr.msk.f32.mxu0 %vm5730_vm0, %v5731_v8 }
0x1344   :  { %5350 = vmatprep.subr.bf16.mxu0 %v5729_v3 }
0x1347   :  { %5352 = vmatpush3.bf16.msra.mxu0 %v5810_v10 }
0x1348   :  { %5359 = vmatprep.subr.bf16.mxu0 %v5729_v3 }
0x1352   :  { %v986_v46 = vpop.permute.xlu0 %985 }
0x1353   :  { %v988_v47 = vmul.f32 %v986_v46, %v5860_v40 }
0x1355   :  { %v995_v36 = vadd.f32 %v994_v9, %v988_v47 }
0x1361   :  { %v1003_v53 = vpop.permute.xlu0 %1002 }
0x1362   :  { %v1005_v51 = vmul.f32 %v1003_v53, %v5863_v44 }
0x1364   :  { %v1006_v18 = vadd.f32 %v1005_v51, %v995_v36 }
0x1365   :  { %v1015_v50 = vpop.permute.xlu1 %1014 }
0x1366   :  { %v1017_v5 = vmul.f32 %v1015_v50, %v5867_v49 }
0x1368   :  { %v1018_v58 = vadd.f32 %v1017_v5, %v1006_v18 }
0x136a   :  { %v1034_v61 = vpop.permute.xlu1 %1033 }
0x136b   :  { %v1036_v16 = vmul.f32 %v1034_v61, %v5873_v60 }
0x1415   :  { %v2804_v55 = vpop.f32.mrb[6].mxu0 }
0x1416   :  { %v6357_v48 = vadd.f32 %v2804_v55, %v6274_v12  ;;  %v5111_v39 = vpop.f32.mrb[7].mxu0  ;;  %v1027_v12 = vpop.permute.xlu0 %1026  ;;  %v2809_v27 = vmul.f32 %v5877_v0, %v2804_v55 }
0x1417   :  { %v1029_v62 = vmul.f32 %v1027_v12, %v5870_v54 }
0x1418   :  { %2819 = vrot.lane.b32.xlu0 %v6357_v48, %s5735_s21 }
0x1419   :  { %v1030_v29 = vadd.f32 %v1029_v62, %v1018_v58 }
0x141b   :  { %v1037_v30 = vadd.f32 %v1036_v16, %v1030_v29 }
0x141d   :  { %v2808_v21 = vadd.f32 %v6286_v33, %v1037_v30  ;;  %v989_v33 = vsel %vm6304_vm1, %v6241_v22, %v6297_v1  ;;  %v6391_v1 = vld [vmem:[%s7916_s0 + $0x10] sm:$0x3] }
0x141e   :  { %v1038_v26 = vsub.f32 %v6324_v19, %v989_v33  ;;  %v1079_v53 = vsub.f32 %v6391_v1, %v1031_v41 }
0x141f   :  { %v6369_v6 = vadd.f32 %v2809_v27, %v2808_v21 }
0x1420   :  { %v1039_v28 = vand.u32 2147483647, %v1038_v26  ;;  %v1080_v47 = vand.u32 2147483647, %v1079_v53 }
0x1421   :  { %v4875_v7 = vmul.f32 -1.442695, %v6369_v6 }
0x1422   :  { %vm1040_vm8 = vcmp.ge.f32.partialorder %v1039_v28, 0.1  ;;  %vm6399_vm9 = vcmp.ge.f32.partialorder %v1080_v47, 0.1 }
0x1423   :  { %5556 = vpow2.f32 %v4875_v7  ;;  %v6380_v32 = vsel %vm1040_vm8, %v6324_v19, %v989_v33  ;;  %v1041_v22 = vsel %vm1040_vm8, %v1038_v26, 0.0  ;;  %v6406_v9 = vsel %vm6399_vm9, %v6391_v1, %v1031_v41 }
0x142d   :  { %v5557_v20 = vpop.eup %5556 }
0x142e   :  { %v2815_v15 = vadd.f32 1.0, %v5557_v20 }
0x1430   :  { %5558 = vrcp.f32 %v2815_v15 }
0x143a   :  { %v5559_v24 = vpop.eup %5558 }
0x148a   :  { %v2820_v17 = vpop.permute.xlu0 %2819 }
0x148b   :  { %v2822_v45 = vmul.f32 %v5559_v24, %v2820_v17  ;;  %v1082_v17 = vsel %vm6399_vm9, %v1079_v53, 0.0 }
0x148d   :  { %2824 = vrot.lane.b32.xlu1 %v2822_v45, %s5735_s21 }
0x14ff   :  { %v2825_v42 = vpop.permute.xlu1 %2824 }
0x1500   :  { %v2827_v56 = vadd.f32 %v2825_v42, %v6369_v6 }
0x1502   :  { %5560 = vtanh.f32 %v2827_v56 }
0x150c   :  { %v5561_v43 = vpop.eup %5560 }
0x150d   :  { %v2829_v55 = vsub.f32 %v6312_v2, %v5561_v43 }
0x150f   :  { %2831 = vrot.lane.b32.xlu0 %v2829_v55, %s5736_s4 }
0x1581   :  { %v2832_v39 = vpop.permute.xlu0 %2831 }
0x1582   :  { %v2834_v46 = vmul.f32 %v5559_v24, %v2832_v39 }
0x1584   :  { %2836 = vrot.lane.b32.xlu1 %v2834_v46, %s5737_s24 }
0x1588   :  { %310 = vrot.lane.b32.xlu1 %v255_v52, %s5732_s19 }
0x158c   :  { %1050 = vperm.xlu1 %5470, %v1041_v22  }
0x1590   :  { %5471 = vset.pattern.permute.xlu1 %v7926_v13 }
0x15f6   :  { %v2837_v51 = vpop.permute.xlu1 %2836 }
0x15f7   :  { %v6408_v36 = vadd.f32 %v5561_v43, %v2837_v51 }
0x15f9   :  { %v2840_v19 = vsub.f32 %v6408_v36, %v6318_v14 }
0x15fa   :  { %v311_v57 = vpop.permute.xlu1 %310 }
0x15fb   :  { %v375_v23 = vadd.f32 %v311_v57, %v255_v52  ;;  %v2841_v5 = vand.u32 2147483647, %v2840_v19 }
0x15fd   :  { %5562 = vrsqrt.f32 %v375_v23  ;;  %vm2842_vm10 = vcmp.ge.f32.partialorder %v2841_v5, 0.05  ;;  %vm443_vm11 = vcmp.eq.f32.partialorder %v375_v23, inf  ;;  %v446_v61 = vand.u32 2147483648, %v375_v23 }
0x15fe   :  { %v2843_v18 = vsel %vm2842_vm10, %v2840_v19, 0.0  ;;  %v6414_v12 = vsel %vm2842_vm10, %v6408_v36, %v6318_v14  ;;  %vm445_vm12 = vcmp.eq.f32.partialorder %v375_v23, 0.0 }
0x15ff   :  { %2846 = vrot.lane.b32.xlu0 %v2843_v18, %s5735_s21 }
0x1603   :  { %1044 = vperm.xlu0 %5455, %v1041_v22  }
0x1607   :  { %v5563_v58 = vpop.eup %5562 }
0x1608   :  { %v442_v62 = vmul.f32 %v5563_v58, %v375_v23 }
0x160a   :  { %v444_v29 = vsel %vm443_vm11, %v375_v23, %v442_v62 }
0x160b   :  { %v447_v16 = vsel %vm445_vm12, %v446_v61, %v444_v29  ;;  %v1051_v28 = vpop.permute.xlu1 %1050 }
0x160c   :  { %v1055_v30 = vsub.f32 %v447_v16, %v6341_v25  ;;  %v567_v27 = vmul.f32 %v447_v16, %v447_v16  ;;  %v1053_v46 = vmul.f32 %v1051_v28, %v5858_v38 }
0x160e   :  { %v1056_v21 = vand.u32 2147483647, %v1055_v30  ;;  %v591_v7 = vmul.f32 %v567_v27, %v447_v16 }
0x1610   :  { %vm1057_vm13 = vcmp.ge.f32.partialorder %v1056_v21, 0.1  ;;  %v1067_v20 = vsub.f32 %v591_v7, %v6346_v37 }
0x1611   :  { %v1058_v14 = vsel %vm1057_vm13, %v1055_v30, 0.0  ;;  %v6420_v15 = vsel %vm1057_vm13, %v447_v16, %v6341_v25 }
0x1612   :  { %1061 = vperm.xlu0 %5455, %v1058_v14   ;;  %v1068_v24 = vand.u32 2147483647, %v1067_v20  ;;  %v1097_v14 = vsub.f32 %v6391_v1, %v6380_v32 }
0x1614   :  { %vm1069_vm14 = vcmp.ge.f32.partialorder %v1068_v24, 0.1 }
0x1615   :  { %v1070_v45 = vsel %vm1069_vm14, %v1067_v20, 0.0  ;;  %v6425_v42 = vsel %vm1069_vm14, %v591_v7, %v6346_v37 }
0x1616   :  { %1085 = vperm.xlu0 %5455, %v1082_v17   ;;  %1073 = vperm.xlu1 %5471, %v1070_v45   ;;  %v1098_v45 = vand.u32 2147483647, %v1097_v14 }
0x1618   :  { %vm6460_vm1 = vcmp.ge.f32.partialorder %v1098_v45, 0.1 }
0x161a   :  { %5472 = vset.pattern.permute.xlu1 %v7924_v11 }
0x161b   :  { %1092 = vperm.xlu1 %5472, %v1082_v17  }
0x1671   :  { %v2847_v56 = vpop.permute.xlu0 %2846 }
0x1672   :  { %5121 = vmatmul.mubr.msk.f32.vlgmr.msra.gmra.mrb[6].mxu1 %vm2046_vm15, %v2847_v56  ;;  %v256_v56 = vmul.f32 %v6391_v1, %v6391_v1 }
0x1673   :  { %5355 = vmatpush3.bf16.msra.mxu1 %v5795_v4  ;;  %5142 = vmatprep.mubr.msk.f32.mxu1 %vm5730_vm0, %v5731_v8 }
0x1674   :  { %5356 = vmatprep.subr.bf16.mxu1 %v5729_v3 }
0x1677   :  { %5358 = vmatpush3.bf16.msra.mxu1 %v5810_v10 }
0x1678   :  { %5365 = vmatprep.subr.bf16.mxu1 %v5729_v3 }
0x1682   :  { %v1045_v26 = vpop.permute.xlu0 %1044 }
0x1683   :  { %v1047_v55 = vmul.f32 %v1045_v26, %v5860_v40 }
0x1685   :  { %v1054_v22 = vadd.f32 %v1053_v46, %v1047_v55 }
0x1691   :  { %v1062_v43 = vpop.permute.xlu0 %1061 }
0x1692   :  { %v1064_v52 = vmul.f32 %v1062_v43, %v5863_v44 }
0x1694   :  { %v1065_v53 = vadd.f32 %v1064_v52, %v1054_v22 }
0x1695   :  { %v1074_v39 = vpop.permute.xlu1 %1073 }
0x1696   :  { %v1076_v41 = vmul.f32 %v1074_v39, %v5867_v49 }
0x1698   :  { %v1077_v47 = vadd.f32 %v1076_v41, %v1065_v53  ;;  %v6480_v41 = vld [vmem:[%s7916_s0 + $0x12] sm:$0x3] }
0x169a   :  { %v1093_v50 = vpop.permute.xlu1 %1092 }
0x169b   :  { %v1095_v57 = vmul.f32 %v1093_v50, %v5873_v60  ;;  %v1138_v50 = vsub.f32 %v6480_v41, %v6406_v9 }
0x1745   :  { %v2916_v25 = vpop.f32.mrb[6].mxu1 }
0x1746   :  { %v6436_v37 = vadd.f32 %v2916_v25, %v6357_v48  ;;  %v5122_v33 = vpop.f32.mrb[7].mxu1  ;;  %v1086_v48 = vpop.permute.xlu0 %1085  ;;  %v2921_v5 = vmul.f32 %v5877_v0, %v2916_v25 }
0x1747   :  { %v1088_v51 = vmul.f32 %v1086_v48, %v5870_v54  ;;  %v1100_v33 = vsel %vm6460_vm1, %v1097_v14, 0.0 }
0x1748   :  { %2931 = vrot.lane.b32.xlu0 %v6436_v37, %s5735_s21 }
0x1749   :  { %v1089_v19 = vadd.f32 %v1088_v51, %v1077_v47 }
0x174b   :  { %v1096_v23 = vadd.f32 %v1095_v57, %v1089_v19  ;;  %v1139_v57 = vand.u32 2147483647, %v1138_v50 }
0x174d   :  { %v2920_v18 = vadd.f32 %v6369_v6, %v1096_v23  ;;  %vm6485_vm6 = vcmp.ge.f32.partialorder %v1139_v57, 0.1 }
0x174f   :  { %v6448_v58 = vadd.f32 %v2921_v5, %v2920_v18 }
0x1751   :  { %v4877_v61 = vmul.f32 -1.442695, %v6448_v58 }
0x1753   :  { %5564 = vpow2.f32 %v4877_v61 }
0x175d   :  { %v5565_v62 = vpop.eup %5564 }
0x175e   :  { %v2927_v29 = vadd.f32 1.0, %v5565_v62 }
0x1760   :  { %5566 = vrcp.f32 %v2927_v29 }
0x176a   :  { %v5567_v16 = vpop.eup %5566 }
0x17ba   :  { %v2932_v30 = vpop.permute.xlu0 %2931 }
0x17bb   :  { %v2934_v27 = vmul.f32 %v5567_v16, %v2932_v30 }
0x17bd   :  { %2936 = vrot.lane.b32.xlu1 %v2934_v27, %s5735_s21  ;;  %v1141_v27 = vsel %vm6485_vm6, %v1138_v50, 0.0 }
0x182f   :  { %v2937_v21 = vpop.permute.xlu1 %2936 }
0x1830   :  { %v2939_v7 = vadd.f32 %v2937_v21, %v6448_v58 }
0x1832   :  { %5568 = vtanh.f32 %v2939_v7 }
0x183c   :  { %v5569_v20 = vpop.eup %5568 }
0x183d   :  { %v2941_v6 = vsub.f32 %v6408_v36, %v5569_v20 }
0x183f   :  { %2943 = vrot.lane.b32.xlu0 %v2941_v6, %s5736_s4 }
0x18b1   :  { %v2944_v24 = vpop.permute.xlu0 %2943 }
0x18b2   :  { %v2946_v17 = vmul.f32 %v5567_v16, %v2944_v24 }
0x18b4   :  { %2948 = vrot.lane.b32.xlu1 %v2946_v17, %s5737_s24 }
0x18b8   :  { %312 = vrot.lane.b32.xlu1 %v256_v56, %s5732_s19 }
0x18bc   :  { %1109 = vperm.xlu1 %5472, %v1100_v33  }
0x18c0   :  { %5473 = vset.pattern.permute.xlu1 %v7926_v13 }
0x1926   :  { %v2949_v26 = vpop.permute.xlu1 %2948 }
0x1927   :  { %v6468_v28 = vadd.f32 %v5569_v20, %v2949_v26 }
0x1929   :  { %v2969_v43 = vsub.f32 %v6468_v28, %v6414_v12 }
0x192a   :  { %v313_v55 = vpop.permute.xlu1 %312 }
0x192b   :  { %v376_v39 = vadd.f32 %v313_v55, %v256_v56  ;;  %v2970_v46 = vand.u32 2147483647, %v2969_v43 }
0x192d   :  { %5570 = vrsqrt.f32 %v376_v39  ;;  %vm2971_vm2 = vcmp.ge.f32.partialorder %v2970_v46, 0.05  ;;  %vm450_vm3 = vcmp.eq.f32.partialorder %v376_v39, inf  ;;  %v453_v48 = vand.u32 2147483648, %v376_v39 }
0x192e   :  { %v2972_v52 = vsel %vm2971_vm2, %v2969_v43, 0.0  ;;  %v6474_v22 = vsel %vm2971_vm2, %v6468_v28, %v6414_v12  ;;  %vm452_vm4 = vcmp.eq.f32.partialorder %v376_v39, 0.0 }
0x192f   :  { %2975 = vrot.lane.b32.xlu0 %v2972_v52, %s5735_s21 }
0x1933   :  { %1103 = vperm.xlu0 %5455, %v1100_v33  }
0x1937   :  { %v5571_v53 = vpop.eup %5570 }
0x1938   :  { %v449_v47 = vmul.f32 %v5571_v53, %v376_v39 }
0x193a   :  { %v451_v51 = vsel %vm450_vm3, %v376_v39, %v449_v47 }
0x193b   :  { %v454_v19 = vsel %vm452_vm4, %v453_v48, %v451_v51  ;;  %v1110_v24 = vpop.permute.xlu1 %1109 }
0x193c   :  { %v1114_v12 = vsub.f32 %v454_v19, %v6420_v15  ;;  %v568_v23 = vmul.f32 %v454_v19, %v454_v19  ;;  %v1112_v33 = vmul.f32 %v1110_v24, %v5858_v38 }
0x193e   :  { %v1115_v5 = vand.u32 2147483647, %v1114_v12  ;;  %v592_v18 = vmul.f32 %v568_v23, %v454_v19 }
0x1940   :  { %vm1116_vm5 = vcmp.ge.f32.partialorder %v1115_v5, 0.1  ;;  %v1126_v62 = vsub.f32 %v592_v18, %v6425_v42 }
0x1941   :  { %v1117_v29 = vsel %vm1116_vm5, %v1114_v12, 0.0  ;;  %v6491_v16 = vsel %vm1116_vm5, %v454_v19, %v6420_v15 }
0x1942   :  { %1120 = vperm.xlu0 %5455, %v1117_v29   ;;  %v1127_v30 = vand.u32 2147483647, %v1126_v62 }
0x1944   :  { %vm1128_vm7 = vcmp.ge.f32.partialorder %v1127_v30, 0.1 }
0x1945   :  { %v1129_v21 = vsel %vm1128_vm7, %v1126_v62, 0.0  ;;  %v6496_v7 = vsel %vm1128_vm7, %v592_v18, %v6425_v42 }
0x1946   :  { %1144 = vperm.xlu0 %5455, %v1141_v27   ;;  %1132 = vperm.xlu1 %5473, %v1129_v21  }
0x194a   :  { %5474 = vset.pattern.permute.xlu1 %v7924_v11 }
0x194b   :  { %1151 = vperm.xlu1 %5474, %v1141_v27  }
0x19a1   :  { %v2976_v20 = vpop.permute.xlu0 %2975 }
0x19a2   :  { %5132 = vmatmul.mubr.msk.f32.vlgmr.msra.gmra.mrb[8].mxu0 %vm2046_vm15, %v2976_v20  ;;  %v6530_v20 = vsel %vm6460_vm1, %v6391_v1, %v6380_v32 }
0x19a3   :  { %5361 = vmatpush3.bf16.msra.mxu0 %v5795_v4  ;;  %5153 = vmatprep.mubr.msk.f32.mxu0 %vm5730_vm0, %v5731_v8 }
0x19a4   :  { %5362 = vmatprep.subr.bf16.mxu0 %v5729_v3 }
0x19a7   :  { %5364 = vmatpush3.bf16.msra.mxu0 %v5810_v10 }
0x19a8   :  { %5371 = vmatprep.subr.bf16.mxu0 %v5729_v3 }
0x19b2   :  { %v1104_v14 = vpop.permute.xlu0 %1103 }
0x19b3   :  { %v1106_v45 = vmul.f32 %v1104_v14, %v5860_v40 }
0x19b5   :  { %v1113_v43 = vadd.f32 %v1112_v33, %v1106_v45 }
0x19c1   :  { %v1121_v17 = vpop.permute.xlu0 %1120 }
0x19c2   :  { %v1123_v26 = vmul.f32 %v1121_v17, %v5863_v44  ;;  %v257_v17 = vmul.f32 %v6480_v41, %v6480_v41 }
0x19c4   :  { %v1124_v39 = vadd.f32 %v1123_v26, %v1113_v43 }
0x19c5   :  { %v1133_v56 = vpop.permute.xlu1 %1132 }
0x19c6   :  { %v1135_v55 = vmul.f32 %v1133_v56, %v5867_v49 }
0x19c8   :  { %v1136_v46 = vadd.f32 %v1135_v55, %v1124_v39 }
0x19ca   :  { %v1152_v52 = vpop.permute.xlu1 %1151 }
0x19cb   :  { %v1154_v47 = vmul.f32 %v1152_v52, %v5873_v60 }
0x1a75   :  { %v3045_v15 = vpop.f32.mrb[8].mxu0 }
0x1a76   :  { %v6507_v42 = vadd.f32 %v3045_v15, %v6436_v37  ;;  %v5133_v6 = vpop.f32.mrb[9].mxu0  ;;  %v1145_v37 = vpop.permute.xlu0 %1144  ;;  %v3050_v51 = vmul.f32 %v5877_v0, %v3045_v15  ;;  %v1156_v15 = vsub.f32 %v6480_v41, %v6530_v20 }
0x1a77   :  { %v1147_v53 = vmul.f32 %v1145_v37, %v5870_v54  ;;  %v6557_v37 = vld [vmem:[%s7916_s0 + $0x14] sm:$0x3] }
0x1a78   :  { %3060 = vrot.lane.b32.xlu0 %v6507_v42, %s5735_s21  ;;  %v1157_v24 = vand.u32 2147483647, %v1156_v15 }
0x1a79   :  { %v1148_v48 = vadd.f32 %v1147_v53, %v1136_v46  ;;  %v6563_v46 = vsel %vm6485_vm6, %v6480_v41, %v6406_v9 }
0x1a7a   :  { %vm6537_vm8 = vcmp.ge.f32.partialorder %v1157_v24, 0.1 }
0x1a7b   :  { %v1155_v50 = vadd.f32 %v1154_v47, %v1148_v48  ;;  %v1159_v32 = vsel %vm6537_vm8, %v1156_v15, 0.0 }
0x1a7d   :  { %v3049_v19 = vadd.f32 %v6448_v58, %v1155_v50 }
0x1a7f   :  { %v6519_v12 = vadd.f32 %v3050_v51, %v3049_v19 }
0x1a81   :  { %v4880_v57 = vmul.f32 -1.442695, %v6519_v12 }
0x1a83   :  { %5572 = vpow2.f32 %v4880_v57 }
0x1a8d   :  { %v5573_v23 = vpop.eup %5572 }
0x1a8e   :  { %v3056_v5 = vadd.f32 1.0, %v5573_v23 }
0x1a90   :  { %5574 = vrcp.f32 %v3056_v5 }
0x1a9a   :  { %v5575_v18 = vpop.eup %5574 }
0x1aea   :  { %v3061_v62 = vpop.permute.xlu0 %3060 }
0x1aeb   :  { %v3063_v29 = vmul.f32 %v5575_v18, %v3061_v62 }
0x1aed   :  { %3065 = vrot.lane.b32.xlu1 %v3063_v29, %s5735_s21 }
0x1b5f   :  { %v3066_v30 = vpop.permute.xlu1 %3065 }
0x1b60   :  { %v3068_v27 = vadd.f32 %v3066_v30, %v6519_v12 }
0x1b62   :  { %5576 = vtanh.f32 %v3068_v27 }
0x1b6c   :  { %v5577_v21 = vpop.eup %5576 }
0x1b6d   :  { %v3070_v58 = vsub.f32 %v6468_v28, %v5577_v21 }
0x1b6f   :  { %3072 = vrot.lane.b32.xlu0 %v3070_v58, %s5736_s4 }
0x1be1   :  { %v3073_v6 = vpop.permute.xlu0 %3072 }
0x1be2   :  { %v3075_v14 = vmul.f32 %v5575_v18, %v3073_v6 }
0x1be4   :  { %3077 = vrot.lane.b32.xlu1 %v3075_v14, %s5737_s24 }
0x1be8   :  { %314 = vrot.lane.b32.xlu1 %v257_v17, %s5732_s19 }
0x1bec   :  { %1168 = vperm.xlu1 %5474, %v1159_v32  }
0x1bf0   :  { %5475 = vset.pattern.permute.xlu1 %v7926_v13 }
0x1c56   :  { %v3078_v1 = vpop.permute.xlu1 %3077 }
0x1c57   :  { %v6545_v25 = vadd.f32 %v5577_v21, %v3078_v1 }
0x1c59   :  { %v3081_v56 = vsub.f32 %v6545_v25, %v6474_v22 }
0x1c5a   :  { %v315_v33 = vpop.permute.xlu1 %314 }
0x1c5b   :  { %v377_v26 = vadd.f32 %v315_v33, %v257_v17  ;;  %v3082_v43 = vand.u32 2147483647, %v3081_v56 }
0x1c5d   :  { %5578 = vrsqrt.f32 %v377_v26  ;;  %vm3083_vm9 = vcmp.ge.f32.partialorder %v3082_v43, 0.05  ;;  %vm457_vm10 = vcmp.eq.f32.partialorder %v377_v26, inf  ;;  %v460_v53 = vand.u32 2147483648, %v377_v26 }
0x1c5e   :  { %v3084_v55 = vsel %vm3083_vm9, %v3081_v56, 0.0  ;;  %v6551_v39 = vsel %vm3083_vm9, %v6545_v25, %v6474_v22  ;;  %vm459_vm11 = vcmp.eq.f32.partialorder %v377_v26, 0.0  ;;  %v1197_v22 = vsub.f32 %v6557_v37, %v6563_v46 }
0x1c5f   :  { %3087 = vrot.lane.b32.xlu0 %v3084_v55, %s5735_s21 }
0x1c60   :  { %v1198_v19 = vand.u32 2147483647, %v1197_v22 }
0x1c62   :  { %vm6568_vm13 = vcmp.ge.f32.partialorder %v1198_v19, 0.1 }
0x1c63   :  { %1162 = vperm.xlu0 %5455, %v1159_v32   ;;  %v1200_v30 = vsel %vm6568_vm13, %v1197_v22, 0.0 }
0x1c67   :  { %v5579_v52 = vpop.eup %5578 }
0x1c68   :  { %v456_v48 = vmul.f32 %v5579_v52, %v377_v26 }
0x1c6a   :  { %v458_v47 = vsel %vm457_vm10, %v377_v26, %v456_v48 }
0x1c6b   :  { %v461_v50 = vsel %vm459_vm11, %v460_v53, %v458_v47  ;;  %v1169_v14 = vpop.permute.xlu1 %1168 }
0x1c6c   :  { %v1173_v51 = vsub.f32 %v461_v50, %v6491_v16  ;;  %v569_v57 = vmul.f32 %v461_v50, %v461_v50  ;;  %v1171_v1 = vmul.f32 %v1169_v14, %v5858_v38 }
0x1c6e   :  { %v1174_v23 = vand.u32 2147483647, %v1173_v51  ;;  %v593_v5 = vmul.f32 %v569_v57, %v461_v50 }
0x1c70   :  { %vm1175_vm12 = vcmp.ge.f32.partialorder %v1174_v23, 0.1  ;;  %v1185_v61 = vsub.f32 %v593_v5, %v6496_v7 }
0x1c71   :  { %v1176_v18 = vsel %vm1175_vm12, %v1173_v51, 0.0  ;;  %v6574_v62 = vsel %vm1175_vm12, %v461_v50, %v6491_v16 }
0x1c72   :  { %1179 = vperm.xlu0 %5455, %v1176_v18   ;;  %v1186_v29 = vand.u32 2147483647, %v1185_v61 }
0x1c74   :  { %vm1187_vm14 = vcmp.ge.f32.partialorder %v1186_v29, 0.1 }
0x1c75   :  { %v1188_v27 = vsel %vm1187_vm14, %v1185_v61, 0.0  ;;  %v6579_v21 = vsel %vm1187_vm14, %v593_v5, %v6496_v7 }
0x1c76   :  { %1203 = vperm.xlu0 %5455, %v1200_v30   ;;  %1191 = vperm.xlu1 %5475, %v1188_v27  }
0x1c7a   :  { %5476 = vset.pattern.permute.xlu1 %v7924_v11 }
0x1c7b   :  { %1210 = vperm.xlu1 %5476, %v1200_v30  }
0x1cd1   :  { %v3088_v58 = vpop.permute.xlu0 %3087 }
0x1cd2   :  { %5143 = vmatmul.mubr.msk.f32.vlgmr.msra.gmra.mrb[8].mxu1 %vm2046_vm15, %v3088_v58 }
0x1cd3   :  { %5367 = vmatpush3.bf16.msra.mxu1 %v5795_v4  ;;  %5164 = vmatprep.mubr.msk.f32.mxu1 %vm5730_vm0, %v5731_v8 }
0x1cd4   :  { %5368 = vmatprep.subr.bf16.mxu1 %v5729_v3 }
0x1cd7   :  { %5370 = vmatpush3.bf16.msra.mxu1 %v5810_v10 }
0x1cd8   :  { %5377 = vmatprep.subr.bf16.mxu1 %v5729_v3 }
0x1ce2   :  { %v1163_v6 = vpop.permute.xlu0 %1162 }
0x1ce3   :  { %v1165_v17 = vmul.f32 %v1163_v6, %v5860_v40 }
0x1ce5   :  { %v1172_v33 = vadd.f32 %v1171_v1, %v1165_v17  ;;  %v258_v17 = vmul.f32 %v6557_v37, %v6557_v37 }
0x1cf1   :  { %v1180_v24 = vpop.permute.xlu0 %1179 }
0x1cf2   :  { %v1182_v56 = vmul.f32 %v1180_v24, %v5863_v44 }
0x1cf4   :  { %v1183_v43 = vadd.f32 %v1182_v56, %v1172_v33 }
0x1cf5   :  { %v1192_v32 = vpop.permute.xlu1 %1191 }
0x1cf6   :  { %v1194_v26 = vmul.f32 %v1192_v32, %v5867_v49 }
0x1cf8   :  { %v1195_v55 = vadd.f32 %v1194_v26, %v1183_v43 }
0x1cfa   :  { %v1211_v52 = vpop.permute.xlu1 %1210 }
0x1cfb   :  { %v1213_v22 = vmul.f32 %v1211_v52, %v5873_v60  ;;  %v6646_v52 = vsel %vm6568_vm13, %v6557_v37, %v6563_v46 }
0x1da5   :  { %v3157_v16 = vpop.f32.mrb[8].mxu1 }
0x1da6   :  { %v6590_v7 = vadd.f32 %v3157_v16, %v6507_v42  ;;  %v5144_v15 = vpop.f32.mrb[9].mxu1  ;;  %v1204_v42 = vpop.permute.xlu0 %1203  ;;  %v3162_v50 = vmul.f32 %v5877_v0, %v3157_v16  ;;  %v6613_v16 = vsel %vm6537_vm8, %v6480_v41, %v6530_v20 }
0x1da7   :  { %v1206_v53 = vmul.f32 %v1204_v42, %v5870_v54  ;;  %v1215_v15 = vsub.f32 %v6557_v37, %v6613_v16 }
0x1da8   :  { %3172 = vrot.lane.b32.xlu0 %v6590_v7, %s5735_s21 }
0x1da9   :  { %v1207_v48 = vadd.f32 %v1206_v53, %v1195_v55  ;;  %v1216_v24 = vand.u32 2147483647, %v1215_v15  ;;  %v6640_v55 = vld [vmem:[%s7916_s0 + $0x16] sm:$0x3] }
0x1dab   :  { %v1214_v47 = vadd.f32 %v1213_v22, %v1207_v48  ;;  %vm6620_vm1 = vcmp.ge.f32.partialorder %v1216_v24, 0.1 }
0x1dac   :  { %v1218_v41 = vsel %vm6620_vm1, %v1215_v15, 0.0 }
0x1dad   :  { %v3161_v51 = vadd.f32 %v6519_v12, %v1214_v47 }
0x1daf   :  { %v6602_v19 = vadd.f32 %v3162_v50, %v3161_v51 }
0x1db1   :  { %v4882_v57 = vmul.f32 -1.442695, %v6602_v19 }
0x1db3   :  { %5580 = vpow2.f32 %v4882_v57 }
0x1dbd   :  { %v5581_v23 = vpop.eup %5580 }
0x1dbe   :  { %v3168_v5 = vadd.f32 1.0, %v5581_v23 }
0x1dc0   :  { %5582 = vrcp.f32 %v3168_v5 }
0x1dca   :  { %v5583_v61 = vpop.eup %5582 }
0x1e1a   :  { %v3173_v18 = vpop.permute.xlu0 %3172 }
0x1e1b   :  { %v3175_v29 = vmul.f32 %v5583_v61, %v3173_v18 }
0x1e1d   :  { %3177 = vrot.lane.b32.xlu1 %v3175_v29, %s5735_s21 }
0x1e8f   :  { %v3178_v30 = vpop.permute.xlu1 %3177 }
0x1e90   :  { %v3180_v27 = vadd.f32 %v3178_v30, %v6602_v19 }
0x1e92   :  { %5584 = vtanh.f32 %v3180_v27 }
0x1e9c   :  { %v5585_v58 = vpop.eup %5584 }
0x1e9d   :  { %v3182_v12 = vsub.f32 %v6545_v25, %v5585_v58 }
0x1e9f   :  { %3184 = vrot.lane.b32.xlu0 %v3182_v12, %s5736_s4 }
0x1f11   :  { %v3185_v6 = vpop.permute.xlu0 %3184 }
0x1f12   :  { %v3187_v14 = vmul.f32 %v5583_v61, %v3185_v6 }
0x1f14   :  { %3189 = vrot.lane.b32.xlu1 %v3187_v14, %s5737_s24 }
0x1f18   :  { %316 = vrot.lane.b32.xlu1 %v258_v17, %s5732_s19 }
0x1f1c   :  { %1227 = vperm.xlu1 %5476, %v1218_v41  }
0x1f20   :  { %5477 = vset.pattern.permute.xlu1 %v7926_v13 }
0x1f86   :  { %v3190_v20 = vpop.permute.xlu1 %3189 }
0x1f87   :  { %v6628_v45 = vadd.f32 %v5585_v58, %v3190_v20 }
0x1f89   :  { %v3193_v1 = vsub.f32 %v6628_v45, %v6551_v39 }
0x1f8a   :  { %v317_v56 = vpop.permute.xlu1 %316 }
0x1f8b   :  { %v378_v33 = vadd.f32 %v317_v56, %v258_v17  ;;  %v3194_v26 = vand.u32 2147483647, %v3193_v1 }
0x1f8d   :  { %5586 = vrsqrt.f32 %v378_v33  ;;  %vm3195_vm2 = vcmp.ge.f32.partialorder %v3194_v26, 0.05  ;;  %vm464_vm3 = vcmp.eq.f32.partialorder %v378_v33, inf  ;;  %v467_v48 = vand.u32 2147483648, %v378_v33 }
0x1f8e   :  { %v3196_v43 = vsel %vm3195_vm2, %v3193_v1, 0.0  ;;  %v6634_v42 = vsel %vm3195_vm2, %v6628_v45, %v6551_v39  ;;  %vm466_vm4 = vcmp.eq.f32.partialorder %v378_v33, 0.0  ;;  %v1256_v39 = vsub.f32 %v6640_v55, %v6646_v52 }
0x1f8f   :  { %3199 = vrot.lane.b32.xlu0 %v3196_v43, %s5735_s21 }
0x1f90   :  { %v1257_v57 = vand.u32 2147483647, %v1256_v39 }
0x1f92   :  { %vm6651_vm6 = vcmp.ge.f32.partialorder %v1257_v57, 0.1 }
0x1f93   :  { %1221 = vperm.xlu0 %5455, %v1218_v41   ;;  %v1259_v27 = vsel %vm6651_vm6, %v1256_v39, 0.0 }
0x1f97   :  { %v5587_v53 = vpop.eup %5586 }
0x1f98   :  { %v463_v22 = vmul.f32 %v5587_v53, %v378_v33 }
0x1f9a   :  { %v465_v47 = vsel %vm464_vm3, %v378_v33, %v463_v22 }
0x1f9b   :  { %v468_v50 = vsel %vm466_vm4, %v467_v48, %v465_v47  ;;  %v1228_v24 = vpop.permute.xlu1 %1227 }
0x1f9c   :  { %v1232_v51 = vsub.f32 %v468_v50, %v6574_v62  ;;  %v570_v23 = vmul.f32 %v468_v50, %v468_v50  ;;  %v1230_v1 = vmul.f32 %v1228_v24, %v5858_v38 }
0x1f9e   :  { %v1233_v5 = vand.u32 2147483647, %v1232_v51  ;;  %v594_v61 = vmul.f32 %v570_v23, %v468_v50 }
0x1fa0   :  { %vm1234_vm5 = vcmp.ge.f32.partialorder %v1233_v5, 0.1  ;;  %v1244_v9 = vsub.f32 %v594_v61, %v6579_v21 }
0x1fa1   :  { %v1235_v18 = vsel %vm1234_vm5, %v1232_v51, 0.0  ;;  %v6657_v29 = vsel %vm1234_vm5, %v468_v50, %v6574_v62 }
0x1fa2   :  { %1238 = vperm.xlu0 %5455, %v1235_v18   ;;  %v1245_v30 = vand.u32 2147483647, %v1244_v9 }
0x1fa4   :  { %vm1246_vm7 = vcmp.ge.f32.partialorder %v1245_v30, 0.1 }
0x1fa5   :  { %v1247_v58 = vsel %vm1246_vm7, %v1244_v9, 0.0  ;;  %v6662_v12 = vsel %vm1246_vm7, %v594_v61, %v6579_v21 }
0x1fa6   :  { %1262 = vperm.xlu0 %5455, %v1259_v27   ;;  %1250 = vperm.xlu1 %5477, %v1247_v58  }
0x1faa   :  { %5478 = vset.pattern.permute.xlu1 %v7924_v11 }
0x1fab   :  { %1269 = vperm.xlu1 %5478, %v1259_v27  }
0x2001   :  { %v3200_v15 = vpop.permute.xlu0 %3199 }
0x2002   :  { %5154 = vmatmul.mubr.msk.f32.vlgmr.msra.gmra.mrb[10].mxu0 %vm2046_vm15, %v3200_v15 }
0x2003   :  { %5373 = vmatpush3.bf16.msra.mxu0 %v5795_v4  ;;  %5175 = vmatprep.mubr.msk.f32.mxu0 %vm5730_vm0, %v5731_v8 }
0x2004   :  { %5374 = vmatprep.subr.bf16.mxu0 %v5729_v3 }
0x2007   :  { %5376 = vmatpush3.bf16.msra.mxu0 %v5810_v10 }
0x2008   :  { %5383 = vmatprep.subr.bf16.mxu0 %v5729_v3 }
0x2012   :  { %v1222_v14 = vpop.permute.xlu0 %1221 }
0x2013   :  { %v1224_v41 = vmul.f32 %v1222_v14, %v5860_v40 }
0x2015   :  { %v1231_v33 = vadd.f32 %v1230_v1, %v1224_v41 }
0x2021   :  { %v1239_v17 = vpop.permute.xlu0 %1238 }
0x2022   :  { %v1241_v56 = vmul.f32 %v1239_v17, %v5863_v44 }
0x2024   :  { %v1242_v43 = vadd.f32 %v1241_v56, %v1231_v33 }
0x2025   :  { %v1251_v20 = vpop.permute.xlu1 %1250 }
0x2026   :  { %v1253_v26 = vmul.f32 %v1251_v20, %v5867_v49  ;;  %v259_v20 = vmul.f32 %v6640_v55, %v6640_v55 }
0x2028   :  { %v1254_v53 = vadd.f32 %v1253_v26, %v1242_v43 }
0x202a   :  { %v1270_v48 = vpop.permute.xlu1 %1269 }
0x202b   :  { %v1272_v47 = vmul.f32 %v1270_v48, %v5873_v60  ;;  %v6723_v48 = vld [vmem:[%s7916_s0 + $0x18] sm:$0x3] }
0x20d5   :  { %v3269_v62 = vpop.f32.mrb[10].mxu0 }
0x20d6   :  { %v6673_v21 = vadd.f32 %v3269_v62, %v6590_v7  ;;  %v5155_v6 = vpop.f32.mrb[11].mxu0  ;;  %v1263_v7 = vpop.permute.xlu0 %1262  ;;  %v3274_v51 = vmul.f32 %v5877_v0, %v3269_v62 }
0x20d7   :  { %v1265_v22 = vmul.f32 %v1263_v7, %v5870_v54  ;;  %v6696_v6 = vsel %vm6620_vm1, %v6557_v37, %v6613_v16 }
0x20d8   :  { %3284 = vrot.lane.b32.xlu0 %v6673_v21, %s5735_s21  ;;  %v1274_v14 = vsub.f32 %v6640_v55, %v6696_v6 }
0x20d9   :  { %v1266_v39 = vadd.f32 %v1265_v22, %v1254_v53  ;;  %v6729_v22 = vsel %vm6651_vm6, %v6640_v55, %v6646_v52 }
0x20da   :  { %v1275_v41 = vand.u32 2147483647, %v1274_v14 }
0x20db   :  { %v1273_v50 = vadd.f32 %v1272_v47, %v1266_v39 }
0x20dc   :  { %vm6703_vm8 = vcmp.ge.f32.partialorder %v1275_v41, 0.1 }
0x20dd   :  { %v3273_v57 = vadd.f32 %v6602_v19, %v1273_v50  ;;  %v1277_v37 = vsel %vm6703_vm8, %v1274_v14, 0.0 }
0x20df   :  { %v6685_v23 = vadd.f32 %v3274_v51, %v3273_v57 }
0x20e1   :  { %v4884_v5 = vmul.f32 -1.442695, %v6685_v23 }
0x20e3   :  { %5588 = vpow2.f32 %v4884_v5 }
0x20ed   :  { %v5589_v61 = vpop.eup %5588 }
0x20ee   :  { %v3280_v9 = vadd.f32 1.0, %v5589_v61 }
0x20f0   :  { %5590 = vrcp.f32 %v3280_v9 }
0x20fa   :  { %v5591_v18 = vpop.eup %5590 }
0x214a   :  { %v3285_v30 = vpop.permute.xlu0 %3284 }
0x214b   :  { %v3287_v27 = vmul.f32 %v5591_v18, %v3285_v30 }
0x214d   :  { %3289 = vrot.lane.b32.xlu1 %v3287_v27, %s5735_s21 }
0x21bf   :  { %v3290_v58 = vpop.permute.xlu1 %3289 }
0x21c0   :  { %v3292_v15 = vadd.f32 %v3290_v58, %v6685_v23 }
0x21c2   :  { %5592 = vtanh.f32 %v3292_v15 }
0x21cc   :  { %v5593_v62 = vpop.eup %5592 }
0x21cd   :  { %v3294_v19 = vsub.f32 %v6628_v45, %v5593_v62 }
0x21cf   :  { %3296 = vrot.lane.b32.xlu0 %v3294_v19, %s5736_s4 }
0x2241   :  { %v3297_v24 = vpop.permute.xlu0 %3296 }
0x2242   :  { %v3299_v17 = vmul.f32 %v5591_v18, %v3297_v24 }
0x2244   :  { %3301 = vrot.lane.b32.xlu1 %v3299_v17, %s5737_s24 }
0x2248   :  { %318 = vrot.lane.b32.xlu1 %v259_v20, %s5732_s19 }
0x224c   :  { %1286 = vperm.xlu1 %5478, %v1277_v37  }
0x2250   :  { %5479 = vset.pattern.permute.xlu1 %v7926_v13 }
0x22b6   :  { %v3302_v16 = vpop.permute.xlu1 %3301 }
0x22b7   :  { %v6711_v32 = vadd.f32 %v5593_v62, %v3302_v16 }
0x22b9   :  { %v3305_v56 = vsub.f32 %v6711_v32, %v6634_v42 }
0x22ba   :  { %v319_v33 = vpop.permute.xlu1 %318 }
0x22bb   :  { %v379_v26 = vadd.f32 %v319_v33, %v259_v20  ;;  %v3306_v43 = vand.u32 2147483647, %v3305_v56 }
0x22bd   :  { %5594 = vrsqrt.f32 %v379_v26  ;;  %vm3307_vm9 = vcmp.ge.f32.partialorder %v3306_v43, 0.05  ;;  %vm471_vm10 = vcmp.eq.f32.partialorder %v379_v26, inf  ;;  %v474_v47 = vand.u32 2147483648, %v379_v26 }
0x22be   :  { %v3308_v7 = vsel %vm3307_vm9, %v3305_v56, 0.0  ;;  %v6717_v53 = vsel %vm3307_vm9, %v6711_v32, %v6634_v42  ;;  %vm473_vm11 = vcmp.eq.f32.partialorder %v379_v26, 0.0  ;;  %v1315_v42 = vsub.f32 %v6723_v48, %v6729_v22 }
0x22bf   :  { %3311 = vrot.lane.b32.xlu0 %v3308_v7, %s5735_s21 }
0x22c0   :  { %v1316_v61 = vand.u32 2147483647, %v1315_v42 }
0x22c2   :  { %vm6734_vm13 = vcmp.ge.f32.partialorder %v1316_v61, 0.1 }
0x22c3   :  { %1280 = vperm.xlu0 %5455, %v1277_v37   ;;  %v1318_v62 = vsel %vm6734_vm13, %v1315_v42, 0.0 }
0x22c7   :  { %v5595_v39 = vpop.eup %5594 }
0x22c8   :  { %v470_v50 = vmul.f32 %v5595_v39, %v379_v26 }
0x22ca   :  { %v472_v51 = vsel %vm471_vm10, %v379_v26, %v470_v50 }
0x22cb   :  { %v475_v57 = vsel %vm473_vm11, %v474_v47, %v472_v51  ;;  %v1287_v20 = vpop.permute.xlu1 %1286 }
0x22cc   :  { %v1291_v5 = vsub.f32 %v475_v57, %v6657_v29  ;;  %v571_v9 = vmul.f32 %v475_v57, %v475_v57  ;;  %v1289_v33 = vmul.f32 %v1287_v20, %v5858_v38 }
0x22ce   :  { %v1292_v18 = vand.u32 2147483647, %v1291_v5  ;;  %v595_v30 = vmul.f32 %v571_v9, %v475_v57 }
0x22d0   :  { %vm1293_vm12 = vcmp.ge.f32.partialorder %v1292_v18, 0.1  ;;  %v1303_v46 = vsub.f32 %v595_v30, %v6662_v12 }
0x22d1   :  { %v1294_v27 = vsel %vm1293_vm12, %v1291_v5, 0.0  ;;  %v6740_v58 = vsel %vm1293_vm12, %v475_v57, %v6657_v29 }
0x22d2   :  { %1297 = vperm.xlu0 %5455, %v1294_v27   ;;  %v1304_v15 = vand.u32 2147483647, %v1303_v46 }
0x22d4   :  { %vm1305_vm14 = vcmp.ge.f32.partialorder %v1304_v15, 0.1 }
0x22d5   :  { %v1306_v19 = vsel %vm1305_vm14, %v1303_v46, 0.0  ;;  %v6745_v14 = vsel %vm1305_vm14, %v595_v30, %v6662_v12 }
0x22d6   :  { %1321 = vperm.xlu0 %5455, %v1318_v62   ;;  %1309 = vperm.xlu1 %5479, %v1306_v19  }
0x22da   :  { %5480 = vset.pattern.permute.xlu1 %v7924_v11 }
0x22db   :  { %1328 = vperm.xlu1 %5480, %v1318_v62  }
0x2331   :  { %v3312_v24 = vpop.permute.xlu0 %3311 }
0x2332   :  { %5165 = vmatmul.mubr.msk.f32.vlgmr.msra.gmra.mrb[10].mxu1 %vm2046_vm15, %v3312_v24 }
0x2333   :  { %5379 = vmatpush3.bf16.msra.mxu1 %v5795_v4  ;;  %5186 = vmatprep.mubr.msk.f32.mxu1 %vm5730_vm0, %v5731_v8 }
0x2334   :  { %5380 = vmatprep.subr.bf16.mxu1 %v5729_v3 }
0x2337   :  { %5382 = vmatpush3.bf16.msra.mxu1 %v5810_v10 }
0x2338   :  { %5389 = vmatprep.subr.bf16.mxu1 %v5729_v3 }
0x2342   :  { %v1281_v41 = vpop.permute.xlu0 %1280 }
0x2343   :  { %v1283_v16 = vmul.f32 %v1281_v41, %v5860_v40  ;;  %v6779_v41 = vsel %vm6703_vm8, %v6640_v55, %v6696_v6 }
0x2344   :  { %v1333_v20 = vsub.f32 %v6723_v48, %v6779_v41 }
0x2345   :  { %v1290_v43 = vadd.f32 %v1289_v33, %v1283_v16  ;;  %v260_v33 = vmul.f32 %v6723_v48, %v6723_v48 }
0x2351   :  { %v1298_v37 = vpop.permute.xlu0 %1297 }
0x2352   :  { %v1300_v26 = vmul.f32 %v1298_v37, %v5863_v44 }
0x2354   :  { %v1301_v39 = vadd.f32 %v1300_v26, %v1290_v43 }
0x2355   :  { %v1310_v56 = vpop.permute.xlu1 %1309 }
0x2356   :  { %v1312_v7 = vmul.f32 %v1310_v56, %v5867_v49  ;;  %v1334_v56 = vand.u32 2147483647, %v1333_v20 }
0x2358   :  { %v1313_v47 = vadd.f32 %v1312_v7, %v1301_v39  ;;  %vm6786_vm1 = vcmp.ge.f32.partialorder %v1334_v56, 0.1 }
0x2359   :  { %v1336_v55 = vsel %vm6786_vm1, %v1333_v20, 0.0 }
0x235a   :  { %v1329_v50 = vpop.permute.xlu1 %1328 }
0x235b   :  { %v1331_v57 = vmul.f32 %v1329_v50, %v5873_v60 }
0x2405   :  { %v3381_v29 = vpop.f32.mrb[10].mxu1 }
0x2406   :  { %v6756_v12 = vadd.f32 %v3381_v29, %v6673_v21  ;;  %v5166_v17 = vpop.f32.mrb[11].mxu1  ;;  %v1322_v21 = vpop.permute.xlu0 %1321  ;;  %v3386_v61 = vmul.f32 %v5877_v0, %v3381_v29 }
0x2407   :  { %v1324_v42 = vmul.f32 %v1322_v21, %v5870_v54 }
0x2408   :  { %3396 = vrot.lane.b32.xlu0 %v6756_v12, %s5735_s21 }
0x2409   :  { %v1325_v51 = vadd.f32 %v1324_v42, %v1313_v47  ;;  %v6806_v42 = vld [vmem:[%s7916_s0 + $0x1a] sm:$0x3] }
0x240b   :  { %v1332_v5 = vadd.f32 %v1331_v57, %v1325_v51  ;;  %v6812_v51 = vsel %vm6734_vm13, %v6723_v48, %v6729_v22 }
0x240d   :  { %v3385_v9 = vadd.f32 %v6685_v23, %v1332_v5 }
0x240f   :  { %v6768_v18 = vadd.f32 %v3386_v61, %v3385_v9 }
0x2411   :  { %v4886_v30 = vmul.f32 -1.442695, %v6768_v18 }
0x2413   :  { %5596 = vpow2.f32 %v4886_v30 }
0x241d   :  { %v5597_v46 = vpop.eup %5596 }
0x241e   :  { %v3392_v27 = vadd.f32 1.0, %v5597_v46 }
0x2420   :  { %5598 = vrcp.f32 %v3392_v27 }
0x242a   :  { %v5599_v15 = vpop.eup %5598 }
0x247a   :  { %v3397_v62 = vpop.permute.xlu0 %3396 }
0x247b   :  { %v3399_v19 = vmul.f32 %v5599_v15, %v3397_v62 }
0x247d   :  { %3401 = vrot.lane.b32.xlu1 %v3399_v19, %s5735_s21 }
0x24ef   :  { %v3402_v24 = vpop.permute.xlu1 %3401 }
0x24f0   :  { %v3404_v17 = vadd.f32 %v3402_v24, %v6768_v18 }
0x24f2   :  { %5600 = vtanh.f32 %v3404_v17 }
0x24fc   :  { %v5601_v29 = vpop.eup %5600 }
0x24fd   :  { %v3406_v23 = vsub.f32 %v6711_v32, %v5601_v29 }
0x24ff   :  { %3408 = vrot.lane.b32.xlu0 %v3406_v23, %s5736_s4 }
0x2571   :  { %v3409_v37 = vpop.permute.xlu0 %3408 }
0x2572   :  { %v3411_v16 = vmul.f32 %v5599_v15, %v3409_v37 }
0x2574   :  { %3413 = vrot.lane.b32.xlu1 %v3411_v16, %s5737_s24 }
0x2578   :  { %320 = vrot.lane.b32.xlu1 %v260_v33, %s5732_s19 }
0x257c   :  { %1345 = vperm.xlu1 %5480, %v1336_v55  }
0x2580   :  { %5481 = vset.pattern.permute.xlu1 %v7926_v13 }
0x25e6   :  { %v3414_v6 = vpop.permute.xlu1 %3413 }
0x25e7   :  { %v6794_v1 = vadd.f32 %v5601_v29, %v3414_v6 }
0x25e9   :  { %v3434_v43 = vsub.f32 %v6794_v1, %v6717_v53 }
0x25ea   :  { %v321_v7 = vpop.permute.xlu1 %320 }
0x25eb   :  { %v380_v39 = vadd.f32 %v321_v7, %v260_v33  ;;  %v3435_v21 = vand.u32 2147483647, %v3434_v43 }
0x25ed   :  { %5602 = vrsqrt.f32 %v380_v39  ;;  %vm3436_vm2 = vcmp.ge.f32.partialorder %v3435_v21, 0.05  ;;  %vm478_vm3 = vcmp.eq.f32.partialorder %v380_v39, inf  ;;  %v481_v5 = vand.u32 2147483648, %v380_v39 }
0x25ee   :  { %v3437_v47 = vsel %vm3436_vm2, %v3434_v43, 0.0  ;;  %v6800_v50 = vsel %vm3436_vm2, %v6794_v1, %v6717_v53  ;;  %vm480_vm4 = vcmp.eq.f32.partialorder %v380_v39, 0.0  ;;  %v1374_v53 = vsub.f32 %v6806_v42, %v6812_v51 }
0x25ef   :  { %3440 = vrot.lane.b32.xlu0 %v3437_v47, %s5735_s21 }
0x25f0   :  { %v1375_v27 = vand.u32 2147483647, %v1374_v53 }
0x25f2   :  { %vm6817_vm6 = vcmp.ge.f32.partialorder %v1375_v27, 0.1 }
0x25f3   :  { %1339 = vperm.xlu0 %5455, %v1336_v55   ;;  %v1377_v23 = vsel %vm6817_vm6, %v1374_v53, 0.0 }
0x25f7   :  { %v5603_v57 = vpop.eup %5602 }
0x25f8   :  { %v477_v61 = vmul.f32 %v5603_v57, %v380_v39 }
0x25fa   :  { %v479_v9 = vsel %vm478_vm3, %v380_v39, %v477_v61 }
0x25fb   :  { %v482_v30 = vsel %vm480_vm4, %v481_v5, %v479_v9  ;;  %v1346_v55 = vpop.permute.xlu1 %1345 }
0x25fc   :  { %v1350_v46 = vsub.f32 %v482_v30, %v6740_v58  ;;  %v572_v15 = vmul.f32 %v482_v30, %v482_v30  ;;  %v1348_v39 = vmul.f32 %v1346_v55, %v5858_v38  ;;  %v6862_v55 = vsel %vm6786_vm1, %v6723_v48, %v6779_v41 }
0x25fe   :  { %v1351_v62 = vand.u32 2147483647, %v1350_v46  ;;  %v596_v19 = vmul.f32 %v572_v15, %v482_v30 }
0x2600   :  { %vm1352_vm5 = vcmp.ge.f32.partialorder %v1351_v62, 0.1  ;;  %v1362_v52 = vsub.f32 %v596_v19, %v6745_v14 }
0x2601   :  { %v1353_v24 = vsel %vm1352_vm5, %v1350_v46, 0.0  ;;  %v6823_v17 = vsel %vm1352_vm5, %v482_v30, %v6740_v58 }
0x2602   :  { %1356 = vperm.xlu0 %5455, %v1353_v24   ;;  %v1363_v29 = vand.u32 2147483647, %v1362_v52 }
0x2604   :  { %vm1364_vm7 = vcmp.ge.f32.partialorder %v1363_v29, 0.1 }
0x2605   :  { %v1365_v20 = vsel %vm1364_vm7, %v1362_v52, 0.0  ;;  %v6828_v37 = vsel %vm1364_vm7, %v596_v19, %v6745_v14 }
0x2606   :  { %1380 = vperm.xlu0 %5455, %v1377_v23   ;;  %1368 = vperm.xlu1 %5481, %v1365_v20  }
0x260a   :  { %5482 = vset.pattern.permute.xlu1 %v7924_v11 }
0x260b   :  { %1387 = vperm.xlu1 %5482, %v1377_v23  }
0x2661   :  { %v3441_v16 = vpop.permute.xlu0 %3440 }
0x2662   :  { %5176 = vmatmul.mubr.msk.f32.vlgmr.msra.gmra.mrb[12].mxu0 %vm2046_vm15, %v3441_v16 }
0x2663   :  { %5385 = vmatpush3.bf16.msra.mxu0 %v5795_v4  ;;  %5197 = vmatprep.mubr.msk.f32.mxu0 %vm5730_vm0, %v5731_v8 }
0x2664   :  { %5386 = vmatprep.subr.bf16.mxu0 %v5729_v3 }
0x2667   :  { %5388 = vmatpush3.bf16.msra.mxu0 %v5810_v10 }
0x2668   :  { %5395 = vmatprep.subr.bf16.mxu0 %v5729_v3 }
0x2672   :  { %v1340_v33 = vpop.permute.xlu0 %1339 }
0x2673   :  { %v1342_v43 = vmul.f32 %v1340_v33, %v5860_v40 }
0x2675   :  { %v1349_v47 = vadd.f32 %v1348_v39, %v1342_v43 }
0x2681   :  { %v1357_v6 = vpop.permute.xlu0 %1356 }
0x2682   :  { %v1359_v21 = vmul.f32 %v1357_v6, %v5863_v44  ;;  %v1392_v6 = vsub.f32 %v6806_v42, %v6862_v55 }
0x2684   :  { %v1360_v5 = vadd.f32 %v1359_v21, %v1349_v47  ;;  %v1393_v39 = vand.u32 2147483647, %v1392_v6  ;;  %v261_v21 = vmul.f32 %v6806_v42, %v6806_v42 }
0x2685   :  { %v1369_v7 = vpop.permute.xlu1 %1368 }
0x2686   :  { %v1371_v57 = vmul.f32 %v1369_v7, %v5867_v49  ;;  %vm6869_vm8 = vcmp.ge.f32.partialorder %v1393_v39, 0.1 }
0x2687   :  { %v1395_v48 = vsel %vm6869_vm8, %v1392_v6, 0.0 }
0x2688   :  { %v1372_v61 = vadd.f32 %v1371_v57, %v1360_v5 }
0x268a   :  { %v1388_v53 = vpop.permute.xlu1 %1387 }
0x268b   :  { %v1390_v46 = vmul.f32 %v1388_v53, %v5873_v60 }
0x2735   :  { %v3510_v58 = vpop.f32.mrb[12].mxu0 }
0x2736   :  { %v6839_v14 = vadd.f32 %v3510_v58, %v6756_v12  ;;  %v5177_v56 = vpop.f32.mrb[13].mxu0  ;;  %v1381_v12 = vpop.permute.xlu0 %1380  ;;  %v3515_v15 = vmul.f32 %v5877_v0, %v3510_v58 }
0x2737   :  { %v1383_v9 = vmul.f32 %v1381_v12, %v5870_v54 }
0x2738   :  { %3525 = vrot.lane.b32.xlu0 %v6839_v14, %s5735_s21 }
0x2739   :  { %v1384_v30 = vadd.f32 %v1383_v9, %v1372_v61 }
0x273b   :  { %v1391_v27 = vadd.f32 %v1390_v46, %v1384_v30  ;;  %v6889_v30 = vld [vmem:[%s7916_s0 + $0x1c] sm:$0x3]  ;;  %v6895_v46 = vsel %vm6817_vm6, %v6806_v42, %v6812_v51 }
0x273d   :  { %v3514_v62 = vadd.f32 %v6768_v18, %v1391_v27 }
0x273f   :  { %v6851_v19 = vadd.f32 %v3515_v15, %v3514_v62 }
0x2741   :  { %v4889_v52 = vmul.f32 -1.442695, %v6851_v19 }
0x2743   :  { %5604 = vpow2.f32 %v4889_v52 }
0x274d   :  { %v5605_v24 = vpop.eup %5604 }
0x274e   :  { %v3521_v29 = vadd.f32 1.0, %v5605_v24 }
0x2750   :  { %5606 = vrcp.f32 %v3521_v29 }
0x275a   :  { %v5607_v23 = vpop.eup %5606 }
0x27aa   :  { %v3526_v20 = vpop.permute.xlu0 %3525 }
0x27ab   :  { %v3528_v16 = vmul.f32 %v5607_v23, %v3526_v20 }
0x27ad   :  { %3530 = vrot.lane.b32.xlu1 %v3528_v16, %s5735_s21 }
0x281f   :  { %v3531_v56 = vpop.permute.xlu1 %3530 }
0x2820   :  { %v3533_v33 = vadd.f32 %v3531_v56, %v6851_v19 }
0x2822   :  { %5608 = vtanh.f32 %v3533_v33 }
0x282c   :  { %v5609_v58 = vpop.eup %5608 }
0x282d   :  { %v3535_v18 = vsub.f32 %v6794_v1, %v5609_v58 }
0x282f   :  { %3537 = vrot.lane.b32.xlu0 %v3535_v18, %s5736_s4 }
0x28a1   :  { %v3538_v43 = vpop.permute.xlu0 %3537 }
0x28a2   :  { %v3540_v7 = vmul.f32 %v5607_v23, %v3538_v43 }
0x28a4   :  { %3542 = vrot.lane.b32.xlu1 %v3540_v7, %s5737_s24 }
0x28a8   :  { %322 = vrot.lane.b32.xlu1 %v261_v21, %s5732_s19 }
0x28ac   :  { %1404 = vperm.xlu1 %5482, %v1395_v48  }
0x28b0   :  { %5483 = vset.pattern.permute.xlu1 %v7926_v13 }
0x2916   :  { %v3543_v41 = vpop.permute.xlu1 %3542 }
0x2917   :  { %v6877_v26 = vadd.f32 %v5609_v58, %v3543_v41 }
0x2919   :  { %v3546_v57 = vsub.f32 %v6877_v26, %v6800_v50 }
0x291a   :  { %v323_v5 = vpop.permute.xlu1 %322 }
0x291b   :  { %v381_v12 = vadd.f32 %v323_v5, %v261_v21  ;;  %v3547_v61 = vand.u32 2147483647, %v3546_v57 }
0x291d   :  { %5610 = vrsqrt.f32 %v381_v12  ;;  %vm3548_vm9 = vcmp.ge.f32.partialorder %v3547_v61, 0.05  ;;  %vm485_vm10 = vcmp.eq.f32.partialorder %v381_v12, inf  ;;  %v488_v15 = vand.u32 2147483648, %v381_v12 }
0x291e   :  { %v3549_v53 = vsel %vm3548_vm9, %v3546_v57, 0.0  ;;  %v6883_v9 = vsel %vm3548_vm9, %v6877_v26, %v6800_v50  ;;  %vm487_vm11 = vcmp.eq.f32.partialorder %v381_v12, 0.0  ;;  %v1433_v50 = vsub.f32 %v6889_v30, %v6895_v46 }
0x291f   :  { %3552 = vrot.lane.b32.xlu0 %v3549_v53, %s5735_s21 }
0x2920   :  { %v1434_v23 = vand.u32 2147483647, %v1433_v50 }
0x2922   :  { %vm6900_vm13 = vcmp.ge.f32.partialorder %v1434_v23, 0.1 }
0x2923   :  { %1398 = vperm.xlu0 %5455, %v1395_v48   ;;  %v1436_v6 = vsel %vm6900_vm13, %v1433_v50, 0.0 }
0x2927   :  { %v5611_v27 = vpop.eup %5610 }
0x2928   :  { %v484_v62 = vmul.f32 %v5611_v27, %v381_v12 }
0x292a   :  { %v486_v52 = vsel %vm485_vm10, %v381_v12, %v484_v62 }
0x292b   :  { %v489_v24 = vsel %vm487_vm11, %v488_v15, %v486_v52  ;;  %v1405_v41 = vpop.permute.xlu1 %1404 }
0x292c   :  { %v1409_v29 = vsub.f32 %v489_v24, %v6823_v17  ;;  %v573_v20 = vmul.f32 %v489_v24, %v489_v24  ;;  %v1407_v61 = vmul.f32 %v1405_v41, %v5858_v38 }
0x292e   :  { %v1410_v16 = vand.u32 2147483647, %v1409_v29  ;;  %v597_v56 = vmul.f32 %v573_v20, %v489_v24 }
0x2930   :  { %vm1411_vm12 = vcmp.ge.f32.partialorder %v1410_v16, 0.1  ;;  %v1421_v22 = vsub.f32 %v597_v56, %v6828_v37 }
0x2931   :  { %v1412_v33 = vsel %vm1411_vm12, %v1409_v29, 0.0  ;;  %v6906_v58 = vsel %vm1411_vm12, %v489_v24, %v6823_v17 }
0x2932   :  { %1415 = vperm.xlu0 %5455, %v1412_v33   ;;  %v1422_v18 = vand.u32 2147483647, %v1421_v22 }
0x2934   :  { %vm1423_vm14 = vcmp.ge.f32.partialorder %v1422_v18, 0.1 }
0x2935   :  { %v1424_v43 = vsel %vm1423_vm14, %v1421_v22, 0.0  ;;  %v6911_v7 = vsel %vm1423_vm14, %v597_v56, %v6828_v37 }
0x2936   :  { %1439 = vperm.xlu0 %5455, %v1436_v6   ;;  %1427 = vperm.xlu1 %5483, %v1424_v43  }
0x293a   :  { %5484 = vset.pattern.permute.xlu1 %v7924_v11 }
0x293b   :  { %1446 = vperm.xlu1 %5484, %v1436_v6  }
0x2991   :  { %v3553_v39 = vpop.permute.xlu0 %3552 }
0x2992   :  { %5187 = vmatmul.mubr.msk.f32.vlgmr.msra.gmra.mrb[12].mxu1 %vm2046_vm15, %v3553_v39 }
0x2993   :  { %5391 = vmatpush3.bf16.msra.mxu1 %v5795_v4  ;;  %5208 = vmatprep.mubr.msk.f32.mxu1 %vm5730_vm0, %v5731_v8 }
0x2994   :  { %5392 = vmatprep.subr.bf16.mxu1 %v5729_v3 }
0x2997   :  { %5394 = vmatpush3.bf16.msra.mxu1 %v5810_v10 }
0x2998   :  { %5401 = vmatprep.subr.bf16.mxu1 %v5729_v3 }
0x29a2   :  { %v1399_v48 = vpop.permute.xlu0 %1398 }
0x29a3   :  { %v1401_v5 = vmul.f32 %v1399_v48, %v5860_v40 }
0x29a5   :  { %v1408_v27 = vadd.f32 %v1407_v61, %v1401_v5 }
0x29b1   :  { %v1416_v57 = vpop.permute.xlu0 %1415 }
0x29b2   :  { %v1418_v53 = vmul.f32 %v1416_v57, %v5863_v44  ;;  %v6945_v57 = vsel %vm6869_vm8, %v6806_v42, %v6862_v55 }
0x29b3   :  { %v1451_v5 = vsub.f32 %v6889_v30, %v6945_v57 }
0x29b4   :  { %v1419_v62 = vadd.f32 %v1418_v53, %v1408_v27  ;;  %v262_v27 = vmul.f32 %v6889_v30, %v6889_v30 }
0x29b5   :  { %v1428_v12 = vpop.permute.xlu1 %1427  ;;  %v1452_v53 = vand.u32 2147483647, %v1451_v5 }
0x29b6   :  { %v1430_v15 = vmul.f32 %v1428_v12, %v5867_v49 }
0x29b7   :  { %vm6952_vm1 = vcmp.ge.f32.partialorder %v1452_v53, 0.1 }
0x29b8   :  { %v1431_v50 = vadd.f32 %v1430_v15, %v1419_v62  ;;  %v1454_v42 = vsel %vm6952_vm1, %v1451_v5, 0.0 }
0x29ba   :  { %v1447_v52 = vpop.permute.xlu1 %1446 }
0x29bb   :  { %v1449_v23 = vmul.f32 %v1447_v52, %v5873_v60 }
0x2a65   :  { %v3622_v17 = vpop.f32.mrb[12].mxu1 }
0x2a66   :  { %v6922_v37 = vadd.f32 %v3622_v17, %v6839_v14  ;;  %v5188_v21 = vpop.f32.mrb[13].mxu1  ;;  %v1440_v14 = vpop.permute.xlu0 %1439  ;;  %v3627_v16 = vmul.f32 %v5877_v0, %v3622_v17 }
0x2a67   :  { %v1442_v24 = vmul.f32 %v1440_v14, %v5870_v54 }
0x2a68   :  { %3637 = vrot.lane.b32.xlu0 %v6922_v37, %s5735_s21 }
0x2a69   :  { %v1443_v29 = vadd.f32 %v1442_v24, %v1431_v50 }
0x2a6b   :  { %v1450_v20 = vadd.f32 %v1449_v23, %v1443_v29  ;;  %v6972_v23 = vld [vmem:[%s7916_s0 + $0x1e] sm:$0x3] }
0x2a6d   :  { %v3626_v56 = vadd.f32 %v6851_v19, %v1450_v20  ;;  %v6978_v20 = vsel %vm6900_vm13, %v6889_v30, %v6895_v46 }
0x2a6f   :  { %v6934_v22 = vadd.f32 %v3627_v16, %v3626_v56 }
0x2a71   :  { %v4891_v33 = vmul.f32 -1.442695, %v6934_v22 }
0x2a73   :  { %5612 = vpow2.f32 %v4891_v33 }
0x2a7d   :  { %v5613_v18 = vpop.eup %5612 }
0x2a7e   :  { %v3633_v6 = vadd.f32 1.0, %v5613_v18 }
0x2a80   :  { %5614 = vrcp.f32 %v3633_v6 }
0x2a8a   :  { %v5615_v43 = vpop.eup %5614 }
0x2ada   :  { %v3638_v39 = vpop.permute.xlu0 %3637 }
0x2adb   :  { %v3640_v21 = vmul.f32 %v5615_v43, %v3638_v39 }
0x2add   :  { %3642 = vrot.lane.b32.xlu1 %v3640_v21, %s5735_s21 }
0x2b4f   :  { %v3643_v48 = vpop.permute.xlu1 %3642 }
0x2b50   :  { %v3645_v41 = vadd.f32 %v3643_v48, %v6934_v22 }
0x2b52   :  { %5616 = vtanh.f32 %v3645_v41 }
0x2b5c   :  { %v5617_v17 = vpop.eup %5616 }
0x2b5d   :  { %v3647_v19 = vsub.f32 %v6877_v26, %v5617_v17 }
0x2b5f   :  { %3649 = vrot.lane.b32.xlu0 %v3647_v19, %s5736_s4 }
0x2bd1   :  { %v3650_v12 = vpop.permute.xlu0 %3649 }
0x2bd2   :  { %v3652_v61 = vmul.f32 %v5615_v43, %v3650_v12 }
0x2bd4   :  { %3654 = vrot.lane.b32.xlu1 %v3652_v61, %s5737_s24 }
0x2bd8   :  { %324 = vrot.lane.b32.xlu1 %v262_v27, %s5732_s19 }
0x2bdc   :  { %1463 = vperm.xlu1 %5484, %v1454_v42  }
0x2be0   :  { %5485 = vset.pattern.permute.xlu1 %v7926_v13 }
0x2c46   :  { %v3655_v55 = vpop.permute.xlu1 %3654 }
0x2c47   :  { %v6960_v47 = vadd.f32 %v5617_v17, %v3655_v55 }
0x2c49   :  { %v3658_v62 = vsub.f32 %v6960_v47, %v6883_v9 }
0x2c4a   :  { %v325_v14 = vpop.permute.xlu1 %324 }
0x2c4b   :  { %v382_v50 = vadd.f32 %v325_v14, %v262_v27  ;;  %v3659_v52 = vand.u32 2147483647, %v3658_v62 }
0x2c4d   :  { %5618 = vrsqrt.f32 %v382_v50  ;;  %vm3660_vm2 = vcmp.ge.f32.partialorder %v3659_v52, 0.05  ;;  %vm492_vm3 = vcmp.eq.f32.partialorder %v382_v50, inf  ;;  %v495_v56 = vand.u32 2147483648, %v382_v50 }
0x2c4e   :  { %v3661_v24 = vsel %vm3660_vm2, %v3658_v62, 0.0  ;;  %v6966_v29 = vsel %vm3660_vm2, %v6960_v47, %v6883_v9  ;;  %vm494_vm4 = vcmp.eq.f32.partialorder %v382_v50, 0.0  ;;  %v1492_v9 = vsub.f32 %v6972_v23, %v6978_v20 }
0x2c4f   :  { %3664 = vrot.lane.b32.xlu0 %v3661_v24, %s5735_s21 }
0x2c50   :  { %v1493_v39 = vand.u32 2147483647, %v1492_v9 }
0x2c52   :  { %vm6983_vm6 = vcmp.ge.f32.partialorder %v1493_v39, 0.1 }
0x2c53   :  { %1457 = vperm.xlu0 %5455, %v1454_v42   ;;  %v1495_v12 = vsel %vm6983_vm6, %v1492_v9, 0.0 }
0x2c57   :  { %v5619_v16 = vpop.eup %5618 }
0x2c58   :  { %v491_v33 = vmul.f32 %v5619_v16, %v382_v50 }
0x2c5a   :  { %v493_v18 = vsel %vm492_vm3, %v382_v50, %v491_v33 }
0x2c5b   :  { %v496_v6 = vsel %vm494_vm4, %v495_v56, %v493_v18  ;;  %v1464_v62 = vpop.permute.xlu1 %1463 }
0x2c5c   :  { %v1468_v43 = vsub.f32 %v496_v6, %v6906_v58  ;;  %v574_v21 = vmul.f32 %v496_v6, %v496_v6  ;;  %v1466_v24 = vmul.f32 %v1464_v62, %v5858_v38 }
0x2c5e   :  { %v1469_v48 = vand.u32 2147483647, %v1468_v43  ;;  %v598_v41 = vmul.f32 %v574_v21, %v496_v6 }
0x2c60   :  { %vm1470_vm5 = vcmp.ge.f32.partialorder %v1469_v48, 0.1  ;;  %v1480_v51 = vsub.f32 %v598_v41, %v6911_v7 }
0x2c61   :  { %v1471_v17 = vsel %vm1470_vm5, %v1468_v43, 0.0  ;;  %v6989_v19 = vsel %vm1470_vm5, %v496_v6, %v6906_v58 }
0x2c62   :  { %1474 = vperm.xlu0 %5455, %v1471_v17   ;;  %v1481_v5 = vand.u32 2147483647, %v1480_v51 }
0x2c64   :  { %vm1482_vm7 = vcmp.ge.f32.partialorder %v1481_v5, 0.1 }
0x2c65   :  { %v1483_v61 = vsel %vm1482_vm7, %v1480_v51, 0.0  ;;  %v6994_v53 = vsel %vm1482_vm7, %v598_v41, %v6911_v7 }
0x2c66   :  { %1498 = vperm.xlu0 %5455, %v1495_v12   ;;  %1486 = vperm.xlu1 %5485, %v1483_v61  }
0x2c6a   :  { %5486 = vset.pattern.permute.xlu1 %v7924_v11 }
0x2c6b   :  { %1505 = vperm.xlu1 %5486, %v1495_v12  }
0x2cc1   :  { %v3665_v27 = vpop.permute.xlu0 %3664 }
0x2cc2   :  { %5198 = vmatmul.mubr.msk.f32.vlgmr.msra.gmra.mrb[14].mxu0 %vm2046_vm15, %v3665_v27 }
0x2cc3   :  { %5397 = vmatpush3.bf16.msra.mxu0 %v5795_v4  ;;  %5219 = vmatprep.mubr.msk.f32.mxu0 %vm5730_vm0, %v5731_v8 }
0x2cc4   :  { %5398 = vmatprep.subr.bf16.mxu0 %v5729_v3 }
0x2cc7   :  { %5400 = vmatpush3.bf16.msra.mxu0 %v5810_v10 }
0x2cc8   :  { %5407 = vmatprep.subr.bf16.mxu0 %v5729_v3 }
0x2cd2   :  { %v1458_v55 = vpop.permute.xlu0 %1457 }
0x2cd3   :  { %v1460_v50 = vmul.f32 %v1458_v55, %v5860_v40 }
0x2cd5   :  { %v1467_v56 = vadd.f32 %v1466_v24, %v1460_v50  ;;  %v7028_v50 = vsel %vm6952_vm1, %v6889_v30, %v6945_v57 }
0x2ce1   :  { %v1475_v14 = vpop.permute.xlu0 %1474 }
0x2ce2   :  { %v1477_v16 = vmul.f32 %v1475_v14, %v5863_v44 }
0x2ce4   :  { %v1478_v9 = vadd.f32 %v1477_v16, %v1467_v56 }
0x2ce5   :  { %v1487_v52 = vpop.permute.xlu1 %1486 }
0x2ce6   :  { %v1489_v33 = vmul.f32 %v1487_v52, %v5867_v49  ;;  %v1510_v52 = vsub.f32 %v6972_v23, %v7028_v50 }
0x2ce8   :  { %v1490_v18 = vadd.f32 %v1489_v33, %v1478_v9  ;;  %v1511_v56 = vand.u32 2147483647, %v1510_v52  ;;  %v263_v33 = vmul.f32 %v6972_v23, %v6972_v23 }
0x2cea   :  { %v1506_v6 = vpop.permute.xlu1 %1505  ;;  %vm7035_vm8 = vcmp.ge.f32.partialorder %v1511_v56, 0.1 }
0x2ceb   :  { %v1508_v21 = vmul.f32 %v1506_v6, %v5873_v60  ;;  %v1513_v30 = vsel %vm7035_vm8, %v1510_v52, 0.0 }
0x2d95   :  { %v3734_v58 = vpop.f32.mrb[14].mxu0 }
0x2d96   :  { %v7005_v7 = vadd.f32 %v3734_v58, %v6922_v37  ;;  %v5199_v42 = vpop.f32.mrb[15].mxu0  ;;  %v1499_v37 = vpop.permute.xlu0 %1498  ;;  %v3739_v41 = vmul.f32 %v5877_v0, %v3734_v58 }
0x2d97   :  { %v1501_v43 = vmul.f32 %v1499_v37, %v5870_v54 }
0x2d98   :  { %3749 = vrot.lane.b32.xlu0 %v7005_v7, %s5735_s21 }
0x2d99   :  { %v1502_v39 = vadd.f32 %v1501_v43, %v1490_v18 }
0x2d9b   :  { %v1509_v48 = vadd.f32 %v1508_v21, %v1502_v39 }
0x2d9d   :  { %v3738_v51 = vadd.f32 %v6934_v22, %v1509_v48  ;;  %v7055_v48 = vld [vmem:[%s7916_s0 + $0x20] sm:$0x3] }
0x2d9f   :  { %v7017_v17 = vadd.f32 %v3739_v41, %v3738_v51  ;;  %v7061_v41 = vsel %vm6983_vm6, %v6972_v23, %v6978_v20 }
0x2da1   :  { %v4893_v5 = vmul.f32 -1.442695, %v7017_v17 }
0x2da3   :  { %5620 = vpow2.f32 %v4893_v5 }
0x2dad   :  { %v5621_v12 = vpop.eup %5620 }
0x2dae   :  { %v3745_v61 = vadd.f32 1.0, %v5621_v12 }
0x2db0   :  { %5622 = vrcp.f32 %v3745_v61 }
0x2dba   :  { %v5623_v27 = vpop.eup %5622 }
0x2e0a   :  { %v3750_v42 = vpop.permute.xlu0 %3749 }
0x2e0b   :  { %v3752_v55 = vmul.f32 %v5623_v27, %v3750_v42 }
0x2e0d   :  { %3754 = vrot.lane.b32.xlu1 %v3752_v55, %s5735_s21 }
0x2e7f   :  { %v3755_v62 = vpop.permute.xlu1 %3754 }
0x2e80   :  { %v3757_v14 = vadd.f32 %v3755_v62, %v7017_v17 }
0x2e82   :  { %5624 = vtanh.f32 %v3757_v14 }
0x2e8c   :  { %v5625_v58 = vpop.eup %5624 }
0x2e8d   :  { %v3759_v22 = vsub.f32 %v6960_v47, %v5625_v58 }
0x2e8f   :  { %3761 = vrot.lane.b32.xlu0 %v3759_v22, %s5736_s4 }
0x2f01   :  { %v3762_v24 = vpop.permute.xlu0 %3761 }
0x2f02   :  { %v3764_v16 = vmul.f32 %v5623_v27, %v3762_v24 }
0x2f04   :  { %3766 = vrot.lane.b32.xlu1 %v3764_v16, %s5737_s24 }
0x2f08   :  { %326 = vrot.lane.b32.xlu1 %v263_v33, %s5732_s19 }
0x2f0c   :  { %1522 = vperm.xlu1 %5486, %v1513_v30  }
0x2f10   :  { %5487 = vset.pattern.permute.xlu1 %v7926_v13 }
0x2f76   :  { %v3767_v57 = vpop.permute.xlu1 %3766 }
0x2f77   :  { %v7043_v15 = vadd.f32 %v5625_v58, %v3767_v57 }
0x2f79   :  { %v3770_v37 = vsub.f32 %v7043_v15, %v6966_v29 }
0x2f7a   :  { %v327_v18 = vpop.permute.xlu1 %326 }
0x2f7b   :  { %v383_v6 = vadd.f32 %v327_v18, %v263_v33  ;;  %v3771_v43 = vand.u32 2147483647, %v3770_v37 }
0x2f7d   :  { %5626 = vrsqrt.f32 %v383_v6  ;;  %vm3772_vm9 = vcmp.ge.f32.partialorder %v3771_v43, 0.05  ;;  %vm499_vm10 = vcmp.eq.f32.partialorder %v383_v6, inf  ;;  %v502_v5 = vand.u32 2147483648, %v383_v6 }
0x2f7e   :  { %v3773_v39 = vsel %vm3772_vm9, %v3770_v37, 0.0  ;;  %v7049_v21 = vsel %vm3772_vm9, %v7043_v15, %v6966_v29  ;;  %vm501_vm11 = vcmp.eq.f32.partialorder %v383_v6, 0.0  ;;  %v1551_v29 = vsub.f32 %v7055_v48, %v7061_v41 }
0x2f7f   :  { %3776 = vrot.lane.b32.xlu0 %v3773_v39, %s5735_s21 }
0x2f80   :  { %v1552_v55 = vand.u32 2147483647, %v1551_v29 }
0x2f82   :  { %vm7066_vm13 = vcmp.ge.f32.partialorder %v1552_v55, 0.1 }
0x2f83   :  { %1516 = vperm.xlu0 %5455, %v1513_v30   ;;  %v1554_v16 = vsel %vm7066_vm13, %v1551_v29, 0.0 }
0x2f87   :  { %v5627_v51 = vpop.eup %5626 }
0x2f88   :  { %v498_v12 = vmul.f32 %v5627_v51, %v383_v6 }
0x2f8a   :  { %v500_v61 = vsel %vm499_vm10, %v383_v6, %v498_v12 }
0x2f8b   :  { %v503_v27 = vsel %vm501_vm11, %v502_v5, %v500_v61  ;;  %v1523_v18 = vpop.permute.xlu1 %1522 }
0x2f8c   :  { %v1527_v42 = vsub.f32 %v503_v27, %v6989_v19  ;;  %v575_v62 = vmul.f32 %v503_v27, %v503_v27  ;;  %v1525_v51 = vmul.f32 %v1523_v18, %v5858_v38 }
0x2f8e   :  { %v1528_v14 = vand.u32 2147483647, %v1527_v42  ;;  %v599_v58 = vmul.f32 %v575_v62, %v503_v27 }
0x2f90   :  { %vm1529_vm12 = vcmp.ge.f32.partialorder %v1528_v14, 0.1  ;;  %v1539_v46 = vsub.f32 %v599_v58, %v6994_v53 }
0x2f91   :  { %v1530_v22 = vsel %vm1529_vm12, %v1527_v42, 0.0  ;;  %v7072_v52 = vsel %vm1529_vm12, %v503_v27, %v6989_v19 }
0x2f92   :  { %1533 = vperm.xlu0 %5455, %v1530_v22   ;;  %v1540_v24 = vand.u32 2147483647, %v1539_v46 }
0x2f94   :  { %vm1541_vm14 = vcmp.ge.f32.partialorder %v1540_v24, 0.1 }
0x2f95   :  { %v1542_v56 = vsel %vm1541_vm14, %v1539_v46, 0.0  ;;  %v7077_v33 = vsel %vm1541_vm14, %v599_v58, %v6994_v53 }
0x2f96   :  { %1557 = vperm.xlu0 %5455, %v1554_v16   ;;  %1545 = vperm.xlu1 %5487, %v1542_v56  }
0x2f9a   :  { %5488 = vset.pattern.permute.xlu1 %v7924_v11 }
0x2f9b   :  { %1564 = vperm.xlu1 %5488, %v1554_v16  }
0x2ff1   :  { %v3777_v30 = vpop.permute.xlu0 %3776 }
0x2ff2   :  { %5209 = vmatmul.mubr.msk.f32.vlgmr.msra.gmra.mrb[14].mxu1 %vm2046_vm15, %v3777_v30 }
0x2ff3   :  { %5403 = vmatpush3.bf16.msra.mxu1 %v5795_v4  ;;  %5230 = vmatprep.mubr.msk.f32.mxu1 %vm5730_vm0, %v5731_v8 }
0x2ff4   :  { %5404 = vmatprep.subr.bf16.mxu1 %v5729_v3 }
0x2ff7   :  { %5406 = vmatpush3.bf16.msra.mxu1 %v5810_v10 }
0x2ff8   :  { %5413 = vmatprep.subr.bf16.mxu1 %v5729_v3 }
0x3002   :  { %v1517_v37 = vpop.permute.xlu0 %1516 }
0x3003   :  { %v1519_v43 = vmul.f32 %v1517_v37, %v5860_v40 }
0x3005   :  { %v1526_v12 = vadd.f32 %v1525_v51, %v1519_v43 }
0x3011   :  { %v1534_v6 = vpop.permute.xlu0 %1533 }
0x3012   :  { %v1536_v5 = vmul.f32 %v1534_v6, %v5863_v44 }
0x3014   :  { %v1537_v61 = vadd.f32 %v1536_v5, %v1526_v12 }
0x3015   :  { %v1546_v39 = vpop.permute.xlu1 %1545 }
0x3016   :  { %v1548_v29 = vmul.f32 %v1546_v39, %v5867_v49  ;;  %v7111_v39 = vsel %vm7035_vm8, %v6972_v23, %v7028_v50 }
0x3017   :  { %v1569_v51 = vsub.f32 %v7055_v48, %v7111_v39 }
0x3018   :  { %v1549_v27 = vadd.f32 %v1548_v29, %v1537_v61  ;;  %v264_v61 = vmul.f32 %v7055_v48, %v7055_v48 }
0x3019   :  { %v1570_v29 = vand.u32 2147483647, %v1569_v51 }
0x301a   :  { %v1565_v42 = vpop.permute.xlu1 %1564 }
0x301b   :  { %v1567_v14 = vmul.f32 %v1565_v42, %v5873_v60  ;;  %vm7118_vm1 = vcmp.ge.f32.partialorder %v1570_v29, 0.1 }
0x301c   :  { %v1572_v23 = vsel %vm7118_vm1, %v1569_v51, 0.0 }
0x30c5   :  { %v3846_v19 = vpop.f32.mrb[14].mxu1 }
0x30c6   :  { %v7088_v53 = vadd.f32 %v3846_v19, %v7005_v7  ;;  %v5210_v57 = vpop.f32.mrb[15].mxu1  ;;  %v1558_v7 = vpop.permute.xlu0 %1557  ;;  %v3851_v46 = vmul.f32 %v5877_v0, %v3846_v19 }
0x30c7   :  { %v1560_v55 = vmul.f32 %v1558_v7, %v5870_v54 }
0x30c8   :  { %3861 = vrot.lane.b32.xlu0 %v7088_v53, %s5735_s21 }
0x30c9   :  { %v1561_v62 = vadd.f32 %v1560_v55, %v1549_v27 }
0x30cb   :  { %v1568_v58 = vadd.f32 %v1567_v14, %v1561_v62 }
0x30cd   :  { %v3850_v22 = vadd.f32 %v7017_v17, %v1568_v58 }
0x30cf   :  { %v7100_v24 = vadd.f32 %v3851_v46, %v3850_v22  ;;  %v7138_v46 = vld [vmem:[%s7916_s0 + $0x22] sm:$0x3]  ;;  %v7144_v22 = vsel %vm7066_vm13, %v7055_v48, %v7061_v41 }
0x30d1   :  { %v4895_v16 = vmul.f32 -1.442695, %v7100_v24 }
0x30d3   :  { %5628 = vpow2.f32 %v4895_v16 }
0x30dd   :  { %v5629_v56 = vpop.eup %5628 }
0x30de   :  { %v3857_v30 = vadd.f32 1.0, %v5629_v56 }
0x30e0   :  { %5630 = vrcp.f32 %v3857_v30 }
0x30ea   :  { %v5631_v57 = vpop.eup %5630 }
0x313a   :  { %v3862_v37 = vpop.permute.xlu0 %3861 }
0x313b   :  { %v3864_v18 = vmul.f32 %v5631_v57, %v3862_v37 }
0x313d   :  { %3866 = vrot.lane.b32.xlu1 %v3864_v18, %s5735_s21 }
0x31af   :  { %v3867_v6 = vpop.permute.xlu1 %3866 }
0x31b0   :  { %v3869_v43 = vadd.f32 %v3867_v6, %v7100_v24 }
0x31b2   :  { %5632 = vtanh.f32 %v3869_v43 }
0x31bc   :  { %v5633_v19 = vpop.eup %5632 }
0x31bd   :  { %v3871_v17 = vsub.f32 %v7043_v15, %v5633_v19 }
0x31bf   :  { %3873 = vrot.lane.b32.xlu0 %v3871_v17, %s5736_s4 }
0x3231   :  { %v3874_v5 = vpop.permute.xlu0 %3873 }
0x3232   :  { %v3876_v12 = vmul.f32 %v5631_v57, %v3874_v5 }
0x3234   :  { %3878 = vrot.lane.b32.xlu1 %v3876_v12, %s5737_s24 }
0x3238   :  { %328 = vrot.lane.b32.xlu1 %v264_v61, %s5732_s19 }
0x323c   :  { %1581 = vperm.xlu1 %5488, %v1572_v23  }
0x3240   :  { %5489 = vset.pattern.permute.xlu1 %v7926_v13 }
0x32a6   :  { %v3879_v50 = vpop.permute.xlu1 %3878 }
0x32a7   :  { %v7126_v9 = vadd.f32 %v5633_v19, %v3879_v50 }
0x32a9   :  { %v3899_v27 = vsub.f32 %v7126_v9, %v7049_v21 }
0x32aa   :  { %v329_v42 = vpop.permute.xlu1 %328 }
0x32ab   :  { %v384_v55 = vadd.f32 %v329_v42, %v264_v61  ;;  %v3900_v62 = vand.u32 2147483647, %v3899_v27 }
0x32ad   :  { %5634 = vrsqrt.f32 %v384_v55  ;;  %vm3901_vm2 = vcmp.ge.f32.partialorder %v3900_v62, 0.05  ;;  %vm506_vm3 = vcmp.eq.f32.partialorder %v384_v55, inf  ;;  %v509_v56 = vand.u32 2147483648, %v384_v55 }
0x32ae   :  { %v3902_v14 = vsel %vm3901_vm2, %v3899_v27, 0.0  ;;  %v7132_v58 = vsel %vm3901_vm2, %v7126_v9, %v7049_v21  ;;  %vm508_vm4 = vcmp.eq.f32.partialorder %v384_v55, 0.0  ;;  %v1610_v21 = vsub.f32 %v7138_v46, %v7144_v22 }
0x32af   :  { %3905 = vrot.lane.b32.xlu0 %v3902_v14, %s5735_s21 }
0x32b0   :  { %v1611_v6 = vand.u32 2147483647, %v1610_v21 }
0x32b2   :  { %vm7149_vm6 = vcmp.ge.f32.partialorder %v1611_v6, 0.1 }
0x32b3   :  { %1575 = vperm.xlu0 %5455, %v1572_v23   ;;  %v1613_v29 = vsel %vm7149_vm6, %v1610_v21, 0.0 }
0x32b7   :  { %v5635_v16 = vpop.eup %5634 }
0x32b8   :  { %v505_v30 = vmul.f32 %v5635_v16, %v384_v55 }
0x32ba   :  { %v507_v57 = vsel %vm506_vm3, %v384_v55, %v505_v30 }
0x32bb   :  { %v510_v37 = vsel %vm508_vm4, %v509_v56, %v507_v57  ;;  %v1582_v55 = vpop.permute.xlu1 %1581 }
0x32bc   :  { %v1586_v18 = vsub.f32 %v510_v37, %v7072_v52  ;;  %v576_v43 = vmul.f32 %v510_v37, %v510_v37  ;;  %v1584_v56 = vmul.f32 %v1582_v55, %v5858_v38 }
0x32be   :  { %v1587_v19 = vand.u32 2147483647, %v1586_v18  ;;  %v600_v17 = vmul.f32 %v576_v43, %v510_v37 }
0x32c0   :  { %vm1588_vm5 = vcmp.ge.f32.partialorder %v1587_v19, 0.1  ;;  %v1598_v20 = vsub.f32 %v600_v17, %v7077_v33 }
0x32c1   :  { %v1589_v51 = vsel %vm1588_vm5, %v1586_v18, 0.0  ;;  %v7155_v5 = vsel %vm1588_vm5, %v510_v37, %v7072_v52 }
0x32c2   :  { %1592 = vperm.xlu0 %5455, %v1589_v51   ;;  %v1599_v12 = vand.u32 2147483647, %v1598_v20 }
0x32c4   :  { %vm1600_vm7 = vcmp.ge.f32.partialorder %v1599_v12, 0.1 }
0x32c5   :  { %v1601_v61 = vsel %vm1600_vm7, %v1598_v20, 0.0  ;;  %v7160_v23 = vsel %vm1600_vm7, %v600_v17, %v7077_v33 }
0x32c6   :  { %1616 = vperm.xlu0 %5455, %v1613_v29   ;;  %1604 = vperm.xlu1 %5489, %v1601_v61  }
0x32ca   :  { %5490 = vset.pattern.permute.xlu1 %v7924_v11 }
0x32cb   :  { %1623 = vperm.xlu1 %5490, %v1613_v29  }
0x3321   :  { %v3906_v50 = vpop.permute.xlu0 %3905 }
0x3322   :  { %5220 = vmatmul.mubr.msk.f32.vlgmr.msra.gmra.mrb[16].mxu0 %vm2046_vm15, %v3906_v50 }
0x3323   :  { %5409 = vmatpush3.bf16.msra.mxu0 %v5795_v4  ;;  %5241 = vmatprep.mubr.msk.f32.mxu0 %vm5730_vm0, %v5731_v8 }
0x3324   :  { %5410 = vmatprep.subr.bf16.mxu0 %v5729_v3 }
0x3327   :  { %5412 = vmatpush3.bf16.msra.mxu0 %v5810_v10 }
0x3328   :  { %5419 = vmatprep.subr.bf16.mxu0 %v5729_v3 }
0x3332   :  { %v1576_v42 = vpop.permute.xlu0 %1575 }
0x3333   :  { %v1578_v14 = vmul.f32 %v1576_v42, %v5860_v40 }
0x3335   :  { %v1585_v21 = vadd.f32 %v1584_v56, %v1578_v14  ;;  %v7194_v56 = vsel %vm7118_vm1, %v7055_v48, %v7111_v39 }
0x3341   :  { %v1593_v62 = vpop.permute.xlu0 %1592 }
0x3342   :  { %v1595_v30 = vmul.f32 %v1593_v62, %v5863_v44 }
0x3344   :  { %v1596_v37 = vadd.f32 %v1595_v30, %v1585_v21  ;;  %v1628_v30 = vsub.f32 %v7138_v46, %v7194_v56 }
0x3345   :  { %v1605_v16 = vpop.permute.xlu1 %1604 }
0x3346   :  { %v1607_v57 = vmul.f32 %v1605_v16, %v5867_v49 }
0x3348   :  { %v1608_v18 = vadd.f32 %v1607_v57, %v1596_v37  ;;  %v1629_v37 = vand.u32 2147483647, %v1628_v30 }
0x334a   :  { %v1624_v6 = vpop.permute.xlu1 %1623  ;;  %vm7201_vm8 = vcmp.ge.f32.partialorder %v1629_v37, 0.1 }
0x334b   :  { %v1626_v17 = vmul.f32 %v1624_v6, %v5873_v60  ;;  %v1631_v48 = vsel %vm7201_vm8, %v1628_v30, 0.0 }
0x33f5   :  { %v3975_v52 = vpop.f32.mrb[16].mxu0 }
0x33f6   :  { %v7171_v33 = vadd.f32 %v3975_v52, %v7088_v53  ;;  %v5221_v27 = vpop.f32.mrb[17].mxu0  ;;  %v1617_v53 = vpop.permute.xlu0 %1616  ;;  %v3980_v51 = vmul.f32 %v5877_v0, %v3975_v52 }
0x33f7   :  { %v1619_v43 = vmul.f32 %v1617_v53, %v5870_v54  ;;  %v265_v53 = vmul.f32 %v7138_v46, %v7138_v46 }
0x33f8   :  { %3990 = vrot.lane.b32.xlu0 %v7171_v33, %s5735_s21 }
0x33f9   :  { %v1620_v19 = vadd.f32 %v1619_v43, %v1608_v18 }
0x33fb   :  { %v1627_v20 = vadd.f32 %v1626_v17, %v1620_v19 }
0x33fd   :  { %v3979_v12 = vadd.f32 %v7100_v24, %v1627_v20 }
0x33ff   :  { %v7183_v29 = vadd.f32 %v3980_v51, %v3979_v12  ;;  %v7221_v12 = vld [vmem:[%s7916_s0 + $0x24] sm:$0x3] }
0x3401   :  { %v4898_v61 = vmul.f32 -1.442695, %v7183_v29 }
0x3403   :  { %5636 = vpow2.f32 %v4898_v61  ;;  %v7227_v61 = vsel %vm7149_vm6, %v7138_v46, %v7144_v22 }
0x340d   :  { %v5637_v50 = vpop.eup %5636 }
0x340e   :  { %v3986_v27 = vadd.f32 1.0, %v5637_v50 }
0x3410   :  { %5638 = vrcp.f32 %v3986_v27 }
0x341a   :  { %v5639_v42 = vpop.eup %5638 }
0x346a   :  { %v3991_v55 = vpop.permute.xlu0 %3990 }
0x346b   :  { %v3993_v62 = vmul.f32 %v5639_v42, %v3991_v55 }
0x346d   :  { %3995 = vrot.lane.b32.xlu1 %v3993_v62, %s5735_s21 }
0x34df   :  { %v3996_v14 = vpop.permute.xlu1 %3995 }
0x34e0   :  { %v3998_v16 = vadd.f32 %v3996_v14, %v7183_v29 }
0x34e2   :  { %5640 = vtanh.f32 %v3998_v16 }
0x34ec   :  { %v5641_v52 = vpop.eup %5640 }
0x34ed   :  { %v4000_v24 = vsub.f32 %v7126_v9, %v5641_v52 }
0x34ef   :  { %4002 = vrot.lane.b32.xlu0 %v4000_v24, %s5736_s4 }
0x3561   :  { %v4003_v21 = vpop.permute.xlu0 %4002 }
0x3562   :  { %v4005_v57 = vmul.f32 %v5639_v42, %v4003_v21 }
0x3564   :  { %4007 = vrot.lane.b32.xlu1 %v4005_v57, %s5737_s24 }
0x3568   :  { %330 = vrot.lane.b32.xlu1 %v265_v53, %s5732_s19 }
0x356c   :  { %1640 = vperm.xlu1 %5490, %v1631_v48  }
0x3570   :  { %5491 = vset.pattern.permute.xlu1 %v7926_v13 }
0x35d6   :  { %v4008_v39 = vpop.permute.xlu1 %4007 }
0x35d7   :  { %v7209_v7 = vadd.f32 %v5641_v52, %v4008_v39 }
0x35d9   :  { %v4011_v6 = vsub.f32 %v7209_v7, %v7132_v58 }
0x35da   :  { %v331_v43 = vpop.permute.xlu1 %330 }
0x35db   :  { %v385_v19 = vadd.f32 %v331_v43, %v265_v53  ;;  %v4012_v17 = vand.u32 2147483647, %v4011_v6 }
0x35dd   :  { %5642 = vrsqrt.f32 %v385_v19  ;;  %vm4013_vm9 = vcmp.ge.f32.partialorder %v4012_v17, 0.05  ;;  %vm513_vm10 = vcmp.eq.f32.partialorder %v385_v19, inf  ;;  %v516_v27 = vand.u32 2147483648, %v385_v19 }
0x35de   :  { %v4014_v20 = vsel %vm4013_vm9, %v4011_v6, 0.0  ;;  %v7215_v51 = vsel %vm4013_vm9, %v7209_v7, %v7132_v58  ;;  %vm515_vm11 = vcmp.eq.f32.partialorder %v385_v19, 0.0  ;;  %v1669_v58 = vsub.f32 %v7221_v12, %v7227_v61 }
0x35df   :  { %4017 = vrot.lane.b32.xlu0 %v4014_v20, %s5735_s21 }
0x35e0   :  { %v1670_v16 = vand.u32 2147483647, %v1669_v58 }
0x35e2   :  { %vm7232_vm13 = vcmp.ge.f32.partialorder %v1670_v16, 0.1 }
0x35e3   :  { %1634 = vperm.xlu0 %5455, %v1631_v48   ;;  %v1672_v53 = vsel %vm7232_vm13, %v1669_v58, 0.0 }
0x35e7   :  { %v5643_v50 = vpop.eup %5642 }
0x35e8   :  { %v512_v42 = vmul.f32 %v5643_v50, %v385_v19 }
0x35ea   :  { %v514_v55 = vsel %vm513_vm10, %v385_v19, %v512_v42 }
0x35eb   :  { %v517_v62 = vsel %vm515_vm11, %v516_v27, %v514_v55  ;;  %v1641_v17 = vpop.permute.xlu1 %1640 }
0x35ec   :  { %v1645_v14 = vsub.f32 %v517_v62, %v7155_v5  ;;  %v577_v52 = vmul.f32 %v517_v62, %v517_v62  ;;  %v1643_v42 = vmul.f32 %v1641_v17, %v5858_v38 }
0x35ee   :  { %v1646_v24 = vand.u32 2147483647, %v1645_v14  ;;  %v601_v30 = vmul.f32 %v577_v52, %v517_v62 }
0x35f0   :  { %vm1647_vm12 = vcmp.ge.f32.partialorder %v1646_v24, 0.1  ;;  %v1657_v41 = vsub.f32 %v601_v30, %v7160_v23 }
0x35f1   :  { %v1648_v21 = vsel %vm1647_vm12, %v1645_v14, 0.0  ;;  %v7238_v57 = vsel %vm1647_vm12, %v517_v62, %v7155_v5 }
0x35f2   :  { %1651 = vperm.xlu0 %5455, %v1648_v21   ;;  %v1658_v37 = vand.u32 2147483647, %v1657_v41 }
0x35f4   :  { %vm1659_vm14 = vcmp.ge.f32.partialorder %v1658_v37, 0.1 }
0x35f5   :  { %v1660_v48 = vsel %vm1659_vm14, %v1657_v41, 0.0  ;;  %v7243_v39 = vsel %vm1659_vm14, %v601_v30, %v7160_v23 }
0x35f6   :  { %1675 = vperm.xlu0 %5455, %v1672_v53   ;;  %1663 = vperm.xlu1 %5491, %v1660_v48  }
0x35fa   :  { %5492 = vset.pattern.permute.xlu1 %v7924_v11 }
0x35fb   :  { %1682 = vperm.xlu1 %5492, %v1672_v53  }
0x3651   :  { %v4018_v6 = vpop.permute.xlu0 %4017 }
0x3652   :  { %5231 = vmatmul.mubr.msk.f32.vlgmr.msra.gmra.mrb[16].mxu1 %vm2046_vm15, %v4018_v6 }
0x3653   :  { %5415 = vmatpush3.bf16.msra.mxu1 %v5795_v4  ;;  %5252 = vmatprep.mubr.msk.f32.mxu1 %vm5730_vm0, %v5731_v8 }
0x3654   :  { %5416 = vmatprep.subr.bf16.mxu1 %v5729_v3 }
0x3657   :  { %5418 = vmatpush3.bf16.msra.mxu1 %v5810_v10 }
0x3658   :  { %5425 = vmatprep.subr.bf16.mxu1 %v5729_v3 }
0x3662   :  { %v1635_v19 = vpop.permute.xlu0 %1634 }
0x3663   :  { %v1637_v50 = vmul.f32 %v1635_v19, %v5860_v40 }
0x3665   :  { %v1644_v55 = vadd.f32 %v1643_v42, %v1637_v50 }
0x3671   :  { %v1652_v20 = vpop.permute.xlu0 %1651 }
0x3672   :  { %v1654_v58 = vmul.f32 %v1652_v20, %v5863_v44 }
0x3674   :  { %v1655_v14 = vadd.f32 %v1654_v58, %v1644_v55  ;;  %v7277_v58 = vsel %vm7201_vm8, %v7138_v46, %v7194_v56 }
0x3675   :  { %v1664_v27 = vpop.permute.xlu1 %1663  ;;  %v1687_v55 = vsub.f32 %v7221_v12, %v7277_v58 }
0x3676   :  { %v1666_v62 = vmul.f32 %v1664_v27, %v5867_v49 }
0x3678   :  { %v1667_v16 = vadd.f32 %v1666_v62, %v1655_v14 }
0x367a   :  { %v1683_v52 = vpop.permute.xlu1 %1682 }
0x367b   :  { %v1685_v41 = vmul.f32 %v1683_v52, %v5873_v60 }
0x3725   :  { %v4087_v5 = vpop.f32.mrb[16].mxu1 }
0x3726   :  { %v7254_v23 = vadd.f32 %v4087_v5, %v7171_v33  ;;  %v5232_v43 = vpop.f32.mrb[17].mxu1  ;;  %v1676_v33 = vpop.permute.xlu0 %1675  ;;  %v4092_v37 = vmul.f32 %v5877_v0, %v4087_v5 }
0x3727   :  { %v1678_v24 = vmul.f32 %v1676_v33, %v5870_v54  ;;  %v1688_v33 = vand.u32 2147483647, %v1687_v55 }
0x3728   :  { %4102 = vrot.lane.b32.xlu0 %v7254_v23, %s5735_s21 }
0x3729   :  { %v1679_v30 = vadd.f32 %v1678_v24, %v1667_v16  ;;  %v266_v16 = vmul.f32 %v7221_v12, %v7221_v12  ;;  %vm7284_vm1 = vcmp.ge.f32.partialorder %v1688_v33, 0.1 }
0x372a   :  { %v1690_v46 = vsel %vm7284_vm1, %v1687_v55, 0.0 }
0x372b   :  { %v1686_v21 = vadd.f32 %v1685_v41, %v1679_v30 }
0x372d   :  { %v4091_v53 = vadd.f32 %v7183_v29, %v1686_v21 }
0x372f   :  { %v7266_v48 = vadd.f32 %v4092_v37, %v4091_v53 }
0x3731   :  { %v4900_v6 = vmul.f32 -1.442695, %v7266_v48 }
0x3733   :  { %5644 = vpow2.f32 %v4900_v6  ;;  %v7304_v6 = vld [vmem:[%s7916_s0 + $0x26] sm:$0x3] }
0x373d   :  { %v5645_v43 = vpop.eup %5644 }
0x373e   :  { %v4098_v19 = vadd.f32 1.0, %v5645_v43  ;;  %v7310_v43 = vsel %vm7232_vm13, %v7221_v12, %v7227_v61 }
0x3740   :  { %5646 = vrcp.f32 %v4098_v19 }
0x374a   :  { %v5647_v17 = vpop.eup %5646 }
0x379a   :  { %v4103_v20 = vpop.permute.xlu0 %4102 }
0x379b   :  { %v4105_v50 = vmul.f32 %v5647_v17, %v4103_v20 }
0x379d   :  { %4107 = vrot.lane.b32.xlu1 %v4105_v50, %s5735_s21 }
0x380f   :  { %v4108_v27 = vpop.permute.xlu1 %4107 }
0x3810   :  { %v4110_v42 = vadd.f32 %v4108_v27, %v7266_v48 }
0x3812   :  { %5648 = vtanh.f32 %v4110_v42 }
0x381c   :  { %v5649_v5 = vpop.eup %5648 }
0x381d   :  { %v4112_v29 = vsub.f32 %v7209_v7, %v5649_v5 }
0x381f   :  { %4114 = vrot.lane.b32.xlu0 %v4112_v29, %s5736_s4 }
0x3891   :  { %v4115_v62 = vpop.permute.xlu0 %4114 }
0x3892   :  { %v4117_v14 = vmul.f32 %v5647_v17, %v4115_v62 }
0x3894   :  { %4119 = vrot.lane.b32.xlu1 %v4117_v14, %s5737_s24 }
0x3898   :  { %332 = vrot.lane.b32.xlu1 %v266_v16, %s5732_s19 }
0x389c   :  { %1699 = vperm.xlu1 %5492, %v1690_v46  }
0x38a0   :  { %5493 = vset.pattern.permute.xlu1 %v7926_v13 }
0x3906   :  { %v4120_v56 = vpop.permute.xlu1 %4119 }
0x3907   :  { %v7292_v18 = vadd.f32 %v5649_v5, %v4120_v56 }
0x3909   :  { %v4123_v24 = vsub.f32 %v7292_v18, %v7215_v51 }
0x390a   :  { %v333_v30 = vpop.permute.xlu1 %332 }
0x390b   :  { %v386_v41 = vadd.f32 %v333_v30, %v266_v16  ;;  %v4124_v21 = vand.u32 2147483647, %v4123_v24 }
0x390d   :  { %5650 = vrsqrt.f32 %v386_v41  ;;  %vm4125_vm2 = vcmp.ge.f32.partialorder %v4124_v21, 0.05  ;;  %vm520_vm3 = vcmp.eq.f32.partialorder %v386_v41, inf  ;;  %v523_v17 = vand.u32 2147483648, %v386_v41 }
0x390e   :  { %v4126_v37 = vsel %vm4125_vm2, %v4123_v24, 0.0  ;;  %v7298_v53 = vsel %vm4125_vm2, %v7292_v18, %v7215_v51  ;;  %vm522_vm4 = vcmp.eq.f32.partialorder %v386_v41, 0.0  ;;  %v1728_v51 = vsub.f32 %v7304_v6, %v7310_v43 }
0x390f   :  { %4129 = vrot.lane.b32.xlu0 %v4126_v37, %s5735_s21 }
0x3910   :  { %v1729_v5 = vand.u32 2147483647, %v1728_v51 }
0x3912   :  { %vm7315_vm6 = vcmp.ge.f32.partialorder %v1729_v5, 0.1 }
0x3913   :  { %1693 = vperm.xlu0 %5455, %v1690_v46   ;;  %v1731_v46 = vsel %vm7315_vm6, %v1728_v51, 0.0 }
0x3917   :  { %v5651_v19 = vpop.eup %5650 }
0x3918   :  { %v519_v20 = vmul.f32 %v5651_v19, %v386_v41 }
0x391a   :  { %v521_v50 = vsel %vm520_vm3, %v386_v41, %v519_v20 }
0x391b   :  { %v524_v27 = vsel %vm522_vm4, %v523_v17, %v521_v50  ;;  %v1700_v37 = vpop.permute.xlu1 %1699 }
0x391c   :  { %v1704_v42 = vsub.f32 %v524_v27, %v7238_v57  ;;  %v578_v29 = vmul.f32 %v524_v27, %v524_v27  ;;  %v1702_v51 = vmul.f32 %v1700_v37, %v5858_v38 }
0x391e   :  { %v1705_v55 = vand.u32 2147483647, %v1704_v42  ;;  %v602_v62 = vmul.f32 %v578_v29, %v524_v27 }
0x3920   :  { %vm1706_vm5 = vcmp.ge.f32.partialorder %v1705_v55, 0.1  ;;  %v1716_v22 = vsub.f32 %v602_v62, %v7243_v39 }
0x3921   :  { %v1707_v14 = vsel %vm1706_vm5, %v1704_v42, 0.0  ;;  %v7321_v33 = vsel %vm1706_vm5, %v524_v27, %v7238_v57 }
0x3922   :  { %1710 = vperm.xlu0 %5455, %v1707_v14   ;;  %v1717_v16 = vand.u32 2147483647, %v1716_v22 }
0x3924   :  { %vm1718_vm7 = vcmp.ge.f32.partialorder %v1717_v16, 0.1 }
0x3925   :  { %v1719_v56 = vsel %vm1718_vm7, %v1716_v22, 0.0  ;;  %v7326_v24 = vsel %vm1718_vm7, %v602_v62, %v7243_v39 }
0x3926   :  { %1734 = vperm.xlu0 %5455, %v1731_v46   ;;  %1722 = vperm.xlu1 %5493, %v1719_v56  }
0x392a   :  { %5494 = vset.pattern.permute.xlu1 %v7924_v11 }
0x392b   :  { %1741 = vperm.xlu1 %5494, %v1731_v46  }
0x3981   :  { %v4130_v30 = vpop.permute.xlu0 %4129 }
0x3982   :  { %5242 = vmatmul.mubr.msk.f32.vlgmr.msra.gmra.mrb[18].mxu0 %vm2046_vm15, %v4130_v30 }
0x3983   :  { %5421 = vmatpush3.bf16.msra.mxu0 %v5795_v4  ;;  %5263 = vmatprep.mubr.msk.f32.mxu0 %vm5730_vm0, %v5731_v8 }
0x3984   :  { %5422 = vmatprep.subr.bf16.mxu0 %v5729_v3 }
0x3987   :  { %5424 = vmatpush3.bf16.msra.mxu0 %v5810_v10 }
0x3988   :  { %5431 = vmatprep.subr.bf16.mxu0 %v5729_v3 }
0x3992   :  { %v1694_v21 = vpop.permute.xlu0 %1693 }
0x3993   :  { %v1696_v17 = vmul.f32 %v1694_v21, %v5860_v40 }
0x3995   :  { %v1703_v27 = vadd.f32 %v1702_v51, %v1696_v17 }
0x39a1   :  { %v1711_v19 = vpop.permute.xlu0 %1710 }
0x39a2   :  { %v1713_v50 = vmul.f32 %v1711_v19, %v5863_v44 }
0x39a4   :  { %v1714_v5 = vadd.f32 %v1713_v50, %v1703_v27  ;;  %v7360_v27 = vsel %vm7284_vm1, %v7221_v12, %v7277_v58 }
0x39a5   :  { %v1723_v20 = vpop.permute.xlu1 %1722 }
0x39a6   :  { %v1725_v42 = vmul.f32 %v1723_v20, %v5867_v49 }
0x39a8   :  { %v1726_v29 = vadd.f32 %v1725_v42, %v1714_v5  ;;  %v1746_v42 = vsub.f32 %v7304_v6, %v7360_v27 }
0x39aa   :  { %v1742_v55 = vpop.permute.xlu1 %1741 }
0x39ab   :  { %v1744_v14 = vmul.f32 %v1742_v55, %v5873_v60  ;;  %v267_v55 = vmul.f32 %v7304_v6, %v7304_v6 }
0x3a55   :  { %v4199_v57 = vpop.f32.mrb[18].mxu0 }
0x3a56   :  { %v7337_v39 = vadd.f32 %v4199_v57, %v7254_v23  ;;  %v5243_v41 = vpop.f32.mrb[19].mxu0  ;;  %v1735_v23 = vpop.permute.xlu0 %1734  ;;  %v4204_v46 = vmul.f32 %v5877_v0, %v4199_v57 }
0x3a57   :  { %v1737_v62 = vmul.f32 %v1735_v23, %v5870_v54 }
0x3a58   :  { %4214 = vrot.lane.b32.xlu0 %v7337_v39, %s5735_s21 }
0x3a59   :  { %v1738_v22 = vadd.f32 %v1737_v62, %v1726_v29  ;;  %v1747_v29 = vand.u32 2147483647, %v1746_v42 }
0x3a5b   :  { %v1745_v16 = vadd.f32 %v1744_v14, %v1738_v22  ;;  %vm7367_vm8 = vcmp.ge.f32.partialorder %v1747_v29, 0.1 }
0x3a5c   :  { %v1749_v12 = vsel %vm7367_vm8, %v1746_v42, 0.0 }
0x3a5d   :  { %v4203_v56 = vadd.f32 %v7266_v48, %v1745_v16 }
0x3a5f   :  { %v7349_v30 = vadd.f32 %v4204_v46, %v4203_v56 }
0x3a61   :  { %v4902_v41 = vmul.f32 -1.442695, %v7349_v30 }
0x3a63   :  { %5652 = vpow2.f32 %v4902_v41 }
0x3a6d   :  { %v5653_v21 = vpop.eup %5652 }
0x3a6e   :  { %v4210_v37 = vadd.f32 1.0, %v5653_v21  ;;  %v7387_v21 = vld [vmem:[%s7916_s0 + $0x28] sm:$0x3] }
0x3a70   :  { %5654 = vrcp.f32 %v4210_v37  ;;  %v7393_v37 = vsel %vm7315_vm6, %v7304_v6, %v7310_v43 }
0x3a7a   :  { %v5655_v19 = vpop.eup %5654 }
0x3aca   :  { %v4215_v17 = vpop.permute.xlu0 %4214 }
0x3acb   :  { %v4217_v20 = vmul.f32 %v5655_v19, %v4215_v17 }
0x3acd   :  { %4219 = vrot.lane.b32.xlu1 %v4217_v20, %s5735_s21 }
0x3b3f   :  { %v4220_v51 = vpop.permute.xlu1 %4219 }
0x3b40   :  { %v4222_v50 = vadd.f32 %v4220_v51, %v7349_v30 }
0x3b42   :  { %5656 = vtanh.f32 %v4222_v50 }
0x3b4c   :  { %v5657_v57 = vpop.eup %5656 }
0x3b4d   :  { %v4224_v48 = vsub.f32 %v7292_v18, %v5657_v57 }
0x3b4f   :  { %4226 = vrot.lane.b32.xlu0 %v4224_v48, %s5736_s4 }
0x3bc1   :  { %v4227_v5 = vpop.permute.xlu0 %4226 }
0x3bc2   :  { %v4229_v23 = vmul.f32 %v5655_v19, %v4227_v5 }
0x3bc4   :  { %4231 = vrot.lane.b32.xlu1 %v4229_v23, %s5737_s24 }
0x3bc8   :  { %334 = vrot.lane.b32.xlu1 %v267_v55, %s5732_s19 }
0x3bcc   :  { %1758 = vperm.xlu1 %5494, %v1749_v12  }
0x3bd0   :  { %5495 = vset.pattern.permute.xlu1 %v7926_v13 }
0x3c36   :  { %v4232_v58 = vpop.permute.xlu1 %4231 }
0x3c37   :  { %v7375_v52 = vadd.f32 %v5657_v57, %v4232_v58 }
0x3c39   :  { %v4235_v22 = vsub.f32 %v7375_v52, %v7298_v53 }
0x3c3a   :  { %v335_v14 = vpop.permute.xlu1 %334 }
0x3c3b   :  { %v387_v16 = vadd.f32 %v335_v14, %v267_v55  ;;  %v4236_v46 = vand.u32 2147483647, %v4235_v22 }
0x3c3d   :  { %5658 = vrsqrt.f32 %v387_v16  ;;  %vm4237_vm9 = vcmp.ge.f32.partialorder %v4236_v46, 0.05  ;;  %vm527_vm10 = vcmp.eq.f32.partialorder %v387_v16, inf  ;;  %v530_v17 = vand.u32 2147483648, %v387_v16 }
0x3c3e   :  { %v4238_v56 = vsel %vm4237_vm9, %v4235_v22, 0.0  ;;  %v7381_v41 = vsel %vm4237_vm9, %v7375_v52, %v7298_v53  ;;  %vm529_vm11 = vcmp.eq.f32.partialorder %v387_v16, 0.0  ;;  %v1787_v53 = vsub.f32 %v7387_v21, %v7393_v37 }
0x3c3f   :  { %4241 = vrot.lane.b32.xlu0 %v4238_v56, %s5735_s21 }
0x3c40   :  { %v1788_v48 = vand.u32 2147483647, %v1787_v53 }
0x3c42   :  { %vm7398_vm13 = vcmp.ge.f32.partialorder %v1788_v48, 0.1 }
0x3c43   :  { %1752 = vperm.xlu0 %5455, %v1749_v12   ;;  %v1790_v58 = vsel %vm7398_vm13, %v1787_v53, 0.0 }
0x3c47   :  { %v5659_v19 = vpop.eup %5658 }
0x3c48   :  { %v526_v20 = vmul.f32 %v5659_v19, %v387_v16 }
0x3c4a   :  { %v528_v51 = vsel %vm527_vm10, %v387_v16, %v526_v20 }
0x3c4b   :  { %v531_v50 = vsel %vm529_vm11, %v530_v17, %v528_v51  ;;  %v1759_v19 = vpop.permute.xlu1 %1758 }
0x3c4c   :  { %v1763_v57 = vsub.f32 %v531_v50, %v7321_v33  ;;  %v579_v42 = vmul.f32 %v531_v50, %v531_v50  ;;  %v1761_v51 = vmul.f32 %v1759_v19, %v5858_v38 }
0x3c4e   :  { %v1764_v5 = vand.u32 2147483647, %v1763_v57  ;;  %v603_v23 = vmul.f32 %v579_v42, %v531_v50 }
0x3c50   :  { %vm1765_vm12 = vcmp.ge.f32.partialorder %v1764_v5, 0.1  ;;  %v1775_v61 = vsub.f32 %v603_v23, %v7326_v24 }
0x3c51   :  { %v1766_v29 = vsel %vm1765_vm12, %v1763_v57, 0.0  ;;  %v7404_v55 = vsel %vm1765_vm12, %v531_v50, %v7321_v33 }
0x3c52   :  { %1769 = vperm.xlu0 %5455, %v1766_v29   ;;  %v1776_v12 = vand.u32 2147483647, %v1775_v61 }
0x3c54   :  { %vm1777_vm14 = vcmp.ge.f32.partialorder %v1776_v12, 0.1 }
0x3c55   :  { %v1778_v22 = vsel %vm1777_vm14, %v1775_v61, 0.0  ;;  %v7409_v14 = vsel %vm1777_vm14, %v603_v23, %v7326_v24 }
0x3c56   :  { %1793 = vperm.xlu0 %5455, %v1790_v58   ;;  %1781 = vperm.xlu1 %5495, %v1778_v22  }
0x3c5a   :  { %5496 = vset.pattern.permute.xlu1 %v7924_v11 }
0x3c5b   :  { %1800 = vperm.xlu1 %5496, %v1790_v58  }
0x3cb1   :  { %v4242_v16 = vpop.permute.xlu0 %4241 }
0x3cb2   :  { %5253 = vmatmul.mubr.msk.f32.vlgmr.msra.gmra.mrb[18].mxu1 %vm2046_vm15, %v4242_v16 }
0x3cb3   :  { %5427 = vmatpush3.bf16.msra.mxu1 %v5795_v4  ;;  %5274 = vmatprep.mubr.msk.f32.mxu1 %vm5730_vm0, %v5731_v8 }
0x3cb4   :  { %5428 = vmatprep.subr.bf16.mxu1 %v5729_v3 }
0x3cb7   :  { %5430 = vmatpush3.bf16.msra.mxu1 %v5810_v10 }
0x3cb8   :  { %5437 = vmatprep.subr.bf16.mxu1 %v5729_v3 }
0x3cc2   :  { %v1753_v56 = vpop.permute.xlu0 %1752 }
0x3cc3   :  { %v1755_v20 = vmul.f32 %v1753_v56, %v5860_v40 }
0x3cc5   :  { %v1762_v57 = vadd.f32 %v1761_v51, %v1755_v20 }
0x3cd1   :  { %v1770_v17 = vpop.permute.xlu0 %1769 }
0x3cd2   :  { %v1772_v50 = vmul.f32 %v1770_v17, %v5863_v44 }
0x3cd4   :  { %v1773_v42 = vadd.f32 %v1772_v50, %v1762_v57 }
0x3cd5   :  { %v1782_v53 = vpop.permute.xlu1 %1781 }
0x3cd6   :  { %v1784_v48 = vmul.f32 %v1782_v53, %v5867_v49 }
0x3cd8   :  { %v1785_v5 = vadd.f32 %v1784_v48, %v1773_v42  ;;  %v7443_v48 = vsel %vm7367_vm8, %v7304_v6, %v7360_v27 }
0x3cd9   :  { %v1805_v42 = vsub.f32 %v7387_v21, %v7443_v48 }
0x3cda   :  { %v1801_v23 = vpop.permute.xlu1 %1800 }
0x3cdb   :  { %v1803_v12 = vmul.f32 %v1801_v23, %v5873_v60  ;;  %v1806_v23 = vand.u32 2147483647, %v1805_v42 }
0x3cdd   :  { %vm7450_vm1 = vcmp.ge.f32.partialorder %v1806_v23, 0.1 }
0x3cde   :  { %v1808_v6 = vsel %vm7450_vm1, %v1805_v42, 0.0 }
0x3d85   :  { %v4311_v33 = vpop.f32.mrb[18].mxu1 }
0x3d86   :  { %v7420_v24 = vadd.f32 %v4311_v33, %v7337_v39  ;;  %v5254_v46 = vpop.f32.mrb[19].mxu1  ;;  %v1794_v39 = vpop.permute.xlu0 %1793  ;;  %v4316_v22 = vmul.f32 %v5877_v0, %v4311_v33 }
0x3d87   :  { %v1796_v61 = vmul.f32 %v1794_v39, %v5870_v54 }
0x3d88   :  { %4326 = vrot.lane.b32.xlu0 %v7420_v24, %s5735_s21 }
0x3d89   :  { %v1797_v29 = vadd.f32 %v1796_v61, %v1785_v5  ;;  %v268_v61 = vmul.f32 %v7387_v21, %v7387_v21 }
0x3d8b   :  { %v1804_v58 = vadd.f32 %v1803_v12, %v1797_v29 }
0x3d8d   :  { %v4315_v16 = vadd.f32 %v7349_v30, %v1804_v58 }
0x3d8f   :  { %v7432_v46 = vadd.f32 %v4316_v22, %v4315_v16 }
0x3d91   :  { %v4904_v56 = vmul.f32 -1.442695, %v7432_v46 }
0x3d93   :  { %5660 = vpow2.f32 %v4904_v56 }
0x3d9d   :  { %v5661_v19 = vpop.eup %5660 }
0x3d9e   :  { %v4322_v17 = vadd.f32 1.0, %v5661_v19 }
0x3da0   :  { %5662 = vrcp.f32 %v4322_v17  ;;  %v7470_v17 = vld [vmem:[%s7916_s0 + $0x2a] sm:$0x3] }
0x3daa   :  { %v5663_v20 = vpop.eup %5662 }
0x3dfa   :  { %v4327_v53 = vpop.permute.xlu0 %4326 }
0x3dfb   :  { %v4329_v51 = vmul.f32 %v5663_v20, %v4327_v53 }
0x3dfd   :  { %4331 = vrot.lane.b32.xlu1 %v4329_v51, %s5735_s21 }
0x3e6f   :  { %v4332_v50 = vpop.permute.xlu1 %4331 }
0x3e70   :  { %v4334_v57 = vadd.f32 %v4332_v50, %v7432_v46 }
0x3e72   :  { %5664 = vtanh.f32 %v4334_v57 }
0x3e7c   :  { %v5665_v33 = vpop.eup %5664 }
0x3e7d   :  { %v4336_v30 = vsub.f32 %v7375_v52, %v5665_v33 }
0x3e7f   :  { %4338 = vrot.lane.b32.xlu0 %v4336_v30, %s5736_s4 }
0x3ef1   :  { %v4339_v39 = vpop.permute.xlu0 %4338 }
0x3ef2   :  { %v4341_v5 = vmul.f32 %v5663_v20, %v4339_v39  ;;  %v7476_v20 = vsel %vm7398_vm13, %v7387_v21, %v7393_v37 }
0x3ef4   :  { %4343 = vrot.lane.b32.xlu1 %v4341_v5, %s5737_s24 }
0x3ef8   :  { %336 = vrot.lane.b32.xlu1 %v268_v61, %s5732_s19 }
0x3efc   :  { %1817 = vperm.xlu1 %5496, %v1808_v6  }
0x3f00   :  { %5497 = vset.pattern.permute.xlu1 %v7926_v13 }
0x3f66   :  { %v4344_v27 = vpop.permute.xlu1 %4343 }
0x3f67   :  { %v7458_v62 = vadd.f32 %v5665_v33, %v4344_v27 }
0x3f69   :  { %v4364_v12 = vsub.f32 %v7458_v62, %v7381_v41 }
0x3f6a   :  { %v337_v58 = vpop.permute.xlu1 %336 }
0x3f6b   :  { %v388_v22 = vadd.f32 %v337_v58, %v268_v61  ;;  %v4365_v16 = vand.u32 2147483647, %v4364_v12 }
0x3f6d   :  { %5666 = vrsqrt.f32 %v388_v22  ;;  %vm4366_vm2 = vcmp.ge.f32.partialorder %v4365_v16, 0.05  ;;  %vm534_vm3 = vcmp.eq.f32.partialorder %v388_v22, inf  ;;  %v537_v51 = vand.u32 2147483648, %v388_v22 }
0x3f6e   :  { %v4367_v56 = vsel %vm4366_vm2, %v4364_v12, 0.0  ;;  %v7464_v19 = vsel %vm4366_vm2, %v7458_v62, %v7381_v41  ;;  %vm536_vm4 = vcmp.eq.f32.partialorder %v388_v22, 0.0  ;;  %v1846_v41 = vsub.f32 %v7470_v17, %v7476_v20 }
0x3f6f   :  { %4370 = vrot.lane.b32.xlu0 %v4367_v56, %s5735_s21 }
0x3f70   :  { %v1847_v42 = vand.u32 2147483647, %v1846_v41 }
0x3f72   :  { %vm7481_vm6 = vcmp.ge.f32.partialorder %v1847_v42, 0.1 }
0x3f73   :  { %1811 = vperm.xlu0 %5455, %v1808_v6   ;;  %v1849_v12 = vsel %vm7481_vm6, %v1846_v41, 0.0 }
0x3f77   :  { %v5667_v53 = vpop.eup %5666 }
0x3f78   :  { %v533_v50 = vmul.f32 %v5667_v53, %v388_v22 }
0x3f7a   :  { %v535_v57 = vsel %vm534_vm3, %v388_v22, %v533_v50 }
0x3f7b   :  { %v538_v33 = vsel %vm536_vm4, %v537_v51, %v535_v57  ;;  %v1818_v51 = vpop.permute.xlu1 %1817 }
0x3f7c   :  { %v1822_v30 = vsub.f32 %v538_v33, %v7404_v55  ;;  %v580_v39 = vmul.f32 %v538_v33, %v538_v33 }
0x3f7e   :  { %v1823_v5 = vand.u32 2147483647, %v1822_v30  ;;  %v604_v23 = vmul.f32 %v580_v39, %v538_v33 }
0x3f80   :  { %vm1824_vm5 = vcmp.ge.f32.partialorder %v1823_v5, 0.1  ;;  %v1834_v43 = vsub.f32 %v604_v23, %v7409_v14 }
0x3f81   :  { %v1825_v61 = vsel %vm1824_vm5, %v1822_v30, 0.0  ;;  %v7487_v6 = vsel %vm1824_vm5, %v538_v33, %v7404_v55  ;;  %v1820_v33 = vmul.f32 %v1818_v51, %v5858_v38 }
0x3f82   :  { %1828 = vperm.xlu0 %5455, %v1825_v61   ;;  %v1835_v27 = vand.u32 2147483647, %v1834_v43 }
0x3f84   :  { %vm1836_vm7 = vcmp.ge.f32.partialorder %v1835_v27, 0.1 }
0x3f85   :  { %v1837_v58 = vsel %vm1836_vm7, %v1834_v43, 0.0  ;;  %v7492_v22 = vsel %vm1836_vm7, %v604_v23, %v7409_v14 }
0x3f86   :  { %1852 = vperm.xlu0 %5455, %v1849_v12   ;;  %1840 = vperm.xlu1 %5497, %v1837_v58  }
0x3f8a   :  { %5498 = vset.pattern.permute.xlu1 %v7924_v11 }
0x3f8b   :  { %1859 = vperm.xlu1 %5498, %v1849_v12  }
0x3fe1   :  { %v4371_v16 = vpop.permute.xlu0 %4370 }
0x3fe2   :  { %5264 = vmatmul.mubr.msk.f32.vlgmr.msra.gmra.mrb[20].mxu0 %vm2046_vm15, %v4371_v16 }
0x3fe3   :  { %5433 = vmatpush3.bf16.msra.mxu0 %v5795_v4  ;;  %5285 = vmatprep.mubr.msk.f32.mxu0 %vm5730_vm0, %v5731_v8 }
0x3fe4   :  { %5434 = vmatprep.subr.bf16.mxu0 %v5729_v3 }
0x3fe7   :  { %5436 = vmatpush3.bf16.msra.mxu0 %v5810_v10 }
0x3ff2   :  { %v1812_v53 = vpop.permute.xlu0 %1811 }
0x3ff3   :  { %v1814_v41 = vmul.f32 %v1812_v53, %v5860_v40 }
0x3ff5   :  { %v1821_v42 = vadd.f32 %v1820_v33, %v1814_v41 }
0x4001   :  { %v1829_v50 = vpop.permute.xlu0 %1828 }
0x4002   :  { %v1831_v30 = vmul.f32 %v1829_v50, %v5863_v44 }
0x4004   :  { %v1832_v5 = vadd.f32 %v1831_v30, %v1821_v42 }
0x4005   :  { %v1841_v57 = vpop.permute.xlu1 %1840 }
0x4006   :  { %v1843_v39 = vmul.f32 %v1841_v57, %v5867_v49 }
0x4008   :  { %v1844_v23 = vadd.f32 %v1843_v39, %v1832_v5  ;;  %v7525_v5 = vsel %vm7450_vm1, %v7387_v21, %v7443_v48 }
0x400a   :  { %v1860_v43 = vpop.permute.xlu1 %1859 }
0x400b   :  { %v1862_v12 = vmul.f32 %v1860_v43, %v5873_v60 }
0x40b5   :  { %v4440_v55 = vpop.f32.mrb[20].mxu0 }
0x40b6   :  { %v7502_v14 = vadd.f32 %v4440_v55, %v7420_v24  ;;  %v5265_v56 = vpop.f32.mrb[21].mxu0  ;;  %v1853_v24 = vpop.permute.xlu0 %1852  ;;  %v4445_v16 = vmul.f32 %v5877_v0, %v4440_v55 }
0x40b7   :  { %v1855_v61 = vmul.f32 %v1853_v24, %v5870_v54  ;;  %v1864_v24 = vsub.f32 %v7470_v17, %v7525_v5 }
0x40b8   :  { %4455 = vrot.lane.b32.xlu0 %v7502_v14, %s5735_s21 }
0x40b9   :  { %v1856_v27 = vadd.f32 %v1855_v61, %v1844_v23  ;;  %v1865_v61 = vand.u32 2147483647, %v1864_v24 }
0x40bb   :  { %v1863_v58 = vadd.f32 %v1862_v12, %v1856_v27  ;;  %v269_v27 = vmul.f32 %v7470_v17, %v7470_v17  ;;  %vm7532_vm8 = vcmp.ge.f32.partialorder %v1865_v61, 0.1 }
0x40bc   :  { %v1867_v21 = vsel %vm7532_vm8, %v1864_v24, 0.0 }
0x40bd   :  { %v4444_v56 = vadd.f32 %v7432_v46, %v1863_v58 }
0x40bf   :  { %v7514_v53 = vadd.f32 %v4445_v16, %v4444_v56 }
0x40c1   :  { %v4907_v51 = vmul.f32 -1.442695, %v7514_v53 }
0x40c3   :  { %5668 = vpow2.f32 %v4907_v51 }
0x40cd   :  { %v5669_v50 = vpop.eup %5668 }
0x40ce   :  { %v4451_v41 = vadd.f32 1.0, %v5669_v50 }
0x40d0   :  { %5670 = vrcp.f32 %v4451_v41 }
0x40da   :  { %v5671_v57 = vpop.eup %5670 }
0x412a   :  { %v4456_v33 = vpop.permute.xlu0 %4455 }
0x412b   :  { %v4458_v30 = vmul.f32 %v5671_v57, %v4456_v33  ;;  %v7558_v33 = vsel %vm7481_vm6, %v7470_v17, %v7476_v20 }
0x412d   :  { %4460 = vrot.lane.b32.xlu1 %v4458_v30, %s5735_s21 }
0x419f   :  { %v4461_v42 = vpop.permute.xlu1 %4460 }
0x41a0   :  { %v4463_v39 = vadd.f32 %v4461_v42, %v7514_v53 }
0x41a2   :  { %5672 = vtanh.f32 %v4463_v39 }
0x41ac   :  { %v5673_v55 = vpop.eup %5672 }
0x41ad   :  { %v4465_v46 = vsub.f32 %v7458_v62, %v5673_v55 }
0x41af   :  { %4467 = vrot.lane.b32.xlu0 %v4465_v46, %s5736_s4 }
0x4221   :  { %v4468_v23 = vpop.permute.xlu0 %4467 }
0x4222   :  { %v4470_v43 = vmul.f32 %v5671_v57, %v4468_v23  ;;  %v7552_v57 = vld [vmem:[%s7916_s0 + $0x2c] sm:$0x3] }
0x4224   :  { %4472 = vrot.lane.b32.xlu1 %v4470_v43, %s5737_s24 }
0x4228   :  { %338 = vrot.lane.b32.xlu1 %v269_v27, %s5732_s19 }
0x422c   :  { %1876 = vperm.xlu1 %5498, %v1867_v21  }
0x4230   :  { %5499 = vset.pattern.permute.xlu1 %v7926_v13 }
0x4296   :  { %v4473_v48 = vpop.permute.xlu1 %4472 }
0x4297   :  { %v7540_v29 = vadd.f32 %v5673_v55, %v4473_v48 }
0x4299   :  { %v4476_v58 = vsub.f32 %v7540_v29, %v7464_v19 }
0x429a   :  { %v339_v16 = vpop.permute.xlu1 %338 }
0x429b   :  { %v389_v56 = vadd.f32 %v339_v16, %v269_v27  ;;  %v4477_v51 = vand.u32 2147483647, %v4476_v58 }
0x429d   :  { %5674 = vrsqrt.f32 %v389_v56  ;;  %vm4478_vm9 = vcmp.ge.f32.partialorder %v4477_v51, 0.05  ;;  %vm541_vm10 = vcmp.eq.f32.partialorder %v389_v56, inf  ;;  %v544_v42 = vand.u32 2147483648, %v389_v56 }
0x429e   :  { %v4479_v50 = vsel %vm4478_vm9, %v4476_v58, 0.0  ;;  %v7546_v41 = vsel %vm4478_vm9, %v7540_v29, %v7464_v19  ;;  %vm543_vm11 = vcmp.eq.f32.partialorder %v389_v56, 0.0  ;;  %v1905_v19 = vsub.f32 %v7552_v57, %v7558_v33 }
0x429f   :  { %4482 = vrot.lane.b32.xlu0 %v4479_v50, %s5735_s21 }
0x42a0   :  { %v1906_v23 = vand.u32 2147483647, %v1905_v19 }
0x42a2   :  { %vm7563_vm13 = vcmp.ge.f32.partialorder %v1906_v23, 0.1 }
0x42a3   :  { %1870 = vperm.xlu0 %5455, %v1867_v21   ;;  %v1908_v16 = vsel %vm7563_vm13, %v1905_v19, 0.0 }
0x42a7   :  { %v5675_v30 = vpop.eup %5674 }
0x42a8   :  { %v540_v39 = vmul.f32 %v5675_v30, %v389_v56 }
0x42aa   :  { %v542_v55 = vsel %vm541_vm10, %v389_v56, %v540_v39 }
0x42ab   :  { %v545_v46 = vsel %vm543_vm11, %v544_v42, %v542_v55  ;;  %v1877_v39 = vpop.permute.xlu1 %1876 }
0x42ac   :  { %v1881_v24 = vsub.f32 %v545_v46, %v7487_v6  ;;  %v581_v43 = vmul.f32 %v545_v46, %v545_v46 }
0x42ae   :  { %v1882_v61 = vand.u32 2147483647, %v1881_v24  ;;  %v605_v27 = vmul.f32 %v581_v43, %v545_v46 }
0x42b0   :  { %vm1883_vm12 = vcmp.ge.f32.partialorder %v1882_v61, 0.1  ;;  %v1893_v37 = vsub.f32 %v605_v27, %v7492_v22 }
0x42b1   :  { %v1884_v21 = vsel %vm1883_vm12, %v1881_v24, 0.0  ;;  %v7569_v48 = vsel %vm1883_vm12, %v545_v46, %v7487_v6 }
0x42b2   :  { %1887 = vperm.xlu0 %5455, %v1884_v21   ;;  %v1894_v58 = vand.u32 2147483647, %v1893_v37 }
0x42b4   :  { %vm1895_vm14 = vcmp.ge.f32.partialorder %v1894_v58, 0.1 }
0x42b5   :  { %v1896_v56 = vsel %vm1895_vm14, %v1893_v37, 0.0  ;;  %v7574_v51 = vsel %vm1895_vm14, %v605_v27, %v7492_v22  ;;  %vm2499_vm14 = vcmask 523264  }
0x42b6   :  { %1911 = vperm.xlu0 %5455, %v1908_v16   ;;  %1899 = vperm.xlu1 %5499, %v1896_v56  }
0x42ba   :  { %5500 = vset.pattern.permute.xlu1 %v7924_v11 }
0x42bb   :  { %1918 = vperm.xlu1 %5500, %v1908_v16  }
0x4311   :  { %v4483_v50 = vpop.permute.xlu0 %4482 }
0x4312   :  { %5275 = vmatmul.mubr.msk.f32.vlgmr.msra.gmra.mrb[20].mxu1 %vm2046_vm15, %v4483_v50 }
0x4313   :  { %5439 = vmatpush3.bf16.msra.mxu1 %v5795_v4  ;;  %5296 = vmatprep.mubr.msk.f32.mxu1 %vm5730_vm0, %v5731_v8  ;;  %v1879_v8 = vmul.f32 %v1877_v39, %v5858_v38 }
0x4314   :  { %5440 = vmatprep.subr.bf16.mxu1 %v5729_v3 }
0x4317   :  { %5442 = vmatpush3.bf16.msra.mxu1 %v5810_v10 }
0x4322   :  { %v1871_v42 = vpop.permute.xlu0 %1870 }
0x4323   :  { %v1873_v4 = vmul.f32 %v1871_v42, %v5860_v40 }
0x4325   :  { %v1880_v46 = vadd.f32 %v1879_v8, %v1873_v4 }
0x4331   :  { %v1888_v19 = vpop.permute.xlu0 %1887 }
0x4332   :  { %v1890_v3 = vmul.f32 %v1888_v19, %v5863_v44 }
0x4334   :  { %v1891_v24 = vadd.f32 %v1890_v3, %v1880_v46  ;;  %v7607_v3 = vsel %vm7532_vm8, %v7470_v17, %v7525_v5 }
0x4335   :  { %v1900_v55 = vpop.permute.xlu1 %1899  ;;  %v1923_v46 = vsub.f32 %v7552_v57, %v7607_v3 }
0x4336   :  { %v1902_v10 = vmul.f32 %v1900_v55, %v5867_v49 }
0x4338   :  { %v1903_v23 = vadd.f32 %v1902_v10, %v1891_v24 }
0x433a   :  { %v1919_v43 = vpop.permute.xlu1 %1918 }
0x433b   :  { %v1921_v37 = vmul.f32 %v1919_v43, %v5873_v60 }
0x43e5   :  { %v4552_v6 = vpop.f32.mrb[20].mxu1 }
0x43e6   :  { %v7584_v22 = vadd.f32 %v4552_v6, %v7502_v14  ;;  %v5276_v30 = vpop.f32.mrb[21].mxu1  ;;  %v1912_v14 = vpop.permute.xlu0 %1911  ;;  %v4557_v58 = vmul.f32 %v5877_v0, %v4552_v6 }
0x43e7   :  { %v1914_v61 = vmul.f32 %v1912_v14, %v5870_v54  ;;  %v1924_v14 = vand.u32 2147483647, %v1923_v46 }
0x43e8   :  { %4567 = vrot.lane.b32.xlu0 %v7584_v22, %s5735_s21 }
0x43e9   :  { %v1915_v27 = vadd.f32 %v1914_v61, %v1903_v23  ;;  %v270_v23 = vmul.f32 %v7552_v57, %v7552_v57  ;;  %vm7614_vm0 = vcmp.ge.f32.partialorder %v1924_v14, 0.1 }
0x43ea   :  { %v1926_v17 = vsel %vm7614_vm0, %v1923_v46, 0.0 }
0x43eb   :  { %v1922_v21 = vadd.f32 %v1921_v37, %v1915_v27 }
0x43ed   :  { %v4556_v16 = vadd.f32 %v7514_v53, %v1922_v21 }
0x43ef   :  { %v7596_v56 = vadd.f32 %v4557_v58, %v4556_v16 }
0x43f1   :  { %v4909_v50 = vmul.f32 -1.442695, %v7596_v56 }
0x43f3   :  { %5676 = vpow2.f32 %v4909_v50 }
0x43fd   :  { %v5677_v30 = vpop.eup %5676 }
0x43fe   :  { %v4563_v42 = vadd.f32 1.0, %v5677_v30  ;;  %v7640_v30 = vld [vmem:[%s7916_s0 + $0x2e] sm:$0x3] }
0x4400   :  { %5678 = vrcp.f32 %v4563_v42  ;;  %v7646_v42 = vsel %vm7563_vm13, %v7552_v57, %v7558_v33 }
0x440a   :  { %v5679_v39 = vpop.eup %5678 }
0x445a   :  { %v4568_v19 = vpop.permute.xlu0 %4567 }
0x445b   :  { %v4570_v4 = vmul.f32 %v5679_v39, %v4568_v19 }
0x445d   :  { %4572 = vrot.lane.b32.xlu1 %v4570_v4, %s5735_s21 }
0x44cf   :  { %v4573_v55 = vpop.permute.xlu1 %4572 }
0x44d0   :  { %v4575_v8 = vadd.f32 %v4573_v55, %v7596_v56  ;;  %v1964_v55 = vsub.f32 %v7640_v30, %v7646_v42 }
0x44d2   :  { %5680 = vtanh.f32 %v4575_v8  ;;  %v1965_v46 = vand.u32 2147483647, %v1964_v55 }
0x44d4   :  { %vm7663_vm5 = vcmp.ge.f32.partialorder %v1965_v46, 0.1 }
0x44dc   :  { %v5681_v6 = vpop.eup %5680 }
0x44dd   :  { %v4577_v53 = vsub.f32 %v7540_v29, %v5681_v6 }
0x44df   :  { %4579 = vrot.lane.b32.xlu0 %v4577_v53, %s5736_s4 }
0x4551   :  { %v4580_v10 = vpop.permute.xlu0 %4579 }
0x4552   :  { %v4582_v24 = vmul.f32 %v5679_v39, %v4580_v10 }
0x4554   :  { %4584 = vrot.lane.b32.xlu1 %v4582_v24, %s5737_s24 }
0x4558   :  { %340 = vrot.lane.b32.xlu1 %v270_v23, %s5732_s19 }
0x455c   :  { %1935 = vperm.xlu1 %5500, %v1926_v17  }
0x4560   :  { %5501 = vset.pattern.permute.xlu1 %v7926_v13 }
0x45c6   :  { %v4585_v5 = vpop.permute.xlu1 %4584 }
0x45c7   :  { %v7622_v12 = vadd.f32 %v5681_v6, %v4585_v5 }
0x45c9   :  { %v4588_v61 = vsub.f32 %v7622_v12, %v7546_v41 }
0x45ca   :  { %v341_v27 = vpop.permute.xlu1 %340 }
0x45cb   :  { %v390_v37 = vadd.f32 %v341_v27, %v270_v23  ;;  %v4589_v21 = vand.u32 2147483647, %v4588_v61  ;;  %v1967_v27 = vsel %vm7663_vm5, %v1964_v55, 0.0 }
0x45cd   :  { %5682 = vrsqrt.f32 %v390_v37  ;;  %vm7626_vm1 = vcmp.ge.f32.partialorder %v4589_v21, 0.05  ;;  %vm548_vm2 = vcmp.eq.f32.partialorder %v390_v37, inf  ;;  %v551_v19 = vand.u32 2147483648, %v390_v37 }
0x45ce   :  { %v4591_v16 = vsel %vm7626_vm1, %v4588_v61, 0.0  ;;  %vm550_vm3 = vcmp.eq.f32.partialorder %v390_v37, 0.0 }
0x45cf   :  { %4594 = vrot.lane.b32.xlu0 %v4591_v16, %s5735_s21 }
0x45d3   :  { %1929 = vperm.xlu0 %5455, %v1926_v17  }
0x45d7   :  { %v5683_v39 = vpop.eup %5682 }
0x45d8   :  { %v547_v4 = vmul.f32 %v5683_v39, %v390_v37 }
0x45da   :  { %v549_v8 = vsel %vm548_vm2, %v390_v37, %v547_v4 }
0x45db   :  { %v7650_v6 = vsel %vm550_vm3, %v551_v19, %v549_v8 }
0x45dc   :  { %v1940_v53 = vsub.f32 %v7650_v6, %v7569_v48  ;;  %v582_v20 = vmul.f32 %v7650_v6, %v7650_v6 }
0x45de   :  { %v1941_v33 = vand.u32 2147483647, %v1940_v53  ;;  %v7657_v10 = vmul.f32 %v582_v20, %v7650_v6 }
0x45e0   :  { %vm7659_vm4 = vcmp.ge.f32.partialorder %v1941_v33, 0.1  ;;  %v1952_v23 = vsub.f32 %v7657_v10, %v7574_v51 }
0x45e1   :  { %v1943_v17 = vsel %vm7659_vm4, %v1940_v53, 0.0  ;;  %v1936_v53 = vpop.permute.xlu1 %1935 }
0x45e2   :  { %1946 = vperm.xlu0 %5455, %v1943_v17   ;;  %v1953_v61 = vand.u32 2147483647, %v1952_v23 }
0x45e4   :  { %vm7677_vm6 = vcmp.ge.f32.partialorder %v1953_v61, 0.1 }
0x45e5   :  { %v1955_v21 = vsel %vm7677_vm6, %v1952_v23, 0.0  ;;  %v1938_v23 = vmul.f32 %v1936_v53, %v5858_v38 }
0x45e6   :  { %1970 = vperm.xlu0 %5455, %v1967_v27   ;;  %1958 = vperm.xlu1 %5501, %v1955_v21  }
0x45ea   :  { %5502 = vset.pattern.permute.xlu1 %v7924_v11 }
0x45eb   :  { %1977 = vperm.xlu1 %5502, %v1967_v27  }
0x4641   :  { %v4595_v39 = vpop.permute.xlu0 %4594 }
0x4642   :  { %5286 = vmatmul.mubr.msk.f32.vlgmr.msra.gmra.mrb[22].mxu0 %vm2046_vm15, %v4595_v39 }
0x4652   :  { %v1930_v8 = vpop.permute.xlu0 %1929 }
0x4653   :  { %v1932_v20 = vmul.f32 %v1930_v8, %v5860_v40 }
0x4655   :  { %v1939_v61 = vadd.f32 %v1938_v23, %v1932_v20 }
0x4661   :  { %v1947_v46 = vpop.permute.xlu0 %1946 }
0x4662   :  { %v1949_v17 = vmul.f32 %v1947_v46, %v5863_v44 }
0x4664   :  { %v1950_v21 = vadd.f32 %v1949_v17, %v1939_v61 }
0x4665   :  { %v1959_v33 = vpop.permute.xlu1 %1958 }
0x4666   :  { %v1961_v27 = vmul.f32 %v1959_v33, %v5867_v49 }
0x4668   :  { %v1962_v39 = vadd.f32 %v1961_v27, %v1950_v21 }
0x4715   :  { %v4664_v19 = vpop.f32.mrb[22].mxu0 }
0x4716   :  { %v7690_v4 = vadd.f32 %v4664_v19, %v7584_v22  ;;  %v5287_v55 = vpop.f32.mrb[23].mxu0  ;;  %v1971_v22 = vpop.permute.xlu0 %1970  ;;  %v4669_v8 = vmul.f32 %v5877_v0, %v4664_v19 }
0x4717   :  { %v1978_v55 = vpop.permute.xlu1 %1977  ;;  %v1973_v11 = vmul.f32 %v1971_v22, %v5870_v54  ;;  %v271_v22 = vmul.f32 %v7640_v30, %v7640_v30 }
0x4718   :  { %4679 = vrot.lane.b32.xlu0 %v7690_v4, %s5735_s21  ;;  %v1980_v5 = vmul.f32 %v1978_v55, %v5873_v60  ;;  %v8021_v55 = vmov 0  }
0x4719   :  { %v1974_v16 = vadd.f32 %v1973_v11, %v1962_v39 }
0x471b   :  { %v1981_v50 = vadd.f32 %v1980_v5, %v1974_v16 }
0x471d   :  { %v4668_v13 = vadd.f32 %v7596_v56, %v1981_v50 }
0x471f   :  { %v7702_v53 = vadd.f32 %v4669_v8, %v4668_v13  ;;  %v1933_v13 = vsel %vm7614_vm0, %v7552_v57, %v7607_v3  ;;  %v8022_v57 = vsel %vm7626_vm1, %v7622_v12, %v7546_v41  ;;  %vm2501_vm0 = vcmask 785408  }
0x4720   :  { %v1982_v50 = vsub.f32 %v7640_v30, %v1933_v13  ;;  %v8023_v13 = vsel %vm7659_vm4, %v7650_v6, %v7569_v48  ;;  %v8025_v48 = vmov 1   ;;  %vm204_vm1 = vcmask 189440  }
0x4721   :  { %v4911_v46 = vmul.f32 -1.442695, %v7702_v53 }
0x4722   :  { %v1983_v21 = vand.u32 2147483647, %v1982_v50 }
0x4723   :  { %5684 = vpow2.f32 %v4911_v46 }
0x4724   :  { %vm1984_vm7 = vcmp.ge.f32.partialorder %v1983_v21, 0.1 }
0x4725   :  { %v1985_v39 = vsel %vm1984_vm7, %v1982_v50, 0.0 }
0x472d   :  { %v5685_v20 = vpop.eup %5684 }
0x472e   :  { %v4675_v33 = vadd.f32 1.0, %v5685_v20 }
0x4730   :  { %5686 = vrcp.f32 %v4675_v33 }
0x473a   :  { %v5687_v23 = vpop.eup %5686 }
0x478a   :  { %v4680_v17 = vpop.permute.xlu0 %4679 }
0x478b   :  { %v4682_v61 = vmul.f32 %v5687_v23, %v4680_v17  ;;  %v1975_v17 = vsel %vm7663_vm5, %v7640_v30, %v7646_v42 }
0x478d   :  { %4684 = vrot.lane.b32.xlu1 %v4682_v61, %s5735_s21 }
0x47ff   :  { %v4685_v11 = vpop.permute.xlu1 %4684 }
0x4800   :  { %v4687_v5 = vadd.f32 %v4685_v11, %v7702_v53  ;;  %v5698_v11 = vld [vmem:[%s7916_s0] sm:$0x3]  ;;  %s4839_s0 = sld [smem:[#allocation2 + $0x1]] }
0x4802   :  { %5688 = vtanh.f32 %v4687_v5  ;;  %v2020_v5 = vsub.f32 %v5698_v11, %v1975_v17 }
0x4804   :  { %v2021_v14 = vand.u32 2147483647, %v2020_v5 }
0x4806   :  { %vm2022_vm12 = vcmp.ge.f32.partialorder %v2021_v14, 0.1 }
0x4807   :  { %v2023_v24 = vsel %vm2022_vm12, %v2020_v5, 0.0 }
0x480c   :  { %v5689_v16 = vpop.eup %5688 }
0x480d   :  { %v4689_v56 = vsub.f32 %v7622_v12, %v5689_v16 }
0x480f   :  { %4691 = vrot.lane.b32.xlu0 %v4689_v56, %s5736_s4 }
0x4881   :  { %v4692_v19 = vpop.permute.xlu0 %4691 }
0x4882   :  { %v4694_v27 = vmul.f32 %v5687_v23, %v4692_v19 }
0x4884   :  { %4696 = vrot.lane.b32.xlu1 %v4694_v27, %s5737_s24  ;;  %v8024_v27 = vsel %vm7677_vm6, %v7657_v10, %v7574_v51 }
0x4888   :  { %342 = vrot.lane.b32.xlu1 %v271_v22, %s5732_s19  ;;  %s7855_s19 = sld [smem:[#allocation4 + $0x2]] }
0x488c   :  { %1993 = vperm.xlu1 %5502, %v1985_v39  }
0x4890   :  { %5503 = vset.pattern.permute.xlu1 %v8021_v55 }
0x48f6   :  { %v4697_v8 = vpop.permute.xlu1 %4696 }
0x48f7   :  { %v7719_v43 = vadd.f32 %v5689_v16, %v4697_v8 }
0x48f9   :  { %v4700_v3 = vsub.f32 %v7719_v43, %v8022_v57 }
0x48fa   :  { %v343_v46 = vpop.permute.xlu1 %342 }
0x48fb   :  { %v391_v20 = vadd.f32 %v343_v46, %v271_v22  ;;  %v4701_v33 = vand.u32 2147483647, %v4700_v3 }
0x48fd   :  { %5690 = vrsqrt.f32 %v391_v20  ;;  %vm4702_vm8 = vcmp.ge.f32.partialorder %v4701_v33, 0.05  ;;  %vm555_vm9 = vcmp.eq.f32.partialorder %v391_v20, inf  ;;  %v558_v61 = vand.u32 2147483648, %v391_v20 }
0x48fe   :  { %v4703_v23 = vsel %vm4702_vm8, %v4700_v3, 0.0  ;;  %vm557_vm10 = vcmp.eq.f32.partialorder %v391_v20, 0.0 }
0x48ff   :  { %4705 = vrot.lane.b32.xlu0 %v4703_v23, %s5735_s21 }
0x4903   :  { %1988 = vperm.xlu0 %5455, %v1985_v39  }
0x4907   :  { %v5691_v58 = vpop.eup %5690 }
0x4908   :  { %v554_v41 = vmul.f32 %v5691_v58, %v391_v20 }
0x490a   :  { %v556_v16 = vsel %vm555_vm9, %v391_v20, %v554_v41 }
0x490b   :  { %v559_v56 = vsel %vm557_vm10, %v558_v61, %v556_v16  ;;  %v1994_v57 = vpop.permute.xlu1 %1993 }
0x490c   :  { %v1998_v50 = vsub.f32 %v559_v56, %v8023_v13  ;;  %v583_v30 = vmul.f32 %v559_v56, %v559_v56  ;;  %v1996_v33 = vmul.f32 %v1994_v57, %v5858_v38  ;;  %v168_v57 = vstv %s4854_s2 }
0x490e   :  { %v1999_v42 = vand.u32 2147483647, %v1998_v50  ;;  %v607_v19 = vmul.f32 %v583_v30, %v559_v56 }
0x4910   :  { %vm2000_vm11 = vcmp.ge.f32.partialorder %v1999_v42, 0.1  ;;  %v2009_v21 = vsub.f32 %v607_v19, %v8024_v27 }
0x4911   :  { %v2001_v22 = vsel %vm2000_vm11, %v1998_v50, 0.0 }
0x4912   :  { %2004 = vperm.xlu0 %5455, %v2001_v22   ;;  %v2010_v39 = vand.u32 2147483647, %v2009_v21 }
0x4914   :  { %vm2011_vm13 = vcmp.ge.f32.partialorder %v2010_v39, 0.1  ;;  %v66_v39 = vstv %s4840_s23 }
0x4915   :  { %v2012_v55 = vsel %vm2011_vm13, %v2009_v21, 0.0 }
0x4916   :  { %2026 = vperm.xlu0 %5455, %v2023_v24   ;;  %2015 = vperm.xlu1 %5503, %v2012_v55   ;;  %v148_v55 = vstv %s4851_s27 }
0x491a   :  { %5504 = vset.pattern.permute.xlu1 %v8025_v48  ;;  %5505 = vset.pattern.permute.xlu0 %v8025_v48 }
0x491b   :  { %2032 = vperm.xlu1 %5504, %v2023_v24  }
0x4971   :  { %v4706_v6 = vpop.permute.xlu0 %4705 }
0x4972   :  { %5297 = vmatmul.mubr.msk.f32.vlgmr.msra.gmra.mrb[22].mxu1 %vm2046_vm15, %v4706_v6  ;;  %v7777_v6 = vld [vmem:[%s7917_s1 + $0x2] sm:$0x3] }
0x4982   :  { %v1989_v8 = vpop.permute.xlu0 %1988 }
0x4983   :  { %v1991_v46 = vmul.f32 %v1989_v8, %v5860_v40 }
0x4985   :  { %v1997_v17 = vadd.f32 %v1996_v33, %v1991_v46 }
0x4991   :  { %v2005_v3 = vpop.permute.xlu0 %2004 }
0x4992   :  { %v2007_v23 = vmul.f32 %v2005_v3, %v5863_v44  ;;  %v169_v3 = vmul.f32 %v7777_v6, %v168_v57 }
0x4994   :  { %v2008_v61 = vadd.f32 %v2007_v23, %v1997_v17  ;;  %v176_v23 = vstv %s4855_s12 }
0x4995   :  { %v2016_v20 = vpop.permute.xlu1 %2015  ;;  %v2027_v41 = vpop.permute.xlu0 %2026  ;;  %v177_v17 = vmul.f32 %v7777_v6, %v176_v23 }
0x4996   :  { %v2018_v58 = vmul.f32 %v2016_v20, %v5867_v49  ;;  %v2029_v5 = vmul.f32 %v2027_v41, %v5870_v54  ;;  %v131_v20 = vstv %s4849_s11  ;;  %v54_v41 = vstv %s53_s13 }
0x4997   :  { %v132_v33 = vmul.f32 %v7777_v6, %v131_v20 }
0x4998   :  { %v2019_v11 = vadd.f32 %v2018_v58, %v2008_v61 }
0x499a   :  { %v2030_v16 = vadd.f32 %v2029_v5, %v2019_v11 }
0x4a45   :  { %v4775_v37 = vpop.f32.mrb[22].mxu1 }
0x4a46   :  { %v4782_v51 = vadd.f32 %v4775_v37, %v7690_v4  ;;  %v5298_v10 = vpop.f32.mrb[23].mxu1  ;;  %v2033_v4 = vpop.permute.xlu1 %2032  ;;  %v4780_v40 = vmul.f32 %v5877_v0, %v4775_v37  ;;  %v7764_v0 = vld [vmem:[%s7917_s1] sm:$0x3]  ;;  %v78_v37 = vstv %s4842_s28  ;;  %s4845_s1 = sld [smem:[#allocation2 + $0x7]] }
0x4a47   :  { %v2035_v56 = vmul.f32 %v2033_v4, %v5873_v60  ;;  %v67_v24 = vmul.f32 %v66_v39, %v7764_v0  ;;  %v149_v48 = vmul.f32 %v148_v55, %v7764_v0  ;;  %v86_v10 = vstv %s4843_s30 }
0x4a48   :  { %4790 = vrot.lane.b32.xlu0 %v4782_v51, %s5735_s21  ;;  %v79_v51 = vmul.f32 %v7777_v6, %v78_v37  ;;  %v87_v8 = vmul.f32 %v7777_v6, %v86_v10  ;;  %v164_v39 = vstv %s4853_s17 }
0x4a49   :  { %v2036_v13 = vadd.f32 %v2035_v56, %v2030_v16  ;;  %v99_v16 = vstv %s4844_s15 }
0x4a4b   :  { %v4779_v50 = vadd.f32 %v7702_v53, %v2036_v13  ;;  %v58_v53 = vstv %s4839_s0 }
0x4a4c   :  { %v59_v22 = vmul.f32 %v58_v53, %v7764_v0 }
0x4a4d   :  { %v4781_v38 = vadd.f32 %v4780_v40, %v4779_v50  ;;  %v100_v50 = vmul.f32 %v99_v16, %v7764_v0 }
0x4a4f   :  { %v4913_v14 = vmul.f32 -1.442695, %v4781_v38 }
0x4a51   :  { %5692 = vpow2.f32 %v4913_v14 }
0x4a5b   :  { %v5693_v44 = vpop.eup %5692 }
0x4a5c   :  { %v4786_v30 = vadd.f32 1.0, %v5693_v44 }
0x4a5e   :  { %5694 = vrcp.f32 %v4786_v30 }
0x4a68   :  { %v5695_v49 = vpop.eup %5694 }
0x4aba   :  { %v4791_v42 = vpop.permute.xlu0 %4790 }
0x4abb   :  { %v4793_v19 = vmul.f32 %v5695_v49, %v4791_v42 }
0x4abd   :  { %4795 = vrot.lane.b32.xlu1 %v4793_v19, %s5735_s21 }
0x4b2f   :  { %v4796_v54 = vpop.permute.xlu1 %4795 }
0x4b30   :  { %v4798_v27 = vadd.f32 %v4796_v54, %v4781_v38  ;;  %v119_v54 = vstv %s4847_s16 }
0x4b32   :  { %5696 = vtanh.f32 %v4798_v27 }
0x4b3c   :  { %v7759_v60 = vpop.eup %5696 }
0x4b3d   :  { %v4800_v21 = vsub.f32 %v7719_v43, %v7759_v60 }
0x4b3f   :  { %4802 = vrot.lane.b32.xlu0 %v4800_v21, %s5736_s4 }
0x4b43   :  { %61 = vrot.lane.b32.xlu0 %v59_v22, %s5738_s29 }
0x4b47   :  { %69 = vrot.lane.b32.xlu0 %v67_v24, %s5736_s4 }
0x4b4b   :  { %151 = vrot.lane.b32.xlu0 %v149_v48, %s5738_s29  ;;  %v165_v48 = vmul.f32 %v7777_v6, %v164_v39 }
0x4b4f   :  { %81 = vrot.lane.b32.xlu0 %v79_v51, %s5738_s29 }
0x4b53   :  { %89 = vrot.lane.b32.xlu0 %v87_v8, %s5736_s4 }
0x4b57   :  { %171 = vrot.lane.b32.xlu0 %v169_v3, %s5738_s29 }
0x4b5b   :  { %2487 = vrot.lane.b32.xlu0 %v5900_v34, %s5735_s21 }
0x4b5f   :  { %2953 = vrot.lane.b32.xlu0 %v6229_v35, %s5735_s21  ;;  %v103_v35 = vstv %s4845_s1 }
0x4b63   :  { %3418 = vrot.lane.b32.xlu0 %v6545_v25, %s5735_s21 }
0x4b67   :  { %3883 = vrot.lane.b32.xlu0 %v6877_v26, %s5735_s21  ;;  %v104_v26 = vmul.f32 %v103_v35, %v7764_v0 }
0x4b6b   :  { %4348 = vrot.lane.b32.xlu0 %v7209_v7, %s5735_s21  ;;  %v111_v7 = vstv %s4846_s3 }
0x4b6f   :  { %4812 = vrot.lane.b32.xlu0 %v7540_v29, %s5735_s21  ;;  %s4848_s21 = sld [smem:[#allocation2 + $0xa]] }
0x4b73   :  { %2495 = vrot.lane.b32.xlu0 %v6146_v59, %s5737_s24  ;;  %v112_v59 = vmul.f32 %v111_v7, %v7764_v0 }
0x4b75   :  { %v123_v29 = vstv %s4848_s21 }
0x4b76   :  { %v124_v46 = vmul.f32 %v7777_v6, %v123_v29 }
0x4b77   :  { %3426 = vrot.lane.b32.xlu0 %v6794_v1, %s5737_s24  ;;  %v156_v1 = vstv %s4852_s10 }
0x4b7b   :  { %4356 = vrot.lane.b32.xlu0 %v7458_v62, %s5737_s24  ;;  %v157_v62 = vmul.f32 %v156_v1, %v7764_v0 }
0x4bb1   :  { %v4803_v34 = vpop.permute.xlu0 %4802 }
0x4bb2   :  { %v4805_v25 = vmul.f32 %v5695_v49, %v4803_v34 }
0x4bb4   :  { %4807 = vrot.lane.b32.xlu1 %v4805_v25, %s5737_s24 }
0x4bb8   :  { %106 = vrot.lane.b32.xlu1 %v104_v26, %s5738_s29 }
0x4bbc   :  { %114 = vrot.lane.b32.xlu1 %v112_v59, %s5736_s4 }
0x4bc0   :  { %159 = vrot.lane.b32.xlu1 %v157_v62, %s5736_s4 }
0x4bc4   :  { %126 = vrot.lane.b32.xlu1 %v124_v46, %s5738_s29 }
0x4bc8   :  { %134 = vrot.lane.b32.xlu1 %v132_v33, %s5736_s4 }
0x4bcc   :  { %179 = vrot.lane.b32.xlu1 %v177_v17, %s5736_s4  ;;  %v207_v17 = vstv %s4858_s18 }
0x4bd0   :  { %2491 = vrot.lane.b32.xlu1 %v5976_v31, %s5736_s4  ;;  %v62_v31 = vpop.permute.xlu0 %61 }
0x4bd4   :  { %2957 = vrot.lane.b32.xlu1 %v6312_v2, %s5736_s4  ;;  %v70_v2 = vpop.permute.xlu0 %69 }
0x4bd8   :  { %3422 = vrot.lane.b32.xlu1 %v6628_v45, %s5736_s4  ;;  %v152_v58 = vpop.permute.xlu0 %151 }
0x4bdc   :  { %3887 = vrot.lane.b32.xlu1 %v6960_v47, %s5736_s4  ;;  %v82_v45 = vpop.permute.xlu0 %81  ;;  %v55_v47 = vmul.f32 %v54_v41, %v7764_v0 }
0x4bde   :  { %v64_v11 = vadd.f32 %v62_v31, %v55_v47  ;;  %v192_v47 = vstv %s7849_s5 }
0x4be0   :  { %4352 = vrot.lane.b32.xlu1 %v7292_v18, %s5736_s4  ;;  %v90_v61 = vpop.permute.xlu0 %89  ;;  %v72_v4 = vadd.f32 %v70_v2, %v64_v11 }
0x4be4   :  { %4816 = vrot.lane.b32.xlu1 %v7622_v12, %s5736_s4  ;;  %v172_v18 = vpop.permute.xlu0 %171  ;;  %v74_v12 = vstv %s4841_s14  ;;  %s4850_s4 = sld [smem:[#allocation2 + $0xc]] }
0x4be8   :  { %2961 = vrot.lane.b32.xlu1 %v6468_v28, %s5737_s24  ;;  %v75_v28 = vmul.f32 %v7777_v6, %v74_v12  ;;  %v2488_v5 = vpop.permute.xlu0 %2487 }
0x4bea   :  { %v144_v38 = vstv %s4850_s4 }
0x4beb   :  { %v145_v30 = vmul.f32 %v144_v38, %v7764_v0  ;;  %v214_v38 = vstv %s7857_s22 }
0x4bec   :  { %3891 = vrot.lane.b32.xlu1 %v7126_v9, %s5737_s24  ;;  %v76_v9 = vadd.f32 %v75_v28, %v72_v4  ;;  %v7835_v56 = vpop.permute.xlu0 %2953 }
0x4bed   :  { %v154_v53 = vadd.f32 %v152_v58, %v145_v30 }
0x4bee   :  { %v84_v14 = vadd.f32 %v82_v45, %v76_v9 }
0x4bf0   :  { %v92_v42 = vadd.f32 %v90_v61, %v84_v14  ;;  %v7841_v19 = vpop.permute.xlu0 %3418 }
0x4bf2   :  { %v93_v22 = vadd.f32 3.0, %v92_v42 }
0x4bf4   :  { %v7844_v24 = vpop.permute.xlu0 %3883  ;;  %v94_v0 = vmax.f32 %v93_v22, 0.0 }
0x4bf6   :  { %v95_v3 = vmin.f32 %v94_v0, 6.0 }
0x4bf8   :  { %v7847_v34 = vpop.permute.xlu0 %4348  ;;  %v96_v7 = vmul.f32 %v95_v3, %v92_v42 }
0x4bfa   :  { %v97_v46 = vmul.f32 0.16666667, %v96_v7 }
0x4bfc   :  { %v7853_v59 = vpop.permute.xlu0 %4812  ;;  %v208_v12 = vmul.f32 %v207_v17, %v97_v46 }
0x4c00   :  { %v2496_v41 = vpop.permute.xlu0 %2495 }
0x4c26   :  { %v4808_v13 = vpop.permute.xlu1 %4807 }
0x4c27   :  { %v4810_v40 = vadd.f32 %v7759_v60, %v4808_v13  ;;  %v120_v60 = vmul.f32 %v7777_v6, %v119_v54 }
0x4c29   :  { %4820 = vrot.lane.b32.xlu1 %v4810_v40, %s5737_s24  ;;  %s188_s24 = sld [smem:[#allocation4]] }
0x4c2a   :  { %v107_v44 = vpop.permute.xlu1 %106 }
0x4c2b   :  { %v109_v49 = vadd.f32 %v107_v44, %v100_v50  ;;  %v196_v50 = vstv %s7855_s19 }
0x4c2e   :  { %v115_v27 = vpop.permute.xlu1 %114 }
0x4c2f   :  { %v117_v21 = vadd.f32 %v115_v27, %v109_v49  ;;  %v189_v20 = vstv %s188_s24  ;;  %v3427_v27 = vpop.permute.xlu0 %3426 }
0x4c30   :  { %v190_v61 = vmul.f32 %v189_v20, %v97_v46 }
0x4c31   :  { %v121_v51 = vadd.f32 %v120_v60, %v117_v21 }
0x4c32   :  { %v160_v55 = vpop.permute.xlu1 %159 }
0x4c33   :  { %v162_v37 = vadd.f32 %v160_v55, %v154_v53 }
0x4c35   :  { %v166_v8 = vadd.f32 %v165_v48, %v162_v37 }
0x4c36   :  { %v127_v10 = vpop.permute.xlu1 %126 }
0x4c37   :  { %v129_v57 = vadd.f32 %v127_v10, %v121_v51  ;;  %v174_v26 = vadd.f32 %v172_v18, %v166_v8  ;;  %v210_v18 = vstv %s7851_s20 }
0x4c3a   :  { %v135_v35 = vpop.permute.xlu1 %134 }
0x4c3b   :  { %v137_v25 = vadd.f32 %v135_v35, %v129_v57 }
0x4c3d   :  { %v138_v6 = vadd.f32 3.0, %v137_v25 }
0x4c3e   :  { %v180_v1 = vpop.permute.xlu1 %179 }
0x4c3f   :  { %v139_v62 = vmax.f32 %v138_v6, 0.0  ;;  %v182_v29 = vadd.f32 %v180_v1, %v174_v26 }
0x4c41   :  { %v140_v33 = vmin.f32 %v139_v62, 6.0  ;;  %v183_v23 = vadd.f32 3.0, %v182_v29 }
0x4c42   :  { %v2492_v31 = vpop.permute.xlu1 %2491 }
0x4c43   :  { %v141_v2 = vmul.f32 %v140_v33, %v137_v25  ;;  %v184_v58 = vmax.f32 %v183_v23, 0.0  ;;  %v2498_v45 = vsel %vm2046_vm15, %v2488_v5, %v2492_v31 }
0x4c44   :  { %v2500_v11 = vsel %vm2499_vm14, %v2498_v45, %v6061_v63 }
0x4c45   :  { %v142_v4 = vmul.f32 0.16666667, %v141_v2  ;;  %v185_v28 = vmin.f32 %v184_v58, 6.0  ;;  %v2502_v9 = vsel %vm2501_vm0, %v2500_v11, %v2496_v41 }
0x4c46   :  { %2503 = vst [vmem:[%s7922_s6] sm:$0x3] %v2502_v9  ;;  %v2958_v16 = vpop.permute.xlu1 %2957 }
0x4c47   :  { %v193_v13 = vmul.f32 %v192_v47, %v142_v4  ;;  %v211_v5 = vmul.f32 %v210_v18, %v142_v4  ;;  %v186_v40 = vmul.f32 %v185_v28, %v182_v29  ;;  %v2964_v1 = vsel %vm2046_vm15, %v7835_v56, %v2958_v16 }
0x4c48   :  { %v2965_v29 = vsel %vm2499_vm14, %v2964_v1, %v6408_v36 }
0x4c49   :  { %v194_v14 = vadd.f32 %v193_v13, %v190_v61  ;;  %v212_v44 = vadd.f32 %v211_v5, %v208_v12  ;;  %v187_v30 = vmul.f32 0.16666667, %v186_v40 }
0x4c4a   :  { %v3423_v49 = vpop.permute.xlu1 %3422 }
0x4c4b   :  { %v197_v63 = vmul.f32 %v196_v50, %v187_v30  ;;  %v215_v42 = vmul.f32 %v214_v38, %v187_v30  ;;  %v3429_v54 = vsel %vm2046_vm15, %v7841_v19, %v3423_v49 }
0x4c4c   :  { %v3430_v53 = vsel %vm2499_vm14, %v3429_v54, %v6711_v32  ;;  %v4357_v32 = vpop.permute.xlu0 %4356 }
0x4c4d   :  { %v198_v21 = vadd.f32 %v197_v63, %v194_v14  ;;  %v216_v60 = vadd.f32 %v215_v42, %v212_v44  ;;  %v3431_v22 = vsel %vm2501_vm0, %v3430_v53, %v3427_v27 }
0x4c4e   :  { %4887 = vst [vmem:[%s7922_s6 + $0x4] sm:$0x3] %v3431_v22  ;;  %v3888_v39 = vpop.permute.xlu1 %3887 }
0x4c4f   :  { %v199_v55 = vadd.f32 3.0, %v198_v21  ;;  %v217_v48 = vadd.f32 3.0, %v216_v60  ;;  %v3894_v56 = vsel %vm2046_vm15, %v7844_v24, %v3888_v39 }
0x4c50   :  { %v3895_v46 = vsel %vm2499_vm14, %v3894_v56, %v7043_v15 }
0x4c51   :  { %v200_v37 = vmax.f32 %v199_v55, 0.0  ;;  %v218_v51 = vmax.f32 %v217_v48, 0.0 }
0x4c52   :  { %v4353_v0 = vpop.permute.xlu1 %4352 }
0x4c53   :  { %v201_v10 = vmin.f32 %v200_v37, 6.0  ;;  %v219_v19 = vmin.f32 %v218_v51, 6.0  ;;  %v4359_v8 = vsel %vm2046_vm15, %v7847_v34, %v4353_v0 }
0x4c54   :  { %v4360_v57 = vsel %vm2499_vm14, %v4359_v8, %v7375_v52 }
0x4c55   :  { %v202_v3 = vmul.f32 %v201_v10, %v198_v21  ;;  %v220_v35 = vmul.f32 %v219_v19, %v216_v60  ;;  %v4361_v25 = vsel %vm2501_vm0, %v4360_v57, %v4357_v32 }
0x4c56   :  { %4905 = vst [vmem:[%s7922_s6 + $0x8] sm:$0x3] %v4361_v25  ;;  %v4817_v26 = vpop.permute.xlu1 %4816 }
0x4c57   :  { %v203_v7 = vmul.f32 0.16666667, %v202_v3  ;;  %v221_v6 = vmul.f32 0.16666667, %v220_v35  ;;  %v4823_v34 = vsel %vm2046_vm15, %v7853_v59, %v4817_v26 }
0x4c58   :  { %v4824_v52 = vsel %vm2499_vm14, %v4823_v34, %v7719_v43 }
0x4c59   :  { %205 = vst.msk [vmem:[%s7923_s7] sm:$0x3] %vm204_vm1, %v203_v7  ;;  %4861 = vst.msk [vmem:[%s7923_s7 + $0x2] sm:$0x3] %vm204_vm1, %v221_v6 }
0x4c5a   :  { %v2962_v62 = vpop.permute.xlu1 %2961 }
0x4c5b   :  { %v2966_v59 = vsel %vm2501_vm0, %v2965_v29, %v2962_v62 }
0x4c5c   :  { %4878 = vst [vmem:[%s7922_s6 + $0x2] sm:$0x3] %v2966_v59 }
0x4c5e   :  { %v3892_v43 = vpop.permute.xlu1 %3891 }
0x4c5f   :  { %v3896_v20 = vsel %vm2501_vm0, %v3895_v46, %v3892_v43 }
0x4c60   :  { %4896 = vst [vmem:[%s7922_s6 + $0x6] sm:$0x3] %v3896_v20 }
0x4c9b   :  { %v4821_v36 = vpop.permute.xlu1 %4820 }
0x4c9c   :  { %v4825_v33 = vsel %vm2501_vm0, %v4824_v52, %v4821_v36 }
0x4c9d   :  { %4914 = vst [vmem:[%s7922_s6 + $0xa] sm:$0x3] %v4825_v33 }
0x4c9e   :  { %4836 = vsyncpa [#allocation3], 1 }
0x4c9f   :  { %4837 = vsyncpa [#allocation5], 1 }

</bundles_post_ra>
